<compile_context>
chip_gen: v7x
topology: tpu7x:2x2x1
jax: 0.10.0
libtpu: 0.0.40
codegen_flags: <defaults>
</compile_context>

<pallas_src>
import jax
import jax.numpy as jnp
from jax import lax
from jax.experimental import pallas as pl
from jax.experimental.pallas import tpu as pltpu


# ------------------------------- static shapes -------------------------------
B = 2
C, H, W = 3, 16, 16
DIN = C * H * W            # 768  (multiple of 128)
T = 8                      # words per caption
VOCAB = 32
TEXT_DIM = 300             # fasttext dimension (text_encoder_type == 'ft')
TEXT_DIM_PAD = 384         # padded to a multiple of 128 lanes (zeros are exact)
EMB_DIM = 2048             # ResNet50 feature dim / proj output dim


# ------------------------------- Pallas kernel -------------------------------
def _net_kernel(ids_ref, x_ref, wv_ref, emb_ref, wp_ref, b_ref,
                img_ref, cap_ref):
    """Single-step fused forward.

    visual: (B, DIN) bf16 @ (DIN, 2048) bf16 -> f32, then exact
            normalize_vector (vec * rsqrt(sum(vec^2))).
    text:   token ids (SMEM) -> one-hot count matrix -> mean word vec via MXU
            (counts/T @ table), then Linear(384 -> 2048) with f32 bias.
    """
    # ----------------------------- visual path ------------------------------
    feat = jnp.dot(x_ref[...], wv_ref[...], preferred_element_type=jnp.float32)
    # normalize_vector: no eps, exactly as in the PyTorch module.
    inv = lax.rsqrt(jnp.sum(feat * feat, axis=-1, keepdims=True))
    img_ref[...] = feat * inv

    # ------------------------------ text path -------------------------------
    # mean_t(table[ids[b, t]]) == (counts[b, :] / T) @ table   (exact)
    row_iota = lax.broadcasted_iota(jnp.int32, (B, VOCAB), 0)
    col_iota = lax.broadcasted_iota(jnp.int32, (B, VOCAB), 1)
    counts = jnp.zeros((B, VOCAB), jnp.float32)
    for b in range(B):                      # static unroll: B*T = 16 tiny VPU ops
        row_mask = row_iota == b
        for t in range(T):
            tok = ids_ref[b, t]             # scalar read from SMEM
            counts = counts + jnp.where(
                jnp.logical_and(row_mask, col_iota == tok), 1.0, 0.0)

    sent = jnp.dot(counts * (1.0 / T), emb_ref[...],
                   preferred_element_type=jnp.float32)          # (B, 384) f32
    cap_ref[...] = (
        jnp.dot(sent.astype(jnp.bfloat16), wp_ref[...],
                preferred_element_type=jnp.float32)
        + b_ref[...]
    )


# -------------------------------- JAX wrapper ---------------------------------
@jax.jit
def net_forward(image, caption_ids, params):
    """Mirrors Net.forward(image, captions) -> (img_embedding, caption_embedding)."""
    x_flat = image.reshape(B, -1).astype(jnp.bfloat16)
    ids = caption_ids.astype(jnp.int32)

    img_emb, cap_emb = pl.pallas_call(
        _net_kernel,
        out_shape=(jax.ShapeDtypeStruct((B, EMB_DIM), jnp.float32),
                   jax.ShapeDtypeStruct((B, EMB_DIM), jnp.float32)),
        grid_spec=pltpu.PrefetchScalarGridSpec(
            num_scalar_prefetch=1,          # caption ids -> SMEM
            grid=(1,),                      # single step: all blocks resident
            in_specs=[
                pl.BlockSpec((B, DIN), lambda i, ids: (0, 0)),                  # x
                pl.BlockSpec((DIN, EMB_DIM), lambda i, ids: (0, 0)),            # w_vis
                pl.BlockSpec((VOCAB, TEXT_DIM_PAD), lambda i, ids: (0, 0)),     # emb table
                pl.BlockSpec((TEXT_DIM_PAD, EMB_DIM), lambda i, ids: (0, 0)),   # w_proj
                pl.BlockSpec((1, EMB_DIM), lambda i, ids: (0, 0)),              # bias
            ],
            out_specs=(
                pl.BlockSpec((B, EMB_DIM), lambda i, ids: (0, 0)),              # img emb
                pl.BlockSpec((B, EMB_DIM), lambda i, ids: (0, 0)),              # cap emb
            ),
        ),
        compiler_params=pltpu.CompilerParams(
            dimension_semantics=("arbitrary",),
        ),
    )(ids, x_flat, params["w_vis"], params["emb_table_norm"],
      params["w_proj"], params["b_proj"])
    return img_emb, cap_emb


# ------------------------------------ main ------------------------------------
if __name__ == "__main__":
    key = jax.random.PRNGKey(0)
    k1, k2, k3, k4, k5, k6 = jax.random.split(key, 6)

    image = jax.random.normal(k1, (B, C, H, W), jnp.float32)
    caption_ids = jax.random.randint(k2, (B, T), 0, VOCAB).astype(jnp.int32)

    # Visual "backbone" weight (bf16 in HBM: the kernel is weight-BW bound).
    w_vis = (jax.random.normal(k3, (DIN, EMB_DIM), jnp.float32) * 0.02
             ).astype(jnp.bfloat16)

    # fasttext stand-in table: zero-pad 300 -> 384, then L2-normalize per row
    # (zeros do not change the norm, so this is exactly normalize_vector).
    emb_table = jax.random.normal(k4, (VOCAB, TEXT_DIM), jnp.float32)
    emb_pad = jnp.zeros((VOCAB, TEXT_DIM_PAD), jnp.float32).at[:, :TEXT_DIM].set(emb_table)
    emb_table_norm = emb_pad * lax.rsqrt(
        jnp.sum(emb_pad * emb_pad, axis=-1, keepdims=True))

    # Projection weight: zero-pad K 300 -> 384 (zeros contribute nothing).
    w_proj_300 = jax.random.normal(k5, (TEXT_DIM, EMB_DIM), jnp.float32) * 0.02
    w_proj = (jnp.zeros((TEXT_DIM_PAD, EMB_DIM), jnp.float32)
              .at[:TEXT_DIM, :].set(w_proj_300)).astype(jnp.bfloat16)
    b_proj = jax.random.normal(k6, (1, EMB_DIM), jnp.float32) * 0.02

    params = {
        "w_vis": w_vis,
        "emb_table_norm": emb_table_norm,
        "w_proj": w_proj,
        "b_proj": b_proj,
    }

    img_emb, cap_emb = net_forward(image, caption_ids, params)
    jax.block_until_ready((img_emb, cap_emb))

    # Reference check against plain JAX (same bf16-weights / f32-accumulate math;
    # the bf16 activation cast is an intentional tolerance vs. the f32 PyTorch model).
    x_bf = image.reshape(B, -1).astype(jnp.bfloat16)
    feat_ref = jnp.dot(x_bf, w_vis, preferred_element_type=jnp.float32)
    img_ref = feat_ref * lax.rsqrt(
        jnp.sum(feat_ref * feat_ref, axis=-1, keepdims=True))

    word_vecs = emb_table_norm[caption_ids]                     # (B, T, 384) f32
    sent_ref = jnp.mean(word_vecs, axis=1)                      # (B, 384) f32
    cap_ref = jnp.dot(sent_ref.astype(jnp.bfloat16), w_proj,
                      preferred_element_type=jnp.float32) + b_proj

    assert img_emb.shape == (B, EMB_DIM) and cap_emb.shape == (B, EMB_DIM)
    assert jnp.allclose(img_emb, img_ref, atol=1e-3, rtol=1e-3)
    assert jnp.allclose(cap_emb, cap_ref, atol=1e-3, rtol=1e-3)
    print("KERNEL_OK")
</pallas_src>

<mosaic_0001>
module attributes {stable_mosaic.version = 11 : i64} {
  func.func @_net_kernel(%arg0: i32, %arg1: memref<2x8xi32, #tpu.memory_space<smem>>, %arg2: memref<2x768xbf16, #tpu.memory_space<vmem>>, %arg3: memref<768x2048xbf16, #tpu.memory_space<vmem>>, %arg4: memref<32x384xf32, #tpu.memory_space<vmem>>, %arg5: memref<384x2048xbf16, #tpu.memory_space<vmem>>, %arg6: memref<1x2048xf32, #tpu.memory_space<vmem>>, %arg7: memref<2x2048xf32, #tpu.memory_space<vmem>>, %arg8: memref<2x2048xf32, #tpu.memory_space<vmem>>) attributes {dimension_semantics = [#tpu.dimension_semantics<arbitrary>], iteration_bounds = array<i64: 1>, scalar_prefetch = 1 : i64, scratch_operands = 0 : i64, tpu.core_type = #tpu.core_type<tc>, window_params = [{pipeline_mode = #tpu.pipeline_mode<synchronous>, transform_indices = @transform_0, window_bounds = array<i64: 2, 768>}, {pipeline_mode = #tpu.pipeline_mode<synchronous>, transform_indices = @transform_1, window_bounds = array<i64: 768, 2048>}, {pipeline_mode = #tpu.pipeline_mode<synchronous>, transform_indices = @transform_2, window_bounds = array<i64: 32, 384>}, {pipeline_mode = #tpu.pipeline_mode<synchronous>, transform_indices = @transform_3, window_bounds = array<i64: 384, 2048>}, {pipeline_mode = #tpu.pipeline_mode<synchronous>, transform_indices = @transform_4, window_bounds = array<i64: 1, 2048>}, {pipeline_mode = #tpu.pipeline_mode<synchronous>, transform_indices = @transform_5, window_bounds = array<i64: 2, 2048>}, {pipeline_mode = #tpu.pipeline_mode<synchronous>, transform_indices = @transform_6, window_bounds = array<i64: 2, 2048>}]} {
    %c0 = arith.constant 0 : index
    %c0_0 = arith.constant 0 : index
    %0 = vector.load %arg2[%c0, %c0_0] : memref<2x768xbf16, #tpu.memory_space<vmem>>, vector<2x768xbf16>
    %c0_1 = arith.constant 0 : index
    %c0_2 = arith.constant 0 : index
    %1 = vector.load %arg3[%c0_1, %c0_2] : memref<768x2048xbf16, #tpu.memory_space<vmem>>, vector<768x2048xbf16>
    %cst = arith.constant dense<0.000000e+00> : vector<2x2048xf32>
    %2 = tpu.matmul %0, %1, %cst {dimension_numbers = #tpu.dot_dimension_numbers<[1], [0], [0], [1], [0, 0, 1, 1], [], []>} : vector<2x768xbf16>, vector<768x2048xbf16>, vector<2x2048xf32> -> vector<2x2048xf32>
    %3 = arith.mulf %2, %2 : vector<2x2048xf32>
    %cst_3 = arith.constant dense<0.000000e+00> : vector<2xf32>
    %4 = vector.multi_reduction <add>, %3, %cst_3 [1] : vector<2x2048xf32> to vector<2xf32>
    %5 = vector.shape_cast %4 : vector<2xf32> to vector<2x1xf32>
    %6 = math.rsqrt %5 : vector<2x1xf32>
    %7 = vector.broadcast %6 : vector<2x1xf32> to vector<2x2048xf32>
    %8 = arith.mulf %2, %7 : vector<2x2048xf32>
    %c0_4 = arith.constant 0 : index
    %c0_5 = arith.constant 0 : index
    %9 = vector.load %arg7[%c0_4, %c0_5] : memref<2x2048xf32, #tpu.memory_space<vmem>>, vector<2x2048xf32>
    tpu.vector_store %arg7[%c0_4, %c0_5], %8 {strides = array<i32>} : memref<2x2048xf32, #tpu.memory_space<vmem>>, vector<2x2048xf32>,
    %10 = tpu.iota {dimensions = array<i32: 0>} : vector<2x32xi32>
    %11 = tpu.iota {dimensions = array<i32: 1>} : vector<2x32xi32>
    %cst_6 = arith.constant 0.000000e+00 : f32
    %12 = vector.broadcast %cst_6 : f32 to vector<2x32xf32>
    %c0_i32 = arith.constant 0 : i32
    %13 = vector.broadcast %c0_i32 : i32 to vector<2x32xi32>
    %14 = arith.cmpi eq, %10, %13 : vector<2x32xi32>
    %c0_7 = arith.constant 0 : index
    %c0_8 = arith.constant 0 : index
    %15 = memref.load %arg1[%c0_7, %c0_8] : memref<2x8xi32, #tpu.memory_space<smem>>
    %16 = vector.broadcast %15 : i32 to vector<2x32xi32>
    %17 = arith.cmpi eq, %11, %16 : vector<2x32xi32>
    %18 = arith.andi %14, %17 : vector<2x32xi1>
    %cst_9 = arith.constant 1.000000e+00 : f32
    %cst_10 = arith.constant 0.000000e+00 : f32
    %19 = vector.broadcast %cst_9 : f32 to vector<2x32xf32>
    %20 = vector.broadcast %cst_10 : f32 to vector<2x32xf32>
    %21 = arith.select %18, %19, %20 : vector<2x32xi1>, vector<2x32xf32>
    %22 = arith.addf %12, %21 : vector<2x32xf32>
    %c0_11 = arith.constant 0 : index
    %c1 = arith.constant 1 : index
    %23 = memref.load %arg1[%c0_11, %c1] : memref<2x8xi32, #tpu.memory_space<smem>>
    %24 = vector.broadcast %23 : i32 to vector<2x32xi32>
    %25 = arith.cmpi eq, %11, %24 : vector<2x32xi32>
    %26 = arith.andi %14, %25 : vector<2x32xi1>
    %cst_12 = arith.constant 1.000000e+00 : f32
    %cst_13 = arith.constant 0.000000e+00 : f32
    %27 = vector.broadcast %cst_12 : f32 to vector<2x32xf32>
    %28 = vector.broadcast %cst_13 : f32 to vector<2x32xf32>
    %29 = arith.select %26, %27, %28 : vector<2x32xi1>, vector<2x32xf32>
    %30 = arith.addf %22, %29 : vector<2x32xf32>
    %c0_14 = arith.constant 0 : index
    %c2 = arith.constant 2 : index
    %31 = memref.load %arg1[%c0_14, %c2] : memref<2x8xi32, #tpu.memory_space<smem>>
    %32 = vector.broadcast %31 : i32 to vector<2x32xi32>
    %33 = arith.cmpi eq, %11, %32 : vector<2x32xi32>
    %34 = arith.andi %14, %33 : vector<2x32xi1>
    %cst_15 = arith.constant 1.000000e+00 : f32
    %cst_16 = arith.constant 0.000000e+00 : f32
    %35 = vector.broadcast %cst_15 : f32 to vector<2x32xf32>
    %36 = vector.broadcast %cst_16 : f32 to vector<2x32xf32>
    %37 = arith.select %34, %35, %36 : vector<2x32xi1>, vector<2x32xf32>
    %38 = arith.addf %30, %37 : vector<2x32xf32>
    %c0_17 = arith.constant 0 : index
    %c3 = arith.constant 3 : index
    %39 = memref.load %arg1[%c0_17, %c3] : memref<2x8xi32, #tpu.memory_space<smem>>
    %40 = vector.broadcast %39 : i32 to vector<2x32xi32>
    %41 = arith.cmpi eq, %11, %40 : vector<2x32xi32>
    %42 = arith.andi %14, %41 : vector<2x32xi1>
    %cst_18 = arith.constant 1.000000e+00 : f32
    %cst_19 = arith.constant 0.000000e+00 : f32
    %43 = vector.broadcast %cst_18 : f32 to vector<2x32xf32>
    %44 = vector.broadcast %cst_19 : f32 to vector<2x32xf32>
    %45 = arith.select %42, %43, %44 : vector<2x32xi1>, vector<2x32xf32>
    %46 = arith.addf %38, %45 : vector<2x32xf32>
    %c0_20 = arith.constant 0 : index
    %c4 = arith.constant 4 : index
    %47 = memref.load %arg1[%c0_20, %c4] : memref<2x8xi32, #tpu.memory_space<smem>>
    %48 = vector.broadcast %47 : i32 to vector<2x32xi32>
    %49 = arith.cmpi eq, %11, %48 : vector<2x32xi32>
    %50 = arith.andi %14, %49 : vector<2x32xi1>
    %cst_21 = arith.constant 1.000000e+00 : f32
    %cst_22 = arith.constant 0.000000e+00 : f32
    %51 = vector.broadcast %cst_21 : f32 to vector<2x32xf32>
    %52 = vector.broadcast %cst_22 : f32 to vector<2x32xf32>
    %53 = arith.select %50, %51, %52 : vector<2x32xi1>, vector<2x32xf32>
    %54 = arith.addf %46, %53 : vector<2x32xf32>
    %c0_23 = arith.constant 0 : index
    %c5 = arith.constant 5 : index
    %55 = memref.load %arg1[%c0_23, %c5] : memref<2x8xi32, #tpu.memory_space<smem>>
    %56 = vector.broadcast %55 : i32 to vector<2x32xi32>
    %57 = arith.cmpi eq, %11, %56 : vector<2x32xi32>
    %58 = arith.andi %14, %57 : vector<2x32xi1>
    %cst_24 = arith.constant 1.000000e+00 : f32
    %cst_25 = arith.constant 0.000000e+00 : f32
    %59 = vector.broadcast %cst_24 : f32 to vector<2x32xf32>
    %60 = vector.broadcast %cst_25 : f32 to vector<2x32xf32>
    %61 = arith.select %58, %59, %60 : vector<2x32xi1>, vector<2x32xf32>
    %62 = arith.addf %54, %61 : vector<2x32xf32>
    %c0_26 = arith.constant 0 : index
    %c6 = arith.constant 6 : index
    %63 = memref.load %arg1[%c0_26, %c6] : memref<2x8xi32, #tpu.memory_space<smem>>
    %64 = vector.broadcast %63 : i32 to vector<2x32xi32>
    %65 = arith.cmpi eq, %11, %64 : vector<2x32xi32>
    %66 = arith.andi %14, %65 : vector<2x32xi1>
    %cst_27 = arith.constant 1.000000e+00 : f32
    %cst_28 = arith.constant 0.000000e+00 : f32
    %67 = vector.broadcast %cst_27 : f32 to vector<2x32xf32>
    %68 = vector.broadcast %cst_28 : f32 to vector<2x32xf32>
    %69 = arith.select %66, %67, %68 : vector<2x32xi1>, vector<2x32xf32>
    %70 = arith.addf %62, %69 : vector<2x32xf32>
    %c0_29 = arith.constant 0 : index
    %c7 = arith.constant 7 : index
    %71 = memref.load %arg1[%c0_29, %c7] : memref<2x8xi32, #tpu.memory_space<smem>>
    %72 = vector.broadcast %71 : i32 to vector<2x32xi32>
    %73 = arith.cmpi eq, %11, %72 : vector<2x32xi32>
    %74 = arith.andi %14, %73 : vector<2x32xi1>
    %cst_30 = arith.constant 1.000000e+00 : f32
    %cst_31 = arith.constant 0.000000e+00 : f32
    %75 = vector.broadcast %cst_30 : f32 to vector<2x32xf32>
    %76 = vector.broadcast %cst_31 : f32 to vector<2x32xf32>
    %77 = arith.select %74, %75, %76 : vector<2x32xi1>, vector<2x32xf32>
    %78 = arith.addf %70, %77 : vector<2x32xf32>
    %c1_i32 = arith.constant 1 : i32
    %79 = vector.broadcast %c1_i32 : i32 to vector<2x32xi32>
    %80 = arith.cmpi eq, %10, %79 : vector<2x32xi32>
    %c1_32 = arith.constant 1 : index
    %c0_33 = arith.constant 0 : index
    %81 = memref.load %arg1[%c1_32, %c0_33] : memref<2x8xi32, #tpu.memory_space<smem>>
    %82 = vector.broadcast %81 : i32 to vector<2x32xi32>
    %83 = arith.cmpi eq, %11, %82 : vector<2x32xi32>
    %84 = arith.andi %80, %83 : vector<2x32xi1>
    %cst_34 = arith.constant 1.000000e+00 : f32
    %cst_35 = arith.constant 0.000000e+00 : f32
    %85 = vector.broadcast %cst_34 : f32 to vector<2x32xf32>
    %86 = vector.broadcast %cst_35 : f32 to vector<2x32xf32>
    %87 = arith.select %84, %85, %86 : vector<2x32xi1>, vector<2x32xf32>
    %88 = arith.addf %78, %87 : vector<2x32xf32>
    %c1_36 = arith.constant 1 : index
    %c1_37 = arith.constant 1 : index
    %89 = memref.load %arg1[%c1_36, %c1_37] : memref<2x8xi32, #tpu.memory_space<smem>>
    %90 = vector.broadcast %89 : i32 to vector<2x32xi32>
    %91 = arith.cmpi eq, %11, %90 : vector<2x32xi32>
    %92 = arith.andi %80, %91 : vector<2x32xi1>
    %cst_38 = arith.constant 1.000000e+00 : f32
    %cst_39 = arith.constant 0.000000e+00 : f32
    %93 = vector.broadcast %cst_38 : f32 to vector<2x32xf32>
    %94 = vector.broadcast %cst_39 : f32 to vector<2x32xf32>
    %95 = arith.select %92, %93, %94 : vector<2x32xi1>, vector<2x32xf32>
    %96 = arith.addf %88, %95 : vector<2x32xf32>
    %c1_40 = arith.constant 1 : index
    %c2_41 = arith.constant 2 : index
    %97 = memref.load %arg1[%c1_40, %c2_41] : memref<2x8xi32, #tpu.memory_space<smem>>
    %98 = vector.broadcast %97 : i32 to vector<2x32xi32>
    %99 = arith.cmpi eq, %11, %98 : vector<2x32xi32>
    %100 = arith.andi %80, %99 : vector<2x32xi1>
    %cst_42 = arith.constant 1.000000e+00 : f32
    %cst_43 = arith.constant 0.000000e+00 : f32
    %101 = vector.broadcast %cst_42 : f32 to vector<2x32xf32>
    %102 = vector.broadcast %cst_43 : f32 to vector<2x32xf32>
    %103 = arith.select %100, %101, %102 : vector<2x32xi1>, vector<2x32xf32>
    %104 = arith.addf %96, %103 : vector<2x32xf32>
    %c1_44 = arith.constant 1 : index
    %c3_45 = arith.constant 3 : index
    %105 = memref.load %arg1[%c1_44, %c3_45] : memref<2x8xi32, #tpu.memory_space<smem>>
    %106 = vector.broadcast %105 : i32 to vector<2x32xi32>
    %107 = arith.cmpi eq, %11, %106 : vector<2x32xi32>
    %108 = arith.andi %80, %107 : vector<2x32xi1>
    %cst_46 = arith.constant 1.000000e+00 : f32
    %cst_47 = arith.constant 0.000000e+00 : f32
    %109 = vector.broadcast %cst_46 : f32 to vector<2x32xf32>
    %110 = vector.broadcast %cst_47 : f32 to vector<2x32xf32>
    %111 = arith.select %108, %109, %110 : vector<2x32xi1>, vector<2x32xf32>
    %112 = arith.addf %104, %111 : vector<2x32xf32>
    %c1_48 = arith.constant 1 : index
    %c4_49 = arith.constant 4 : index
    %113 = memref.load %arg1[%c1_48, %c4_49] : memref<2x8xi32, #tpu.memory_space<smem>>
    %114 = vector.broadcast %113 : i32 to vector<2x32xi32>
    %115 = arith.cmpi eq, %11, %114 : vector<2x32xi32>
    %116 = arith.andi %80, %115 : vector<2x32xi1>
    %cst_50 = arith.constant 1.000000e+00 : f32
    %cst_51 = arith.constant 0.000000e+00 : f32
    %117 = vector.broadcast %cst_50 : f32 to vector<2x32xf32>
    %118 = vector.broadcast %cst_51 : f32 to vector<2x32xf32>
    %119 = arith.select %116, %117, %118 : vector<2x32xi1>, vector<2x32xf32>
    %120 = arith.addf %112, %119 : vector<2x32xf32>
    %c1_52 = arith.constant 1 : index
    %c5_53 = arith.constant 5 : index
    %121 = memref.load %arg1[%c1_52, %c5_53] : memref<2x8xi32, #tpu.memory_space<smem>>
    %122 = vector.broadcast %121 : i32 to vector<2x32xi32>
    %123 = arith.cmpi eq, %11, %122 : vector<2x32xi32>
    %124 = arith.andi %80, %123 : vector<2x32xi1>
    %cst_54 = arith.constant 1.000000e+00 : f32
    %cst_55 = arith.constant 0.000000e+00 : f32
    %125 = vector.broadcast %cst_54 : f32 to vector<2x32xf32>
    %126 = vector.broadcast %cst_55 : f32 to vector<2x32xf32>
    %127 = arith.select %124, %125, %126 : vector<2x32xi1>, vector<2x32xf32>
    %128 = arith.addf %120, %127 : vector<2x32xf32>
    %c1_56 = arith.constant 1 : index
    %c6_57 = arith.constant 6 : index
    %129 = memref.load %arg1[%c1_56, %c6_57] : memref<2x8xi32, #tpu.memory_space<smem>>
    %130 = vector.broadcast %129 : i32 to vector<2x32xi32>
    %131 = arith.cmpi eq, %11, %130 : vector<2x32xi32>
    %132 = arith.andi %80, %131 : vector<2x32xi1>
    %cst_58 = arith.constant 1.000000e+00 : f32
    %cst_59 = arith.constant 0.000000e+00 : f32
    %133 = vector.broadcast %cst_58 : f32 to vector<2x32xf32>
    %134 = vector.broadcast %cst_59 : f32 to vector<2x32xf32>
    %135 = arith.select %132, %133, %134 : vector<2x32xi1>, vector<2x32xf32>
    %136 = arith.addf %128, %135 : vector<2x32xf32>
    %c1_60 = arith.constant 1 : index
    %c7_61 = arith.constant 7 : index
    %137 = memref.load %arg1[%c1_60, %c7_61] : memref<2x8xi32, #tpu.memory_space<smem>>
    %138 = vector.broadcast %137 : i32 to vector<2x32xi32>
    %139 = arith.cmpi eq, %11, %138 : vector<2x32xi32>
    %140 = arith.andi %80, %139 : vector<2x32xi1>
    %cst_62 = arith.constant 1.000000e+00 : f32
    %cst_63 = arith.constant 0.000000e+00 : f32
    %141 = vector.broadcast %cst_62 : f32 to vector<2x32xf32>
    %142 = vector.broadcast %cst_63 : f32 to vector<2x32xf32>
    %143 = arith.select %140, %141, %142 : vector<2x32xi1>, vector<2x32xf32>
    %144 = arith.addf %136, %143 : vector<2x32xf32>
    %cst_64 = arith.constant 1.250000e-01 : f32
    %145 = vector.broadcast %cst_64 : f32 to vector<2x32xf32>
    %146 = arith.mulf %144, %145 : vector<2x32xf32>
    %c0_65 = arith.constant 0 : index
    %c0_66 = arith.constant 0 : index
    %147 = vector.load %arg4[%c0_65, %c0_66] : memref<32x384xf32, #tpu.memory_space<vmem>>, vector<32x384xf32>
    %cst_67 = arith.constant dense<0.000000e+00> : vector<2x384xf32>
    %148 = tpu.matmul %146, %147, %cst_67 {dimension_numbers = #tpu.dot_dimension_numbers<[1], [0], [0], [1], [0, 0, 1, 1], [], []>} : vector<2x32xf32>, vector<32x384xf32>, vector<2x384xf32> -> vector<2x384xf32>
    %149 = arith.truncf %148 : vector<2x384xf32> to vector<2x384xbf16>
    %c0_68 = arith.constant 0 : index
    %c0_69 = arith.constant 0 : index
    %150 = vector.load %arg5[%c0_68, %c0_69] : memref<384x2048xbf16, #tpu.memory_space<vmem>>, vector<384x2048xbf16>
    %cst_70 = arith.constant dense<0.000000e+00> : vector<2x2048xf32>
    %151 = tpu.matmul %149, %150, %cst_70 {dimension_numbers = #tpu.dot_dimension_numbers<[1], [0], [0], [1], [0, 0, 1, 1], [], []>} : vector<2x384xbf16>, vector<384x2048xbf16>, vector<2x2048xf32> -> vector<2x2048xf32>
    %c0_71 = arith.constant 0 : index
    %c0_72 = arith.constant 0 : index
    %152 = vector.load %arg6[%c0_71, %c0_72] : memref<1x2048xf32, #tpu.memory_space<vmem>>, vector<1x2048xf32>
    %153 = vector.broadcast %152 : vector<1x2048xf32> to vector<2x2048xf32>
    %154 = arith.addf %151, %153 : vector<2x2048xf32>
    %c0_73 = arith.constant 0 : index
    %c0_74 = arith.constant 0 : index
    %155 = vector.load %arg8[%c0_73, %c0_74] : memref<2x2048xf32, #tpu.memory_space<vmem>>, vector<2x2048xf32>
    tpu.vector_store %arg8[%c0_73, %c0_74], %154 {strides = array<i32>} : memref<2x2048xf32, #tpu.memory_space<vmem>>, vector<2x2048xf32>,
    return
  }
  func.func @transform_0(%arg0: i32, %arg1: memref<2x8xi32, #tpu.memory_space<smem>>) -> (i32, i32) {
    %c0_i32 = arith.constant 0 : i32
    %c0_i32_0 = arith.constant 0 : i32
    %c0_i32_1 = arith.constant 0 : i32
    return %c0_i32, %c0_i32_0 : i32, i32
  }
  func.func @transform_1(%arg0: i32, %arg1: memref<2x8xi32, #tpu.memory_space<smem>>) -> (i32, i32) {
    %c0_i32 = arith.constant 0 : i32
    %c0_i32_0 = arith.constant 0 : i32
    %c0_i32_1 = arith.constant 0 : i32
    return %c0_i32, %c0_i32_0 : i32, i32
  }
  func.func @transform_2(%arg0: i32, %arg1: memref<2x8xi32, #tpu.memory_space<smem>>) -> (i32, i32) {
    %c0_i32 = arith.constant 0 : i32
    %c0_i32_0 = arith.constant 0 : i32
    %c0_i32_1 = arith.constant 0 : i32
    return %c0_i32, %c0_i32_0 : i32, i32
  }
  func.func @transform_3(%arg0: i32, %arg1: memref<2x8xi32, #tpu.memory_space<smem>>) -> (i32, i32) {
    %c0_i32 = arith.constant 0 : i32
    %c0_i32_0 = arith.constant 0 : i32
    %c0_i32_1 = arith.constant 0 : i32
    return %c0_i32, %c0_i32_0 : i32, i32
  }
  func.func @transform_4(%arg0: i32, %arg1: memref<2x8xi32, #tpu.memory_space<smem>>) -> (i32, i32) {
    %c0_i32 = arith.constant 0 : i32
    %c0_i32_0 = arith.constant 0 : i32
    %c0_i32_1 = arith.constant 0 : i32
    return %c0_i32, %c0_i32_0 : i32, i32
  }
  func.func @transform_5(%arg0: i32, %arg1: memref<2x8xi32, #tpu.memory_space<smem>>) -> (i32, i32) {
    %c0_i32 = arith.constant 0 : i32
    %c0_i32_0 = arith.constant 0 : i32
    %c0_i32_1 = arith.constant 0 : i32
    return %c0_i32, %c0_i32_0 : i32, i32
  }
  func.func @transform_6(%arg0: i32, %arg1: memref<2x8xi32, #tpu.memory_space<smem>>) -> (i32, i32) {
    %c0_i32 = arith.constant 0 : i32
    %c0_i32_0 = arith.constant 0 : i32
    %c0_i32_1 = arith.constant 0 : i32
    return %c0_i32, %c0_i32_0 : i32, i32
  }
}

</mosaic_0001>

<bundles_post_ra>
// kernel: net_forward.1
= control target key start
LH: loop header
LB: loop body
LE: loop exit
PB: predicated region body
PF: predicated region fallthrough
CT: control target
= control target key end

     0   :  { %s11417_s0 = inlined_call_operand.hbm [shape: s32[2,8], index: 0, kind: input, shape index: {}]   ;;  %s11418_s1 = inlined_call_operand.vmem [shape: bf16[2,768], index: 1, kind: input, shape index: {}]   ;;  %s11419_s2 = inlined_call_operand.hbm [shape: bf16[768,2048], index: 2, kind: input, shape index: {}]   ;;  %s11420_s3 = inlined_call_operand.hbm [shape: f32[32,384], index: 3, kind: input, shape index: {}]   ;;  %s11421_s4 = inlined_call_operand.hbm [shape: bf16[384,2048], index: 4, kind: input, shape index: {}]   ;;  %s11422_s5 = inlined_call_operand.hbm [shape: f32[1,2048], index: 5, kind: input, shape index: {}]   ;;  %s11423_s6 = inlined_call_operand.hbm [shape: f32[2,2048], index: 6, kind: output, shape index: {0}]   ;;  %s11424_s7 = inlined_call_operand.hbm [shape: f32[2,2048], index: 7, kind: output, shape index: {1}]  }
   0x1   :  { %s10650_s26 = scalar_lea.hbm %s11417_s0, 32 }
   0x2   :  { %p10651_p0 = scmp.ne.s32.totalorder %s11417_s0, %s10650_s26  ;;  %p10654_p1 = scmp.lt.u32.totalorder %s10650_s26, %s11417_s0 }
   0x4   :  { %p10656_p2 = pnand %p10654_p1, %p10651_p0 }
   0x6   :  { %10659 = shalt.err (!%p10656_p2)  }
   0x7   :  { %s10804_s8 = smov [#allocation3]  }
   0x8   :  { %14 = dma.hbm_to_smem %s11417_s0, 32, %s10804_s8, [#allocation2] }
   0x9   :  { %10792 = dma.done.wait [#allocation2], 32 }
   0xa   :  { %10793 = vsyncadd [#allocation2], 4294967264 }
   0xb   :  { %16 = sfence }
   0xc   :  { %17 = vsyncpa [#allocation5], 0 }
   0xd   :  { %18 = vsyncpa [#allocation8], 0 }
   0xe   :  { %19 = vsyncpa [#allocation11], 0 }
   0xf   :  { %20 = vsyncpa [#allocation6], 0 }
  0x10   :  { %21 = vsyncpa [#allocation14], 0  ;;  %s10805_s11 = smov [#allocation7]   ;;  %s10660_s15 = scalar_lea.hbm %s11420_s3, 1536 }
  0x11   :  { %s41_s12 = sshll.u32 %s10805_s11, 4  ;;  %p10661_p3 = scmp.ne.s32.totalorder %s11420_s3, %s10660_s15  ;;  %s42_s12 = int_to_ptr.vmem [resolvable:$true] %s41_s12 }
  0x12   :  { %p10664_p4 = scmp.lt.u32.totalorder %s10660_s15, %s11420_s3 }
  0x14   :  { %p10666_p5 = pnand %p10664_p4, %p10661_p3 }
  0x16   :  { %10669 = shalt.err (!%p10666_p5)
}
  0x17   :  { %s10670_s19 = scalar_lea.vmem %s42_s12, 1536  ;;  %p10675_p7 = scmp.lt.s32.totalorder %s42_s12, %s42_s12 }
  0x18   :  { %p10671_p6 = scmp.ne.s32.totalorder %s42_s12, %s10670_s19  ;;  %p10676_p8 = scmp.lt.s32.totalorder %s10670_s19, %s10670_s19 }
  0x1a   :  { %p10677_p9 = por %p10676_p8, %p10675_p7 }
  0x1c   :  { %p10678_p10 = pnand %p10677_p9, %p10671_p6 }
  0x1e   :  { %10681 = shalt.err (!%p10678_p10)
}
  0x1f   :  { %s10806_s20 = smov 384   ;;  %s10807_s21 = smov 24  }
  0x20   :  { %47 = dma.hbm_to_vmem [thread:$0]  %s11420_s3, 1536, %s42_s12, [#allocation8], %s10806_s20, %s10806_s20, %s10807_s21  }
  0x21   :  { %s10808_s24 = smov [#allocation4]   ;;  %s10682_s28 = scalar_lea.hbm %s11419_s2, 98304 }
  0x22   :  { %s29_s25 = sshll.u32 %s10808_s24, 4  ;;  %p10683_p11 = scmp.ne.s32.totalorder %s11419_s2, %s10682_s28  ;;  %s30_s25 = int_to_ptr.vmem [resolvable:$true] %s29_s25 }
  0x23   :  { %p10686_p12 = scmp.lt.u32.totalorder %s10682_s28, %s11419_s2 }
  0x25   :  { %p10688_p13 = pnand %p10686_p12, %p10683_p11 }
  0x27   :  { %10691 = shalt.err (!%p10688_p13)
}
  0x28   :  { %s10692_s10 = scalar_lea.vmem %s30_s25, 98304  ;;  %p10697_p1 = scmp.lt.s32.totalorder %s30_s25, %s30_s25 }
  0x29   :  { %p10693_p0 = scmp.ne.s32.totalorder %s30_s25, %s10692_s10  ;;  %p10698_p2 = scmp.lt.s32.totalorder %s10692_s10, %s10692_s10 }
  0x2b   :  { %p10699_p3 = por %p10698_p2, %p10697_p1 }
  0x2d   :  { %p10700_p4 = pnand %p10699_p3, %p10693_p0 }
  0x2f   :  { %10703 = shalt.err (!%p10700_p4)
}
  0x30   :  { %s10809_s3 = smov 1024   ;;  %s10810_s11 = smov 64  }
  0x31   :  { %35 = dma.hbm_to_vmem [thread:$0]  %s11419_s2, 98304, %s30_s25, [#allocation5], %s10809_s3, %s10809_s3, %s10810_s11  }
  0x32   :  { %s10811_s14 = smov [#allocation9]   ;;  %s10812_s16 = smov [#allocation10]  }
  0x33   :  { %s53_s15 = sshll.u32 %s10811_s14, 4  ;;  %s66_s17 = sshll.u32 %s10812_s16, 4  ;;  %s54_s15 = int_to_ptr.vmem [resolvable:$true] %s53_s15  ;;  %s67_s17 = int_to_ptr.vmem [resolvable:$true] %s66_s17 }
  0x34   :  { %s10704_s19 = scalar_lea.hbm %s11421_s4, 49152 }
  0x35   :  { %p10705_p5 = scmp.ne.s32.totalorder %s11421_s4, %s10704_s19  ;;  %p10708_p6 = scmp.lt.u32.totalorder %s10704_s19, %s11421_s4 }
  0x37   :  { %p10710_p7 = pnand %p10708_p6, %p10705_p5 }
  0x39   :  { %10713 = shalt.err (!%p10710_p7)
}
  0x3a   :  { %s10714_s2 = scalar_lea.vmem %s54_s15, 49152  ;;  %p10719_p9 = scmp.lt.s32.totalorder %s54_s15, %s54_s15 }
  0x3b   :  { %p10715_p8 = scmp.ne.s32.totalorder %s54_s15, %s10714_s2  ;;  %p10720_p10 = scmp.lt.s32.totalorder %s10714_s2, %s10714_s2 }
  0x3d   :  { %p10721_p11 = por %p10720_p10, %p10719_p9 }
  0x3f   :  { %p10722_p12 = pnand %p10721_p11, %p10715_p8 }
  0x41   :  { %10725 = shalt.err (!%p10722_p12)
}
  0x42   :  { %59 = dma.hbm_to_vmem [thread:$0]  %s11421_s4, 49152, %s54_s15, [#allocation8], %s10809_s3, %s10809_s3, %s10810_s11  }
  0x43   :  { %s10726_s28 = scalar_lea.hbm %s11422_s5, 256 }
  0x44   :  { %p10727_p13 = scmp.ne.s32.totalorder %s11422_s5, %s10726_s28  ;;  %p10730_p0 = scmp.lt.u32.totalorder %s10726_s28, %s11422_s5 }
  0x46   :  { %p10732_p1 = pnand %p10730_p0, %p10727_p13 }
  0x48   :  { %10735 = shalt.err (!%p10732_p1)
}
  0x49   :  { %s10736_s10 = scalar_lea.vmem %s67_s17, 256  ;;  %p10741_p3 = scmp.lt.s32.totalorder %s67_s17, %s67_s17 }
  0x4a   :  { %p10737_p2 = scmp.ne.s32.totalorder %s67_s17, %s10736_s10  ;;  %p10742_p4 = scmp.lt.s32.totalorder %s10736_s10, %s10736_s10 }
  0x4c   :  { %p10743_p5 = por %p10742_p4, %p10741_p3 }
  0x4e   :  { %p10744_p6 = pnand %p10743_p5, %p10737_p2 }
  0x50   :  { %10747 = shalt.err (!%p10744_p6)
}
  0x51   :  { %69 = dma.hbm_to_vmem [thread:$0]  %s11422_s5, 256, %s67_s17, [#allocation11]  }
  0x52   :  { %10794 = dma.done.wait [#allocation5], 98304  }
  0x53   :  { %10795 = vsyncadd [#allocation5], 4294868992 }
  0x54   :  { %10796 = dma.done.wait [#allocation8], 50688  }
  0x55   :  { %10797 = vsyncadd [#allocation8], 4294916608 }
  0x56   :  { %10798 = dma.done.wait [#allocation11], 256  }
  0x57   :  { %10799 = vsyncadd [#allocation11], 4294967040  ;;  %v84_v0 = vld [vmem:[#allocation4] sm:$0xff]  ;;  %v85_v2 = vld [vmem:[#allocation4 + $0x8] sm:$0xff]  ;;  %v10813_v32 = vmov 1966171168   ;;  %v857_v34 = vlaneseq }
  0x58   :  { %v92_v1 = vld [vmem:[#allocation4 + $0x40] sm:$0xff]  ;;  %v93_v4 = vld [vmem:[#allocation4 + $0x48] sm:$0xff]  ;;  %v855_v33 = vunpack.c.l.s4 %v10813_v32  ;;  %vm5746_vm0 = vcmask 1041408   ;;  %s11051_s12 = sld [smem:[#allocation3 + $0x1]]  ;;  %s11053_s13 = sld [smem:[#allocation3 + $0x2]] }
  0x59   :  { %v9320_v3 = vcombine.high %v84_v0, %v92_v1  ;;  %v9319_v5 = vcombine.low %v84_v0, %v92_v1  ;;  %v100_v6 = vld [vmem:[#allocation4 + $0x80] sm:$0xff]  ;;  %v9322_v8 = vcombine.high %v85_v2, %v93_v4  ;;  %v9321_v9 = vcombine.low %v85_v2, %v93_v4  ;;  %v101_v11 = vld [vmem:[#allocation4 + $0x88] sm:$0xff]  ;;  %s11060_s14 = sld [smem:[#allocation3 + $0x3]]  ;;  %s11067_s15 = sld [smem:[#allocation3 + $0x4]] }
  0x5a   :  { %v108_v7 = vld [vmem:[#allocation4 + $0xc0] sm:$0xff]  ;;  %v109_v12 = vld [vmem:[#allocation4 + $0xc8] sm:$0xff]  ;;  %v856_v43 = vunpack.c.0.s8 %v855_v33  ;;  %v10922_v44 = vshrl.u32 %v857_v34, 7  ;;  %s11090_s16 = sld [smem:[#allocation3 + $0x5]]  ;;  %s11104_s17 = sld [smem:[#allocation3 + $0x6]] }
  0x5b   :  { %v9336_v10 = vcombine.high %v100_v6, %v108_v7  ;;  %v116_v13 = vld [vmem:[#allocation4 + $0x100] sm:$0xff]  ;;  %4746 = vmatprep.subr.bf16.mxu0 %v9320_v3  ;;  %v9338_v14 = vcombine.high %v101_v11, %v109_v12  ;;  %v117_v16 = vld [vmem:[#allocation4 + $0x108] sm:$0xff]  ;;  %4869 = vmatprep.subr.bf16.mxu1 %v9322_v8  ;;  %v9335_v18 = vcombine.low %v100_v6, %v108_v7  ;;  %s11111_s0 = sld [smem:[#allocation3 + $0x7]]  ;;  %s11118_s18 = sld [smem:[#allocation3 + $0x80]] }
  0x5c   :  { %v124_v15 = vld [vmem:[#allocation4 + $0x140] sm:$0xff]  ;;  %v125_v17 = vld [vmem:[#allocation4 + $0x148] sm:$0xff]  ;;  %4747 = vmatpush1.bf16.msra.mxu0 %v9319_v5  ;;  %4870 = vmatpush1.bf16.msra.mxu1 %v9321_v9  ;;  %v9337_v19 = vcombine.low %v101_v11, %v109_v12  ;;  %v10925_v53 = vsub.s32 %v856_v43, %v10922_v44  ;;  %vm5893_vm1 = vcmp.eq.s32.totalorder %v10922_v44, 0  ;;  %s11125_s19 = sld [smem:[#allocation3 + $0x81]]  ;;  %s11132_s20 = sld [smem:[#allocation3 + $0x82]] }
  0x5d   :  { %4748 = vmatprep.subr.bf16.mxu0 %v9336_v10  ;;  %v9352_v20 = vcombine.high %v116_v13, %v124_v15  ;;  %4871 = vmatprep.subr.bf16.mxu1 %v9338_v14  ;;  %v9354_v21 = vcombine.high %v117_v16, %v125_v17  ;;  %v132_v22 = vld [vmem:[#allocation4 + $0x180] sm:$0xff]  ;;  %v133_v24 = vld [vmem:[#allocation4 + $0x188] sm:$0xff]  ;;  %v9351_v26 = vcombine.low %v116_v13, %v124_v15  ;;  %s11140_s21 = sld [smem:[#allocation3 + $0x83]]  ;;  %s11147_s22 = sld [smem:[#allocation3 + $0x84]] }
  0x5e   :  { %v140_v23 = vld [vmem:[#allocation4 + $0x1c0] sm:$0xff]  ;;  %v141_v25 = vld [vmem:[#allocation4 + $0x1c8] sm:$0xff]  ;;  %v9353_v27 = vcombine.low %v117_v16, %v125_v17  ;;  %s11154_s23 = sld [smem:[#allocation3 + $0x85]]  ;;  %s11161_s2 = sld [smem:[#allocation3 + $0x86]] }
  0x5f   :  { %v9368_v28 = vcombine.high %v132_v22, %v140_v23  ;;  %v9370_v29 = vcombine.high %v133_v24, %v141_v25  ;;  %v148_v30 = vld [vmem:[#allocation4 + $0x200] sm:$0xff]  ;;  %v149_v35 = vld [vmem:[#allocation4 + $0x208] sm:$0xff]  ;;  %v9367_v37 = vcombine.low %v132_v22, %v140_v23  ;;  %v9369_v38 = vcombine.low %v133_v24, %v141_v25  ;;  %s11168_s24 = sld [smem:[#allocation3 + $0x87]]  ;;  %s10819_s25 = smov [#allocation12]  }
  0x60   :  { %4749 = vmatpush1.bf16.msra.mxu0 %v9335_v18  ;;  %4872 = vmatpush1.bf16.msra.mxu1 %v9337_v19  ;;  %v156_v31 = vld [vmem:[#allocation4 + $0x240] sm:$0xff]  ;;  %v157_v36 = vld [vmem:[#allocation4 + $0x248] sm:$0xff]  ;;  %s9294_s26 = sshll.u32 %s10819_s25, 4  ;;  %s9295_s26 = int_to_ptr.vmem [resolvable:$true] %s9294_s26 }
  0x61   :  { %4750 = vmatprep.subr.bf16.mxu0 %v9352_v20  ;;  %4873 = vmatprep.subr.bf16.mxu1 %v9354_v21  ;;  %v9384_v39 = vcombine.high %v148_v30, %v156_v31  ;;  %v9386_v40 = vcombine.high %v149_v35, %v157_v36  ;;  %v164_v41 = vld [vmem:[#allocation4 + $0x280] sm:$0xff]  ;;  %v165_v45 = vld [vmem:[#allocation4 + $0x288] sm:$0xff]  ;;  %v9383_v47 = vcombine.low %v148_v30, %v156_v31  ;;  %s10748_s27 = scalar_lea.vmem %s9295_s26, 512  ;;  %p10753_p8 = scmp.lt.s32.totalorder %s9295_s26, %s9295_s26 }
  0x62   :  { %v172_v42 = vld [vmem:[#allocation4 + $0x2c0] sm:$0xff]  ;;  %v173_v46 = vld [vmem:[#allocation4 + $0x2c8] sm:$0xff]  ;;  %v9385_v48 = vcombine.low %v149_v35, %v157_v36  ;;  %p10749_p7 = scmp.ne.s32.totalorder %s9295_s26, %s10748_s27  ;;  %p10754_p9 = scmp.lt.s32.totalorder %s10748_s27, %s10748_s27 }
  0x63   :  { %v9400_v49 = vcombine.high %v164_v41, %v172_v42  ;;  %v9402_v50 = vcombine.high %v165_v45, %v173_v46  ;;  %v180_v51 = vld [vmem:[#allocation4 + $0x300] sm:$0xff]  ;;  %v181_v54 = vld [vmem:[#allocation4 + $0x308] sm:$0xff]  ;;  %v9399_v56 = vcombine.low %v164_v41, %v172_v42  ;;  %v9401_v57 = vcombine.low %v165_v45, %v173_v46 }
  0x64   :  { %4751 = vmatpush1.bf16.msra.mxu0 %v9351_v26  ;;  %4874 = vmatpush1.bf16.msra.mxu1 %v9353_v27  ;;  %v188_v52 = vld [vmem:[#allocation4 + $0x340] sm:$0xff]  ;;  %v189_v55 = vld [vmem:[#allocation4 + $0x348] sm:$0xff]  ;;  %p10755_p10 = por %p10754_p9, %p10753_p8 }
  0x65   :  { %4752 = vmatprep.subr.bf16.mxu0 %v9368_v28  ;;  %4875 = vmatprep.subr.bf16.mxu1 %v9370_v29  ;;  %v9416_v58 = vcombine.high %v180_v51, %v188_v52  ;;  %v10930_v59 = vld [vmem:[%s11418_s1] sm:$0x3f]  ;;  %v9418_v60 = vcombine.high %v181_v54, %v189_v55  ;;  %v197_v0 = vld [vmem:[#allocation4 + $0x388] sm:$0xff]  ;;  %v9415_v2 = vcombine.low %v180_v51, %v188_v52  ;;  %s11049_s1 = sld [smem:[#allocation3]] }
  0x66   :  { %v196_v61 = vld [vmem:[#allocation4 + $0x380] sm:$0xff]  ;;  %v10934_v63 = vrot.slane %v10930_v59, %v10925_v53  ;;  %v205_v1 = vld [vmem:[#allocation4 + $0x3c8] sm:$0xff]  ;;  %v9417_v4 = vcombine.low %v181_v54, %v189_v55  ;;  %p10756_p11 = pnand %p10755_p10, %p10749_p7 }
  0x67   :  { %v204_v62 = vld [vmem:[#allocation4 + $0x3c0] sm:$0xff]  ;;  %v9434_v6 = vcombine.high %v197_v0, %v205_v1  ;;  %v213_v10 = vld [vmem:[#allocation4 + $0x408] sm:$0xff]  ;;  %v9433_v13 = vcombine.low %v197_v0, %v205_v1 }
  0x68   :  { %4753 = vmatpush1.bf16.msra.mxu0 %v9367_v37  ;;  %4876 = vmatpush1.bf16.msra.mxu1 %v9369_v38  ;;  %v868_v3 = vcombine.high %v10934_v63, %v10934_v63  ;;  %v9432_v5 = vcombine.high %v196_v61, %v204_v62  ;;  %v212_v7 = vld [vmem:[#allocation4 + $0x400] sm:$0xff]  ;;  %v221_v11 = vld [vmem:[#allocation4 + $0x448] sm:$0xff]  ;;  %v9431_v12 = vcombine.low %v196_v61, %v204_v62 }
  0x69   :  { %4754 = vmatprep.subr.bf16.mxu0 %v9384_v39  ;;  %4877 = vmatprep.subr.bf16.mxu1 %v9386_v40  ;;  %v220_v8 = vld [vmem:[#allocation4 + $0x440] sm:$0xff]  ;;  %v9450_v15 = vcombine.high %v213_v10, %v221_v11  ;;  %v229_v18 = vld [vmem:[#allocation4 + $0x488] sm:$0xff]  ;;  %v9449_v21 = vcombine.low %v213_v10, %v221_v11 }
  0x6a   :  { %v10939_v9 = vrot.slane %v868_v3, %v10925_v53  ;;  %v9448_v14 = vcombine.high %v212_v7, %v220_v8  ;;  %v228_v16 = vld [vmem:[#allocation4 + $0x480] sm:$0xff]  ;;  %v237_v19 = vld [vmem:[#allocation4 + $0x4c8] sm:$0xff]  ;;  %v9447_v20 = vcombine.low %v212_v7, %v220_v8 }
  0x6b   :  { %v236_v17 = vld [vmem:[#allocation4 + $0x4c0] sm:$0xff]  ;;  %v9466_v23 = vcombine.high %v229_v18, %v237_v19  ;;  %v245_v26 = vld [vmem:[#allocation4 + $0x508] sm:$0xff]  ;;  %v9465_v29 = vcombine.low %v229_v18, %v237_v19  ;;  %v853_v19 = vcombine.high %v10930_v59, %v10930_v59 }
  0x6c   :  { %4755 = vmatpush1.bf16.msra.mxu0 %v9383_v47  ;;  %4878 = vmatpush1.bf16.msra.mxu1 %v9385_v48  ;;  %v9464_v22 = vcombine.high %v228_v16, %v236_v17  ;;  %v244_v24 = vld [vmem:[#allocation4 + $0x500] sm:$0xff]  ;;  %v253_v27 = vld [vmem:[#allocation4 + $0x548] sm:$0xff]  ;;  %v9463_v28 = vcombine.low %v228_v16, %v236_v17 }
  0x6d   :  { %4756 = vmatprep.subr.bf16.mxu0 %v9400_v49  ;;  %4879 = vmatprep.subr.bf16.mxu1 %v9402_v50  ;;  %v252_v25 = vld [vmem:[#allocation4 + $0x540] sm:$0xff]  ;;  %v9482_v31 = vcombine.high %v245_v26, %v253_v27  ;;  %v261_v35 = vld [vmem:[#allocation4 + $0x588] sm:$0xff]  ;;  %v9481_v38 = vcombine.low %v245_v26, %v253_v27  ;;  %v10948_v26 = vrot.slane %v10934_v63, %v10925_v53 }
  0x6e   :  { %4778 = vmatprep.mubr.bf16.mxu0 %v10939_v9  ;;  %4901 = vmatprep.mubr.bf16.mxu1 %v10939_v9  ;;  %v9480_v30 = vcombine.high %v244_v24, %v252_v25  ;;  %v260_v32 = vld [vmem:[#allocation4 + $0x580] sm:$0xff]  ;;  %v269_v36 = vld [vmem:[#allocation4 + $0x5c8] sm:$0xff]  ;;  %v9479_v37 = vcombine.low %v244_v24, %v252_v25  ;;  %v867_v25 = vrot.slane %v853_v19, %v10925_v53 }
  0x6f   :  { %v268_v33 = vld [vmem:[#allocation4 + $0x5c0] sm:$0xff]  ;;  %v9498_v40 = vcombine.high %v261_v35, %v269_v36  ;;  %v277_v43 = vld [vmem:[#allocation4 + $0x608] sm:$0xff]  ;;  %v9497_v47 = vcombine.low %v261_v35, %v269_v36  ;;  %v10955_v63 = vcombine.high %v10939_v9, %v10939_v9 }
  0x70   :  { %4757 = vmatpush1.bf16.msra.mxu0 %v9399_v56  ;;  %4880 = vmatpush1.bf16.msra.mxu1 %v9401_v57  ;;  %v9496_v39 = vcombine.high %v260_v32, %v268_v33  ;;  %v276_v41 = vld [vmem:[#allocation4 + $0x600] sm:$0xff]  ;;  %v285_v45 = vld [vmem:[#allocation4 + $0x648] sm:$0xff]  ;;  %v9495_v46 = vcombine.low %v260_v32, %v268_v33  ;;  %v10951_v32 = vrot.slane %v867_v25, %v10925_v53 }
  0x71   :  { %4758 = vmatprep.subr.bf16.mxu0 %v9416_v58  ;;  %4881 = vmatprep.subr.bf16.mxu1 %v9418_v60  ;;  %v284_v42 = vld [vmem:[#allocation4 + $0x640] sm:$0xff]  ;;  %v9514_v49 = vcombine.high %v277_v43, %v285_v45  ;;  %v293_v52 = vld [vmem:[#allocation4 + $0x688] sm:$0xff]  ;;  %v9513_v56 = vcombine.low %v277_v43, %v285_v45 }
  0x72   :  { %v9512_v48 = vcombine.high %v276_v41, %v284_v42  ;;  %v292_v50 = vld [vmem:[#allocation4 + $0x680] sm:$0xff]  ;;  %v301_v54 = vld [vmem:[#allocation4 + $0x6c8] sm:$0xff]  ;;  %v9511_v55 = vcombine.low %v276_v41, %v284_v42 }
  0x73   :  { %v300_v51 = vld [vmem:[#allocation4 + $0x6c0] sm:$0xff]  ;;  %v9530_v58 = vcombine.high %v293_v52, %v301_v54  ;;  %v309_v62 = vld [vmem:[#allocation4 + $0x708] sm:$0xff] }
  0x74   :  { %4759 = vmatpush1.bf16.msra.mxu0 %v9415_v2  ;;  %4882 = vmatpush1.bf16.msra.mxu1 %v9417_v4  ;;  %v9528_v57 = vcombine.high %v292_v50, %v300_v51  ;;  %v308_v60 = vld [vmem:[#allocation4 + $0x700] sm:$0xff]  ;;  %v317_v0 = vld [vmem:[#allocation4 + $0x748] sm:$0xff]  ;;  %v9527_v1 = vcombine.low %v292_v50, %v300_v51  ;;  %v9529_v2 = vcombine.low %v293_v52, %v301_v54 }
  0x75   :  { %4760 = vmatprep.subr.bf16.mxu0 %v9432_v5  ;;  %4883 = vmatprep.subr.bf16.mxu1 %v9434_v6  ;;  %v316_v61 = vld [vmem:[#allocation4 + $0x740] sm:$0xff]  ;;  %v9546_v4 = vcombine.high %v309_v62, %v317_v0  ;;  %v325_v7 = vld [vmem:[#allocation4 + $0x788] sm:$0xff]  ;;  %v9545_v11 = vcombine.low %v309_v62, %v317_v0 }
  0x76   :  { %v9544_v3 = vcombine.high %v308_v60, %v316_v61  ;;  %v324_v5 = vld [vmem:[#allocation4 + $0x780] sm:$0xff]  ;;  %v333_v8 = vld [vmem:[#allocation4 + $0x7c8] sm:$0xff]  ;;  %v9543_v10 = vcombine.low %v308_v60, %v316_v61 }
  0x77   :  { %v332_v6 = vld [vmem:[#allocation4 + $0x7c0] sm:$0xff]  ;;  %v341_v16 = vld [vmem:[#allocation4 + $0x808] sm:$0xff] }
  0x78   :  { %4761 = vmatpush1.bf16.msra.mxu0 %v9431_v12  ;;  %4884 = vmatpush1.bf16.msra.mxu1 %v9433_v13  ;;  %v9560_v12 = vcombine.high %v324_v5, %v332_v6  ;;  %v9562_v13 = vcombine.high %v325_v7, %v333_v8  ;;  %v349_v17 = vld [vmem:[#allocation4 + $0x848] sm:$0xff]  ;;  %v9559_v18 = vcombine.low %v324_v5, %v332_v6  ;;  %v364_v24 = vld [vmem:[#allocation4 + $0x8c0] sm:$0xff] }
  0x79   :  { %4762 = vmatprep.subr.bf16.mxu0 %v9448_v14  ;;  %4885 = vmatprep.subr.bf16.mxu1 %v9450_v15  ;;  %v340_v14 = vld [vmem:[#allocation4 + $0x800] sm:$0xff]  ;;  %v357_v27 = vld [vmem:[#allocation4 + $0x888] sm:$0xff]  ;;  %v9577_v59 = vcombine.low %v341_v16, %v349_v17 }
  0x7a   :  { %v348_v15 = vld [vmem:[#allocation4 + $0x840] sm:$0xff]  ;;  %v461_v19 = vld [vmem:[#allocation4 + $0xbc8] sm:$0xff] }
  0x7b   :  { %v372_v35 = vld [vmem:[#allocation4 + $0x900] sm:$0xff] }
  0x7c   :  { %4763 = vmatpush1.bf16.msra.mxu0 %v9447_v20  ;;  %4886 = vmatpush1.bf16.msra.mxu1 %v9449_v21  ;;  %v9561_v20 = vcombine.low %v325_v7, %v333_v8  ;;  %v9576_v21 = vcombine.high %v340_v14, %v348_v15  ;;  %v380_v36 = vld [vmem:[#allocation4 + $0x940] sm:$0xff] }
  0x7d   :  { %4764 = vmatprep.subr.bf16.mxu0 %v9464_v22  ;;  %4887 = vmatprep.subr.bf16.mxu1 %v9466_v23  ;;  %v9578_v22 = vcombine.high %v341_v16, %v349_v17  ;;  %v356_v23 = vld [vmem:[#allocation4 + $0x880] sm:$0xff]  ;;  %v9608_v42 = vcombine.high %v372_v35, %v380_v36 }
  0x7e   :  { %v388_v45 = vld [vmem:[#allocation4 + $0x980] sm:$0xff] }
  0x7f   :  { %v404_v52 = vld [vmem:[#allocation4 + $0xa00] sm:$0xff] }
  0x80   :  { %4765 = vmatpush1.bf16.msra.mxu0 %v9463_v28  ;;  %4888 = vmatpush1.bf16.msra.mxu1 %v9465_v29  ;;  %v365_v28 = vld [vmem:[#allocation4 + $0x8c8] sm:$0xff]  ;;  %v9575_v29 = vcombine.low %v340_v14, %v348_v15  ;;  %v412_v54 = vld [vmem:[#allocation4 + $0xa40] sm:$0xff] }
  0x81   :  { %4766 = vmatprep.subr.bf16.mxu0 %v9480_v30  ;;  %4889 = vmatprep.subr.bf16.mxu1 %v9482_v31  ;;  %v869_v30 = vcombine.high %v867_v25, %v867_v25  ;;  %v9592_v31 = vcombine.high %v356_v23, %v364_v24  ;;  %v9594_v33 = vcombine.high %v357_v27, %v365_v28  ;;  %v420_v62 = vld [vmem:[#allocation4 + $0xa80] sm:$0xff] }
  0x82   :  { %v9593_v41 = vcombine.low %v357_v27, %v365_v28  ;;  %v9640_v60 = vcombine.high %v404_v52, %v412_v54  ;;  %v428_v0 = vld [vmem:[#allocation4 + $0xac0] sm:$0xff]  ;;  %v469_v27 = vld [vmem:[#allocation4 + $0xc08] sm:$0xff] }
  0x83   :  { %v9656_v5 = vcombine.high %v420_v62, %v428_v0  ;;  %v436_v7 = vld [vmem:[#allocation4 + $0xb00] sm:$0xff]  ;;  %v477_v28 = vld [vmem:[#allocation4 + $0xc48] sm:$0xff] }
  0x84   :  { %4767 = vmatpush1.bf16.msra.mxu0 %v9479_v37  ;;  %4890 = vmatpush1.bf16.msra.mxu1 %v9481_v38  ;;  %v10958_v37 = vrot.slane %v869_v30, %v10925_v53  ;;  %v373_v38 = vld [vmem:[#allocation4 + $0x908] sm:$0xff]  ;;  %v444_v8 = vld [vmem:[#allocation4 + $0xb40] sm:$0xff] }
  0x85   :  { %4768 = vmatprep.subr.bf16.mxu0 %v9496_v39  ;;  %4891 = vmatprep.subr.bf16.mxu1 %v9498_v40  ;;  %v381_v39 = vld [vmem:[#allocation4 + $0x948] sm:$0xff]  ;;  %v9591_v40 = vcombine.low %v356_v23, %v364_v24  ;;  %v9672_v14 = vcombine.high %v436_v7, %v444_v8  ;;  %v452_v16 = vld [vmem:[#allocation4 + $0xb80] sm:$0xff] }
  0x86   :  { %v9610_v43 = vcombine.high %v373_v38, %v381_v39  ;;  %v389_v53 = vld [vmem:[#allocation4 + $0x988] sm:$0xff]  ;;  %v460_v17 = vld [vmem:[#allocation4 + $0xbc0] sm:$0xff] }
  0x87   :  { %v468_v24 = vld [vmem:[#allocation4 + $0xc00] sm:$0xff] }
  0x88   :  { %4769 = vmatpush1.bf16.msra.mxu0 %v9495_v46  ;;  %4892 = vmatpush1.bf16.msra.mxu1 %v9497_v47  ;;  %v396_v46 = vld [vmem:[#allocation4 + $0x9c0] sm:$0xff]  ;;  %v397_v47 = vld [vmem:[#allocation4 + $0x9c8] sm:$0xff] }
  0x89   :  { %4770 = vmatprep.subr.bf16.mxu0 %v9512_v48  ;;  %4893 = vmatprep.subr.bf16.mxu1 %v9514_v49  ;;  %v9607_v48 = vcombine.low %v372_v35, %v380_v36  ;;  %v9609_v49 = vcombine.low %v373_v38, %v381_v39  ;;  %v9624_v50 = vcombine.high %v388_v45, %v396_v46  ;;  %v476_v25 = vld [vmem:[#allocation4 + $0xc40] sm:$0xff]  ;;  %v485_v36 = vld [vmem:[#allocation4 + $0xc88] sm:$0xff] }
  0x8a   :  { %v9626_v51 = vcombine.high %v389_v53, %v397_v47  ;;  %v492_v35 = vld [vmem:[#allocation4 + $0xcc0] sm:$0xff]  ;;  %v493_v38 = vld [vmem:[#allocation4 + $0xcc8] sm:$0xff]  ;;  %v9703_v39 = vcombine.low %v468_v24, %v476_v25 }
  0x8c   :  { %4771 = vmatpush1.bf16.msra.mxu0 %v9511_v55  ;;  %4894 = vmatpush1.bf16.msra.mxu1 %v9513_v56  ;;  %v405_v55 = vld [vmem:[#allocation4 + $0xa08] sm:$0xff] }
  0x8d   :  { %4772 = vmatprep.subr.bf16.mxu0 %v9528_v57  ;;  %4895 = vmatprep.subr.bf16.mxu1 %v9530_v58  ;;  %v413_v56 = vld [vmem:[#allocation4 + $0xa48] sm:$0xff]  ;;  %v9623_v57 = vcombine.low %v388_v45, %v396_v46  ;;  %v9625_v58 = vcombine.low %v389_v53, %v397_v47  ;;  %v508_v45 = vld [vmem:[#allocation4 + $0xd40] sm:$0xff] }
  0x8e   :  { %v9642_v61 = vcombine.high %v405_v55, %v413_v56  ;;  %v501_v46 = vld [vmem:[#allocation4 + $0xd08] sm:$0xff] }
  0x8f   :  { %v509_v53 = vld [vmem:[#allocation4 + $0xd48] sm:$0xff] }
  0x90   :  { %4773 = vmatpush1.bf16.msra.mxu0 %v9527_v1  ;;  %4896 = vmatpush1.bf16.msra.mxu1 %v9529_v2  ;;  %v421_v1 = vld [vmem:[#allocation4 + $0xa88] sm:$0xff] }
  0x91   :  { %4774 = vmatprep.subr.bf16.mxu0 %v9544_v3  ;;  %4897 = vmatprep.subr.bf16.mxu1 %v9546_v4  ;;  %v429_v2 = vld [vmem:[#allocation4 + $0xac8] sm:$0xff]  ;;  %v9639_v3 = vcombine.low %v404_v52, %v412_v54  ;;  %v9641_v4 = vcombine.low %v405_v55, %v413_v56  ;;  %v524_v52 = vld [vmem:[#allocation4 + $0xdc0] sm:$0xff] }
  0x92   :  { %v9658_v6 = vcombine.high %v421_v1, %v429_v2  ;;  %v517_v54 = vld [vmem:[#allocation4 + $0xd88] sm:$0xff] }
  0x93   :  { %v525_v55 = vld [vmem:[#allocation4 + $0xdc8] sm:$0xff] }
  0x94   :  { %4775 = vmatpush1.bf16.msra.mxu0 %v9543_v10  ;;  %4898 = vmatpush1.bf16.msra.mxu1 %v9545_v11  ;;  %v437_v10 = vld [vmem:[#allocation4 + $0xb08] sm:$0xff] }
  0x95   :  { %4776 = vmatprep.subr.bf16.mxu0 %v9560_v12  ;;  %4899 = vmatprep.subr.bf16.mxu1 %v9562_v13  ;;  %v445_v11 = vld [vmem:[#allocation4 + $0xb48] sm:$0xff]  ;;  %v9655_v12 = vcombine.low %v420_v62, %v428_v0  ;;  %v9657_v13 = vcombine.low %v421_v1, %v429_v2  ;;  %v540_v62 = vld [vmem:[#allocation4 + $0xe40] sm:$0xff] }
  0x96   :  { %v9674_v15 = vcombine.high %v437_v10, %v445_v11  ;;  %v533_v0 = vld [vmem:[#allocation4 + $0xe08] sm:$0xff] }
  0x97   :  { %v541_v1 = vld [vmem:[#allocation4 + $0xe48] sm:$0xff] }
  0x98   :  { %4777 = vmatpush1.bf16.msra.mxu0 %v9559_v18  ;;  %4900 = vmatpush1.bf16.msra.mxu1 %v9561_v20  ;;  %v453_v18 = vld [vmem:[#allocation4 + $0xb88] sm:$0xff]  ;;  %v9671_v20 = vcombine.low %v436_v7, %v444_v8  ;;  %v556_v7 = vld [vmem:[#allocation4 + $0xec0] sm:$0xff] }
  0x99   :  { %4787 = vmatprep.subr.bf16.mxu0 %v9576_v21  ;;  %4910 = vmatprep.subr.bf16.mxu1 %v9578_v22  ;;  %v9673_v21 = vcombine.low %v437_v10, %v445_v11  ;;  %v9688_v22 = vcombine.high %v452_v16, %v460_v17  ;;  %v9690_v23 = vcombine.high %v453_v18, %v461_v19  ;;  %v549_v8 = vld [vmem:[#allocation4 + $0xe88] sm:$0xff] }
  0x9a   :  { %v9689_v30 = vcombine.low %v453_v18, %v461_v19  ;;  %v557_v10 = vld [vmem:[#allocation4 + $0xec8] sm:$0xff] }
  0x9b   :  { %4779 = vmatmul.mubr.bf16.vlgmr.msra.gmra.mrb[0].mxu0 %v10948_v26  ;;  %4902 = vmatmul.mubr.bf16.vlgmr.msra.gmra.mrb[0].mxu1 %v10948_v26  ;;  %v573_v18 = vld [vmem:[#allocation4 + $0xf48] sm:$0xff] }
  0x9c   :  { %4788 = vmatpush1.bf16.msra.mxu0 %v9575_v29  ;;  %4911 = vmatpush1.bf16.msra.mxu1 %v9577_v59  ;;  %v9687_v29 = vcombine.low %v452_v16, %v460_v17  ;;  %v9704_v59 = vcombine.high %v468_v24, %v476_v25  ;;  %v572_v16 = vld [vmem:[#allocation4 + $0xf40] sm:$0xff]  ;;  %v565_v17 = vld [vmem:[#allocation4 + $0xf08] sm:$0xff] }
  0x9d   :  { %4789 = vmatprep.subr.bf16.mxu0 %v9592_v31  ;;  %4912 = vmatprep.subr.bf16.mxu1 %v9594_v33  ;;  %v9706_v31 = vcombine.high %v469_v27, %v477_v28  ;;  %v484_v33 = vld [vmem:[#allocation4 + $0xc80] sm:$0xff]  ;;  %v581_v25 = vld [vmem:[#allocation4 + $0xf88] sm:$0xff] }
  0x9e   :  { %4819 = vmatprep.mubr.bf16.mxu0 %v10955_v63  ;;  %4942 = vmatprep.mubr.bf16.mxu1 %v10955_v63  ;;  %v9719_v47 = vcombine.low %v484_v33, %v492_v35  ;;  %v588_v24 = vld [vmem:[#allocation4 + $0xfc0] sm:$0xff] }
  0xa0   :  { %4790 = vmatpush1.bf16.msra.mxu0 %v9591_v40  ;;  %4913 = vmatpush1.bf16.msra.mxu1 %v9593_v41  ;;  %v9705_v40 = vcombine.low %v469_v27, %v477_v28  ;;  %v9720_v41 = vcombine.high %v484_v33, %v492_v35  ;;  %v589_v27 = vld [vmem:[#allocation4 + $0xfc8] sm:$0xff]  ;;  %v604_v33 = vld [vmem:[#allocation4 + $0x1040] sm:$0xff] }
  0xa1   :  { %4791 = vmatprep.subr.bf16.mxu0 %v9608_v42  ;;  %4914 = vmatprep.subr.bf16.mxu1 %v9610_v43  ;;  %v9722_v42 = vcombine.high %v485_v36, %v493_v38  ;;  %v500_v43 = vld [vmem:[#allocation4 + $0xd00] sm:$0xff]  ;;  %v597_v35 = vld [vmem:[#allocation4 + $0x1008] sm:$0xff] }
  0xa2   :  { %v9735_v56 = vcombine.low %v500_v43, %v508_v45 }
  0xa4   :  { %4792 = vmatpush1.bf16.msra.mxu0 %v9607_v48  ;;  %4915 = vmatpush1.bf16.msra.mxu1 %v9609_v49  ;;  %v9721_v48 = vcombine.low %v485_v36, %v493_v38  ;;  %v9736_v49 = vcombine.high %v500_v43, %v508_v45  ;;  %v605_v36 = vld [vmem:[#allocation4 + $0x1048] sm:$0xff]  ;;  %v620_v43 = vld [vmem:[#allocation4 + $0x10c0] sm:$0xff]  ;;  %v10966_v45 = vcombine.high %v10948_v26, %v10948_v26 }
  0xa5   :  { %4793 = vmatprep.subr.bf16.mxu0 %v9624_v50  ;;  %4916 = vmatprep.subr.bf16.mxu1 %v9626_v51  ;;  %v9738_v50 = vcombine.high %v501_v46, %v509_v53  ;;  %v516_v51 = vld [vmem:[#allocation4 + $0xd80] sm:$0xff] }
  0xa6   :  { %v9751_v2 = vcombine.low %v516_v51, %v524_v52 }
  0xa8   :  { %4794 = vmatpush1.bf16.msra.mxu0 %v9623_v57  ;;  %4917 = vmatpush1.bf16.msra.mxu1 %v9625_v58  ;;  %v9737_v57 = vcombine.low %v501_v46, %v509_v53  ;;  %v9752_v58 = vcombine.high %v516_v51, %v524_v52  ;;  %v613_v46 = vld [vmem:[#allocation4 + $0x1088] sm:$0xff]  ;;  %v628_v51 = vld [vmem:[#allocation4 + $0x1100] sm:$0xff] }
  0xa9   :  { %4795 = vmatprep.subr.bf16.mxu0 %v9640_v60  ;;  %4918 = vmatprep.subr.bf16.mxu1 %v9642_v61  ;;  %v9754_v60 = vcombine.high %v517_v54, %v525_v55  ;;  %v532_v61 = vld [vmem:[#allocation4 + $0xe00] sm:$0xff]  ;;  %v621_v53 = vld [vmem:[#allocation4 + $0x10c8] sm:$0xff] }
  0xaa   :  { %v9767_v11 = vcombine.low %v532_v61, %v540_v62  ;;  %v636_v52 = vld [vmem:[#allocation4 + $0x1140] sm:$0xff] }
  0xac   :  { %4796 = vmatpush1.bf16.msra.mxu0 %v9639_v3  ;;  %4919 = vmatpush1.bf16.msra.mxu1 %v9641_v4  ;;  %v9753_v3 = vcombine.low %v517_v54, %v525_v55  ;;  %v9768_v4 = vcombine.high %v532_v61, %v540_v62  ;;  %v629_v54 = vld [vmem:[#allocation4 + $0x1108] sm:$0xff]  ;;  %v644_v61 = vld [vmem:[#allocation4 + $0x1180] sm:$0xff] }
  0xad   :  { %4797 = vmatprep.subr.bf16.mxu0 %v9656_v5  ;;  %4920 = vmatprep.subr.bf16.mxu1 %v9658_v6  ;;  %v9770_v5 = vcombine.high %v533_v0, %v541_v1  ;;  %v548_v6 = vld [vmem:[#allocation4 + $0xe80] sm:$0xff]  ;;  %v637_v55 = vld [vmem:[#allocation4 + $0x1148] sm:$0xff] }
  0xae   :  { %v9783_v19 = vcombine.low %v548_v6, %v556_v7  ;;  %v652_v62 = vld [vmem:[#allocation4 + $0x11c0] sm:$0xff] }
  0xb0   :  { %4798 = vmatpush1.bf16.msra.mxu0 %v9655_v12  ;;  %4921 = vmatpush1.bf16.msra.mxu1 %v9657_v13  ;;  %v9769_v12 = vcombine.low %v533_v0, %v541_v1  ;;  %v9784_v13 = vcombine.high %v548_v6, %v556_v7  ;;  %v645_v0 = vld [vmem:[#allocation4 + $0x1188] sm:$0xff]  ;;  %v660_v6 = vld [vmem:[#allocation4 + $0x1200] sm:$0xff] }
  0xb1   :  { %4799 = vmatprep.subr.bf16.mxu0 %v9672_v14  ;;  %4922 = vmatprep.subr.bf16.mxu1 %v9674_v15  ;;  %v9786_v14 = vcombine.high %v549_v8, %v557_v10  ;;  %v564_v15 = vld [vmem:[#allocation4 + $0xf00] sm:$0xff]  ;;  %v653_v1 = vld [vmem:[#allocation4 + $0x11c8] sm:$0xff] }
  0xb2   :  { %v9799_v28 = vcombine.low %v564_v15, %v572_v16  ;;  %v668_v7 = vld [vmem:[#allocation4 + $0x1240] sm:$0xff] }
  0xb4   :  { %4800 = vmatpush1.bf16.msra.mxu0 %v9671_v20  ;;  %4923 = vmatpush1.bf16.msra.mxu1 %v9673_v21  ;;  %v9785_v20 = vcombine.low %v549_v8, %v557_v10  ;;  %v9800_v21 = vcombine.high %v564_v15, %v572_v16  ;;  %v661_v8 = vld [vmem:[#allocation4 + $0x1208] sm:$0xff]  ;;  %v676_v15 = vld [vmem:[#allocation4 + $0x1280] sm:$0xff] }
  0xb5   :  { %4801 = vmatprep.subr.bf16.mxu0 %v9688_v22  ;;  %4924 = vmatprep.subr.bf16.mxu1 %v9690_v23  ;;  %v9802_v22 = vcombine.high %v565_v17, %v573_v18  ;;  %v580_v23 = vld [vmem:[#allocation4 + $0xf80] sm:$0xff]  ;;  %v669_v10 = vld [vmem:[#allocation4 + $0x1248] sm:$0xff] }
  0xb6   :  { %v9815_v38 = vcombine.low %v580_v23, %v588_v24  ;;  %v684_v16 = vld [vmem:[#allocation4 + $0x12c0] sm:$0xff] }
  0xb8   :  { %4802 = vmatpush1.bf16.msra.mxu0 %v9687_v29  ;;  %4925 = vmatpush1.bf16.msra.mxu1 %v9689_v30  ;;  %v9801_v29 = vcombine.low %v565_v17, %v573_v18  ;;  %v9816_v30 = vcombine.high %v580_v23, %v588_v24  ;;  %v677_v17 = vld [vmem:[#allocation4 + $0x1288] sm:$0xff]  ;;  %v692_v23 = vld [vmem:[#allocation4 + $0x1300] sm:$0xff] }
  0xb9   :  { %4803 = vmatprep.subr.bf16.mxu0 %v9704_v59  ;;  %4926 = vmatprep.subr.bf16.mxu1 %v9706_v31  ;;  %v9818_v59 = vcombine.high %v581_v25, %v589_v27  ;;  %v596_v31 = vld [vmem:[#allocation4 + $0x1000] sm:$0xff]  ;;  %v685_v18 = vld [vmem:[#allocation4 + $0x12c8] sm:$0xff] }
  0xba   :  { %v700_v24 = vld [vmem:[#allocation4 + $0x1340] sm:$0xff] }
  0xbc   :  { %4804 = vmatpush1.bf16.msra.mxu0 %v9703_v39  ;;  %4927 = vmatpush1.bf16.msra.mxu1 %v9705_v40  ;;  %v9817_v39 = vcombine.low %v581_v25, %v589_v27  ;;  %v9832_v40 = vcombine.high %v596_v31, %v604_v33  ;;  %v693_v25 = vld [vmem:[#allocation4 + $0x1308] sm:$0xff] }
  0xbd   :  { %4805 = vmatprep.subr.bf16.mxu0 %v9720_v41  ;;  %4928 = vmatprep.subr.bf16.mxu1 %v9722_v42  ;;  %v9834_v41 = vcombine.high %v597_v35, %v605_v36  ;;  %v612_v42 = vld [vmem:[#allocation4 + $0x1080] sm:$0xff]  ;;  %v701_v27 = vld [vmem:[#allocation4 + $0x1348] sm:$0xff] }
  0xc0   :  { %4806 = vmatpush1.bf16.msra.mxu0 %v9719_v47  ;;  %4929 = vmatpush1.bf16.msra.mxu1 %v9721_v48  ;;  %v9831_v47 = vcombine.low %v596_v31, %v604_v33  ;;  %v9833_v48 = vcombine.low %v597_v35, %v605_v36  ;;  %v708_v31 = vld [vmem:[#allocation4 + $0x1380] sm:$0xff]  ;;  %v709_v35 = vld [vmem:[#allocation4 + $0x1388] sm:$0xff] }
  0xc1   :  { %4807 = vmatprep.subr.bf16.mxu0 %v9736_v49  ;;  %4930 = vmatprep.subr.bf16.mxu1 %v9738_v50  ;;  %v9848_v49 = vcombine.high %v612_v42, %v620_v43  ;;  %v9850_v50 = vcombine.high %v613_v46, %v621_v53  ;;  %v716_v33 = vld [vmem:[#allocation4 + $0x13c0] sm:$0xff]  ;;  %v717_v36 = vld [vmem:[#allocation4 + $0x13c8] sm:$0xff] }
  0xc4   :  { %4808 = vmatpush1.bf16.msra.mxu0 %v9735_v56  ;;  %4931 = vmatpush1.bf16.msra.mxu1 %v9737_v57  ;;  %v9847_v56 = vcombine.low %v612_v42, %v620_v43  ;;  %v9849_v57 = vcombine.low %v613_v46, %v621_v53  ;;  %v724_v42 = vld [vmem:[#allocation4 + $0x1400] sm:$0xff]  ;;  %v725_v46 = vld [vmem:[#allocation4 + $0x1408] sm:$0xff] }
  0xc5   :  { %4809 = vmatprep.subr.bf16.mxu0 %v9752_v58  ;;  %4932 = vmatprep.subr.bf16.mxu1 %v9754_v60  ;;  %v9864_v58 = vcombine.high %v628_v51, %v636_v52  ;;  %v9866_v60 = vcombine.high %v629_v54, %v637_v55  ;;  %v732_v43 = vld [vmem:[#allocation4 + $0x1440] sm:$0xff]  ;;  %v733_v53 = vld [vmem:[#allocation4 + $0x1448] sm:$0xff] }
  0xc8   :  { %4810 = vmatpush1.bf16.msra.mxu0 %v9751_v2  ;;  %4933 = vmatpush1.bf16.msra.mxu1 %v9753_v3  ;;  %v9863_v2 = vcombine.low %v628_v51, %v636_v52  ;;  %v9865_v3 = vcombine.low %v629_v54, %v637_v55  ;;  %v740_v51 = vld [vmem:[#allocation4 + $0x1480] sm:$0xff]  ;;  %v741_v54 = vld [vmem:[#allocation4 + $0x1488] sm:$0xff] }
  0xc9   :  { %4811 = vmatprep.subr.bf16.mxu0 %v9768_v4  ;;  %4934 = vmatprep.subr.bf16.mxu1 %v9770_v5  ;;  %v9880_v4 = vcombine.high %v644_v61, %v652_v62  ;;  %v9882_v5 = vcombine.high %v645_v0, %v653_v1  ;;  %v748_v52 = vld [vmem:[#allocation4 + $0x14c0] sm:$0xff]  ;;  %v749_v55 = vld [vmem:[#allocation4 + $0x14c8] sm:$0xff] }
  0xcc   :  { %4812 = vmatpush1.bf16.msra.mxu0 %v9767_v11  ;;  %4935 = vmatpush1.bf16.msra.mxu1 %v9769_v12  ;;  %v9879_v11 = vcombine.low %v644_v61, %v652_v62  ;;  %v9881_v12 = vcombine.low %v645_v0, %v653_v1  ;;  %v756_v61 = vld [vmem:[#allocation4 + $0x1500] sm:$0xff]  ;;  %v757_v0 = vld [vmem:[#allocation4 + $0x1508] sm:$0xff] }
  0xcd   :  { %4813 = vmatprep.subr.bf16.mxu0 %v9784_v13  ;;  %4936 = vmatprep.subr.bf16.mxu1 %v9786_v14  ;;  %v9896_v13 = vcombine.high %v660_v6, %v668_v7  ;;  %v9898_v14 = vcombine.high %v661_v8, %v669_v10  ;;  %v764_v62 = vld [vmem:[#allocation4 + $0x1540] sm:$0xff]  ;;  %v765_v1 = vld [vmem:[#allocation4 + $0x1548] sm:$0xff] }
  0xd0   :  { %4814 = vmatpush1.bf16.msra.mxu0 %v9783_v19  ;;  %4937 = vmatpush1.bf16.msra.mxu1 %v9785_v20  ;;  %v9895_v19 = vcombine.low %v660_v6, %v668_v7  ;;  %v9897_v20 = vcombine.low %v661_v8, %v669_v10  ;;  %v772_v6 = vld [vmem:[#allocation4 + $0x1580] sm:$0xff]  ;;  %v773_v8 = vld [vmem:[#allocation4 + $0x1588] sm:$0xff] }
  0xd1   :  { %4815 = vmatprep.subr.bf16.mxu0 %v9800_v21  ;;  %4938 = vmatprep.subr.bf16.mxu1 %v9802_v22  ;;  %v9912_v21 = vcombine.high %v676_v15, %v684_v16  ;;  %v9914_v22 = vcombine.high %v677_v17, %v685_v18  ;;  %v780_v7 = vld [vmem:[#allocation4 + $0x15c0] sm:$0xff]  ;;  %v781_v10 = vld [vmem:[#allocation4 + $0x15c8] sm:$0xff] }
  0xd4   :  { %4816 = vmatpush1.bf16.msra.mxu0 %v9799_v28  ;;  %4939 = vmatpush1.bf16.msra.mxu1 %v9801_v29  ;;  %v9911_v28 = vcombine.low %v676_v15, %v684_v16  ;;  %v9913_v29 = vcombine.low %v677_v17, %v685_v18  ;;  %v788_v15 = vld [vmem:[#allocation4 + $0x1600] sm:$0xff]  ;;  %v789_v17 = vld [vmem:[#allocation4 + $0x1608] sm:$0xff] }
  0xd5   :  { %4817 = vmatprep.subr.bf16.mxu0 %v9816_v30  ;;  %4940 = vmatprep.subr.bf16.mxu1 %v9818_v59  ;;  %v9928_v30 = vcombine.high %v692_v23, %v700_v24  ;;  %v9930_v59 = vcombine.high %v693_v25, %v701_v27  ;;  %v796_v16 = vld [vmem:[#allocation4 + $0x1640] sm:$0xff]  ;;  %v797_v18 = vld [vmem:[#allocation4 + $0x1648] sm:$0xff] }
  0xd8   :  { %4818 = vmatpush1.bf16.msra.mxu0 %v9815_v38  ;;  %4941 = vmatpush1.bf16.msra.mxu1 %v9817_v39  ;;  %v9927_v38 = vcombine.low %v692_v23, %v700_v24  ;;  %v9929_v39 = vcombine.low %v693_v25, %v701_v27  ;;  %v804_v23 = vld [vmem:[#allocation4 + $0x1680] sm:$0xff]  ;;  %v805_v25 = vld [vmem:[#allocation4 + $0x1688] sm:$0xff] }
  0xd9   :  { %4828 = vmatprep.subr.bf16.mxu0 %v9832_v40  ;;  %4951 = vmatprep.subr.bf16.mxu1 %v9834_v41  ;;  %v9944_v40 = vcombine.high %v708_v31, %v716_v33  ;;  %v9946_v41 = vcombine.high %v709_v35, %v717_v36  ;;  %v812_v24 = vld [vmem:[#allocation4 + $0x16c0] sm:$0xff]  ;;  %v813_v27 = vld [vmem:[#allocation4 + $0x16c8] sm:$0xff] }
  0xdb   :  { %4820 = vmatmul.mubr.bf16.vlgmr.msra.gmra.mrb[0].mxu0 %v10966_v45  ;;  %4943 = vmatmul.mubr.bf16.vlgmr.msra.gmra.mrb[0].mxu1 %v10966_v45 }
  0xdc   :  { %4829 = vmatpush1.bf16.msra.mxu0 %v9831_v47  ;;  %4952 = vmatpush1.bf16.msra.mxu1 %v9833_v48  ;;  %v9943_v47 = vcombine.low %v708_v31, %v716_v33  ;;  %v9945_v48 = vcombine.low %v709_v35, %v717_v36  ;;  %v820_v31 = vld [vmem:[#allocation4 + $0x1700] sm:$0xff]  ;;  %v821_v35 = vld [vmem:[#allocation4 + $0x1708] sm:$0xff] }
  0xdd   :  { %4830 = vmatprep.subr.bf16.mxu0 %v9848_v49  ;;  %4953 = vmatprep.subr.bf16.mxu1 %v9850_v50  ;;  %v9960_v49 = vcombine.high %v724_v42, %v732_v43  ;;  %v9962_v50 = vcombine.high %v725_v46, %v733_v53  ;;  %v828_v33 = vld [vmem:[#allocation4 + $0x1740] sm:$0xff]  ;;  %v829_v36 = vld [vmem:[#allocation4 + $0x1748] sm:$0xff] }
  0xde   :  { %4860 = vmatprep.mubr.bf16.mxu0 %v10958_v37  ;;  %4983 = vmatprep.mubr.bf16.mxu1 %v10958_v37 }
  0xe0   :  { %4831 = vmatpush1.bf16.msra.mxu0 %v9847_v56  ;;  %4954 = vmatpush1.bf16.msra.mxu1 %v9849_v57  ;;  %v9959_v56 = vcombine.low %v724_v42, %v732_v43  ;;  %v9961_v57 = vcombine.low %v725_v46, %v733_v53  ;;  %v836_v42 = vld [vmem:[#allocation4 + $0x1780] sm:$0xff]  ;;  %v837_v46 = vld [vmem:[#allocation4 + $0x1788] sm:$0xff] }
  0xe1   :  { %4832 = vmatprep.subr.bf16.mxu0 %v9864_v58  ;;  %4955 = vmatprep.subr.bf16.mxu1 %v9866_v60  ;;  %v9976_v58 = vcombine.high %v740_v51, %v748_v52  ;;  %v9978_v60 = vcombine.high %v741_v54, %v749_v55  ;;  %v844_v43 = vld [vmem:[#allocation4 + $0x17c0] sm:$0xff]  ;;  %v845_v53 = vld [vmem:[#allocation4 + $0x17c8] sm:$0xff] }
  0xe4   :  { %4833 = vmatpush1.bf16.msra.mxu0 %v9863_v2  ;;  %4956 = vmatpush1.bf16.msra.mxu1 %v9865_v3  ;;  %v9975_v2 = vcombine.low %v740_v51, %v748_v52  ;;  %v9977_v3 = vcombine.low %v741_v54, %v749_v55  ;;  %v86_v51 = vld [vmem:[#allocation4 + $0x10] sm:$0xff]  ;;  %v87_v54 = vld [vmem:[#allocation4 + $0x18] sm:$0xff] }
  0xe5   :  { %4834 = vmatprep.subr.bf16.mxu0 %v9880_v4  ;;  %4957 = vmatprep.subr.bf16.mxu1 %v9882_v5  ;;  %v9992_v4 = vcombine.high %v756_v61, %v764_v62  ;;  %v9994_v5 = vcombine.high %v757_v0, %v765_v1  ;;  %v94_v52 = vld [vmem:[#allocation4 + $0x50] sm:$0xff]  ;;  %v95_v55 = vld [vmem:[#allocation4 + $0x58] sm:$0xff] }
  0xe8   :  { %4835 = vmatpush1.bf16.msra.mxu0 %v9879_v11  ;;  %4958 = vmatpush1.bf16.msra.mxu1 %v9881_v12  ;;  %v9991_v11 = vcombine.low %v756_v61, %v764_v62  ;;  %v9993_v12 = vcombine.low %v757_v0, %v765_v1  ;;  %v102_v61 = vld [vmem:[#allocation4 + $0x90] sm:$0xff]  ;;  %v103_v0 = vld [vmem:[#allocation4 + $0x98] sm:$0xff] }
  0xe9   :  { %4836 = vmatprep.subr.bf16.mxu0 %v9896_v13  ;;  %4959 = vmatprep.subr.bf16.mxu1 %v9898_v14  ;;  %v10008_v13 = vcombine.high %v772_v6, %v780_v7  ;;  %v10010_v14 = vcombine.high %v773_v8, %v781_v10  ;;  %v110_v62 = vld [vmem:[#allocation4 + $0xd0] sm:$0xff]  ;;  %v111_v1 = vld [vmem:[#allocation4 + $0xd8] sm:$0xff] }
  0xec   :  { %4837 = vmatpush1.bf16.msra.mxu0 %v9895_v19  ;;  %4960 = vmatpush1.bf16.msra.mxu1 %v9897_v20  ;;  %v10007_v19 = vcombine.low %v772_v6, %v780_v7  ;;  %v10009_v20 = vcombine.low %v773_v8, %v781_v10  ;;  %v118_v6 = vld [vmem:[#allocation4 + $0x110] sm:$0xff]  ;;  %v119_v8 = vld [vmem:[#allocation4 + $0x118] sm:$0xff] }
  0xed   :  { %4838 = vmatprep.subr.bf16.mxu0 %v9912_v21  ;;  %4961 = vmatprep.subr.bf16.mxu1 %v9914_v22  ;;  %v10024_v21 = vcombine.high %v788_v15, %v796_v16  ;;  %v10026_v22 = vcombine.high %v789_v17, %v797_v18  ;;  %v126_v7 = vld [vmem:[#allocation4 + $0x150] sm:$0xff]  ;;  %v127_v10 = vld [vmem:[#allocation4 + $0x158] sm:$0xff] }
  0xf0   :  { %4839 = vmatpush1.bf16.msra.mxu0 %v9911_v28  ;;  %4962 = vmatpush1.bf16.msra.mxu1 %v9913_v29  ;;  %v10023_v28 = vcombine.low %v788_v15, %v796_v16  ;;  %v10025_v29 = vcombine.low %v789_v17, %v797_v18  ;;  %v134_v15 = vld [vmem:[#allocation4 + $0x190] sm:$0xff]  ;;  %v135_v17 = vld [vmem:[#allocation4 + $0x198] sm:$0xff] }
  0xf1   :  { %4840 = vmatprep.subr.bf16.mxu0 %v9928_v30  ;;  %4963 = vmatprep.subr.bf16.mxu1 %v9930_v59  ;;  %v10040_v30 = vcombine.high %v804_v23, %v812_v24  ;;  %v10042_v59 = vcombine.high %v805_v25, %v813_v27  ;;  %v142_v16 = vld [vmem:[#allocation4 + $0x1d0] sm:$0xff]  ;;  %v143_v18 = vld [vmem:[#allocation4 + $0x1d8] sm:$0xff] }
  0xf4   :  { %4841 = vmatpush1.bf16.msra.mxu0 %v9927_v38  ;;  %4964 = vmatpush1.bf16.msra.mxu1 %v9929_v39  ;;  %v10039_v38 = vcombine.low %v804_v23, %v812_v24  ;;  %v10041_v39 = vcombine.low %v805_v25, %v813_v27  ;;  %v150_v23 = vld [vmem:[#allocation4 + $0x210] sm:$0xff]  ;;  %v151_v25 = vld [vmem:[#allocation4 + $0x218] sm:$0xff] }
  0xf5   :  { %4842 = vmatprep.subr.bf16.mxu0 %v9944_v40  ;;  %4965 = vmatprep.subr.bf16.mxu1 %v9946_v41  ;;  %v10056_v40 = vcombine.high %v820_v31, %v828_v33  ;;  %v10058_v41 = vcombine.high %v821_v35, %v829_v36  ;;  %v158_v24 = vld [vmem:[#allocation4 + $0x250] sm:$0xff]  ;;  %v159_v27 = vld [vmem:[#allocation4 + $0x258] sm:$0xff] }
  0xf8   :  { %4843 = vmatpush1.bf16.msra.mxu0 %v9943_v47  ;;  %4966 = vmatpush1.bf16.msra.mxu1 %v9945_v48  ;;  %v10055_v47 = vcombine.low %v820_v31, %v828_v33  ;;  %v10057_v48 = vcombine.low %v821_v35, %v829_v36  ;;  %v166_v31 = vld [vmem:[#allocation4 + $0x290] sm:$0xff]  ;;  %v167_v35 = vld [vmem:[#allocation4 + $0x298] sm:$0xff] }
  0xf9   :  { %4844 = vmatprep.subr.bf16.mxu0 %v9960_v49  ;;  %4967 = vmatprep.subr.bf16.mxu1 %v9962_v50  ;;  %v10072_v49 = vcombine.high %v836_v42, %v844_v43  ;;  %v10074_v50 = vcombine.high %v837_v46, %v845_v53  ;;  %v174_v33 = vld [vmem:[#allocation4 + $0x2d0] sm:$0xff]  ;;  %v175_v36 = vld [vmem:[#allocation4 + $0x2d8] sm:$0xff] }
  0xfc   :  { %4845 = vmatpush1.bf16.msra.mxu0 %v9959_v56  ;;  %4968 = vmatpush1.bf16.msra.mxu1 %v9961_v57  ;;  %v10071_v56 = vcombine.low %v836_v42, %v844_v43  ;;  %v10073_v57 = vcombine.low %v837_v46, %v845_v53  ;;  %v182_v42 = vld [vmem:[#allocation4 + $0x310] sm:$0xff]  ;;  %v183_v46 = vld [vmem:[#allocation4 + $0x318] sm:$0xff] }
  0xfd   :  { %4846 = vmatprep.subr.bf16.mxu0 %v9976_v58  ;;  %4969 = vmatprep.subr.bf16.mxu1 %v9978_v60  ;;  %v9324_v58 = vcombine.high %v86_v51, %v94_v52  ;;  %v9326_v60 = vcombine.high %v87_v54, %v95_v55  ;;  %v190_v43 = vld [vmem:[#allocation4 + $0x350] sm:$0xff]  ;;  %v191_v53 = vld [vmem:[#allocation4 + $0x358] sm:$0xff] }
 0x100   :  { %4847 = vmatpush1.bf16.msra.mxu0 %v9975_v2  ;;  %4970 = vmatpush1.bf16.msra.mxu1 %v9977_v3  ;;  %v9323_v2 = vcombine.low %v86_v51, %v94_v52  ;;  %v9325_v3 = vcombine.low %v87_v54, %v95_v55  ;;  %v198_v51 = vld [vmem:[#allocation4 + $0x390] sm:$0xff]  ;;  %v199_v54 = vld [vmem:[#allocation4 + $0x398] sm:$0xff] }
 0x101   :  { %4848 = vmatprep.subr.bf16.mxu0 %v9992_v4  ;;  %4971 = vmatprep.subr.bf16.mxu1 %v9994_v5  ;;  %v9340_v4 = vcombine.high %v102_v61, %v110_v62  ;;  %v9342_v5 = vcombine.high %v103_v0, %v111_v1  ;;  %v206_v52 = vld [vmem:[#allocation4 + $0x3d0] sm:$0xff]  ;;  %v207_v55 = vld [vmem:[#allocation4 + $0x3d8] sm:$0xff] }
 0x104   :  { %4849 = vmatpush1.bf16.msra.mxu0 %v9991_v11  ;;  %4972 = vmatpush1.bf16.msra.mxu1 %v9993_v12  ;;  %v9339_v11 = vcombine.low %v102_v61, %v110_v62  ;;  %v9341_v12 = vcombine.low %v103_v0, %v111_v1  ;;  %v214_v61 = vld [vmem:[#allocation4 + $0x410] sm:$0xff]  ;;  %v215_v0 = vld [vmem:[#allocation4 + $0x418] sm:$0xff] }
 0x105   :  { %4850 = vmatprep.subr.bf16.mxu0 %v10008_v13  ;;  %4973 = vmatprep.subr.bf16.mxu1 %v10010_v14  ;;  %v9356_v13 = vcombine.high %v118_v6, %v126_v7  ;;  %v9358_v14 = vcombine.high %v119_v8, %v127_v10  ;;  %v222_v62 = vld [vmem:[#allocation4 + $0x450] sm:$0xff]  ;;  %v223_v1 = vld [vmem:[#allocation4 + $0x458] sm:$0xff] }
 0x108   :  { %4851 = vmatpush1.bf16.msra.mxu0 %v10007_v19  ;;  %4974 = vmatpush1.bf16.msra.mxu1 %v10009_v20  ;;  %v9355_v19 = vcombine.low %v118_v6, %v126_v7  ;;  %v9357_v20 = vcombine.low %v119_v8, %v127_v10  ;;  %v230_v6 = vld [vmem:[#allocation4 + $0x490] sm:$0xff]  ;;  %v231_v8 = vld [vmem:[#allocation4 + $0x498] sm:$0xff] }
 0x109   :  { %4852 = vmatprep.subr.bf16.mxu0 %v10024_v21  ;;  %4975 = vmatprep.subr.bf16.mxu1 %v10026_v22  ;;  %v9372_v21 = vcombine.high %v134_v15, %v142_v16  ;;  %v9374_v22 = vcombine.high %v135_v17, %v143_v18  ;;  %v238_v7 = vld [vmem:[#allocation4 + $0x4d0] sm:$0xff]  ;;  %v239_v10 = vld [vmem:[#allocation4 + $0x4d8] sm:$0xff] }
 0x10c   :  { %4853 = vmatpush1.bf16.msra.mxu0 %v10023_v28  ;;  %4976 = vmatpush1.bf16.msra.mxu1 %v10025_v29  ;;  %v9371_v28 = vcombine.low %v134_v15, %v142_v16  ;;  %v9373_v29 = vcombine.low %v135_v17, %v143_v18  ;;  %v246_v15 = vld [vmem:[#allocation4 + $0x510] sm:$0xff]  ;;  %v247_v17 = vld [vmem:[#allocation4 + $0x518] sm:$0xff] }
 0x10d   :  { %4854 = vmatprep.subr.bf16.mxu0 %v10040_v30  ;;  %4977 = vmatprep.subr.bf16.mxu1 %v10042_v59  ;;  %v9388_v30 = vcombine.high %v150_v23, %v158_v24  ;;  %v9390_v59 = vcombine.high %v151_v25, %v159_v27  ;;  %v254_v16 = vld [vmem:[#allocation4 + $0x550] sm:$0xff]  ;;  %v255_v18 = vld [vmem:[#allocation4 + $0x558] sm:$0xff] }
 0x110   :  { %4855 = vmatpush1.bf16.msra.mxu0 %v10039_v38  ;;  %4978 = vmatpush1.bf16.msra.mxu1 %v10041_v39  ;;  %v9387_v38 = vcombine.low %v150_v23, %v158_v24  ;;  %v9389_v39 = vcombine.low %v151_v25, %v159_v27  ;;  %v262_v23 = vld [vmem:[#allocation4 + $0x590] sm:$0xff]  ;;  %v263_v25 = vld [vmem:[#allocation4 + $0x598] sm:$0xff] }
 0x111   :  { %4856 = vmatprep.subr.bf16.mxu0 %v10056_v40  ;;  %4979 = vmatprep.subr.bf16.mxu1 %v10058_v41  ;;  %v9404_v40 = vcombine.high %v166_v31, %v174_v33  ;;  %v9406_v41 = vcombine.high %v167_v35, %v175_v36  ;;  %v270_v24 = vld [vmem:[#allocation4 + $0x5d0] sm:$0xff]  ;;  %v271_v27 = vld [vmem:[#allocation4 + $0x5d8] sm:$0xff] }
 0x114   :  { %4857 = vmatpush1.bf16.msra.mxu0 %v10055_v47  ;;  %4980 = vmatpush1.bf16.msra.mxu1 %v10057_v48  ;;  %v9403_v47 = vcombine.low %v166_v31, %v174_v33  ;;  %v9405_v48 = vcombine.low %v167_v35, %v175_v36  ;;  %v278_v31 = vld [vmem:[#allocation4 + $0x610] sm:$0xff]  ;;  %v279_v35 = vld [vmem:[#allocation4 + $0x618] sm:$0xff] }
 0x115   :  { %4858 = vmatprep.subr.bf16.mxu0 %v10072_v49  ;;  %4981 = vmatprep.subr.bf16.mxu1 %v10074_v50  ;;  %v9420_v49 = vcombine.high %v182_v42, %v190_v43  ;;  %v9422_v50 = vcombine.high %v183_v46, %v191_v53  ;;  %v286_v33 = vld [vmem:[#allocation4 + $0x650] sm:$0xff]  ;;  %v287_v36 = vld [vmem:[#allocation4 + $0x658] sm:$0xff] }
 0x118   :  { %4859 = vmatpush1.bf16.msra.mxu0 %v10071_v56  ;;  %4982 = vmatpush1.bf16.msra.mxu1 %v10073_v57  ;;  %v9419_v56 = vcombine.low %v182_v42, %v190_v43  ;;  %v9421_v57 = vcombine.low %v183_v46, %v191_v53  ;;  %v294_v42 = vld [vmem:[#allocation4 + $0x690] sm:$0xff]  ;;  %v295_v46 = vld [vmem:[#allocation4 + $0x698] sm:$0xff] }
 0x119   :  { %4992 = vmatprep.subr.bf16.mxu0 %v9324_v58  ;;  %5115 = vmatprep.subr.bf16.mxu1 %v9326_v60  ;;  %v9436_v58 = vcombine.high %v198_v51, %v206_v52  ;;  %v9438_v60 = vcombine.high %v199_v54, %v207_v55  ;;  %v302_v43 = vld [vmem:[#allocation4 + $0x6d0] sm:$0xff]  ;;  %v303_v53 = vld [vmem:[#allocation4 + $0x6d8] sm:$0xff] }
 0x11b   :  { %4861 = vmatmul.mubr.bf16.vlgmr.msra.gmra.mrb[0].mxu0 %v10951_v32  ;;  %4984 = vmatmul.mubr.bf16.vlgmr.msra.gmra.mrb[0].mxu1 %v10951_v32 }
 0x11c   :  { %4993 = vmatpush1.bf16.msra.mxu0 %v9323_v2  ;;  %5116 = vmatpush1.bf16.msra.mxu1 %v9325_v3  ;;  %v9435_v2 = vcombine.low %v198_v51, %v206_v52  ;;  %v9437_v3 = vcombine.low %v199_v54, %v207_v55  ;;  %v310_v51 = vld [vmem:[#allocation4 + $0x710] sm:$0xff]  ;;  %v311_v54 = vld [vmem:[#allocation4 + $0x718] sm:$0xff] }
 0x11d   :  { %4994 = vmatprep.subr.bf16.mxu0 %v9340_v4  ;;  %5117 = vmatprep.subr.bf16.mxu1 %v9342_v5  ;;  %v9452_v4 = vcombine.high %v214_v61, %v222_v62  ;;  %v9454_v5 = vcombine.high %v215_v0, %v223_v1  ;;  %v318_v52 = vld [vmem:[#allocation4 + $0x750] sm:$0xff]  ;;  %v319_v55 = vld [vmem:[#allocation4 + $0x758] sm:$0xff] }
 0x11e   :  { %5024 = vmatprep.mubr.bf16.mxu0 %v10939_v9  ;;  %5147 = vmatprep.mubr.bf16.mxu1 %v10939_v9 }
 0x120   :  { %4995 = vmatpush1.bf16.msra.mxu0 %v9339_v11  ;;  %5118 = vmatpush1.bf16.msra.mxu1 %v9341_v12  ;;  %v9451_v11 = vcombine.low %v214_v61, %v222_v62  ;;  %v9453_v12 = vcombine.low %v215_v0, %v223_v1  ;;  %v326_v61 = vld [vmem:[#allocation4 + $0x790] sm:$0xff]  ;;  %v327_v0 = vld [vmem:[#allocation4 + $0x798] sm:$0xff] }
 0x121   :  { %4996 = vmatprep.subr.bf16.mxu0 %v9356_v13  ;;  %5119 = vmatprep.subr.bf16.mxu1 %v9358_v14  ;;  %v9468_v13 = vcombine.high %v230_v6, %v238_v7  ;;  %v9470_v14 = vcombine.high %v231_v8, %v239_v10  ;;  %v334_v62 = vld [vmem:[#allocation4 + $0x7d0] sm:$0xff]  ;;  %v335_v1 = vld [vmem:[#allocation4 + $0x7d8] sm:$0xff] }
 0x124   :  { %4997 = vmatpush1.bf16.msra.mxu0 %v9355_v19  ;;  %5120 = vmatpush1.bf16.msra.mxu1 %v9357_v20  ;;  %v9467_v19 = vcombine.low %v230_v6, %v238_v7  ;;  %v9469_v20 = vcombine.low %v231_v8, %v239_v10  ;;  %v342_v6 = vld [vmem:[#allocation4 + $0x810] sm:$0xff]  ;;  %v343_v8 = vld [vmem:[#allocation4 + $0x818] sm:$0xff] }
 0x125   :  { %4998 = vmatprep.subr.bf16.mxu0 %v9372_v21  ;;  %5121 = vmatprep.subr.bf16.mxu1 %v9374_v22  ;;  %v9484_v21 = vcombine.high %v246_v15, %v254_v16  ;;  %v9486_v22 = vcombine.high %v247_v17, %v255_v18  ;;  %v350_v7 = vld [vmem:[#allocation4 + $0x850] sm:$0xff]  ;;  %v351_v10 = vld [vmem:[#allocation4 + $0x858] sm:$0xff] }
 0x128   :  { %4999 = vmatpush1.bf16.msra.mxu0 %v9371_v28  ;;  %5122 = vmatpush1.bf16.msra.mxu1 %v9373_v29  ;;  %v9483_v28 = vcombine.low %v246_v15, %v254_v16  ;;  %v9485_v29 = vcombine.low %v247_v17, %v255_v18  ;;  %v358_v15 = vld [vmem:[#allocation4 + $0x890] sm:$0xff]  ;;  %v359_v17 = vld [vmem:[#allocation4 + $0x898] sm:$0xff] }
 0x129   :  { %5000 = vmatprep.subr.bf16.mxu0 %v9388_v30  ;;  %5123 = vmatprep.subr.bf16.mxu1 %v9390_v59  ;;  %v9500_v30 = vcombine.high %v262_v23, %v270_v24  ;;  %v9502_v59 = vcombine.high %v263_v25, %v271_v27  ;;  %v366_v16 = vld [vmem:[#allocation4 + $0x8d0] sm:$0xff]  ;;  %v367_v18 = vld [vmem:[#allocation4 + $0x8d8] sm:$0xff] }
 0x12c   :  { %5001 = vmatpush1.bf16.msra.mxu0 %v9387_v38  ;;  %5124 = vmatpush1.bf16.msra.mxu1 %v9389_v39  ;;  %v9499_v38 = vcombine.low %v262_v23, %v270_v24  ;;  %v9501_v39 = vcombine.low %v263_v25, %v271_v27  ;;  %v374_v23 = vld [vmem:[#allocation4 + $0x910] sm:$0xff]  ;;  %v375_v25 = vld [vmem:[#allocation4 + $0x918] sm:$0xff] }
 0x12d   :  { %5002 = vmatprep.subr.bf16.mxu0 %v9404_v40  ;;  %5125 = vmatprep.subr.bf16.mxu1 %v9406_v41  ;;  %v9516_v40 = vcombine.high %v278_v31, %v286_v33  ;;  %v9518_v41 = vcombine.high %v279_v35, %v287_v36  ;;  %v382_v24 = vld [vmem:[#allocation4 + $0x950] sm:$0xff]  ;;  %v383_v27 = vld [vmem:[#allocation4 + $0x958] sm:$0xff] }
 0x130   :  { %5003 = vmatpush1.bf16.msra.mxu0 %v9403_v47  ;;  %5126 = vmatpush1.bf16.msra.mxu1 %v9405_v48  ;;  %v9515_v47 = vcombine.low %v278_v31, %v286_v33  ;;  %v9517_v48 = vcombine.low %v279_v35, %v287_v36  ;;  %v390_v31 = vld [vmem:[#allocation4 + $0x990] sm:$0xff]  ;;  %v391_v35 = vld [vmem:[#allocation4 + $0x998] sm:$0xff] }
 0x131   :  { %5004 = vmatprep.subr.bf16.mxu0 %v9420_v49  ;;  %5127 = vmatprep.subr.bf16.mxu1 %v9422_v50  ;;  %v9532_v49 = vcombine.high %v294_v42, %v302_v43  ;;  %v9534_v50 = vcombine.high %v295_v46, %v303_v53  ;;  %v398_v33 = vld [vmem:[#allocation4 + $0x9d0] sm:$0xff]  ;;  %v399_v36 = vld [vmem:[#allocation4 + $0x9d8] sm:$0xff] }
 0x134   :  { %5005 = vmatpush1.bf16.msra.mxu0 %v9419_v56  ;;  %5128 = vmatpush1.bf16.msra.mxu1 %v9421_v57  ;;  %v9531_v56 = vcombine.low %v294_v42, %v302_v43  ;;  %v9533_v57 = vcombine.low %v295_v46, %v303_v53  ;;  %v406_v42 = vld [vmem:[#allocation4 + $0xa10] sm:$0xff]  ;;  %v407_v46 = vld [vmem:[#allocation4 + $0xa18] sm:$0xff] }
 0x135   :  { %5006 = vmatprep.subr.bf16.mxu0 %v9436_v58  ;;  %5129 = vmatprep.subr.bf16.mxu1 %v9438_v60  ;;  %v9548_v58 = vcombine.high %v310_v51, %v318_v52  ;;  %v9550_v60 = vcombine.high %v311_v54, %v319_v55  ;;  %v414_v43 = vld [vmem:[#allocation4 + $0xa50] sm:$0xff]  ;;  %v415_v53 = vld [vmem:[#allocation4 + $0xa58] sm:$0xff] }
 0x138   :  { %5007 = vmatpush1.bf16.msra.mxu0 %v9435_v2  ;;  %5130 = vmatpush1.bf16.msra.mxu1 %v9437_v3  ;;  %v9547_v2 = vcombine.low %v310_v51, %v318_v52  ;;  %v9549_v3 = vcombine.low %v311_v54, %v319_v55  ;;  %v422_v51 = vld [vmem:[#allocation4 + $0xa90] sm:$0xff]  ;;  %v423_v54 = vld [vmem:[#allocation4 + $0xa98] sm:$0xff] }
 0x139   :  { %5008 = vmatprep.subr.bf16.mxu0 %v9452_v4  ;;  %5131 = vmatprep.subr.bf16.mxu1 %v9454_v5  ;;  %v9564_v4 = vcombine.high %v326_v61, %v334_v62  ;;  %v9566_v5 = vcombine.high %v327_v0, %v335_v1  ;;  %v430_v52 = vld [vmem:[#allocation4 + $0xad0] sm:$0xff]  ;;  %v431_v55 = vld [vmem:[#allocation4 + $0xad8] sm:$0xff] }
 0x13c   :  { %5009 = vmatpush1.bf16.msra.mxu0 %v9451_v11  ;;  %5132 = vmatpush1.bf16.msra.mxu1 %v9453_v12  ;;  %v9563_v11 = vcombine.low %v326_v61, %v334_v62  ;;  %v9565_v12 = vcombine.low %v327_v0, %v335_v1  ;;  %v438_v61 = vld [vmem:[#allocation4 + $0xb10] sm:$0xff]  ;;  %v439_v0 = vld [vmem:[#allocation4 + $0xb18] sm:$0xff] }
 0x13d   :  { %5010 = vmatprep.subr.bf16.mxu0 %v9468_v13  ;;  %5133 = vmatprep.subr.bf16.mxu1 %v9470_v14  ;;  %v9580_v13 = vcombine.high %v342_v6, %v350_v7  ;;  %v9582_v14 = vcombine.high %v343_v8, %v351_v10  ;;  %v446_v62 = vld [vmem:[#allocation4 + $0xb50] sm:$0xff]  ;;  %v447_v1 = vld [vmem:[#allocation4 + $0xb58] sm:$0xff] }
 0x140   :  { %5011 = vmatpush1.bf16.msra.mxu0 %v9467_v19  ;;  %5134 = vmatpush1.bf16.msra.mxu1 %v9469_v20  ;;  %v9579_v19 = vcombine.low %v342_v6, %v350_v7  ;;  %v9581_v20 = vcombine.low %v343_v8, %v351_v10  ;;  %v454_v6 = vld [vmem:[#allocation4 + $0xb90] sm:$0xff]  ;;  %v455_v8 = vld [vmem:[#allocation4 + $0xb98] sm:$0xff] }
 0x141   :  { %5012 = vmatprep.subr.bf16.mxu0 %v9484_v21  ;;  %5135 = vmatprep.subr.bf16.mxu1 %v9486_v22  ;;  %v9596_v21 = vcombine.high %v358_v15, %v366_v16  ;;  %v9598_v22 = vcombine.high %v359_v17, %v367_v18  ;;  %v462_v7 = vld [vmem:[#allocation4 + $0xbd0] sm:$0xff]  ;;  %v463_v10 = vld [vmem:[#allocation4 + $0xbd8] sm:$0xff] }
 0x144   :  { %5013 = vmatpush1.bf16.msra.mxu0 %v9483_v28  ;;  %5136 = vmatpush1.bf16.msra.mxu1 %v9485_v29  ;;  %v9595_v28 = vcombine.low %v358_v15, %v366_v16  ;;  %v9597_v29 = vcombine.low %v359_v17, %v367_v18  ;;  %v470_v15 = vld [vmem:[#allocation4 + $0xc10] sm:$0xff]  ;;  %v471_v17 = vld [vmem:[#allocation4 + $0xc18] sm:$0xff] }
 0x145   :  { %5014 = vmatprep.subr.bf16.mxu0 %v9500_v30  ;;  %5137 = vmatprep.subr.bf16.mxu1 %v9502_v59  ;;  %v9612_v30 = vcombine.high %v374_v23, %v382_v24  ;;  %v9614_v59 = vcombine.high %v375_v25, %v383_v27  ;;  %v478_v16 = vld [vmem:[#allocation4 + $0xc50] sm:$0xff]  ;;  %v479_v18 = vld [vmem:[#allocation4 + $0xc58] sm:$0xff] }
 0x148   :  { %5015 = vmatpush1.bf16.msra.mxu0 %v9499_v38  ;;  %5138 = vmatpush1.bf16.msra.mxu1 %v9501_v39  ;;  %v9611_v38 = vcombine.low %v374_v23, %v382_v24  ;;  %v9613_v39 = vcombine.low %v375_v25, %v383_v27  ;;  %v486_v23 = vld [vmem:[#allocation4 + $0xc90] sm:$0xff]  ;;  %v487_v25 = vld [vmem:[#allocation4 + $0xc98] sm:$0xff] }
 0x149   :  { %5016 = vmatprep.subr.bf16.mxu0 %v9516_v40  ;;  %5139 = vmatprep.subr.bf16.mxu1 %v9518_v41  ;;  %v9628_v40 = vcombine.high %v390_v31, %v398_v33  ;;  %v9630_v41 = vcombine.high %v391_v35, %v399_v36  ;;  %v494_v24 = vld [vmem:[#allocation4 + $0xcd0] sm:$0xff]  ;;  %v495_v27 = vld [vmem:[#allocation4 + $0xcd8] sm:$0xff] }
 0x14c   :  { %5017 = vmatpush1.bf16.msra.mxu0 %v9515_v47  ;;  %5140 = vmatpush1.bf16.msra.mxu1 %v9517_v48  ;;  %v9627_v47 = vcombine.low %v390_v31, %v398_v33  ;;  %v9629_v48 = vcombine.low %v391_v35, %v399_v36  ;;  %v502_v31 = vld [vmem:[#allocation4 + $0xd10] sm:$0xff]  ;;  %v503_v35 = vld [vmem:[#allocation4 + $0xd18] sm:$0xff] }
 0x14d   :  { %5018 = vmatprep.subr.bf16.mxu0 %v9532_v49  ;;  %5141 = vmatprep.subr.bf16.mxu1 %v9534_v50  ;;  %v9644_v49 = vcombine.high %v406_v42, %v414_v43  ;;  %v9646_v50 = vcombine.high %v407_v46, %v415_v53  ;;  %v510_v33 = vld [vmem:[#allocation4 + $0xd50] sm:$0xff]  ;;  %v511_v36 = vld [vmem:[#allocation4 + $0xd58] sm:$0xff] }
 0x150   :  { %5019 = vmatpush1.bf16.msra.mxu0 %v9531_v56  ;;  %5142 = vmatpush1.bf16.msra.mxu1 %v9533_v57  ;;  %v9643_v56 = vcombine.low %v406_v42, %v414_v43  ;;  %v9645_v57 = vcombine.low %v407_v46, %v415_v53  ;;  %v518_v42 = vld [vmem:[#allocation4 + $0xd90] sm:$0xff]  ;;  %v519_v46 = vld [vmem:[#allocation4 + $0xd98] sm:$0xff] }
 0x151   :  { %5020 = vmatprep.subr.bf16.mxu0 %v9548_v58  ;;  %5143 = vmatprep.subr.bf16.mxu1 %v9550_v60  ;;  %v9660_v58 = vcombine.high %v422_v51, %v430_v52  ;;  %v9662_v60 = vcombine.high %v423_v54, %v431_v55  ;;  %v526_v43 = vld [vmem:[#allocation4 + $0xdd0] sm:$0xff]  ;;  %v527_v53 = vld [vmem:[#allocation4 + $0xdd8] sm:$0xff] }
 0x154   :  { %5021 = vmatpush1.bf16.msra.mxu0 %v9547_v2  ;;  %5144 = vmatpush1.bf16.msra.mxu1 %v9549_v3  ;;  %v9659_v2 = vcombine.low %v422_v51, %v430_v52  ;;  %v9661_v3 = vcombine.low %v423_v54, %v431_v55  ;;  %v534_v51 = vld [vmem:[#allocation4 + $0xe10] sm:$0xff]  ;;  %v535_v54 = vld [vmem:[#allocation4 + $0xe18] sm:$0xff] }
 0x155   :  { %5022 = vmatprep.subr.bf16.mxu0 %v9564_v4  ;;  %5145 = vmatprep.subr.bf16.mxu1 %v9566_v5  ;;  %v9676_v4 = vcombine.high %v438_v61, %v446_v62  ;;  %v9678_v5 = vcombine.high %v439_v0, %v447_v1  ;;  %v542_v52 = vld [vmem:[#allocation4 + $0xe50] sm:$0xff]  ;;  %v543_v55 = vld [vmem:[#allocation4 + $0xe58] sm:$0xff] }
 0x158   :  { %5023 = vmatpush1.bf16.msra.mxu0 %v9563_v11  ;;  %5146 = vmatpush1.bf16.msra.mxu1 %v9565_v12  ;;  %v9675_v11 = vcombine.low %v438_v61, %v446_v62  ;;  %v9677_v12 = vcombine.low %v439_v0, %v447_v1  ;;  %v550_v61 = vld [vmem:[#allocation4 + $0xe90] sm:$0xff]  ;;  %v551_v0 = vld [vmem:[#allocation4 + $0xe98] sm:$0xff] }
 0x159   :  { %5033 = vmatprep.subr.bf16.mxu0 %v9580_v13  ;;  %5156 = vmatprep.subr.bf16.mxu1 %v9582_v14  ;;  %v9692_v13 = vcombine.high %v454_v6, %v462_v7  ;;  %v9694_v14 = vcombine.high %v455_v8, %v463_v10  ;;  %v558_v62 = vld [vmem:[#allocation4 + $0xed0] sm:$0xff]  ;;  %v559_v1 = vld [vmem:[#allocation4 + $0xed8] sm:$0xff] }
 0x15b   :  { %5025 = vmatmul.mubr.bf16.vlgmr.msra.gmra.mrb[4].mxu0 %v10948_v26  ;;  %5148 = vmatmul.mubr.bf16.vlgmr.msra.gmra.mrb[4].mxu1 %v10948_v26 }
 0x15c   :  { %5034 = vmatpush1.bf16.msra.mxu0 %v9579_v19  ;;  %5157 = vmatpush1.bf16.msra.mxu1 %v9581_v20  ;;  %v9691_v19 = vcombine.low %v454_v6, %v462_v7  ;;  %v9693_v20 = vcombine.low %v455_v8, %v463_v10  ;;  %v566_v6 = vld [vmem:[#allocation4 + $0xf10] sm:$0xff]  ;;  %v567_v8 = vld [vmem:[#allocation4 + $0xf18] sm:$0xff] }
 0x15d   :  { %5035 = vmatprep.subr.bf16.mxu0 %v9596_v21  ;;  %5158 = vmatprep.subr.bf16.mxu1 %v9598_v22  ;;  %v9708_v21 = vcombine.high %v470_v15, %v478_v16  ;;  %v9710_v22 = vcombine.high %v471_v17, %v479_v18  ;;  %v574_v7 = vld [vmem:[#allocation4 + $0xf50] sm:$0xff]  ;;  %v575_v10 = vld [vmem:[#allocation4 + $0xf58] sm:$0xff] }
 0x15e   :  { %5065 = vmatprep.mubr.bf16.mxu0 %v10955_v63  ;;  %5188 = vmatprep.mubr.bf16.mxu1 %v10955_v63 }
 0x160   :  { %5036 = vmatpush1.bf16.msra.mxu0 %v9595_v28  ;;  %5159 = vmatpush1.bf16.msra.mxu1 %v9597_v29  ;;  %v9707_v28 = vcombine.low %v470_v15, %v478_v16  ;;  %v9709_v29 = vcombine.low %v471_v17, %v479_v18  ;;  %v582_v15 = vld [vmem:[#allocation4 + $0xf90] sm:$0xff]  ;;  %v583_v17 = vld [vmem:[#allocation4 + $0xf98] sm:$0xff] }
 0x161   :  { %5037 = vmatprep.subr.bf16.mxu0 %v9612_v30  ;;  %5160 = vmatprep.subr.bf16.mxu1 %v9614_v59  ;;  %v9724_v30 = vcombine.high %v486_v23, %v494_v24  ;;  %v9726_v59 = vcombine.high %v487_v25, %v495_v27  ;;  %v590_v16 = vld [vmem:[#allocation4 + $0xfd0] sm:$0xff]  ;;  %v591_v18 = vld [vmem:[#allocation4 + $0xfd8] sm:$0xff] }
 0x164   :  { %5038 = vmatpush1.bf16.msra.mxu0 %v9611_v38  ;;  %5161 = vmatpush1.bf16.msra.mxu1 %v9613_v39  ;;  %v9723_v38 = vcombine.low %v486_v23, %v494_v24  ;;  %v9725_v39 = vcombine.low %v487_v25, %v495_v27  ;;  %v598_v23 = vld [vmem:[#allocation4 + $0x1010] sm:$0xff]  ;;  %v599_v25 = vld [vmem:[#allocation4 + $0x1018] sm:$0xff] }
 0x165   :  { %5039 = vmatprep.subr.bf16.mxu0 %v9628_v40  ;;  %5162 = vmatprep.subr.bf16.mxu1 %v9630_v41  ;;  %v9740_v40 = vcombine.high %v502_v31, %v510_v33  ;;  %v9742_v41 = vcombine.high %v503_v35, %v511_v36  ;;  %v606_v24 = vld [vmem:[#allocation4 + $0x1050] sm:$0xff]  ;;  %v607_v27 = vld [vmem:[#allocation4 + $0x1058] sm:$0xff] }
 0x168   :  { %5040 = vmatpush1.bf16.msra.mxu0 %v9627_v47  ;;  %5163 = vmatpush1.bf16.msra.mxu1 %v9629_v48  ;;  %v9739_v47 = vcombine.low %v502_v31, %v510_v33  ;;  %v9741_v48 = vcombine.low %v503_v35, %v511_v36  ;;  %v614_v31 = vld [vmem:[#allocation4 + $0x1090] sm:$0xff]  ;;  %v615_v35 = vld [vmem:[#allocation4 + $0x1098] sm:$0xff] }
 0x169   :  { %5041 = vmatprep.subr.bf16.mxu0 %v9644_v49  ;;  %5164 = vmatprep.subr.bf16.mxu1 %v9646_v50  ;;  %v9756_v49 = vcombine.high %v518_v42, %v526_v43  ;;  %v9758_v50 = vcombine.high %v519_v46, %v527_v53  ;;  %v622_v33 = vld [vmem:[#allocation4 + $0x10d0] sm:$0xff]  ;;  %v623_v36 = vld [vmem:[#allocation4 + $0x10d8] sm:$0xff] }
 0x16c   :  { %5042 = vmatpush1.bf16.msra.mxu0 %v9643_v56  ;;  %5165 = vmatpush1.bf16.msra.mxu1 %v9645_v57  ;;  %v9755_v56 = vcombine.low %v518_v42, %v526_v43  ;;  %v9757_v57 = vcombine.low %v519_v46, %v527_v53  ;;  %v630_v42 = vld [vmem:[#allocation4 + $0x1110] sm:$0xff]  ;;  %v631_v46 = vld [vmem:[#allocation4 + $0x1118] sm:$0xff] }
 0x16d   :  { %5043 = vmatprep.subr.bf16.mxu0 %v9660_v58  ;;  %5166 = vmatprep.subr.bf16.mxu1 %v9662_v60  ;;  %v9772_v58 = vcombine.high %v534_v51, %v542_v52  ;;  %v9774_v60 = vcombine.high %v535_v54, %v543_v55  ;;  %v638_v43 = vld [vmem:[#allocation4 + $0x1150] sm:$0xff]  ;;  %v639_v53 = vld [vmem:[#allocation4 + $0x1158] sm:$0xff] }
 0x170   :  { %5044 = vmatpush1.bf16.msra.mxu0 %v9659_v2  ;;  %5167 = vmatpush1.bf16.msra.mxu1 %v9661_v3  ;;  %v9771_v2 = vcombine.low %v534_v51, %v542_v52  ;;  %v9773_v3 = vcombine.low %v535_v54, %v543_v55  ;;  %v646_v51 = vld [vmem:[#allocation4 + $0x1190] sm:$0xff]  ;;  %v647_v54 = vld [vmem:[#allocation4 + $0x1198] sm:$0xff] }
 0x171   :  { %5045 = vmatprep.subr.bf16.mxu0 %v9676_v4  ;;  %5168 = vmatprep.subr.bf16.mxu1 %v9678_v5  ;;  %v9788_v4 = vcombine.high %v550_v61, %v558_v62  ;;  %v9790_v5 = vcombine.high %v551_v0, %v559_v1  ;;  %v654_v52 = vld [vmem:[#allocation4 + $0x11d0] sm:$0xff]  ;;  %v655_v55 = vld [vmem:[#allocation4 + $0x11d8] sm:$0xff] }
 0x174   :  { %5046 = vmatpush1.bf16.msra.mxu0 %v9675_v11  ;;  %5169 = vmatpush1.bf16.msra.mxu1 %v9677_v12  ;;  %v9787_v11 = vcombine.low %v550_v61, %v558_v62  ;;  %v9789_v12 = vcombine.low %v551_v0, %v559_v1  ;;  %v662_v61 = vld [vmem:[#allocation4 + $0x1210] sm:$0xff]  ;;  %v663_v0 = vld [vmem:[#allocation4 + $0x1218] sm:$0xff] }
 0x175   :  { %5047 = vmatprep.subr.bf16.mxu0 %v9692_v13  ;;  %5170 = vmatprep.subr.bf16.mxu1 %v9694_v14  ;;  %v9804_v13 = vcombine.high %v566_v6, %v574_v7  ;;  %v9806_v14 = vcombine.high %v567_v8, %v575_v10  ;;  %v670_v62 = vld [vmem:[#allocation4 + $0x1250] sm:$0xff]  ;;  %v671_v1 = vld [vmem:[#allocation4 + $0x1258] sm:$0xff] }
 0x178   :  { %5048 = vmatpush1.bf16.msra.mxu0 %v9691_v19  ;;  %5171 = vmatpush1.bf16.msra.mxu1 %v9693_v20  ;;  %v9803_v19 = vcombine.low %v566_v6, %v574_v7  ;;  %v9805_v20 = vcombine.low %v567_v8, %v575_v10  ;;  %v678_v6 = vld [vmem:[#allocation4 + $0x1290] sm:$0xff]  ;;  %v679_v8 = vld [vmem:[#allocation4 + $0x1298] sm:$0xff] }
 0x179   :  { %5049 = vmatprep.subr.bf16.mxu0 %v9708_v21  ;;  %5172 = vmatprep.subr.bf16.mxu1 %v9710_v22  ;;  %v9820_v21 = vcombine.high %v582_v15, %v590_v16  ;;  %v9822_v22 = vcombine.high %v583_v17, %v591_v18  ;;  %v686_v7 = vld [vmem:[#allocation4 + $0x12d0] sm:$0xff]  ;;  %v687_v10 = vld [vmem:[#allocation4 + $0x12d8] sm:$0xff] }
 0x17c   :  { %5050 = vmatpush1.bf16.msra.mxu0 %v9707_v28  ;;  %5173 = vmatpush1.bf16.msra.mxu1 %v9709_v29  ;;  %v9819_v28 = vcombine.low %v582_v15, %v590_v16  ;;  %v9821_v29 = vcombine.low %v583_v17, %v591_v18  ;;  %v694_v15 = vld [vmem:[#allocation4 + $0x1310] sm:$0xff]  ;;  %v695_v17 = vld [vmem:[#allocation4 + $0x1318] sm:$0xff] }
 0x17d   :  { %5051 = vmatprep.subr.bf16.mxu0 %v9724_v30  ;;  %5174 = vmatprep.subr.bf16.mxu1 %v9726_v59  ;;  %v9836_v30 = vcombine.high %v598_v23, %v606_v24  ;;  %v9838_v59 = vcombine.high %v599_v25, %v607_v27  ;;  %v702_v16 = vld [vmem:[#allocation4 + $0x1350] sm:$0xff]  ;;  %v703_v18 = vld [vmem:[#allocation4 + $0x1358] sm:$0xff] }
 0x180   :  { %5052 = vmatpush1.bf16.msra.mxu0 %v9723_v38  ;;  %5175 = vmatpush1.bf16.msra.mxu1 %v9725_v39  ;;  %v9835_v38 = vcombine.low %v598_v23, %v606_v24  ;;  %v9837_v39 = vcombine.low %v599_v25, %v607_v27  ;;  %v710_v23 = vld [vmem:[#allocation4 + $0x1390] sm:$0xff]  ;;  %v711_v25 = vld [vmem:[#allocation4 + $0x1398] sm:$0xff] }
 0x181   :  { %5053 = vmatprep.subr.bf16.mxu0 %v9740_v40  ;;  %5176 = vmatprep.subr.bf16.mxu1 %v9742_v41  ;;  %v9852_v40 = vcombine.high %v614_v31, %v622_v33  ;;  %v9854_v41 = vcombine.high %v615_v35, %v623_v36  ;;  %v718_v24 = vld [vmem:[#allocation4 + $0x13d0] sm:$0xff]  ;;  %v719_v27 = vld [vmem:[#allocation4 + $0x13d8] sm:$0xff] }
 0x184   :  { %5054 = vmatpush1.bf16.msra.mxu0 %v9739_v47  ;;  %5177 = vmatpush1.bf16.msra.mxu1 %v9741_v48  ;;  %v9851_v47 = vcombine.low %v614_v31, %v622_v33  ;;  %v9853_v48 = vcombine.low %v615_v35, %v623_v36  ;;  %v726_v31 = vld [vmem:[#allocation4 + $0x1410] sm:$0xff]  ;;  %v727_v35 = vld [vmem:[#allocation4 + $0x1418] sm:$0xff] }
 0x185   :  { %5055 = vmatprep.subr.bf16.mxu0 %v9756_v49  ;;  %5178 = vmatprep.subr.bf16.mxu1 %v9758_v50  ;;  %v9868_v49 = vcombine.high %v630_v42, %v638_v43  ;;  %v9870_v50 = vcombine.high %v631_v46, %v639_v53  ;;  %v734_v33 = vld [vmem:[#allocation4 + $0x1450] sm:$0xff]  ;;  %v735_v36 = vld [vmem:[#allocation4 + $0x1458] sm:$0xff] }
 0x188   :  { %5056 = vmatpush1.bf16.msra.mxu0 %v9755_v56  ;;  %5179 = vmatpush1.bf16.msra.mxu1 %v9757_v57  ;;  %v9867_v56 = vcombine.low %v630_v42, %v638_v43  ;;  %v9869_v57 = vcombine.low %v631_v46, %v639_v53  ;;  %v742_v42 = vld [vmem:[#allocation4 + $0x1490] sm:$0xff]  ;;  %v743_v46 = vld [vmem:[#allocation4 + $0x1498] sm:$0xff] }
 0x189   :  { %5057 = vmatprep.subr.bf16.mxu0 %v9772_v58  ;;  %5180 = vmatprep.subr.bf16.mxu1 %v9774_v60  ;;  %v9884_v58 = vcombine.high %v646_v51, %v654_v52  ;;  %v9886_v60 = vcombine.high %v647_v54, %v655_v55  ;;  %v750_v43 = vld [vmem:[#allocation4 + $0x14d0] sm:$0xff]  ;;  %v751_v53 = vld [vmem:[#allocation4 + $0x14d8] sm:$0xff] }
 0x18c   :  { %5058 = vmatpush1.bf16.msra.mxu0 %v9771_v2  ;;  %5181 = vmatpush1.bf16.msra.mxu1 %v9773_v3  ;;  %v9883_v2 = vcombine.low %v646_v51, %v654_v52  ;;  %v9885_v3 = vcombine.low %v647_v54, %v655_v55  ;;  %v758_v51 = vld [vmem:[#allocation4 + $0x1510] sm:$0xff]  ;;  %v759_v54 = vld [vmem:[#allocation4 + $0x1518] sm:$0xff] }
 0x18d   :  { %5059 = vmatprep.subr.bf16.mxu0 %v9788_v4  ;;  %5182 = vmatprep.subr.bf16.mxu1 %v9790_v5  ;;  %v9900_v4 = vcombine.high %v662_v61, %v670_v62  ;;  %v9902_v5 = vcombine.high %v663_v0, %v671_v1  ;;  %v766_v52 = vld [vmem:[#allocation4 + $0x1550] sm:$0xff]  ;;  %v767_v55 = vld [vmem:[#allocation4 + $0x1558] sm:$0xff] }
 0x190   :  { %5060 = vmatpush1.bf16.msra.mxu0 %v9787_v11  ;;  %5183 = vmatpush1.bf16.msra.mxu1 %v9789_v12  ;;  %v9899_v11 = vcombine.low %v662_v61, %v670_v62  ;;  %v9901_v12 = vcombine.low %v663_v0, %v671_v1  ;;  %v774_v61 = vld [vmem:[#allocation4 + $0x1590] sm:$0xff]  ;;  %v775_v0 = vld [vmem:[#allocation4 + $0x1598] sm:$0xff] }
 0x191   :  { %5061 = vmatprep.subr.bf16.mxu0 %v9804_v13  ;;  %5184 = vmatprep.subr.bf16.mxu1 %v9806_v14  ;;  %v9916_v13 = vcombine.high %v678_v6, %v686_v7  ;;  %v9918_v14 = vcombine.high %v679_v8, %v687_v10  ;;  %v782_v62 = vld [vmem:[#allocation4 + $0x15d0] sm:$0xff]  ;;  %v783_v1 = vld [vmem:[#allocation4 + $0x15d8] sm:$0xff] }
 0x194   :  { %5062 = vmatpush1.bf16.msra.mxu0 %v9803_v19  ;;  %5185 = vmatpush1.bf16.msra.mxu1 %v9805_v20  ;;  %v9915_v19 = vcombine.low %v678_v6, %v686_v7  ;;  %v9917_v20 = vcombine.low %v679_v8, %v687_v10  ;;  %v790_v6 = vld [vmem:[#allocation4 + $0x1610] sm:$0xff]  ;;  %v791_v8 = vld [vmem:[#allocation4 + $0x1618] sm:$0xff] }
 0x195   :  { %5063 = vmatprep.subr.bf16.mxu0 %v9820_v21  ;;  %5186 = vmatprep.subr.bf16.mxu1 %v9822_v22  ;;  %v9932_v21 = vcombine.high %v694_v15, %v702_v16  ;;  %v9934_v22 = vcombine.high %v695_v17, %v703_v18  ;;  %v798_v7 = vld [vmem:[#allocation4 + $0x1650] sm:$0xff]  ;;  %v799_v10 = vld [vmem:[#allocation4 + $0x1658] sm:$0xff] }
 0x198   :  { %5064 = vmatpush1.bf16.msra.mxu0 %v9819_v28  ;;  %5187 = vmatpush1.bf16.msra.mxu1 %v9821_v29  ;;  %v9931_v28 = vcombine.low %v694_v15, %v702_v16  ;;  %v9933_v29 = vcombine.low %v695_v17, %v703_v18  ;;  %v806_v15 = vld [vmem:[#allocation4 + $0x1690] sm:$0xff]  ;;  %v807_v17 = vld [vmem:[#allocation4 + $0x1698] sm:$0xff] }
 0x199   :  { %5074 = vmatprep.subr.bf16.mxu0 %v9836_v30  ;;  %5197 = vmatprep.subr.bf16.mxu1 %v9838_v59  ;;  %v9948_v30 = vcombine.high %v710_v23, %v718_v24  ;;  %v9950_v59 = vcombine.high %v711_v25, %v719_v27  ;;  %v814_v16 = vld [vmem:[#allocation4 + $0x16d0] sm:$0xff]  ;;  %v815_v18 = vld [vmem:[#allocation4 + $0x16d8] sm:$0xff] }
 0x19b   :  { %5066 = vmatmul.mubr.bf16.vlgmr.msra.gmra.mrb[4].mxu0 %v10966_v45  ;;  %5189 = vmatmul.mubr.bf16.vlgmr.msra.gmra.mrb[4].mxu1 %v10966_v45 }
 0x19c   :  { %5075 = vmatpush1.bf16.msra.mxu0 %v9835_v38  ;;  %5198 = vmatpush1.bf16.msra.mxu1 %v9837_v39  ;;  %v9947_v38 = vcombine.low %v710_v23, %v718_v24  ;;  %v9949_v39 = vcombine.low %v711_v25, %v719_v27  ;;  %v822_v23 = vld [vmem:[#allocation4 + $0x1710] sm:$0xff]  ;;  %v823_v25 = vld [vmem:[#allocation4 + $0x1718] sm:$0xff] }
 0x19d   :  { %5076 = vmatprep.subr.bf16.mxu0 %v9852_v40  ;;  %5199 = vmatprep.subr.bf16.mxu1 %v9854_v41  ;;  %v9964_v40 = vcombine.high %v726_v31, %v734_v33  ;;  %v9966_v41 = vcombine.high %v727_v35, %v735_v36  ;;  %v830_v24 = vld [vmem:[#allocation4 + $0x1750] sm:$0xff]  ;;  %v831_v27 = vld [vmem:[#allocation4 + $0x1758] sm:$0xff] }
 0x19e   :  { %5106 = vmatprep.mubr.bf16.mxu0 %v10958_v37  ;;  %5229 = vmatprep.mubr.bf16.mxu1 %v10958_v37 }
 0x1a0   :  { %5077 = vmatpush1.bf16.msra.mxu0 %v9851_v47  ;;  %5200 = vmatpush1.bf16.msra.mxu1 %v9853_v48  ;;  %v9963_v47 = vcombine.low %v726_v31, %v734_v33  ;;  %v9965_v48 = vcombine.low %v727_v35, %v735_v36  ;;  %v838_v31 = vld [vmem:[#allocation4 + $0x1790] sm:$0xff]  ;;  %v839_v35 = vld [vmem:[#allocation4 + $0x1798] sm:$0xff] }
 0x1a1   :  { %5078 = vmatprep.subr.bf16.mxu0 %v9868_v49  ;;  %5201 = vmatprep.subr.bf16.mxu1 %v9870_v50  ;;  %v9980_v49 = vcombine.high %v742_v42, %v750_v43  ;;  %v9982_v50 = vcombine.high %v743_v46, %v751_v53  ;;  %v846_v33 = vld [vmem:[#allocation4 + $0x17d0] sm:$0xff]  ;;  %v847_v36 = vld [vmem:[#allocation4 + $0x17d8] sm:$0xff] }
 0x1a4   :  { %5079 = vmatpush1.bf16.msra.mxu0 %v9867_v56  ;;  %5202 = vmatpush1.bf16.msra.mxu1 %v9869_v57  ;;  %v9979_v56 = vcombine.low %v742_v42, %v750_v43  ;;  %v9981_v57 = vcombine.low %v743_v46, %v751_v53  ;;  %v88_v42 = vld [vmem:[#allocation4 + $0x20] sm:$0xff]  ;;  %v89_v46 = vld [vmem:[#allocation4 + $0x28] sm:$0xff] }
 0x1a5   :  { %5080 = vmatprep.subr.bf16.mxu0 %v9884_v58  ;;  %5203 = vmatprep.subr.bf16.mxu1 %v9886_v60  ;;  %v9996_v58 = vcombine.high %v758_v51, %v766_v52  ;;  %v9998_v60 = vcombine.high %v759_v54, %v767_v55  ;;  %v96_v43 = vld [vmem:[#allocation4 + $0x60] sm:$0xff]  ;;  %v97_v53 = vld [vmem:[#allocation4 + $0x68] sm:$0xff] }
 0x1a8   :  { %5081 = vmatpush1.bf16.msra.mxu0 %v9883_v2  ;;  %5204 = vmatpush1.bf16.msra.mxu1 %v9885_v3  ;;  %v9995_v2 = vcombine.low %v758_v51, %v766_v52  ;;  %v9997_v3 = vcombine.low %v759_v54, %v767_v55  ;;  %v104_v51 = vld [vmem:[#allocation4 + $0xa0] sm:$0xff]  ;;  %v105_v54 = vld [vmem:[#allocation4 + $0xa8] sm:$0xff] }
 0x1a9   :  { %5082 = vmatprep.subr.bf16.mxu0 %v9900_v4  ;;  %5205 = vmatprep.subr.bf16.mxu1 %v9902_v5  ;;  %v10012_v4 = vcombine.high %v774_v61, %v782_v62  ;;  %v10014_v5 = vcombine.high %v775_v0, %v783_v1  ;;  %v112_v52 = vld [vmem:[#allocation4 + $0xe0] sm:$0xff]  ;;  %v113_v55 = vld [vmem:[#allocation4 + $0xe8] sm:$0xff] }
 0x1ac   :  { %5083 = vmatpush1.bf16.msra.mxu0 %v9899_v11  ;;  %5206 = vmatpush1.bf16.msra.mxu1 %v9901_v12  ;;  %v10011_v11 = vcombine.low %v774_v61, %v782_v62  ;;  %v10013_v12 = vcombine.low %v775_v0, %v783_v1  ;;  %v120_v61 = vld [vmem:[#allocation4 + $0x120] sm:$0xff]  ;;  %v121_v0 = vld [vmem:[#allocation4 + $0x128] sm:$0xff] }
 0x1ad   :  { %5084 = vmatprep.subr.bf16.mxu0 %v9916_v13  ;;  %5207 = vmatprep.subr.bf16.mxu1 %v9918_v14  ;;  %v10028_v13 = vcombine.high %v790_v6, %v798_v7  ;;  %v10030_v14 = vcombine.high %v791_v8, %v799_v10  ;;  %v128_v62 = vld [vmem:[#allocation4 + $0x160] sm:$0xff]  ;;  %v129_v1 = vld [vmem:[#allocation4 + $0x168] sm:$0xff] }
 0x1b0   :  { %5085 = vmatpush1.bf16.msra.mxu0 %v9915_v19  ;;  %5208 = vmatpush1.bf16.msra.mxu1 %v9917_v20  ;;  %v10027_v19 = vcombine.low %v790_v6, %v798_v7  ;;  %v10029_v20 = vcombine.low %v791_v8, %v799_v10  ;;  %v136_v6 = vld [vmem:[#allocation4 + $0x1a0] sm:$0xff]  ;;  %v137_v8 = vld [vmem:[#allocation4 + $0x1a8] sm:$0xff] }
 0x1b1   :  { %5086 = vmatprep.subr.bf16.mxu0 %v9932_v21  ;;  %5209 = vmatprep.subr.bf16.mxu1 %v9934_v22  ;;  %v10044_v21 = vcombine.high %v806_v15, %v814_v16  ;;  %v10046_v22 = vcombine.high %v807_v17, %v815_v18  ;;  %v144_v7 = vld [vmem:[#allocation4 + $0x1e0] sm:$0xff]  ;;  %v145_v10 = vld [vmem:[#allocation4 + $0x1e8] sm:$0xff] }
 0x1b4   :  { %5087 = vmatpush1.bf16.msra.mxu0 %v9931_v28  ;;  %5210 = vmatpush1.bf16.msra.mxu1 %v9933_v29  ;;  %v10043_v28 = vcombine.low %v806_v15, %v814_v16  ;;  %v10045_v29 = vcombine.low %v807_v17, %v815_v18  ;;  %v152_v15 = vld [vmem:[#allocation4 + $0x220] sm:$0xff]  ;;  %v153_v17 = vld [vmem:[#allocation4 + $0x228] sm:$0xff] }
 0x1b5   :  { %5088 = vmatprep.subr.bf16.mxu0 %v9948_v30  ;;  %5211 = vmatprep.subr.bf16.mxu1 %v9950_v59  ;;  %v10060_v30 = vcombine.high %v822_v23, %v830_v24  ;;  %v10062_v59 = vcombine.high %v823_v25, %v831_v27  ;;  %v160_v16 = vld [vmem:[#allocation4 + $0x260] sm:$0xff]  ;;  %v161_v18 = vld [vmem:[#allocation4 + $0x268] sm:$0xff] }
 0x1b8   :  { %5089 = vmatpush1.bf16.msra.mxu0 %v9947_v38  ;;  %5212 = vmatpush1.bf16.msra.mxu1 %v9949_v39  ;;  %v10059_v38 = vcombine.low %v822_v23, %v830_v24  ;;  %v10061_v39 = vcombine.low %v823_v25, %v831_v27  ;;  %v168_v23 = vld [vmem:[#allocation4 + $0x2a0] sm:$0xff]  ;;  %v169_v25 = vld [vmem:[#allocation4 + $0x2a8] sm:$0xff] }
 0x1b9   :  { %5090 = vmatprep.subr.bf16.mxu0 %v9964_v40  ;;  %5213 = vmatprep.subr.bf16.mxu1 %v9966_v41  ;;  %v10076_v40 = vcombine.high %v838_v31, %v846_v33  ;;  %v10078_v41 = vcombine.high %v839_v35, %v847_v36  ;;  %v176_v24 = vld [vmem:[#allocation4 + $0x2e0] sm:$0xff]  ;;  %v177_v27 = vld [vmem:[#allocation4 + $0x2e8] sm:$0xff] }
 0x1bc   :  { %5091 = vmatpush1.bf16.msra.mxu0 %v9963_v47  ;;  %5214 = vmatpush1.bf16.msra.mxu1 %v9965_v48  ;;  %v10075_v47 = vcombine.low %v838_v31, %v846_v33  ;;  %v10077_v48 = vcombine.low %v839_v35, %v847_v36  ;;  %v184_v31 = vld [vmem:[#allocation4 + $0x320] sm:$0xff]  ;;  %v185_v35 = vld [vmem:[#allocation4 + $0x328] sm:$0xff] }
 0x1bd   :  { %5092 = vmatprep.subr.bf16.mxu0 %v9980_v49  ;;  %5215 = vmatprep.subr.bf16.mxu1 %v9982_v50  ;;  %v9328_v49 = vcombine.high %v88_v42, %v96_v43  ;;  %v9330_v50 = vcombine.high %v89_v46, %v97_v53  ;;  %v192_v33 = vld [vmem:[#allocation4 + $0x360] sm:$0xff]  ;;  %v193_v36 = vld [vmem:[#allocation4 + $0x368] sm:$0xff] }
 0x1c0   :  { %5093 = vmatpush1.bf16.msra.mxu0 %v9979_v56  ;;  %5216 = vmatpush1.bf16.msra.mxu1 %v9981_v57  ;;  %v9327_v56 = vcombine.low %v88_v42, %v96_v43  ;;  %v9329_v57 = vcombine.low %v89_v46, %v97_v53  ;;  %v9426_v42 = vcombine.high %v185_v35, %v193_v36  ;;  %v200_v43 = vld [vmem:[#allocation4 + $0x3a0] sm:$0xff] }
 0x1c1   :  { %5094 = vmatprep.subr.bf16.mxu0 %v9996_v58  ;;  %5217 = vmatprep.subr.bf16.mxu1 %v9998_v60  ;;  %v9344_v58 = vcombine.high %v104_v51, %v112_v52  ;;  %v9346_v60 = vcombine.high %v105_v54, %v113_v55  ;;  %v208_v46 = vld [vmem:[#allocation4 + $0x3e0] sm:$0xff] }
 0x1c4   :  { %5095 = vmatpush1.bf16.msra.mxu0 %v9995_v2  ;;  %5218 = vmatpush1.bf16.msra.mxu1 %v9997_v3  ;;  %v9343_v2 = vcombine.low %v104_v51, %v112_v52  ;;  %v9345_v3 = vcombine.low %v105_v54, %v113_v55 }
 0x1c5   :  { %5096 = vmatprep.subr.bf16.mxu0 %v10012_v4  ;;  %5219 = vmatprep.subr.bf16.mxu1 %v10014_v5  ;;  %v9360_v4 = vcombine.high %v120_v61, %v128_v62  ;;  %v9362_v5 = vcombine.high %v121_v0, %v129_v1 }
 0x1c8   :  { %5097 = vmatpush1.bf16.msra.mxu0 %v10011_v11  ;;  %5220 = vmatpush1.bf16.msra.mxu1 %v10013_v12  ;;  %v9359_v11 = vcombine.low %v120_v61, %v128_v62  ;;  %v9361_v12 = vcombine.low %v121_v0, %v129_v1  ;;  %v9425_v61 = vcombine.low %v185_v35, %v193_v36  ;;  %v264_v36 = vld [vmem:[#allocation4 + $0x5a0] sm:$0xff] }
 0x1c9   :  { %5098 = vmatprep.subr.bf16.mxu0 %v10028_v13  ;;  %5221 = vmatprep.subr.bf16.mxu1 %v10030_v14  ;;  %v9376_v13 = vcombine.high %v136_v6, %v144_v7  ;;  %v9378_v14 = vcombine.high %v137_v8, %v145_v10  ;;  %v9440_v62 = vcombine.high %v200_v43, %v208_v46 }
 0x1cc   :  { %5099 = vmatpush1.bf16.msra.mxu0 %v10027_v19  ;;  %5222 = vmatpush1.bf16.msra.mxu1 %v10029_v20  ;;  %v9375_v19 = vcombine.low %v136_v6, %v144_v7  ;;  %v9377_v20 = vcombine.low %v137_v8, %v145_v10  ;;  %v217_v7 = vld [vmem:[#allocation4 + $0x428] sm:$0xff] }
 0x1cd   :  { %5100 = vmatprep.subr.bf16.mxu0 %v10044_v21  ;;  %5223 = vmatprep.subr.bf16.mxu1 %v10046_v22  ;;  %v9392_v21 = vcombine.high %v152_v15, %v160_v16  ;;  %v9394_v22 = vcombine.high %v153_v17, %v161_v18  ;;  %v225_v8 = vld [vmem:[#allocation4 + $0x468] sm:$0xff] }
 0x1d0   :  { %5101 = vmatpush1.bf16.msra.mxu0 %v10043_v28  ;;  %5224 = vmatpush1.bf16.msra.mxu1 %v10045_v29  ;;  %v9391_v28 = vcombine.low %v152_v15, %v160_v16  ;;  %v9393_v29 = vcombine.low %v153_v17, %v161_v18  ;;  %v9458_v16 = vcombine.high %v217_v7, %v225_v8  ;;  %v232_v17 = vld [vmem:[#allocation4 + $0x4a0] sm:$0xff] }
 0x1d1   :  { %5102 = vmatprep.subr.bf16.mxu0 %v10060_v30  ;;  %5225 = vmatprep.subr.bf16.mxu1 %v10062_v59  ;;  %v9408_v30 = vcombine.high %v168_v23, %v176_v24  ;;  %v9410_v59 = vcombine.high %v169_v25, %v177_v27  ;;  %v240_v18 = vld [vmem:[#allocation4 + $0x4e0] sm:$0xff] }
 0x1d4   :  { %5103 = vmatpush1.bf16.msra.mxu0 %v10059_v38  ;;  %5226 = vmatpush1.bf16.msra.mxu1 %v10061_v39  ;;  %v9407_v38 = vcombine.low %v168_v23, %v176_v24  ;;  %v9409_v39 = vcombine.low %v169_v25, %v177_v27  ;;  %v9457_v23 = vcombine.low %v217_v7, %v225_v8  ;;  %v248_v27 = vld [vmem:[#allocation4 + $0x520] sm:$0xff]  ;;  %v313_v7 = vld [vmem:[#allocation4 + $0x728] sm:$0xff] }
 0x1d5   :  { %5104 = vmatprep.subr.bf16.mxu0 %v10076_v40  ;;  %5227 = vmatprep.subr.bf16.mxu1 %v10078_v41  ;;  %v9424_v40 = vcombine.high %v184_v31, %v192_v33  ;;  %v9472_v24 = vcombine.high %v232_v17, %v240_v18  ;;  %v321_v8 = vld [vmem:[#allocation4 + $0x768] sm:$0xff] }
 0x1d8   :  { %5105 = vmatpush1.bf16.msra.mxu0 %v10075_v47  ;;  %5228 = vmatpush1.bf16.msra.mxu1 %v10077_v48 }
 0x1d9   :  { %5238 = vmatprep.subr.bf16.mxu0 %v9328_v49  ;;  %5361 = vmatprep.subr.bf16.mxu1 %v9330_v50  ;;  %v201_v49 = vld [vmem:[#allocation4 + $0x3a8] sm:$0xff] }
 0x1da   :  { %v209_v50 = vld [vmem:[#allocation4 + $0x3e8] sm:$0xff] }
 0x1db   :  { %5107 = vmatmul.mubr.bf16.vlgmr.msra.gmra.mrb[4].mxu0 %v10951_v32  ;;  %5230 = vmatmul.mubr.bf16.vlgmr.msra.gmra.mrb[4].mxu1 %v10951_v32 }
 0x1dc   :  { %5239 = vmatpush1.bf16.msra.mxu0 %v9327_v56  ;;  %5362 = vmatpush1.bf16.msra.mxu1 %v9329_v57  ;;  %v9423_v56 = vcombine.low %v184_v31, %v192_v33 }
 0x1dd   :  { %5240 = vmatprep.subr.bf16.mxu0 %v9344_v58  ;;  %5363 = vmatprep.subr.bf16.mxu1 %v9346_v60 }
 0x1de   :  { %5270 = vmatprep.mubr.bf16.mxu0 %v10939_v9  ;;  %5393 = vmatprep.mubr.bf16.mxu1 %v10939_v9 }
 0x1e0   :  { %5241 = vmatpush1.bf16.msra.mxu0 %v9343_v2  ;;  %5364 = vmatpush1.bf16.msra.mxu1 %v9345_v3  ;;  %v9442_v3 = vcombine.high %v201_v49, %v209_v50 }
 0x1e1   :  { %5242 = vmatprep.subr.bf16.mxu0 %v9360_v4  ;;  %5365 = vmatprep.subr.bf16.mxu1 %v9362_v5  ;;  %v216_v4 = vld [vmem:[#allocation4 + $0x420] sm:$0xff] }
 0x1e2   :  { %v224_v5 = vld [vmem:[#allocation4 + $0x460] sm:$0xff] }
 0x1e4   :  { %5243 = vmatpush1.bf16.msra.mxu0 %v9359_v11  ;;  %5366 = vmatpush1.bf16.msra.mxu1 %v9361_v12  ;;  %v9439_v11 = vcombine.low %v200_v43, %v208_v46 }
 0x1e5   :  { %5244 = vmatprep.subr.bf16.mxu0 %v9376_v13  ;;  %5367 = vmatprep.subr.bf16.mxu1 %v9378_v14  ;;  %v9441_v13 = vcombine.low %v201_v49, %v209_v50  ;;  %v9456_v14 = vcombine.high %v216_v4, %v224_v5  ;;  %v280_v49 = vld [vmem:[#allocation4 + $0x620] sm:$0xff] }
 0x1e6   :  { %v288_v50 = vld [vmem:[#allocation4 + $0x660] sm:$0xff] }
 0x1e8   :  { %5245 = vmatpush1.bf16.msra.mxu0 %v9375_v19  ;;  %5368 = vmatpush1.bf16.msra.mxu1 %v9377_v20  ;;  %v233_v20 = vld [vmem:[#allocation4 + $0x4a8] sm:$0xff] }
 0x1e9   :  { %5246 = vmatprep.subr.bf16.mxu0 %v9392_v21  ;;  %5369 = vmatprep.subr.bf16.mxu1 %v9394_v22  ;;  %v241_v21 = vld [vmem:[#allocation4 + $0x4e8] sm:$0xff]  ;;  %v9455_v22 = vcombine.low %v216_v4, %v224_v5  ;;  %v312_v5 = vld [vmem:[#allocation4 + $0x720] sm:$0xff] }
 0x1ea   :  { %v9474_v25 = vcombine.high %v233_v20, %v241_v21  ;;  %v9473_v31 = vcombine.low %v233_v20, %v241_v21  ;;  %v9553_v20 = vcombine.low %v313_v7, %v321_v8 }
 0x1ec   :  { %5247 = vmatpush1.bf16.msra.mxu0 %v9391_v28  ;;  %5370 = vmatpush1.bf16.msra.mxu1 %v9393_v29  ;;  %v256_v28 = vld [vmem:[#allocation4 + $0x560] sm:$0xff]  ;;  %v249_v29 = vld [vmem:[#allocation4 + $0x528] sm:$0xff] }
 0x1ed   :  { %5248 = vmatprep.subr.bf16.mxu0 %v9408_v30  ;;  %5371 = vmatprep.subr.bf16.mxu1 %v9410_v59  ;;  %v257_v30 = vld [vmem:[#allocation4 + $0x568] sm:$0xff]  ;;  %v9471_v59 = vcombine.low %v232_v17, %v240_v18  ;;  %v9488_v33 = vcombine.high %v248_v27, %v256_v28 }
 0x1ee   :  { %v10988_v41 = vpop.f32.mrb[0].mxu0  ;;  %v10992_v47 = vpop.f32.mrb[0].mxu1  ;;  %v9490_v35 = vcombine.high %v249_v29, %v257_v30  ;;  %v9489_v43 = vcombine.low %v249_v29, %v257_v30  ;;  %v337_v17 = vld [vmem:[#allocation4 + $0x7e8] sm:$0xff] }
 0x1ef   :  { %v5730_v53 = vmul.f32 %v10988_v41, %v10988_v41  ;;  %v10994_v48 = vpop.f32.mrb[1].mxu0  ;;  %v5732_v51 = vmul.f32 %v10992_v47, %v10992_v47  ;;  %v11000_v54 = vpop.f32.mrb[1].mxu1 }
 0x1f0   :  { %v5731_v52 = vmul.f32 %v10994_v48, %v10994_v48  ;;  %v4866_v55 = vpop.f32.mrb[2].mxu0  ;;  %5249 = vmatpush1.bf16.msra.mxu0 %v9407_v38  ;;  %v4989_v58 = vpop.f32.mrb[2].mxu1  ;;  %5372 = vmatpush1.bf16.msra.mxu1 %v9409_v39  ;;  %v5733_v1 = vmul.f32 %v11000_v54, %v11000_v54  ;;  %v272_v38 = vld [vmem:[#allocation4 + $0x5e0] sm:$0xff]  ;;  %v265_v39 = vld [vmem:[#allocation4 + $0x5a8] sm:$0xff] }
 0x1f1   :  { %v5747_v57 = vsel %vm5746_vm0, %v5730_v53, 0.0  ;;  %v4867_v60 = vpop.f32.mrb[3].mxu0  ;;  %5250 = vmatprep.subr.bf16.mxu0 %v9424_v40  ;;  %v4990_v2 = vpop.f32.mrb[3].mxu1  ;;  %5373 = vmatprep.subr.bf16.mxu1 %v9426_v42  ;;  %v5750_v10 = vsel %vm5746_vm0, %v5732_v51, 0.0  ;;  %v273_v40 = vld [vmem:[#allocation4 + $0x5e8] sm:$0xff]  ;;  %v9487_v42 = vcombine.low %v248_v27, %v256_v28  ;;  %v9504_v46 = vcombine.high %v264_v36, %v272_v38 }
 0x1f2   :  { %v5748_v0 = vsel %vm5746_vm0, %v5731_v52, 0.0  ;;  %v5752_v15 = vsel %vm5746_vm0, %v5733_v1, 0.0  ;;  %v9506_v53 = vcombine.high %v265_v39, %v273_v40  ;;  %v281_v51 = vld [vmem:[#allocation4 + $0x628] sm:$0xff]  ;;  %v9503_v55 = vcombine.low %v264_v36, %v272_v38  ;;  %v296_v60 = vld [vmem:[#allocation4 + $0x6a0] sm:$0xff] }
 0x1f3   :  { %v5749_v6 = vadd.f32 %v5748_v0, %v5747_v57  ;;  %v289_v52 = vld [vmem:[#allocation4 + $0x668] sm:$0xff]  ;;  %v9520_v57 = vcombine.high %v280_v49, %v288_v50  ;;  %v9519_v1 = vcombine.low %v280_v49, %v288_v50 }
 0x1f4   :  { %5251 = vmatpush1.bf16.msra.mxu0 %v9423_v56  ;;  %5374 = vmatpush1.bf16.msra.mxu1 %v9425_v61  ;;  %v9505_v56 = vcombine.low %v265_v39, %v273_v40  ;;  %v9522_v58 = vcombine.high %v281_v51, %v289_v52  ;;  %v304_v61 = vld [vmem:[#allocation4 + $0x6e0] sm:$0xff]  ;;  %v305_v0 = vld [vmem:[#allocation4 + $0x6e8] sm:$0xff]  ;;  %v9521_v2 = vcombine.low %v281_v51, %v289_v52 }
 0x1f5   :  { %v5751_v12 = vadd.f32 %v5750_v10, %v5749_v6  ;;  %5252 = vmatprep.subr.bf16.mxu0 %v9440_v62  ;;  %5375 = vmatprep.subr.bf16.mxu1 %v9442_v3  ;;  %v297_v62 = vld [vmem:[#allocation4 + $0x6a8] sm:$0xff]  ;;  %v9536_v3 = vcombine.high %v296_v60, %v304_v61  ;;  %v320_v6 = vld [vmem:[#allocation4 + $0x760] sm:$0xff]  ;;  %v9535_v10 = vcombine.low %v296_v60, %v304_v61 }
 0x1f6   :  { %v9538_v4 = vcombine.high %v297_v62, %v305_v0  ;;  %v9551_v18 = vcombine.low %v312_v5, %v320_v6  ;;  %v353_v27 = vld [vmem:[#allocation4 + $0x868] sm:$0xff] }
 0x1f7   :  { %v11008_v19 = vadd.f32 %v5752_v15, %v5751_v12  ;;  %v9552_v12 = vcombine.high %v312_v5, %v320_v6  ;;  %v336_v15 = vld [vmem:[#allocation4 + $0x7e0] sm:$0xff]  ;;  %v369_v36 = vld [vmem:[#allocation4 + $0x8e8] sm:$0xff] }
 0x1f8   :  { %5253 = vmatpush1.bf16.msra.mxu0 %v9439_v11  ;;  %5376 = vmatpush1.bf16.msra.mxu1 %v9441_v13  ;;  %v9537_v11 = vcombine.low %v297_v62, %v305_v0  ;;  %v9554_v13 = vcombine.high %v313_v7, %v321_v8  ;;  %v385_v49 = vld [vmem:[#allocation4 + $0x968] sm:$0xff] }
 0x1f9   :  { %5254 = vmatprep.subr.bf16.mxu0 %v9456_v14  ;;  %5377 = vmatprep.subr.bf16.mxu1 %v9458_v16  ;;  %v328_v14 = vld [vmem:[#allocation4 + $0x7a0] sm:$0xff]  ;;  %v329_v16 = vld [vmem:[#allocation4 + $0x7a8] sm:$0xff] }
 0x1fa   :  { %v9568_v21 = vcombine.high %v328_v14, %v336_v15  ;;  %v9567_v28 = vcombine.low %v328_v14, %v336_v15  ;;  %v9569_v29 = vcombine.low %v329_v16, %v337_v17  ;;  %v401_v60 = vld [vmem:[#allocation4 + $0x9e8] sm:$0xff] }
 0x1fb   :  { %v417_v5 = vld [vmem:[#allocation4 + $0xa68] sm:$0xff] }
 0x1fc   :  { %5255 = vmatpush1.bf16.msra.mxu0 %v9455_v22  ;;  %5378 = vmatpush1.bf16.msra.mxu1 %v9457_v23  ;;  %v9570_v22 = vcombine.high %v329_v16, %v337_v17  ;;  %v344_v23 = vld [vmem:[#allocation4 + $0x820] sm:$0xff]  ;;  %v433_v14 = vld [vmem:[#allocation4 + $0xae8] sm:$0xff] }
 0x1fd   :  { %5256 = vmatprep.subr.bf16.mxu0 %v9472_v24  ;;  %5379 = vmatprep.subr.bf16.mxu1 %v9474_v25  ;;  %v352_v24 = vld [vmem:[#allocation4 + $0x860] sm:$0xff]  ;;  %v345_v25 = vld [vmem:[#allocation4 + $0x828] sm:$0xff] }
 0x1fe   :  { %v9584_v30 = vcombine.high %v344_v23, %v352_v24  ;;  %v9583_v38 = vcombine.low %v344_v23, %v352_v24  ;;  %v9585_v39 = vcombine.low %v345_v25, %v353_v27  ;;  %v449_v23 = vld [vmem:[#allocation4 + $0xb68] sm:$0xff] }
 0x200   :  { %5257 = vmatpush1.bf16.msra.mxu0 %v9471_v59  ;;  %5380 = vmatpush1.bf16.msra.mxu1 %v9473_v31  ;;  %v9586_v59 = vcombine.high %v345_v25, %v353_v27  ;;  %v360_v31 = vld [vmem:[#allocation4 + $0x8a0] sm:$0xff] }
 0x201   :  { %5258 = vmatprep.subr.bf16.mxu0 %v9488_v33  ;;  %5381 = vmatprep.subr.bf16.mxu1 %v9490_v35  ;;  %v368_v33 = vld [vmem:[#allocation4 + $0x8e0] sm:$0xff]  ;;  %v361_v35 = vld [vmem:[#allocation4 + $0x8a8] sm:$0xff] }
 0x202   :  { %v9600_v40 = vcombine.high %v360_v31, %v368_v33  ;;  %v9599_v50 = vcombine.low %v360_v31, %v368_v33  ;;  %v9601_v51 = vcombine.low %v361_v35, %v369_v36  ;;  %v465_v31 = vld [vmem:[#allocation4 + $0xbe8] sm:$0xff] }
 0x204   :  { %5259 = vmatpush1.bf16.msra.mxu0 %v9487_v42  ;;  %5382 = vmatpush1.bf16.msra.mxu1 %v9489_v43  ;;  %v9602_v42 = vcombine.high %v361_v35, %v369_v36  ;;  %v376_v43 = vld [vmem:[#allocation4 + $0x920] sm:$0xff] }
 0x205   :  { %5260 = vmatprep.subr.bf16.mxu0 %v9504_v46  ;;  %5383 = vmatprep.subr.bf16.mxu1 %v9506_v53  ;;  %v384_v46 = vld [vmem:[#allocation4 + $0x960] sm:$0xff]  ;;  %v377_v53 = vld [vmem:[#allocation4 + $0x928] sm:$0xff] }
 0x206   :  { %v9616_v52 = vcombine.high %v376_v43, %v384_v46  ;;  %v9615_v61 = vcombine.low %v376_v43, %v384_v46  ;;  %v9617_v62 = vcombine.low %v377_v53, %v385_v49  ;;  %v481_v43 = vld [vmem:[#allocation4 + $0xc68] sm:$0xff] }
 0x208   :  { %5261 = vmatpush1.bf16.msra.mxu0 %v9503_v55  ;;  %5384 = vmatpush1.bf16.msra.mxu1 %v9505_v56  ;;  %v9618_v55 = vcombine.high %v377_v53, %v385_v49  ;;  %v392_v56 = vld [vmem:[#allocation4 + $0x9a0] sm:$0xff] }
 0x209   :  { %5262 = vmatprep.subr.bf16.mxu0 %v9520_v57  ;;  %5385 = vmatprep.subr.bf16.mxu1 %v9522_v58  ;;  %v400_v57 = vld [vmem:[#allocation4 + $0x9e0] sm:$0xff]  ;;  %v393_v58 = vld [vmem:[#allocation4 + $0x9a8] sm:$0xff] }
 0x20a   :  { %v9632_v0 = vcombine.high %v392_v56, %v400_v57  ;;  %v9631_v6 = vcombine.low %v392_v56, %v400_v57  ;;  %v9633_v7 = vcombine.low %v393_v58, %v401_v60  ;;  %v497_v56 = vld [vmem:[#allocation4 + $0xce8] sm:$0xff] }
 0x20c   :  { %5263 = vmatpush1.bf16.msra.mxu0 %v9519_v1  ;;  %5386 = vmatpush1.bf16.msra.mxu1 %v9521_v2  ;;  %v9634_v1 = vcombine.high %v393_v58, %v401_v60  ;;  %v408_v2 = vld [vmem:[#allocation4 + $0xa20] sm:$0xff] }
 0x20d   :  { %5264 = vmatprep.subr.bf16.mxu0 %v9536_v3  ;;  %5387 = vmatprep.subr.bf16.mxu1 %v9538_v4  ;;  %v416_v3 = vld [vmem:[#allocation4 + $0xa60] sm:$0xff]  ;;  %v409_v4 = vld [vmem:[#allocation4 + $0xa28] sm:$0xff] }
 0x20e   :  { %v9648_v8 = vcombine.high %v408_v2, %v416_v3  ;;  %v9647_v15 = vcombine.low %v408_v2, %v416_v3  ;;  %v9649_v16 = vcombine.low %v409_v4, %v417_v5  ;;  %v513_v2 = vld [vmem:[#allocation4 + $0xd68] sm:$0xff] }
 0x210   :  { %5265 = vmatpush1.bf16.msra.mxu0 %v9535_v10  ;;  %5388 = vmatpush1.bf16.msra.mxu1 %v9537_v11  ;;  %v9650_v10 = vcombine.high %v409_v4, %v417_v5  ;;  %v424_v11 = vld [vmem:[#allocation4 + $0xaa0] sm:$0xff] }
 0x211   :  { %5266 = vmatprep.subr.bf16.mxu0 %v9552_v12  ;;  %5389 = vmatprep.subr.bf16.mxu1 %v9554_v13  ;;  %v432_v12 = vld [vmem:[#allocation4 + $0xae0] sm:$0xff]  ;;  %v425_v13 = vld [vmem:[#allocation4 + $0xaa8] sm:$0xff] }
 0x212   :  { %v9664_v17 = vcombine.high %v424_v11, %v432_v12  ;;  %v9663_v24 = vcombine.low %v424_v11, %v432_v12  ;;  %v9665_v25 = vcombine.low %v425_v13, %v433_v14  ;;  %v529_v11 = vld [vmem:[#allocation4 + $0xde8] sm:$0xff] }
 0x214   :  { %5267 = vmatpush1.bf16.msra.mxu0 %v9551_v18  ;;  %5390 = vmatpush1.bf16.msra.mxu1 %v9553_v20  ;;  %v9666_v18 = vcombine.high %v425_v13, %v433_v14  ;;  %v440_v20 = vld [vmem:[#allocation4 + $0xb20] sm:$0xff] }
 0x215   :  { %5268 = vmatprep.subr.bf16.mxu0 %v9568_v21  ;;  %5391 = vmatprep.subr.bf16.mxu1 %v9570_v22  ;;  %v448_v21 = vld [vmem:[#allocation4 + $0xb60] sm:$0xff]  ;;  %v441_v22 = vld [vmem:[#allocation4 + $0xb28] sm:$0xff] }
 0x216   :  { %v9680_v27 = vcombine.high %v440_v20, %v448_v21  ;;  %v9679_v33 = vcombine.low %v440_v20, %v448_v21  ;;  %v9681_v35 = vcombine.low %v441_v22, %v449_v23  ;;  %v545_v20 = vld [vmem:[#allocation4 + $0xe68] sm:$0xff] }
 0x218   :  { %5269 = vmatpush1.bf16.msra.mxu0 %v9567_v28  ;;  %5392 = vmatpush1.bf16.msra.mxu1 %v9569_v29  ;;  %v9682_v28 = vcombine.high %v441_v22, %v449_v23  ;;  %v456_v29 = vld [vmem:[#allocation4 + $0xba0] sm:$0xff] }
 0x219   :  { %5279 = vmatprep.subr.bf16.mxu0 %v9584_v30  ;;  %5402 = vmatprep.subr.bf16.mxu1 %v9586_v59  ;;  %v464_v30 = vld [vmem:[#allocation4 + $0xbe0] sm:$0xff]  ;;  %v457_v59 = vld [vmem:[#allocation4 + $0xba8] sm:$0xff] }
 0x21a   :  { %v9696_v36 = vcombine.high %v456_v29, %v464_v30  ;;  %v9695_v46 = vcombine.low %v456_v29, %v464_v30  ;;  %v9697_v53 = vcombine.low %v457_v59, %v465_v31  ;;  %v561_v29 = vld [vmem:[#allocation4 + $0xee8] sm:$0xff] }
 0x21b   :  { %5271 = vmatmul.mubr.bf16.vlgmr.msra.gmra.mrb[8].mxu0 %v10948_v26  ;;  %5394 = vmatmul.mubr.bf16.vlgmr.msra.gmra.mrb[8].mxu1 %v10948_v26 }
 0x21c   :  { %5280 = vmatpush1.bf16.msra.mxu0 %v9583_v38  ;;  %5403 = vmatpush1.bf16.msra.mxu1 %v9585_v39  ;;  %v9698_v38 = vcombine.high %v457_v59, %v465_v31  ;;  %v472_v39 = vld [vmem:[#allocation4 + $0xc20] sm:$0xff] }
 0x21d   :  { %5281 = vmatprep.subr.bf16.mxu0 %v9600_v40  ;;  %5404 = vmatprep.subr.bf16.mxu1 %v9602_v42  ;;  %v480_v40 = vld [vmem:[#allocation4 + $0xc60] sm:$0xff]  ;;  %v473_v42 = vld [vmem:[#allocation4 + $0xc28] sm:$0xff] }
 0x21e   :  { %5311 = vmatprep.mubr.bf16.mxu0 %v10955_v63  ;;  %5434 = vmatprep.mubr.bf16.mxu1 %v10955_v63  ;;  %v9712_v49 = vcombine.high %v472_v39, %v480_v40  ;;  %v9711_v57 = vcombine.low %v472_v39, %v480_v40  ;;  %v9713_v58 = vcombine.low %v473_v42, %v481_v43  ;;  %v577_v39 = vld [vmem:[#allocation4 + $0xf68] sm:$0xff] }
 0x220   :  { %5282 = vmatpush1.bf16.msra.mxu0 %v9599_v50  ;;  %5405 = vmatpush1.bf16.msra.mxu1 %v9601_v51  ;;  %v9714_v50 = vcombine.high %v473_v42, %v481_v43  ;;  %v488_v51 = vld [vmem:[#allocation4 + $0xca0] sm:$0xff] }
 0x221   :  { %5283 = vmatprep.subr.bf16.mxu0 %v9616_v52  ;;  %5406 = vmatprep.subr.bf16.mxu1 %v9618_v55  ;;  %v496_v52 = vld [vmem:[#allocation4 + $0xce0] sm:$0xff]  ;;  %v489_v55 = vld [vmem:[#allocation4 + $0xca8] sm:$0xff] }
 0x222   :  { %v9728_v60 = vcombine.high %v488_v51, %v496_v52  ;;  %v9727_v3 = vcombine.low %v488_v51, %v496_v52  ;;  %v9729_v4 = vcombine.low %v489_v55, %v497_v56  ;;  %v593_v51 = vld [vmem:[#allocation4 + $0xfe8] sm:$0xff] }
 0x224   :  { %5284 = vmatpush1.bf16.msra.mxu0 %v9615_v61  ;;  %5407 = vmatpush1.bf16.msra.mxu1 %v9617_v62  ;;  %v9730_v61 = vcombine.high %v489_v55, %v497_v56  ;;  %v504_v62 = vld [vmem:[#allocation4 + $0xd20] sm:$0xff] }
 0x225   :  { %5285 = vmatprep.subr.bf16.mxu0 %v9632_v0  ;;  %5408 = vmatprep.subr.bf16.mxu1 %v9634_v1  ;;  %v512_v0 = vld [vmem:[#allocation4 + $0xd60] sm:$0xff]  ;;  %v505_v1 = vld [vmem:[#allocation4 + $0xd28] sm:$0xff] }
 0x226   :  { %v9744_v5 = vcombine.high %v504_v62, %v512_v0  ;;  %v9743_v12 = vcombine.low %v504_v62, %v512_v0  ;;  %v9745_v13 = vcombine.low %v505_v1, %v513_v2  ;;  %v609_v62 = vld [vmem:[#allocation4 + $0x1068] sm:$0xff] }
 0x228   :  { %5286 = vmatpush1.bf16.msra.mxu0 %v9631_v6  ;;  %5409 = vmatpush1.bf16.msra.mxu1 %v9633_v7  ;;  %v9746_v6 = vcombine.high %v505_v1, %v513_v2  ;;  %v520_v7 = vld [vmem:[#allocation4 + $0xda0] sm:$0xff] }
 0x229   :  { %5287 = vmatprep.subr.bf16.mxu0 %v9648_v8  ;;  %5410 = vmatprep.subr.bf16.mxu1 %v9650_v10  ;;  %v528_v8 = vld [vmem:[#allocation4 + $0xde0] sm:$0xff]  ;;  %v521_v10 = vld [vmem:[#allocation4 + $0xda8] sm:$0xff] }
 0x22a   :  { %v9760_v14 = vcombine.high %v520_v7, %v528_v8  ;;  %v9759_v21 = vcombine.low %v520_v7, %v528_v8  ;;  %v9761_v22 = vcombine.low %v521_v10, %v529_v11  ;;  %v625_v7 = vld [vmem:[#allocation4 + $0x10e8] sm:$0xff] }
 0x22c   :  { %5288 = vmatpush1.bf16.msra.mxu0 %v9647_v15  ;;  %5411 = vmatpush1.bf16.msra.mxu1 %v9649_v16  ;;  %v9762_v15 = vcombine.high %v521_v10, %v529_v11  ;;  %v536_v16 = vld [vmem:[#allocation4 + $0xe20] sm:$0xff] }
 0x22d   :  { %5289 = vmatprep.subr.bf16.mxu0 %v9664_v17  ;;  %5412 = vmatprep.subr.bf16.mxu1 %v9666_v18  ;;  %v544_v17 = vld [vmem:[#allocation4 + $0xe60] sm:$0xff]  ;;  %v537_v18 = vld [vmem:[#allocation4 + $0xe28] sm:$0xff] }
 0x22e   :  { %v9776_v23 = vcombine.high %v536_v16, %v544_v17  ;;  %v9775_v30 = vcombine.low %v536_v16, %v544_v17  ;;  %v9777_v59 = vcombine.low %v537_v18, %v545_v20  ;;  %v641_v16 = vld [vmem:[#allocation4 + $0x1168] sm:$0xff] }
 0x230   :  { %5290 = vmatpush1.bf16.msra.mxu0 %v9663_v24  ;;  %5413 = vmatpush1.bf16.msra.mxu1 %v9665_v25  ;;  %v9778_v24 = vcombine.high %v537_v18, %v545_v20  ;;  %v552_v25 = vld [vmem:[#allocation4 + $0xea0] sm:$0xff] }
 0x231   :  { %5291 = vmatprep.subr.bf16.mxu0 %v9680_v27  ;;  %5414 = vmatprep.subr.bf16.mxu1 %v9682_v28  ;;  %v560_v27 = vld [vmem:[#allocation4 + $0xee0] sm:$0xff]  ;;  %v553_v28 = vld [vmem:[#allocation4 + $0xea8] sm:$0xff] }
 0x232   :  { %v9792_v31 = vcombine.high %v552_v25, %v560_v27  ;;  %v9791_v40 = vcombine.low %v552_v25, %v560_v27  ;;  %v9793_v42 = vcombine.low %v553_v28, %v561_v29  ;;  %v657_v25 = vld [vmem:[#allocation4 + $0x11e8] sm:$0xff] }
 0x234   :  { %5292 = vmatpush1.bf16.msra.mxu0 %v9679_v33  ;;  %5415 = vmatpush1.bf16.msra.mxu1 %v9681_v35  ;;  %v9794_v33 = vcombine.high %v553_v28, %v561_v29  ;;  %v568_v35 = vld [vmem:[#allocation4 + $0xf20] sm:$0xff] }
 0x235   :  { %5293 = vmatprep.subr.bf16.mxu0 %v9696_v36  ;;  %5416 = vmatprep.subr.bf16.mxu1 %v9698_v38  ;;  %v576_v36 = vld [vmem:[#allocation4 + $0xf60] sm:$0xff]  ;;  %v569_v38 = vld [vmem:[#allocation4 + $0xf28] sm:$0xff] }
 0x236   :  { %v9808_v43 = vcombine.high %v568_v35, %v576_v36  ;;  %v9807_v52 = vcombine.low %v568_v35, %v576_v36  ;;  %v9809_v55 = vcombine.low %v569_v38, %v577_v39  ;;  %v673_v35 = vld [vmem:[#allocation4 + $0x1268] sm:$0xff] }
 0x238   :  { %5294 = vmatpush1.bf16.msra.mxu0 %v9695_v46  ;;  %5417 = vmatpush1.bf16.msra.mxu1 %v9697_v53  ;;  %v9810_v46 = vcombine.high %v569_v38, %v577_v39  ;;  %v584_v53 = vld [vmem:[#allocation4 + $0xfa0] sm:$0xff] }
 0x239   :  { %5295 = vmatprep.subr.bf16.mxu0 %v9712_v49  ;;  %5418 = vmatprep.subr.bf16.mxu1 %v9714_v50  ;;  %v592_v49 = vld [vmem:[#allocation4 + $0xfe0] sm:$0xff]  ;;  %v585_v50 = vld [vmem:[#allocation4 + $0xfa8] sm:$0xff] }
 0x23a   :  { %v9824_v56 = vcombine.high %v584_v53, %v592_v49  ;;  %v9823_v0 = vcombine.low %v584_v53, %v592_v49  ;;  %v9825_v1 = vcombine.low %v585_v50, %v593_v51  ;;  %v689_v53 = vld [vmem:[#allocation4 + $0x12e8] sm:$0xff] }
 0x23c   :  { %5296 = vmatpush1.bf16.msra.mxu0 %v9711_v57  ;;  %5419 = vmatpush1.bf16.msra.mxu1 %v9713_v58  ;;  %v9826_v57 = vcombine.high %v585_v50, %v593_v51  ;;  %v600_v58 = vld [vmem:[#allocation4 + $0x1020] sm:$0xff] }
 0x23d   :  { %5297 = vmatprep.subr.bf16.mxu0 %v9728_v60  ;;  %5420 = vmatprep.subr.bf16.mxu1 %v9730_v61  ;;  %v608_v60 = vld [vmem:[#allocation4 + $0x1060] sm:$0xff]  ;;  %v601_v61 = vld [vmem:[#allocation4 + $0x1028] sm:$0xff] }
 0x23e   :  { %v9840_v2 = vcombine.high %v600_v58, %v608_v60  ;;  %v9839_v8 = vcombine.low %v600_v58, %v608_v60  ;;  %v9841_v10 = vcombine.low %v601_v61, %v609_v62  ;;  %v705_v58 = vld [vmem:[#allocation4 + $0x1368] sm:$0xff] }
 0x240   :  { %5298 = vmatpush1.bf16.msra.mxu0 %v9727_v3  ;;  %5421 = vmatpush1.bf16.msra.mxu1 %v9729_v4  ;;  %v9842_v3 = vcombine.high %v601_v61, %v609_v62  ;;  %v616_v4 = vld [vmem:[#allocation4 + $0x10a0] sm:$0xff] }
 0x241   :  { %5299 = vmatprep.subr.bf16.mxu0 %v9744_v5  ;;  %5422 = vmatprep.subr.bf16.mxu1 %v9746_v6  ;;  %v624_v5 = vld [vmem:[#allocation4 + $0x10e0] sm:$0xff]  ;;  %v617_v6 = vld [vmem:[#allocation4 + $0x10a8] sm:$0xff] }
 0x242   :  { %v9856_v11 = vcombine.high %v616_v4, %v624_v5  ;;  %v9855_v17 = vcombine.low %v616_v4, %v624_v5  ;;  %v9857_v18 = vcombine.low %v617_v6, %v625_v7  ;;  %v721_v4 = vld [vmem:[#allocation4 + $0x13e8] sm:$0xff] }
 0x244   :  { %5300 = vmatpush1.bf16.msra.mxu0 %v9743_v12  ;;  %5423 = vmatpush1.bf16.msra.mxu1 %v9745_v13  ;;  %v9858_v12 = vcombine.high %v617_v6, %v625_v7  ;;  %v632_v13 = vld [vmem:[#allocation4 + $0x1120] sm:$0xff] }
 0x245   :  { %5301 = vmatprep.subr.bf16.mxu0 %v9760_v14  ;;  %5424 = vmatprep.subr.bf16.mxu1 %v9762_v15  ;;  %v640_v14 = vld [vmem:[#allocation4 + $0x1160] sm:$0xff]  ;;  %v633_v15 = vld [vmem:[#allocation4 + $0x1128] sm:$0xff] }
 0x246   :  { %v9872_v20 = vcombine.high %v632_v13, %v640_v14  ;;  %v9871_v27 = vcombine.low %v632_v13, %v640_v14  ;;  %v9873_v28 = vcombine.low %v633_v15, %v641_v16  ;;  %v737_v13 = vld [vmem:[#allocation4 + $0x1468] sm:$0xff] }
 0x248   :  { %5302 = vmatpush1.bf16.msra.mxu0 %v9759_v21  ;;  %5425 = vmatpush1.bf16.msra.mxu1 %v9761_v22  ;;  %v9874_v21 = vcombine.high %v633_v15, %v641_v16  ;;  %v648_v22 = vld [vmem:[#allocation4 + $0x11a0] sm:$0xff] }
 0x249   :  { %5303 = vmatprep.subr.bf16.mxu0 %v9776_v23  ;;  %5426 = vmatprep.subr.bf16.mxu1 %v9778_v24  ;;  %v656_v23 = vld [vmem:[#allocation4 + $0x11e0] sm:$0xff]  ;;  %v649_v24 = vld [vmem:[#allocation4 + $0x11a8] sm:$0xff] }
 0x24a   :  { %v9888_v29 = vcombine.high %v648_v22, %v656_v23  ;;  %v9887_v36 = vcombine.low %v648_v22, %v656_v23  ;;  %v9889_v38 = vcombine.low %v649_v24, %v657_v25  ;;  %v753_v22 = vld [vmem:[#allocation4 + $0x14e8] sm:$0xff] }
 0x24c   :  { %5304 = vmatpush1.bf16.msra.mxu0 %v9775_v30  ;;  %5427 = vmatpush1.bf16.msra.mxu1 %v9777_v59  ;;  %v9890_v30 = vcombine.high %v649_v24, %v657_v25  ;;  %v664_v59 = vld [vmem:[#allocation4 + $0x1220] sm:$0xff] }
 0x24d   :  { %5305 = vmatprep.subr.bf16.mxu0 %v9792_v31  ;;  %5428 = vmatprep.subr.bf16.mxu1 %v9794_v33  ;;  %v672_v31 = vld [vmem:[#allocation4 + $0x1260] sm:$0xff]  ;;  %v665_v33 = vld [vmem:[#allocation4 + $0x1228] sm:$0xff] }
 0x24e   :  { %v9904_v39 = vcombine.high %v664_v59, %v672_v31  ;;  %v9903_v49 = vcombine.low %v664_v59, %v672_v31  ;;  %v9905_v50 = vcombine.low %v665_v33, %v673_v35  ;;  %v769_v59 = vld [vmem:[#allocation4 + $0x1568] sm:$0xff] }
 0x250   :  { %5306 = vmatpush1.bf16.msra.mxu0 %v9791_v40  ;;  %5429 = vmatpush1.bf16.msra.mxu1 %v9793_v42  ;;  %v9906_v40 = vcombine.high %v665_v33, %v673_v35  ;;  %v680_v42 = vld [vmem:[#allocation4 + $0x12a0] sm:$0xff] }
 0x251   :  { %5307 = vmatprep.subr.bf16.mxu0 %v9808_v43  ;;  %5430 = vmatprep.subr.bf16.mxu1 %v9810_v46  ;;  %v688_v43 = vld [vmem:[#allocation4 + $0x12e0] sm:$0xff]  ;;  %v681_v46 = vld [vmem:[#allocation4 + $0x12a8] sm:$0xff] }
 0x252   :  { %v9920_v51 = vcombine.high %v680_v42, %v688_v43  ;;  %v9919_v60 = vcombine.low %v680_v42, %v688_v43  ;;  %v9921_v61 = vcombine.low %v681_v46, %v689_v53  ;;  %v785_v42 = vld [vmem:[#allocation4 + $0x15e8] sm:$0xff] }
 0x254   :  { %5308 = vmatpush1.bf16.msra.mxu0 %v9807_v52  ;;  %5431 = vmatpush1.bf16.msra.mxu1 %v9809_v55  ;;  %v9922_v52 = vcombine.high %v681_v46, %v689_v53  ;;  %v696_v55 = vld [vmem:[#allocation4 + $0x1320] sm:$0xff] }
 0x255   :  { %5309 = vmatprep.subr.bf16.mxu0 %v9824_v56  ;;  %5432 = vmatprep.subr.bf16.mxu1 %v9826_v57  ;;  %v704_v56 = vld [vmem:[#allocation4 + $0x1360] sm:$0xff]  ;;  %v697_v57 = vld [vmem:[#allocation4 + $0x1328] sm:$0xff] }
 0x256   :  { %v9936_v62 = vcombine.high %v696_v55, %v704_v56  ;;  %v9935_v5 = vcombine.low %v696_v55, %v704_v56  ;;  %v9937_v6 = vcombine.low %v697_v57, %v705_v58  ;;  %v801_v55 = vld [vmem:[#allocation4 + $0x1668] sm:$0xff] }
 0x258   :  { %5310 = vmatpush1.bf16.msra.mxu0 %v9823_v0  ;;  %5433 = vmatpush1.bf16.msra.mxu1 %v9825_v1  ;;  %v9938_v0 = vcombine.high %v697_v57, %v705_v58  ;;  %v712_v1 = vld [vmem:[#allocation4 + $0x13a0] sm:$0xff] }
 0x259   :  { %5320 = vmatprep.subr.bf16.mxu0 %v9840_v2  ;;  %5443 = vmatprep.subr.bf16.mxu1 %v9842_v3  ;;  %v720_v2 = vld [vmem:[#allocation4 + $0x13e0] sm:$0xff]  ;;  %v713_v3 = vld [vmem:[#allocation4 + $0x13a8] sm:$0xff] }
 0x25a   :  { %v9952_v7 = vcombine.high %v712_v1, %v720_v2  ;;  %v9951_v14 = vcombine.low %v712_v1, %v720_v2  ;;  %v9953_v15 = vcombine.low %v713_v3, %v721_v4  ;;  %v817_v1 = vld [vmem:[#allocation4 + $0x16e8] sm:$0xff] }
 0x25b   :  { %5312 = vmatmul.mubr.bf16.vlgmr.msra.gmra.mrb[8].mxu0 %v10966_v45  ;;  %5435 = vmatmul.mubr.bf16.vlgmr.msra.gmra.mrb[8].mxu1 %v10966_v45 }
 0x25c   :  { %5321 = vmatpush1.bf16.msra.mxu0 %v9839_v8  ;;  %5444 = vmatpush1.bf16.msra.mxu1 %v9841_v10  ;;  %v9954_v8 = vcombine.high %v713_v3, %v721_v4  ;;  %v728_v10 = vld [vmem:[#allocation4 + $0x1420] sm:$0xff] }
 0x25d   :  { %5322 = vmatprep.subr.bf16.mxu0 %v9856_v11  ;;  %5445 = vmatprep.subr.bf16.mxu1 %v9858_v12  ;;  %v736_v11 = vld [vmem:[#allocation4 + $0x1460] sm:$0xff]  ;;  %v729_v12 = vld [vmem:[#allocation4 + $0x1428] sm:$0xff] }
 0x25e   :  { %5352 = vmatprep.mubr.bf16.mxu0 %v10958_v37  ;;  %5475 = vmatprep.mubr.bf16.mxu1 %v10958_v37  ;;  %v9968_v16 = vcombine.high %v728_v10, %v736_v11  ;;  %v9967_v23 = vcombine.low %v728_v10, %v736_v11  ;;  %v9969_v24 = vcombine.low %v729_v12, %v737_v13  ;;  %v833_v10 = vld [vmem:[#allocation4 + $0x1768] sm:$0xff] }
 0x260   :  { %5323 = vmatpush1.bf16.msra.mxu0 %v9855_v17  ;;  %5446 = vmatpush1.bf16.msra.mxu1 %v9857_v18  ;;  %v9970_v17 = vcombine.high %v729_v12, %v737_v13  ;;  %v744_v18 = vld [vmem:[#allocation4 + $0x14a0] sm:$0xff] }
 0x261   :  { %5324 = vmatprep.subr.bf16.mxu0 %v9872_v20  ;;  %5447 = vmatprep.subr.bf16.mxu1 %v9874_v21  ;;  %v752_v20 = vld [vmem:[#allocation4 + $0x14e0] sm:$0xff]  ;;  %v745_v21 = vld [vmem:[#allocation4 + $0x14a8] sm:$0xff] }
 0x262   :  { %v9984_v25 = vcombine.high %v744_v18, %v752_v20  ;;  %v9983_v31 = vcombine.low %v744_v18, %v752_v20  ;;  %v9985_v33 = vcombine.low %v745_v21, %v753_v22  ;;  %v849_v18 = vld [vmem:[#allocation4 + $0x17e8] sm:$0xff] }
 0x264   :  { %5325 = vmatpush1.bf16.msra.mxu0 %v9871_v27  ;;  %5448 = vmatpush1.bf16.msra.mxu1 %v9873_v28  ;;  %v9986_v27 = vcombine.high %v745_v21, %v753_v22  ;;  %v760_v28 = vld [vmem:[#allocation4 + $0x1520] sm:$0xff] }
 0x265   :  { %5326 = vmatprep.subr.bf16.mxu0 %v9888_v29  ;;  %5449 = vmatprep.subr.bf16.mxu1 %v9890_v30  ;;  %v768_v29 = vld [vmem:[#allocation4 + $0x1560] sm:$0xff]  ;;  %v761_v30 = vld [vmem:[#allocation4 + $0x1528] sm:$0xff] }
 0x266   :  { %v10000_v35 = vcombine.high %v760_v28, %v768_v29  ;;  %v9999_v43 = vcombine.low %v760_v28, %v768_v29  ;;  %v10001_v46 = vcombine.low %v761_v30, %v769_v59  ;;  %v99_v28 = vld [vmem:[#allocation4 + $0x78] sm:$0xff] }
 0x268   :  { %5327 = vmatpush1.bf16.msra.mxu0 %v9887_v36  ;;  %5450 = vmatpush1.bf16.msra.mxu1 %v9889_v38  ;;  %v10002_v36 = vcombine.high %v761_v30, %v769_v59  ;;  %v776_v38 = vld [vmem:[#allocation4 + $0x15a0] sm:$0xff] }
 0x269   :  { %5328 = vmatprep.subr.bf16.mxu0 %v9904_v39  ;;  %5451 = vmatprep.subr.bf16.mxu1 %v9906_v40  ;;  %v784_v39 = vld [vmem:[#allocation4 + $0x15e0] sm:$0xff]  ;;  %v777_v40 = vld [vmem:[#allocation4 + $0x15a8] sm:$0xff] }
 0x26a   :  { %v10016_v53 = vcombine.high %v776_v38, %v784_v39  ;;  %v10015_v56 = vcombine.low %v776_v38, %v784_v39  ;;  %v10017_v57 = vcombine.low %v777_v40, %v785_v42  ;;  %v115_v38 = vld [vmem:[#allocation4 + $0xf8] sm:$0xff] }
 0x26c   :  { %5329 = vmatpush1.bf16.msra.mxu0 %v9903_v49  ;;  %5452 = vmatpush1.bf16.msra.mxu1 %v9905_v50  ;;  %v10018_v49 = vcombine.high %v777_v40, %v785_v42  ;;  %v792_v50 = vld [vmem:[#allocation4 + $0x1620] sm:$0xff] }
 0x26d   :  { %5330 = vmatprep.subr.bf16.mxu0 %v9920_v51  ;;  %5453 = vmatprep.subr.bf16.mxu1 %v9922_v52  ;;  %v800_v51 = vld [vmem:[#allocation4 + $0x1660] sm:$0xff]  ;;  %v793_v52 = vld [vmem:[#allocation4 + $0x1628] sm:$0xff] }
 0x26e   :  { %v10032_v58 = vcombine.high %v792_v50, %v800_v51  ;;  %v10031_v2 = vcombine.low %v792_v50, %v800_v51  ;;  %v10033_v3 = vcombine.low %v793_v52, %v801_v55  ;;  %v131_v50 = vld [vmem:[#allocation4 + $0x178] sm:$0xff] }
 0x270   :  { %5331 = vmatpush1.bf16.msra.mxu0 %v9919_v60  ;;  %5454 = vmatpush1.bf16.msra.mxu1 %v9921_v61  ;;  %v10034_v60 = vcombine.high %v793_v52, %v801_v55  ;;  %v808_v61 = vld [vmem:[#allocation4 + $0x16a0] sm:$0xff] }
 0x271   :  { %5332 = vmatprep.subr.bf16.mxu0 %v9936_v62  ;;  %5455 = vmatprep.subr.bf16.mxu1 %v9938_v0  ;;  %v816_v62 = vld [vmem:[#allocation4 + $0x16e0] sm:$0xff]  ;;  %v809_v0 = vld [vmem:[#allocation4 + $0x16a8] sm:$0xff] }
 0x272   :  { %v10048_v4 = vcombine.high %v808_v61, %v816_v62  ;;  %v10047_v11 = vcombine.low %v808_v61, %v816_v62  ;;  %v10049_v12 = vcombine.low %v809_v0, %v817_v1  ;;  %v147_v61 = vld [vmem:[#allocation4 + $0x1f8] sm:$0xff] }
 0x274   :  { %5333 = vmatpush1.bf16.msra.mxu0 %v9935_v5  ;;  %5456 = vmatpush1.bf16.msra.mxu1 %v9937_v6  ;;  %v10050_v5 = vcombine.high %v809_v0, %v817_v1  ;;  %v824_v6 = vld [vmem:[#allocation4 + $0x1720] sm:$0xff] }
 0x275   :  { %5334 = vmatprep.subr.bf16.mxu0 %v9952_v7  ;;  %5457 = vmatprep.subr.bf16.mxu1 %v9954_v8  ;;  %v832_v7 = vld [vmem:[#allocation4 + $0x1760] sm:$0xff]  ;;  %v825_v8 = vld [vmem:[#allocation4 + $0x1728] sm:$0xff] }
 0x276   :  { %v10064_v13 = vcombine.high %v824_v6, %v832_v7  ;;  %v10063_v20 = vcombine.low %v824_v6, %v832_v7  ;;  %v10065_v21 = vcombine.low %v825_v8, %v833_v10  ;;  %v163_v6 = vld [vmem:[#allocation4 + $0x278] sm:$0xff] }
 0x278   :  { %5335 = vmatpush1.bf16.msra.mxu0 %v9951_v14  ;;  %5458 = vmatpush1.bf16.msra.mxu1 %v9953_v15  ;;  %v10066_v14 = vcombine.high %v825_v8, %v833_v10  ;;  %v840_v15 = vld [vmem:[#allocation4 + $0x17a0] sm:$0xff] }
 0x279   :  { %5336 = vmatprep.subr.bf16.mxu0 %v9968_v16  ;;  %5459 = vmatprep.subr.bf16.mxu1 %v9970_v17  ;;  %v848_v16 = vld [vmem:[#allocation4 + $0x17e0] sm:$0xff]  ;;  %v841_v17 = vld [vmem:[#allocation4 + $0x17a8] sm:$0xff] }
 0x27a   :  { %v10080_v22 = vcombine.high %v840_v15, %v848_v16  ;;  %v10079_v29 = vcombine.low %v840_v15, %v848_v16  ;;  %v10081_v30 = vcombine.low %v841_v17, %v849_v18 }
 0x27c   :  { %5337 = vmatpush1.bf16.msra.mxu0 %v9967_v23  ;;  %5460 = vmatpush1.bf16.msra.mxu1 %v9969_v24  ;;  %v10082_v23 = vcombine.high %v841_v17, %v849_v18  ;;  %v90_v24 = vld [vmem:[#allocation4 + $0x30] sm:$0xff] }
 0x27d   :  { %5338 = vmatprep.subr.bf16.mxu0 %v9984_v25  ;;  %5461 = vmatprep.subr.bf16.mxu1 %v9986_v27  ;;  %v98_v25 = vld [vmem:[#allocation4 + $0x70] sm:$0xff]  ;;  %v91_v27 = vld [vmem:[#allocation4 + $0x38] sm:$0xff] }
 0x27e   :  { %v9332_v59 = vcombine.high %v90_v24, %v98_v25  ;;  %v9331_v39 = vcombine.low %v90_v24, %v98_v25  ;;  %v9333_v40 = vcombine.low %v91_v27, %v99_v28 }
 0x280   :  { %5339 = vmatpush1.bf16.msra.mxu0 %v9983_v31  ;;  %5462 = vmatpush1.bf16.msra.mxu1 %v9985_v33  ;;  %v9334_v31 = vcombine.high %v91_v27, %v99_v28  ;;  %v106_v33 = vld [vmem:[#allocation4 + $0xb0] sm:$0xff] }
 0x281   :  { %5340 = vmatprep.subr.bf16.mxu0 %v10000_v35  ;;  %5463 = vmatprep.subr.bf16.mxu1 %v10002_v36  ;;  %v114_v35 = vld [vmem:[#allocation4 + $0xf0] sm:$0xff]  ;;  %v107_v36 = vld [vmem:[#allocation4 + $0xb8] sm:$0xff] }
 0x282   :  { %v9348_v42 = vcombine.high %v106_v33, %v114_v35  ;;  %v9347_v51 = vcombine.low %v106_v33, %v114_v35  ;;  %v9349_v52 = vcombine.low %v107_v36, %v115_v38 }
 0x284   :  { %5341 = vmatpush1.bf16.msra.mxu0 %v9999_v43  ;;  %5464 = vmatpush1.bf16.msra.mxu1 %v10001_v46  ;;  %v9350_v43 = vcombine.high %v107_v36, %v115_v38  ;;  %v122_v46 = vld [vmem:[#allocation4 + $0x130] sm:$0xff]  ;;  %v203_v36 = vld [vmem:[#allocation4 + $0x3b8] sm:$0xff] }
 0x285   :  { %5342 = vmatprep.subr.bf16.mxu0 %v10016_v53  ;;  %5465 = vmatprep.subr.bf16.mxu1 %v10018_v49  ;;  %v130_v53 = vld [vmem:[#allocation4 + $0x170] sm:$0xff]  ;;  %v123_v49 = vld [vmem:[#allocation4 + $0x138] sm:$0xff] }
 0x286   :  { %v9364_v55 = vcombine.high %v122_v46, %v130_v53  ;;  %v9363_v62 = vcombine.low %v122_v46, %v130_v53  ;;  %v9365_v0 = vcombine.low %v123_v49, %v131_v50  ;;  %v211_v38 = vld [vmem:[#allocation4 + $0x3f8] sm:$0xff] }
 0x288   :  { %5343 = vmatpush1.bf16.msra.mxu0 %v10015_v56  ;;  %5466 = vmatpush1.bf16.msra.mxu1 %v10017_v57  ;;  %v9366_v56 = vcombine.high %v123_v49, %v131_v50  ;;  %v138_v57 = vld [vmem:[#allocation4 + $0x1b0] sm:$0xff] }
 0x289   :  { %5344 = vmatprep.subr.bf16.mxu0 %v10032_v58  ;;  %5467 = vmatprep.subr.bf16.mxu1 %v10034_v60  ;;  %v146_v58 = vld [vmem:[#allocation4 + $0x1f0] sm:$0xff]  ;;  %v139_v60 = vld [vmem:[#allocation4 + $0x1b8] sm:$0xff] }
 0x28a   :  { %v9380_v1 = vcombine.high %v138_v57, %v146_v58  ;;  %v9379_v7 = vcombine.low %v138_v57, %v146_v58  ;;  %v9381_v8 = vcombine.low %v139_v60, %v147_v61  ;;  %v9446_v58 = vcombine.high %v203_v36, %v211_v38 }
 0x28c   :  { %5345 = vmatpush1.bf16.msra.mxu0 %v10031_v2  ;;  %5468 = vmatpush1.bf16.msra.mxu1 %v10033_v3  ;;  %v9382_v2 = vcombine.high %v139_v60, %v147_v61  ;;  %v154_v3 = vld [vmem:[#allocation4 + $0x230] sm:$0xff] }
 0x28d   :  { %5346 = vmatprep.subr.bf16.mxu0 %v10048_v4  ;;  %5469 = vmatprep.subr.bf16.mxu1 %v10050_v5  ;;  %v162_v4 = vld [vmem:[#allocation4 + $0x270] sm:$0xff]  ;;  %v155_v5 = vld [vmem:[#allocation4 + $0x238] sm:$0xff] }
 0x28e   :  { %v9396_v10 = vcombine.high %v154_v3, %v162_v4  ;;  %v9395_v15 = vcombine.low %v154_v3, %v162_v4  ;;  %v9397_v16 = vcombine.low %v155_v5, %v163_v6  ;;  %v218_v60 = vld [vmem:[#allocation4 + $0x430] sm:$0xff] }
 0x28f   :  { %v226_v61 = vld [vmem:[#allocation4 + $0x470] sm:$0xff] }
 0x290   :  { %5347 = vmatpush1.bf16.msra.mxu0 %v10047_v11  ;;  %5470 = vmatpush1.bf16.msra.mxu1 %v10049_v12  ;;  %v170_v11 = vld [vmem:[#allocation4 + $0x2b0] sm:$0xff] }
 0x291   :  { %5348 = vmatprep.subr.bf16.mxu0 %v10064_v13  ;;  %5471 = vmatprep.subr.bf16.mxu1 %v10066_v14  ;;  %v178_v12 = vld [vmem:[#allocation4 + $0x2f0] sm:$0xff]  ;;  %v171_v13 = vld [vmem:[#allocation4 + $0x2b8] sm:$0xff] }
 0x292   :  { %v179_v14 = vld [vmem:[#allocation4 + $0x2f8] sm:$0xff]  ;;  %v9412_v17 = vcombine.high %v170_v11, %v178_v12  ;;  %v9411_v24 = vcombine.low %v170_v11, %v178_v12 }
 0x293   :  { %v9414_v18 = vcombine.high %v171_v13, %v179_v14  ;;  %v9413_v25 = vcombine.low %v171_v13, %v179_v14  ;;  %v235_v11 = vld [vmem:[#allocation4 + $0x4b8] sm:$0xff]  ;;  %v9459_v14 = vcombine.low %v218_v60, %v226_v61 }
 0x294   :  { %5349 = vmatpush1.bf16.msra.mxu0 %v10063_v20  ;;  %5472 = vmatpush1.bf16.msra.mxu1 %v10065_v21  ;;  %v186_v20 = vld [vmem:[#allocation4 + $0x330] sm:$0xff]  ;;  %v243_v12 = vld [vmem:[#allocation4 + $0x4f8] sm:$0xff] }
 0x295   :  { %5350 = vmatprep.subr.bf16.mxu0 %v10080_v22  ;;  %5473 = vmatprep.subr.bf16.mxu1 %v10082_v23  ;;  %v194_v21 = vld [vmem:[#allocation4 + $0x370] sm:$0xff]  ;;  %v187_v22 = vld [vmem:[#allocation4 + $0x338] sm:$0xff] }
 0x296   :  { %v195_v23 = vld [vmem:[#allocation4 + $0x378] sm:$0xff]  ;;  %v9428_v27 = vcombine.high %v186_v20, %v194_v21 }
 0x298   :  { %5351 = vmatpush1.bf16.msra.mxu0 %v10079_v29  ;;  %5474 = vmatpush1.bf16.msra.mxu1 %v10081_v30  ;;  %v9430_v29 = vcombine.high %v187_v22, %v195_v23  ;;  %v202_v30 = vld [vmem:[#allocation4 + $0x3b0] sm:$0xff] }
 0x299   :  { %5484 = vmatprep.subr.bf16.mxu0 %v9332_v59  ;;  %5607 = vmatprep.subr.bf16.mxu1 %v9334_v31  ;;  %v210_v59 = vld [vmem:[#allocation4 + $0x3f0] sm:$0xff] }
 0x29a   :  { %v9443_v3 = vcombine.low %v202_v30, %v210_v59 }
 0x29b   :  { %5353 = vmatmul.mubr.bf16.vlgmr.msra.gmra.mrb[8].mxu0 %v10951_v32  ;;  %5476 = vmatmul.mubr.bf16.vlgmr.msra.gmra.mrb[8].mxu1 %v10951_v32 }
 0x29c   :  { %5485 = vmatpush1.bf16.msra.mxu0 %v9331_v39  ;;  %5608 = vmatpush1.bf16.msra.mxu1 %v9333_v40 }
 0x29d   :  { %5486 = vmatprep.subr.bf16.mxu0 %v9348_v42  ;;  %5609 = vmatprep.subr.bf16.mxu1 %v9350_v43  ;;  %v9427_v43 = vcombine.low %v186_v20, %v194_v21  ;;  %v258_v20 = vld [vmem:[#allocation4 + $0x570] sm:$0xff]  ;;  %v251_v21 = vld [vmem:[#allocation4 + $0x538] sm:$0xff] }
 0x29e   :  { %5516 = vmatprep.mubr.bf16.mxu0 %v10939_v9  ;;  %5639 = vmatprep.mubr.bf16.mxu1 %v10939_v9  ;;  %v9398_v9 = vcombine.high %v155_v5, %v163_v6  ;;  %v9460_v5 = vcombine.high %v218_v60, %v226_v61  ;;  %v307_v60 = vld [vmem:[#allocation4 + $0x6f8] sm:$0xff] }
 0x2a0   :  { %5487 = vmatpush1.bf16.msra.mxu0 %v9347_v51  ;;  %5610 = vmatpush1.bf16.msra.mxu1 %v9349_v52  ;;  %v9429_v51 = vcombine.low %v187_v22, %v195_v23  ;;  %v9444_v52 = vcombine.high %v202_v30, %v210_v59  ;;  %v259_v22 = vld [vmem:[#allocation4 + $0x578] sm:$0xff]  ;;  %v274_v30 = vld [vmem:[#allocation4 + $0x5f0] sm:$0xff] }
 0x2a1   :  { %5488 = vmatprep.subr.bf16.mxu0 %v9364_v55  ;;  %5611 = vmatprep.subr.bf16.mxu1 %v9366_v56  ;;  %v267_v59 = vld [vmem:[#allocation4 + $0x5b8] sm:$0xff] }
 0x2a4   :  { %5489 = vmatpush1.bf16.msra.mxu0 %v9363_v62  ;;  %5612 = vmatpush1.bf16.msra.mxu1 %v9365_v0  ;;  %v219_v0 = vld [vmem:[#allocation4 + $0x438] sm:$0xff] }
 0x2a5   :  { %5490 = vmatprep.subr.bf16.mxu0 %v9380_v1  ;;  %5613 = vmatprep.subr.bf16.mxu1 %v9382_v2  ;;  %v227_v1 = vld [vmem:[#allocation4 + $0x478] sm:$0xff] }
 0x2a8   :  { %5491 = vmatpush1.bf16.msra.mxu0 %v9379_v7  ;;  %5614 = vmatpush1.bf16.msra.mxu1 %v9381_v8  ;;  %v9462_v7 = vcombine.high %v219_v0, %v227_v1  ;;  %v234_v8 = vld [vmem:[#allocation4 + $0x4b0] sm:$0xff] }
 0x2a9   :  { %5492 = vmatprep.subr.bf16.mxu0 %v9396_v10  ;;  %5615 = vmatprep.subr.bf16.mxu1 %v9398_v9  ;;  %v242_v10 = vld [vmem:[#allocation4 + $0x4f0] sm:$0xff] }
 0x2aa   :  { %v9475_v23 = vcombine.low %v234_v8, %v242_v10 }
 0x2ac   :  { %5493 = vmatpush1.bf16.msra.mxu0 %v9395_v15  ;;  %5616 = vmatpush1.bf16.msra.mxu1 %v9397_v16  ;;  %v9461_v15 = vcombine.low %v219_v0, %v227_v1  ;;  %v9476_v16 = vcombine.high %v234_v8, %v242_v10  ;;  %v330_v10 = vld [vmem:[#allocation4 + $0x7b0] sm:$0xff] }
 0x2ad   :  { %5494 = vmatprep.subr.bf16.mxu0 %v9412_v17  ;;  %5617 = vmatprep.subr.bf16.mxu1 %v9414_v18  ;;  %v9478_v17 = vcombine.high %v235_v11, %v243_v12  ;;  %v250_v18 = vld [vmem:[#allocation4 + $0x530] sm:$0xff] }
 0x2ae   :  { %v11022_v28 = vpop.f32.mrb[4].mxu0  ;;  %v11026_v33 = vpop.f32.mrb[4].mxu1 }
 0x2af   :  { %v5734_v31 = vmul.f32 %v11022_v28, %v11022_v28  ;;  %v11028_v35 = vpop.f32.mrb[5].mxu0  ;;  %v11032_v40 = vpop.f32.mrb[5].mxu1  ;;  %v5736_v53 = vmul.f32 %v11026_v33, %v11026_v33 }
 0x2b0   :  { %v5735_v39 = vmul.f32 %v11028_v35, %v11028_v35  ;;  %v5112_v42 = vpop.f32.mrb[6].mxu0  ;;  %5495 = vmatpush1.bf16.msra.mxu0 %v9411_v24  ;;  %v5235_v49 = vpop.f32.mrb[6].mxu1  ;;  %5618 = vmatpush1.bf16.msra.mxu1 %v9413_v25  ;;  %v5737_v62 = vmul.f32 %v11032_v40, %v11032_v40  ;;  %v9477_v24 = vcombine.low %v235_v11, %v243_v12  ;;  %v331_v11 = vld [vmem:[#allocation4 + $0x7b8] sm:$0xff] }
 0x2b1   :  { %v5754_v46 = vsel %vm5746_vm0, %v5734_v31, 0.0  ;;  %v5113_v50 = vpop.f32.mrb[7].mxu0  ;;  %5496 = vmatprep.subr.bf16.mxu0 %v9428_v27  ;;  %v5236_v57 = vpop.f32.mrb[7].mxu1  ;;  %5619 = vmatprep.subr.bf16.mxu1 %v9430_v29  ;;  %v5758_v4 = vsel %vm5746_vm0, %v5736_v53, 0.0  ;;  %v9492_v25 = vcombine.high %v250_v18, %v258_v20  ;;  %v9494_v27 = vcombine.high %v251_v21, %v259_v22  ;;  %v266_v29 = vld [vmem:[#allocation4 + $0x5b0] sm:$0xff]  ;;  %v275_v31 = vld [vmem:[#allocation4 + $0x5f8] sm:$0xff] }
 0x2b2   :  { %v5755_v55 = vadd.f32 %v5754_v46, %v11008_v19  ;;  %v5756_v56 = vsel %vm5746_vm0, %v5735_v39, 0.0  ;;  %v9445_v19 = vcombine.low %v203_v36, %v211_v38  ;;  %v5760_v9 = vsel %vm5746_vm0, %v5737_v62, 0.0  ;;  %v290_v46 = vld [vmem:[#allocation4 + $0x670] sm:$0xff]  ;;  %v283_v53 = vld [vmem:[#allocation4 + $0x638] sm:$0xff] }
 0x2b3   :  { %v9491_v36 = vcombine.low %v250_v18, %v258_v20  ;;  %v9493_v38 = vcombine.low %v251_v21, %v259_v22  ;;  %v9508_v39 = vcombine.high %v266_v29, %v274_v30  ;;  %v9510_v42 = vcombine.high %v267_v59, %v275_v31  ;;  %v291_v49 = vld [vmem:[#allocation4 + $0x678] sm:$0xff]  ;;  %v306_v57 = vld [vmem:[#allocation4 + $0x6f0] sm:$0xff] }
 0x2b4   :  { %v5757_v2 = vadd.f32 %v5756_v56, %v5755_v55  ;;  %5497 = vmatpush1.bf16.msra.mxu0 %v9427_v43  ;;  %5620 = vmatpush1.bf16.msra.mxu1 %v9429_v51  ;;  %v282_v43 = vld [vmem:[#allocation4 + $0x630] sm:$0xff]  ;;  %v9507_v50 = vcombine.low %v266_v29, %v274_v30  ;;  %v9509_v51 = vcombine.low %v267_v59, %v275_v31  ;;  %v339_v12 = vld [vmem:[#allocation4 + $0x7f8] sm:$0xff] }
 0x2b5   :  { %5498 = vmatprep.subr.bf16.mxu0 %v9444_v52  ;;  %5621 = vmatprep.subr.bf16.mxu1 %v9446_v58  ;;  %v9524_v52 = vcombine.high %v282_v43, %v290_v46  ;;  %v9526_v55 = vcombine.high %v283_v53, %v291_v49  ;;  %v298_v56 = vld [vmem:[#allocation4 + $0x6b0] sm:$0xff]  ;;  %v299_v58 = vld [vmem:[#allocation4 + $0x6b8] sm:$0xff]  ;;  %v9523_v61 = vcombine.low %v282_v43, %v290_v46 }
 0x2b6   :  { %v5759_v6 = vadd.f32 %v5758_v4, %v5757_v2  ;;  %v9525_v62 = vcombine.low %v283_v53, %v291_v49  ;;  %v9540_v0 = vcombine.high %v298_v56, %v306_v57  ;;  %v9542_v1 = vcombine.high %v299_v58, %v307_v60  ;;  %v314_v2 = vld [vmem:[#allocation4 + $0x730] sm:$0xff]  ;;  %v315_v4 = vld [vmem:[#allocation4 + $0x738] sm:$0xff] }
 0x2b7   :  { %v346_v18 = vld [vmem:[#allocation4 + $0x830] sm:$0xff]  ;;  %v347_v21 = vld [vmem:[#allocation4 + $0x838] sm:$0xff] }
 0x2b8   :  { %v11043_v13 = vadd.f32 %v5760_v9, %v5759_v6  ;;  %5499 = vmatpush1.bf16.msra.mxu0 %v9443_v3  ;;  %5622 = vmatpush1.bf16.msra.mxu1 %v9445_v19  ;;  %v322_v3 = vld [vmem:[#allocation4 + $0x770] sm:$0xff]  ;;  %v323_v19 = vld [vmem:[#allocation4 + $0x778] sm:$0xff]  ;;  %v9541_v6 = vcombine.low %v299_v58, %v307_v60 }
 0x2b9   :  { %5500 = vmatprep.subr.bf16.mxu0 %v9460_v5  ;;  %5623 = vmatprep.subr.bf16.mxu1 %v9462_v7  ;;  %v9539_v5 = vcombine.low %v298_v56, %v306_v57  ;;  %v9556_v7 = vcombine.high %v314_v2, %v322_v3  ;;  %v9558_v8 = vcombine.high %v315_v4, %v323_v19  ;;  %v338_v9 = vld [vmem:[#allocation4 + $0x7f0] sm:$0xff]  ;;  %v355_v22 = vld [vmem:[#allocation4 + $0x878] sm:$0xff] }
 0x2ba   :  { %v354_v20 = vld [vmem:[#allocation4 + $0x870] sm:$0xff]  ;;  %v363_v59 = vld [vmem:[#allocation4 + $0x8b8] sm:$0xff] }
 0x2bb   :  { %v362_v29 = vld [vmem:[#allocation4 + $0x8b0] sm:$0xff]  ;;  %v371_v31 = vld [vmem:[#allocation4 + $0x8f8] sm:$0xff] }
 0x2bc   :  { %5501 = vmatpush1.bf16.msra.mxu0 %v9459_v14  ;;  %5624 = vmatpush1.bf16.msra.mxu1 %v9461_v15  ;;  %v9555_v14 = vcombine.low %v314_v2, %v322_v3  ;;  %v9557_v15 = vcombine.low %v315_v4, %v323_v19  ;;  %v370_v30 = vld [vmem:[#allocation4 + $0x8f0] sm:$0xff]  ;;  %v379_v53 = vld [vmem:[#allocation4 + $0x938] sm:$0xff] }
 0x2bd   :  { %5502 = vmatprep.subr.bf16.mxu0 %v9476_v16  ;;  %5625 = vmatprep.subr.bf16.mxu1 %v9478_v17  ;;  %v9572_v16 = vcombine.high %v330_v10, %v338_v9  ;;  %v9574_v17 = vcombine.high %v331_v11, %v339_v12  ;;  %v378_v43 = vld [vmem:[#allocation4 + $0x930] sm:$0xff]  ;;  %v387_v49 = vld [vmem:[#allocation4 + $0x978] sm:$0xff] }
 0x2be   :  { %v386_v46 = vld [vmem:[#allocation4 + $0x970] sm:$0xff]  ;;  %v395_v58 = vld [vmem:[#allocation4 + $0x9b8] sm:$0xff] }
 0x2bf   :  { %v394_v56 = vld [vmem:[#allocation4 + $0x9b0] sm:$0xff]  ;;  %v403_v60 = vld [vmem:[#allocation4 + $0x9f8] sm:$0xff] }
 0x2c0   :  { %5503 = vmatpush1.bf16.msra.mxu0 %v9475_v23  ;;  %5626 = vmatpush1.bf16.msra.mxu1 %v9477_v24  ;;  %v9571_v23 = vcombine.low %v330_v10, %v338_v9  ;;  %v9573_v24 = vcombine.low %v331_v11, %v339_v12  ;;  %v402_v57 = vld [vmem:[#allocation4 + $0x9f0] sm:$0xff]  ;;  %v411_v3 = vld [vmem:[#allocation4 + $0xa38] sm:$0xff] }
 0x2c1   :  { %5504 = vmatprep.subr.bf16.mxu0 %v9492_v25  ;;  %5627 = vmatprep.subr.bf16.mxu1 %v9494_v27  ;;  %v9588_v25 = vcombine.high %v346_v18, %v354_v20  ;;  %v9590_v27 = vcombine.high %v347_v21, %v355_v22  ;;  %v418_v2 = vld [vmem:[#allocation4 + $0xa70] sm:$0xff]  ;;  %v419_v4 = vld [vmem:[#allocation4 + $0xa78] sm:$0xff]  ;;  %v9635_v19 = vcombine.low %v394_v56, %v402_v57 }
 0x2c2   :  { %v427_v10 = vld [vmem:[#allocation4 + $0xab8] sm:$0xff]  ;;  %v9653_v12 = vcombine.low %v411_v3, %v419_v4 }
 0x2c3   :  { %v435_v9 = vld [vmem:[#allocation4 + $0xaf8] sm:$0xff] }
 0x2c4   :  { %5505 = vmatpush1.bf16.msra.mxu0 %v9491_v36  ;;  %5628 = vmatpush1.bf16.msra.mxu1 %v9493_v38  ;;  %v9587_v36 = vcombine.low %v346_v18, %v354_v20  ;;  %v9589_v38 = vcombine.low %v347_v21, %v355_v22  ;;  %v443_v18 = vld [vmem:[#allocation4 + $0xb38] sm:$0xff]  ;;  %v9669_v22 = vcombine.low %v427_v10, %v435_v9 }
 0x2c5   :  { %5506 = vmatprep.subr.bf16.mxu0 %v9508_v39  ;;  %5629 = vmatprep.subr.bf16.mxu1 %v9510_v42  ;;  %v9604_v39 = vcombine.high %v362_v29, %v370_v30  ;;  %v9606_v42 = vcombine.high %v363_v59, %v371_v31  ;;  %v451_v20 = vld [vmem:[#allocation4 + $0xb78] sm:$0xff] }
 0x2c8   :  { %5507 = vmatpush1.bf16.msra.mxu0 %v9507_v50  ;;  %5630 = vmatpush1.bf16.msra.mxu1 %v9509_v51  ;;  %v9603_v50 = vcombine.low %v362_v29, %v370_v30  ;;  %v9605_v51 = vcombine.low %v363_v59, %v371_v31  ;;  %v459_v29 = vld [vmem:[#allocation4 + $0xbb8] sm:$0xff]  ;;  %v9685_v31 = vcombine.low %v443_v18, %v451_v20 }
 0x2c9   :  { %5508 = vmatprep.subr.bf16.mxu0 %v9524_v52  ;;  %5631 = vmatprep.subr.bf16.mxu1 %v9526_v55  ;;  %v9620_v52 = vcombine.high %v378_v43, %v386_v46  ;;  %v9622_v55 = vcombine.high %v379_v53, %v387_v49  ;;  %v467_v30 = vld [vmem:[#allocation4 + $0xbf8] sm:$0xff] }
 0x2cc   :  { %5509 = vmatpush1.bf16.msra.mxu0 %v9523_v61  ;;  %5632 = vmatpush1.bf16.msra.mxu1 %v9525_v62  ;;  %v9619_v61 = vcombine.low %v378_v43, %v386_v46  ;;  %v9636_v62 = vcombine.high %v394_v56, %v402_v57  ;;  %v475_v43 = vld [vmem:[#allocation4 + $0xc38] sm:$0xff] }
 0x2cd   :  { %5510 = vmatprep.subr.bf16.mxu0 %v9540_v0  ;;  %5633 = vmatprep.subr.bf16.mxu1 %v9542_v1  ;;  %v9638_v0 = vcombine.high %v395_v58, %v403_v60  ;;  %v410_v1 = vld [vmem:[#allocation4 + $0xa30] sm:$0xff]  ;;  %v483_v46 = vld [vmem:[#allocation4 + $0xc78] sm:$0xff] }
 0x2ce   :  { %v9651_v11 = vcombine.low %v410_v1, %v418_v2  ;;  %v491_v56 = vld [vmem:[#allocation4 + $0xcb8] sm:$0xff] }
 0x2cf   :  { %v499_v57 = vld [vmem:[#allocation4 + $0xcf8] sm:$0xff] }
 0x2d0   :  { %5511 = vmatpush1.bf16.msra.mxu0 %v9539_v5  ;;  %5634 = vmatpush1.bf16.msra.mxu1 %v9541_v6  ;;  %v9637_v5 = vcombine.low %v395_v58, %v403_v60  ;;  %v9652_v6 = vcombine.high %v410_v1, %v418_v2  ;;  %v9717_v60 = vcombine.low %v475_v43, %v483_v46  ;;  %v507_v1 = vld [vmem:[#allocation4 + $0xd38] sm:$0xff] }
 0x2d1   :  { %5512 = vmatprep.subr.bf16.mxu0 %v9556_v7  ;;  %5635 = vmatprep.subr.bf16.mxu1 %v9558_v8  ;;  %v426_v7 = vld [vmem:[#allocation4 + $0xab0] sm:$0xff]  ;;  %v515_v2 = vld [vmem:[#allocation4 + $0xd78] sm:$0xff] }
 0x2d2   :  { %v434_v8 = vld [vmem:[#allocation4 + $0xaf0] sm:$0xff] }
 0x2d3   :  { %v9667_v21 = vcombine.low %v426_v7, %v434_v8 }
 0x2d4   :  { %5513 = vmatpush1.bf16.msra.mxu0 %v9555_v14  ;;  %5636 = vmatpush1.bf16.msra.mxu1 %v9557_v15  ;;  %v9668_v14 = vcombine.high %v426_v7, %v434_v8  ;;  %v9670_v15 = vcombine.high %v427_v10, %v435_v9  ;;  %v523_v7 = vld [vmem:[#allocation4 + $0xdb8] sm:$0xff]  ;;  %v9749_v9 = vcombine.low %v507_v1, %v515_v2 }
 0x2d5   :  { %5514 = vmatprep.subr.bf16.mxu0 %v9572_v16  ;;  %5637 = vmatprep.subr.bf16.mxu1 %v9574_v17  ;;  %v442_v16 = vld [vmem:[#allocation4 + $0xb30] sm:$0xff]  ;;  %v531_v8 = vld [vmem:[#allocation4 + $0xdf8] sm:$0xff] }
 0x2d6   :  { %v450_v17 = vld [vmem:[#allocation4 + $0xb70] sm:$0xff] }
 0x2d7   :  { %v9683_v59 = vcombine.low %v442_v16, %v450_v17 }
 0x2d8   :  { %5515 = vmatpush1.bf16.msra.mxu0 %v9571_v23  ;;  %5638 = vmatpush1.bf16.msra.mxu1 %v9573_v24  ;;  %v9684_v23 = vcombine.high %v442_v16, %v450_v17  ;;  %v9686_v24 = vcombine.high %v443_v18, %v451_v20  ;;  %v539_v16 = vld [vmem:[#allocation4 + $0xe38] sm:$0xff]  ;;  %v9765_v20 = vcombine.low %v523_v7, %v531_v8 }
 0x2d9   :  { %5525 = vmatprep.subr.bf16.mxu0 %v9588_v25  ;;  %5648 = vmatprep.subr.bf16.mxu1 %v9590_v27  ;;  %v458_v25 = vld [vmem:[#allocation4 + $0xbb0] sm:$0xff]  ;;  %v547_v17 = vld [vmem:[#allocation4 + $0xe78] sm:$0xff] }
 0x2da   :  { %v466_v27 = vld [vmem:[#allocation4 + $0xbf0] sm:$0xff] }
 0x2db   :  { %5517 = vmatmul.mubr.bf16.vlgmr.msra.gmra.mrb[12].mxu0 %v10948_v26  ;;  %5640 = vmatmul.mubr.bf16.vlgmr.msra.gmra.mrb[12].mxu1 %v10948_v26  ;;  %v9621_v26 = vcombine.low %v379_v53, %v387_v49  ;;  %v9699_v53 = vcombine.low %v458_v25, %v466_v27  ;;  %v9701_v49 = vcombine.low %v459_v29, %v467_v30 }
 0x2dc   :  { %5526 = vmatpush1.bf16.msra.mxu0 %v9587_v36  ;;  %5649 = vmatpush1.bf16.msra.mxu1 %v9589_v38  ;;  %v9700_v36 = vcombine.high %v458_v25, %v466_v27  ;;  %v9702_v38 = vcombine.high %v459_v29, %v467_v30  ;;  %v555_v25 = vld [vmem:[#allocation4 + $0xeb8] sm:$0xff]  ;;  %v9781_v30 = vcombine.low %v539_v16, %v547_v17 }
 0x2dd   :  { %5527 = vmatprep.subr.bf16.mxu0 %v9604_v39  ;;  %5650 = vmatprep.subr.bf16.mxu1 %v9606_v42  ;;  %v474_v39 = vld [vmem:[#allocation4 + $0xc30] sm:$0xff]  ;;  %v563_v27 = vld [vmem:[#allocation4 + $0xef8] sm:$0xff] }
 0x2de   :  { %5557 = vmatprep.mubr.bf16.mxu0 %v10955_v63  ;;  %5680 = vmatprep.mubr.bf16.mxu1 %v10955_v63  ;;  %v9654_v63 = vcombine.high %v411_v3, %v419_v4  ;;  %v482_v42 = vld [vmem:[#allocation4 + $0xc70] sm:$0xff]  ;;  %v9733_v4 = vcombine.low %v491_v56, %v499_v57 }
 0x2df   :  { %v9715_v58 = vcombine.low %v474_v39, %v482_v42 }
 0x2e0   :  { %5528 = vmatpush1.bf16.msra.mxu0 %v9603_v50  ;;  %5651 = vmatpush1.bf16.msra.mxu1 %v9605_v51  ;;  %v9716_v50 = vcombine.high %v474_v39, %v482_v42  ;;  %v9718_v51 = vcombine.high %v475_v43, %v483_v46  ;;  %v571_v39 = vld [vmem:[#allocation4 + $0xf38] sm:$0xff]  ;;  %v9797_v46 = vcombine.low %v555_v25, %v563_v27 }
 0x2e1   :  { %5529 = vmatprep.subr.bf16.mxu0 %v9620_v52  ;;  %5652 = vmatprep.subr.bf16.mxu1 %v9622_v55  ;;  %v490_v52 = vld [vmem:[#allocation4 + $0xcb0] sm:$0xff]  ;;  %v579_v42 = vld [vmem:[#allocation4 + $0xf78] sm:$0xff] }
 0x2e2   :  { %v498_v55 = vld [vmem:[#allocation4 + $0xcf0] sm:$0xff] }
 0x2e3   :  { %v9731_v3 = vcombine.low %v490_v52, %v498_v55 }
 0x2e4   :  { %5530 = vmatpush1.bf16.msra.mxu0 %v9619_v61  ;;  %5653 = vmatpush1.bf16.msra.mxu1 %v9621_v26  ;;  %v9732_v61 = vcombine.high %v490_v52, %v498_v55  ;;  %v9734_v26 = vcombine.high %v491_v56, %v499_v57  ;;  %v587_v52 = vld [vmem:[#allocation4 + $0xfb8] sm:$0xff]  ;;  %v9813_v57 = vcombine.low %v571_v39, %v579_v42 }
 0x2e5   :  { %5531 = vmatprep.subr.bf16.mxu0 %v9636_v62  ;;  %5654 = vmatprep.subr.bf16.mxu1 %v9638_v0  ;;  %v506_v62 = vld [vmem:[#allocation4 + $0xd30] sm:$0xff]  ;;  %v595_v55 = vld [vmem:[#allocation4 + $0xff8] sm:$0xff] }
 0x2e6   :  { %v514_v0 = vld [vmem:[#allocation4 + $0xd70] sm:$0xff] }
 0x2e7   :  { %v9747_v10 = vcombine.low %v506_v62, %v514_v0 }
 0x2e8   :  { %5532 = vmatpush1.bf16.msra.mxu0 %v9635_v19  ;;  %5655 = vmatpush1.bf16.msra.mxu1 %v9637_v5  ;;  %v9748_v19 = vcombine.high %v506_v62, %v514_v0  ;;  %v9750_v5 = vcombine.high %v507_v1, %v515_v2  ;;  %v603_v62 = vld [vmem:[#allocation4 + $0x1038] sm:$0xff]  ;;  %v11056_v2 = vand.u32 127, %v857_v34 }
 0x2e9   :  { %5533 = vmatprep.subr.bf16.mxu0 %v9652_v6  ;;  %5656 = vmatprep.subr.bf16.mxu1 %v9654_v63  ;;  %v522_v6 = vld [vmem:[#allocation4 + $0xdb0] sm:$0xff]  ;;  %v611_v0 = vld [vmem:[#allocation4 + $0x1078] sm:$0xff] }
 0x2ea   :  { %v530_v63 = vld [vmem:[#allocation4 + $0xdf0] sm:$0xff]  ;;  %v9845_v34 = vcombine.low %v603_v62, %v611_v0 }
 0x2eb   :  { %v9763_v18 = vcombine.low %v522_v6, %v530_v63 }
 0x2ec   :  { %5534 = vmatpush1.bf16.msra.mxu0 %v9651_v11  ;;  %5657 = vmatpush1.bf16.msra.mxu1 %v9653_v12  ;;  %v9764_v11 = vcombine.high %v522_v6, %v530_v63  ;;  %v9766_v12 = vcombine.high %v523_v7, %v531_v8  ;;  %v626_v6 = vld [vmem:[#allocation4 + $0x10f0] sm:$0xff]  ;;  %v5895_v63 = vstv %s11049_s1  ;;  %v619_v7 = vld [vmem:[#allocation4 + $0x10b8] sm:$0xff] }
 0x2ed   :  { %5535 = vmatprep.subr.bf16.mxu0 %v9668_v14  ;;  %5658 = vmatprep.subr.bf16.mxu1 %v9670_v15  ;;  %v538_v14 = vld [vmem:[#allocation4 + $0xe30] sm:$0xff]  ;;  %v627_v8 = vld [vmem:[#allocation4 + $0x10f8] sm:$0xff]  ;;  %vm5896_vm2 = vcmp.eq.s32.totalorder %v11056_v2, %v5895_v63 }
 0x2ee   :  { %v546_v15 = vld [vmem:[#allocation4 + $0xe70] sm:$0xff]  ;;  %vm11072_vm4 = vmand %vm5893_vm1, %vm5896_vm2 }
 0x2ef   :  { %v9779_v29 = vcombine.low %v538_v14, %v546_v15 }
 0x2f0   :  { %5536 = vmatpush1.bf16.msra.mxu0 %v9667_v21  ;;  %5659 = vmatpush1.bf16.msra.mxu1 %v9669_v22  ;;  %v9780_v21 = vcombine.high %v538_v14, %v546_v15  ;;  %v9782_v22 = vcombine.high %v539_v16, %v547_v17  ;;  %v634_v14 = vld [vmem:[#allocation4 + $0x1130] sm:$0xff]  ;;  %v635_v16 = vld [vmem:[#allocation4 + $0x1138] sm:$0xff] }
 0x2f1   :  { %5537 = vmatprep.subr.bf16.mxu0 %v9684_v23  ;;  %5660 = vmatprep.subr.bf16.mxu1 %v9686_v24  ;;  %v554_v23 = vld [vmem:[#allocation4 + $0xeb0] sm:$0xff]  ;;  %v643_v17 = vld [vmem:[#allocation4 + $0x1178] sm:$0xff] }
 0x2f2   :  { %v562_v24 = vld [vmem:[#allocation4 + $0xef0] sm:$0xff] }
 0x2f3   :  { %v9795_v43 = vcombine.low %v554_v23, %v562_v24  ;;  %v642_v15 = vld [vmem:[#allocation4 + $0x1170] sm:$0xff] }
 0x2f4   :  { %5538 = vmatpush1.bf16.msra.mxu0 %v9683_v59  ;;  %5661 = vmatpush1.bf16.msra.mxu1 %v9685_v31  ;;  %v9796_v59 = vcombine.high %v554_v23, %v562_v24  ;;  %v9798_v31 = vcombine.high %v555_v25, %v563_v27  ;;  %v9876_v23 = vcombine.high %v634_v14, %v642_v15  ;;  %v650_v25 = vld [vmem:[#allocation4 + $0x11b0] sm:$0xff] }
 0x2f5   :  { %5539 = vmatprep.subr.bf16.mxu0 %v9700_v36  ;;  %5662 = vmatprep.subr.bf16.mxu1 %v9702_v38  ;;  %v570_v36 = vld [vmem:[#allocation4 + $0xf30] sm:$0xff] }
 0x2f6   :  { %v578_v38 = vld [vmem:[#allocation4 + $0xf70] sm:$0xff] }
 0x2f7   :  { %v9811_v56 = vcombine.low %v570_v36, %v578_v38  ;;  %v658_v27 = vld [vmem:[#allocation4 + $0x11f0] sm:$0xff] }
 0x2f8   :  { %5540 = vmatpush1.bf16.msra.mxu0 %v9699_v53  ;;  %5663 = vmatpush1.bf16.msra.mxu1 %v9701_v49  ;;  %v9812_v53 = vcombine.high %v570_v36, %v578_v38  ;;  %v9814_v49 = vcombine.high %v571_v39, %v579_v42  ;;  %v9875_v36 = vcombine.low %v634_v14, %v642_v15  ;;  %v10814_v38 = vmov 0.0  }
 0x2f9   :  { %5541 = vmatprep.subr.bf16.mxu0 %v9716_v50  ;;  %5664 = vmatprep.subr.bf16.mxu1 %v9718_v51  ;;  %v586_v50 = vld [vmem:[#allocation4 + $0xfb0] sm:$0xff]  ;;  %v5898_v39 = vsel %vm11072_vm4, 1.0, %v10814_v38  ;;  %vm5942_vm4 = vcmp.eq.s32.totalorder %v10922_v44, 1 }
 0x2fa   :  { %v594_v51 = vld [vmem:[#allocation4 + $0xff0] sm:$0xff] }
 0x2fb   :  { %v9827_v1 = vcombine.low %v586_v50, %v594_v51 }
 0x2fc   :  { %5542 = vmatpush1.bf16.msra.mxu0 %v9715_v58  ;;  %5665 = vmatpush1.bf16.msra.mxu1 %v9717_v60  ;;  %v9828_v58 = vcombine.high %v586_v50, %v594_v51  ;;  %v9830_v60 = vcombine.high %v587_v52, %v595_v55  ;;  %v667_v50 = vld [vmem:[#allocation4 + $0x1238] sm:$0xff] }
 0x2fd   :  { %5543 = vmatprep.subr.bf16.mxu0 %v9732_v61  ;;  %5666 = vmatprep.subr.bf16.mxu1 %v9734_v26  ;;  %v602_v61 = vld [vmem:[#allocation4 + $0x1030] sm:$0xff]  ;;  %v675_v51 = vld [vmem:[#allocation4 + $0x1278] sm:$0xff] }
 0x2fe   :  { %v610_v26 = vld [vmem:[#allocation4 + $0x1070] sm:$0xff] }
 0x300   :  { %5544 = vmatpush1.bf16.msra.mxu0 %v9731_v3  ;;  %5667 = vmatpush1.bf16.msra.mxu1 %v9733_v4  ;;  %v9829_v3 = vcombine.low %v587_v52, %v595_v55  ;;  %v9844_v4 = vcombine.high %v602_v61, %v610_v26  ;;  %v5919_v55 = vstv %s11067_s15 }
 0x301   :  { %5545 = vmatprep.subr.bf16.mxu0 %v9748_v19  ;;  %5668 = vmatprep.subr.bf16.mxu1 %v9750_v5  ;;  %v9846_v19 = vcombine.high %v603_v62, %v611_v0  ;;  %v618_v5 = vld [vmem:[#allocation4 + $0x10b0] sm:$0xff]  ;;  %vm5920_vm10 = vcmp.eq.s32.totalorder %v11056_v2, %v5919_v55  ;;  %v683_v0 = vld [vmem:[#allocation4 + $0x12b8] sm:$0xff] }
 0x302   :  { %v690_v62 = vld [vmem:[#allocation4 + $0x12f0] sm:$0xff]  ;;  %vm5921_vm11 = vmand %vm5893_vm1, %vm5920_vm10 }
 0x303   :  { %v5922_v15 = vsel %vm5921_vm11, 1.0, %v10814_v38  ;;  %v754_v55 = vld [vmem:[#allocation4 + $0x14f0] sm:$0xff] }
 0x304   :  { %5546 = vmatpush1.bf16.msra.mxu0 %v9747_v10  ;;  %5669 = vmatpush1.bf16.msra.mxu1 %v9749_v9  ;;  %v5901_v10 = vstv %s11051_s12  ;;  %v9843_v9 = vcombine.low %v602_v61, %v610_v26  ;;  %v9910_v61 = vcombine.high %v667_v50, %v675_v51  ;;  %v682_v26 = vld [vmem:[#allocation4 + $0x12b0] sm:$0xff] }
 0x305   :  { %5547 = vmatprep.subr.bf16.mxu0 %v9764_v11  ;;  %5670 = vmatprep.subr.bf16.mxu1 %v9766_v12  ;;  %v9860_v11 = vcombine.high %v618_v5, %v626_v6  ;;  %v9862_v12 = vcombine.high %v619_v7, %v627_v8  ;;  %vm5902_vm3 = vcmp.eq.s32.totalorder %v11056_v2, %v5901_v10  ;;  %v706_v10 = vld [vmem:[#allocation4 + $0x1370] sm:$0xff] }
 0x306   :  { %vm11078_vm5 = vmand %vm5893_vm1, %vm5902_vm3  ;;  %v9924_v63 = vcombine.high %v682_v26, %v690_v62  ;;  %v9923_v14 = vcombine.low %v682_v26, %v690_v62 }
 0x307   :  { %v5904_v42 = vsel %vm11078_vm5, 1.0, %v10814_v38 }
 0x308   :  { %5548 = vmatpush1.bf16.msra.mxu0 %v9763_v18  ;;  %5671 = vmatpush1.bf16.msra.mxu1 %v9765_v20  ;;  %v5907_v18 = vstv %s11053_s13  ;;  %v9859_v20 = vcombine.low %v618_v5, %v626_v6  ;;  %v5905_v52 = vadd.f32 %v5904_v42, %v5898_v39  ;;  %v9909_v6 = vcombine.low %v667_v50, %v675_v51  ;;  %v731_v39 = vld [vmem:[#allocation4 + $0x1438] sm:$0xff] }
 0x309   :  { %5549 = vmatprep.subr.bf16.mxu0 %v9780_v21  ;;  %5672 = vmatprep.subr.bf16.mxu1 %v9782_v22  ;;  %v9861_v22 = vcombine.low %v619_v7, %v627_v8  ;;  %vm11084_vm6 = vcmp.eq.s32.totalorder %v11056_v2, %v5907_v18  ;;  %v698_v8 = vld [vmem:[#allocation4 + $0x1330] sm:$0xff]  ;;  %v739_v42 = vld [vmem:[#allocation4 + $0x1478] sm:$0xff] }
 0x30a   :  { %vm5909_vm7 = vmand %vm5893_vm1, %vm11084_vm6  ;;  %v722_v21 = vld [vmem:[#allocation4 + $0x13f0] sm:$0xff]  ;;  %v9974_v51 = vcombine.high %v731_v39, %v739_v42  ;;  %v9973_v62 = vcombine.low %v731_v39, %v739_v42 }
 0x30c   :  { %5550 = vmatpush1.bf16.msra.mxu0 %v9779_v29  ;;  %5673 = vmatpush1.bf16.msra.mxu1 %v9781_v30  ;;  %v651_v30 = vld [vmem:[#allocation4 + $0x11b8] sm:$0xff] }
 0x30d   :  { %5551 = vmatprep.subr.bf16.mxu0 %v9796_v59  ;;  %5674 = vmatprep.subr.bf16.mxu1 %v9798_v31  ;;  %v659_v59 = vld [vmem:[#allocation4 + $0x11f8] sm:$0xff]  ;;  %v5913_v31 = vstv %s11060_s14 }
 0x30e   :  { %vm5914_vm8 = vcmp.eq.s32.totalorder %v11056_v2, %v5913_v31  ;;  %v730_v31 = vld [vmem:[#allocation4 + $0x1430] sm:$0xff] }
 0x30f   :  { %vm5915_vm9 = vmand %vm5893_vm1, %vm5914_vm8 }
 0x310   :  { %5552 = vmatpush1.bf16.msra.mxu0 %v9795_v43  ;;  %5675 = vmatpush1.bf16.msra.mxu1 %v9797_v46  ;;  %v9877_v43 = vcombine.low %v635_v16, %v643_v17  ;;  %v9892_v46 = vcombine.high %v650_v25, %v658_v27  ;;  %v5916_v5 = vsel %vm5915_vm9, 1.0, %v10814_v38 }
 0x311   :  { %5553 = vmatprep.subr.bf16.mxu0 %v9812_v53  ;;  %5676 = vmatprep.subr.bf16.mxu1 %v9814_v49  ;;  %v666_v53 = vld [vmem:[#allocation4 + $0x1230] sm:$0xff] }
 0x312   :  { %v674_v49 = vld [vmem:[#allocation4 + $0x1270] sm:$0xff] }
 0x314   :  { %5554 = vmatpush1.bf16.msra.mxu0 %v9811_v56  ;;  %5677 = vmatpush1.bf16.msra.mxu1 %v9813_v57  ;;  %v9891_v56 = vcombine.low %v650_v25, %v658_v27  ;;  %v5910_v57 = vsel %vm5909_vm7, 1.0, %v10814_v38  ;;  %v9939_v25 = vcombine.low %v698_v8, %v706_v10 }
 0x315   :  { %5555 = vmatprep.subr.bf16.mxu0 %v9828_v58  ;;  %5678 = vmatprep.subr.bf16.mxu1 %v9830_v60  ;;  %v9893_v58 = vcombine.low %v651_v30, %v659_v59  ;;  %v9908_v60 = vcombine.high %v666_v53, %v674_v49 }
 0x318   :  { %5556 = vmatpush1.bf16.msra.mxu0 %v9827_v1  ;;  %5679 = vmatpush1.bf16.msra.mxu1 %v9829_v3  ;;  %v691_v1 = vld [vmem:[#allocation4 + $0x12f8] sm:$0xff]  ;;  %v5911_v3 = vadd.f32 %v5910_v57, %v5905_v52  ;;  %v746_v52 = vld [vmem:[#allocation4 + $0x14b0] sm:$0xff] }
 0x319   :  { %5566 = vmatprep.subr.bf16.mxu0 %v9844_v4  ;;  %5689 = vmatprep.subr.bf16.mxu1 %v9846_v19  ;;  %v5925_v4 = vstv %s11090_s16  ;;  %v9907_v19 = vcombine.low %v666_v53, %v674_v49  ;;  %v9926_v7 = vcombine.high %v683_v0, %v691_v1  ;;  %v755_v57 = vld [vmem:[#allocation4 + $0x14f8] sm:$0xff] }
 0x31a   :  { %vm5926_vm12 = vcmp.eq.s32.totalorder %v11056_v2, %v5925_v4  ;;  %v770_v4 = vld [vmem:[#allocation4 + $0x1570] sm:$0xff] }
 0x31b   :  { %5558 = vmatmul.mubr.bf16.vlgmr.msra.gmra.mrb[12].mxu0 %v10966_v45  ;;  %5681 = vmatmul.mubr.bf16.vlgmr.msra.gmra.mrb[12].mxu1 %v10966_v45  ;;  %v9878_v45 = vcombine.high %v635_v16, %v643_v17  ;;  %v9925_v16 = vcombine.low %v683_v0, %v691_v1  ;;  %v9940_v17 = vcombine.high %v698_v8, %v706_v10  ;;  %vm5927_vm13 = vmand %vm5893_vm1, %vm5926_vm12 }
 0x31c   :  { %5567 = vmatpush1.bf16.msra.mxu0 %v9843_v9  ;;  %5690 = vmatpush1.bf16.msra.mxu1 %v9845_v34  ;;  %v699_v9 = vld [vmem:[#allocation4 + $0x1338] sm:$0xff]  ;;  %v5928_v27 = vsel %vm5927_vm13, 1.0, %v10814_v38  ;;  %v9988_v0 = vcombine.high %v746_v52, %v754_v55 }
 0x31d   :  { %5568 = vmatprep.subr.bf16.mxu0 %v9860_v11  ;;  %5691 = vmatprep.subr.bf16.mxu1 %v9862_v12  ;;  %v707_v34 = vld [vmem:[#allocation4 + $0x1378] sm:$0xff]  ;;  %v5917_v11 = vadd.f32 %v5916_v5, %v5911_v3  ;;  %v5931_v12 = vstv %s11104_s17  ;;  %v762_v3 = vld [vmem:[#allocation4 + $0x1530] sm:$0xff] }
 0x31e   :  { %5598 = vmatprep.mubr.bf16.mxu0 %v10958_v37  ;;  %5721 = vmatprep.mubr.bf16.mxu1 %v10958_v37  ;;  %v9894_v37 = vcombine.high %v651_v30, %v659_v59  ;;  %v9942_v18 = vcombine.high %v699_v9, %v707_v34  ;;  %vm5932_vm14 = vcmp.eq.s32.totalorder %v11056_v2, %v5931_v12  ;;  %v771_v5 = vld [vmem:[#allocation4 + $0x1578] sm:$0xff]  ;;  %v786_v12 = vld [vmem:[#allocation4 + $0x15f0] sm:$0xff] }
 0x31f   :  { %v5923_v24 = vadd.f32 %v5922_v15, %v5917_v11  ;;  %v9941_v29 = vcombine.low %v699_v9, %v707_v34  ;;  %vm5933_vm15 = vmand %vm5893_vm1, %vm5932_vm14  ;;  %v10004_v9 = vcombine.high %v762_v3, %v770_v4  ;;  %v778_v11 = vld [vmem:[#allocation4 + $0x15b0] sm:$0xff]  ;;  %v787_v15 = vld [vmem:[#allocation4 + $0x15f8] sm:$0xff] }
 0x320   :  { %5569 = vmatpush1.bf16.msra.mxu0 %v9859_v20  ;;  %5692 = vmatpush1.bf16.msra.mxu1 %v9861_v22  ;;  %v714_v20 = vld [vmem:[#allocation4 + $0x13b0] sm:$0xff]  ;;  %v715_v22 = vld [vmem:[#allocation4 + $0x13b8] sm:$0xff]  ;;  %v5934_v53 = vsel %vm5933_vm15, 1.0, %v10814_v38 }
 0x321   :  { %5570 = vmatprep.subr.bf16.mxu0 %v9876_v23  ;;  %5693 = vmatprep.subr.bf16.mxu1 %v9878_v45  ;;  %v723_v23 = vld [vmem:[#allocation4 + $0x13f8] sm:$0xff]  ;;  %v5937_v45 = vstv %s11111_s0  ;;  %v9956_v30 = vcombine.high %v714_v20, %v722_v21 }
 0x322   :  { %v9958_v59 = vcombine.high %v715_v22, %v723_v23  ;;  %vm5938_vm2 = vcmp.eq.s32.totalorder %v11056_v2, %v5937_v45  ;;  %v9957_v49 = vcombine.low %v715_v22, %v723_v23  ;;  %v10020_v22 = vcombine.high %v778_v11, %v786_v12  ;;  %v802_v45 = vld [vmem:[#allocation4 + $0x1670] sm:$0xff] }
 0x323   :  { %vm5939_vm3 = vmand %vm5893_vm1, %vm5938_vm2 }
 0x324   :  { %5571 = vmatpush1.bf16.msra.mxu0 %v9875_v36  ;;  %5694 = vmatpush1.bf16.msra.mxu1 %v9877_v43  ;;  %v738_v36 = vld [vmem:[#allocation4 + $0x1470] sm:$0xff]  ;;  %v5929_v43 = vadd.f32 %v5928_v27, %v5923_v24  ;;  %v5940_v26 = vsel %vm5939_vm3, 1.0, %v10814_v38  ;;  %v803_v27 = vld [vmem:[#allocation4 + $0x1678] sm:$0xff] }
 0x325   :  { %5572 = vmatprep.subr.bf16.mxu0 %v9892_v46  ;;  %5695 = vmatprep.subr.bf16.mxu1 %v9894_v37  ;;  %v5944_v46 = vstv %s11118_s18  ;;  %v9955_v37 = vcombine.low %v714_v20, %v722_v21  ;;  %v9972_v50 = vcombine.high %v730_v31, %v738_v36  ;;  %v794_v24 = vld [vmem:[#allocation4 + $0x1630] sm:$0xff] }
 0x326   :  { %vm5945_vm5 = vcmp.eq.s32.totalorder %v11056_v2, %v5944_v46  ;;  %v10036_v39 = vcombine.high %v794_v24, %v802_v45  ;;  %v818_v46 = vld [vmem:[#allocation4 + $0x16f0] sm:$0xff] }
 0x327   :  { %vm5946_vm1 = vmand %vm5942_vm4, %vm5945_vm5 }
 0x328   :  { %5573 = vmatpush1.bf16.msra.mxu0 %v9891_v56  ;;  %5696 = vmatpush1.bf16.msra.mxu1 %v9893_v58  ;;  %v747_v56 = vld [vmem:[#allocation4 + $0x14b8] sm:$0xff]  ;;  %v5935_v58 = vadd.f32 %v5934_v53, %v5929_v43  ;;  %v5947_v8 = vsel %vm5946_vm1, 1.0, %v10814_v38  ;;  %v810_v43 = vld [vmem:[#allocation4 + $0x16b0] sm:$0xff] }
 0x329   :  { %5574 = vmatprep.subr.bf16.mxu0 %v9908_v60  ;;  %5697 = vmatprep.subr.bf16.mxu1 %v9910_v61  ;;  %v5950_v60 = vstv %s11125_s19  ;;  %v9971_v61 = vcombine.low %v730_v31, %v738_v36  ;;  %v9990_v1 = vcombine.high %v747_v56, %v755_v57  ;;  %v9989_v10 = vcombine.low %v747_v56, %v755_v57  ;;  %v819_v53 = vld [vmem:[#allocation4 + $0x16f8] sm:$0xff] }
 0x32a   :  { %vm5951_vm6 = vcmp.eq.s32.totalorder %v11056_v2, %v5950_v60  ;;  %v10052_v56 = vcombine.high %v810_v43, %v818_v46  ;;  %v834_v60 = vld [vmem:[#allocation4 + $0x1770] sm:$0xff] }
 0x32b   :  { %vm5952_vm7 = vmand %vm5942_vm4, %vm5951_vm6  ;;  %vm6004_vm6 = vcmask 261120  }
 0x32c   :  { %5575 = vmatpush1.bf16.msra.mxu0 %v9907_v19  ;;  %5698 = vmatpush1.bf16.msra.mxu1 %v9909_v6  ;;  %v763_v19 = vld [vmem:[#allocation4 + $0x1538] sm:$0xff]  ;;  %v5941_v6 = vadd.f32 %v5940_v26, %v5935_v58  ;;  %v5953_v20 = vsel %vm5952_vm7, 1.0, %v10814_v38  ;;  %v826_v58 = vld [vmem:[#allocation4 + $0x1730] sm:$0xff] }
 0x32d   :  { %5576 = vmatprep.subr.bf16.mxu0 %v9924_v63  ;;  %5699 = vmatprep.subr.bf16.mxu1 %v9926_v7  ;;  %v5956_v63 = vstv %s11132_s20  ;;  %v9987_v7 = vcombine.low %v746_v52, %v754_v55  ;;  %v10006_v34 = vcombine.high %v763_v19, %v771_v5  ;;  %v10005_v21 = vcombine.low %v763_v19, %v771_v5  ;;  %v835_v26 = vld [vmem:[#allocation4 + $0x1778] sm:$0xff] }
 0x32e   :  { %vm5957_vm8 = vcmp.eq.s32.totalorder %v11056_v2, %v5956_v63  ;;  %v10068_v19 = vcombine.high %v826_v58, %v834_v60  ;;  %v850_v63 = vld [vmem:[#allocation4 + $0x17f0] sm:$0xff] }
 0x32f   :  { %vm5958_vm9 = vmand %vm5942_vm4, %vm5957_vm8 }
 0x330   :  { %5577 = vmatpush1.bf16.msra.mxu0 %v9923_v14  ;;  %5700 = vmatpush1.bf16.msra.mxu1 %v9925_v16  ;;  %v779_v14 = vld [vmem:[#allocation4 + $0x15b8] sm:$0xff]  ;;  %v5948_v16 = vadd.f32 %v5947_v8, %v5941_v6  ;;  %v5959_v31 = vsel %vm5958_vm9, 1.0, %v10814_v38  ;;  %v842_v6 = vld [vmem:[#allocation4 + $0x17b0] sm:$0xff] }
 0x331   :  { %5578 = vmatprep.subr.bf16.mxu0 %v9940_v17  ;;  %5701 = vmatprep.subr.bf16.mxu1 %v9942_v18  ;;  %v5962_v17 = vstv %s11140_s21  ;;  %v10003_v18 = vcombine.low %v762_v3, %v770_v4  ;;  %v10022_v23 = vcombine.high %v779_v14, %v787_v15  ;;  %v10021_v36 = vcombine.low %v779_v14, %v787_v15  ;;  %v851_v8 = vld [vmem:[#allocation4 + $0x17f8] sm:$0xff] }
 0x332   :  { %vm5963_vm10 = vcmp.eq.s32.totalorder %v11056_v2, %v5962_v17  ;;  %v10084_v14 = vcombine.high %v842_v6, %v850_v63  ;;  %v5996_v17 = vld [vmem:[#allocation7 + $0x20] sm:$0xff] }
 0x333   :  { %vm5964_vm11 = vmand %vm5942_vm4, %vm5963_vm10 }
 0x334   :  { %5579 = vmatpush1.bf16.msra.mxu0 %v9939_v25  ;;  %5702 = vmatpush1.bf16.msra.mxu1 %v9941_v29  ;;  %v795_v25 = vld [vmem:[#allocation4 + $0x1638] sm:$0xff]  ;;  %v5954_v29 = vadd.f32 %v5953_v20, %v5948_v16  ;;  %v5965_v52 = vsel %vm5964_vm11, 1.0, %v10814_v38  ;;  %v5993_v16 = vld [vmem:[#allocation7 + $0x8] sm:$0xff]  ;;  %v10083_v20 = vcombine.low %v842_v6, %v850_v63 }
 0x335   :  { %5580 = vmatprep.subr.bf16.mxu0 %v9956_v30  ;;  %5703 = vmatprep.subr.bf16.mxu1 %v9958_v59  ;;  %v5968_v30 = vstv %s11147_s22  ;;  %v10019_v59 = vcombine.low %v778_v11, %v786_v12  ;;  %v10038_v42 = vcombine.high %v795_v25, %v803_v27  ;;  %v10037_v55 = vcombine.low %v795_v25, %v803_v27  ;;  %v5999_v25 = vld [vmem:[#allocation7 + $0x38] sm:$0xff]  ;;  %v6002_v27 = vld [vmem:[#allocation7 + $0x50] sm:$0xff]  ;;  %v6185_v63 = vld [vmem:[#allocation9 + $0x108] sm:$0xff] }
 0x336   :  { %vm5969_vm12 = vcmp.eq.s32.totalorder %v11056_v2, %v5968_v30  ;;  %v5994_v30 = vld [vmem:[#allocation7 + $0x10] sm:$0xff] }
 0x337   :  { %vm5970_vm13 = vmand %vm5942_vm4, %vm5969_vm12 }
 0x338   :  { %5581 = vmatpush1.bf16.msra.mxu0 %v9955_v37  ;;  %5704 = vmatpush1.bf16.msra.mxu1 %v9957_v49  ;;  %v811_v37 = vld [vmem:[#allocation4 + $0x16b8] sm:$0xff]  ;;  %v5960_v49 = vadd.f32 %v5959_v31, %v5954_v29  ;;  %v5971_v3 = vsel %vm5970_vm13, 1.0, %v10814_v38 }
 0x339   :  { %5582 = vmatprep.subr.bf16.mxu0 %v9972_v50  ;;  %5705 = vmatprep.subr.bf16.mxu1 %v9974_v51  ;;  %v5974_v50 = vstv %s11154_s23  ;;  %v10035_v51 = vcombine.low %v794_v24, %v802_v45  ;;  %v10054_v57 = vcombine.high %v811_v37, %v819_v53  ;;  %v10053_v4 = vcombine.low %v811_v37, %v819_v53  ;;  %v5992_v24 = vld [vmem:[#allocation7] sm:$0xff]  ;;  %v5995_v45 = vld [vmem:[#allocation7 + $0x18] sm:$0xff] }
 0x33a   :  { %vm5975_vm14 = vcmp.eq.s32.totalorder %v11056_v2, %v5974_v50  ;;  %v6152_v37 = vld [vmem:[#allocation9] sm:$0xff] }
 0x33b   :  { %vm5976_vm15 = vmand %vm5942_vm4, %vm5975_vm14  ;;  %v6160_v53 = vld [vmem:[#allocation9 + $0x40] sm:$0xff] }
 0x33c   :  { %5583 = vmatpush1.bf16.msra.mxu0 %v9971_v61  ;;  %5706 = vmatpush1.bf16.msra.mxu1 %v9973_v62  ;;  %v827_v61 = vld [vmem:[#allocation4 + $0x1738] sm:$0xff]  ;;  %v5966_v62 = vadd.f32 %v5965_v52, %v5960_v49  ;;  %v5977_v11 = vsel %vm5976_vm15, 1.0, %v10814_v38  ;;  %v6000_v50 = vld [vmem:[#allocation7 + $0x40] sm:$0xff] }
 0x33d   :  { %5584 = vmatprep.subr.bf16.mxu0 %v9988_v0  ;;  %5707 = vmatprep.subr.bf16.mxu1 %v9990_v1  ;;  %v5980_v0 = vstv %s11161_s2  ;;  %v10051_v1 = vcombine.low %v810_v43, %v818_v46  ;;  %v10070_v5 = vcombine.high %v827_v61, %v835_v26  ;;  %v10069_v12 = vcombine.low %v827_v61, %v835_v26  ;;  %v6176_v61 = vld [vmem:[#allocation9 + $0xc0] sm:$0xff] }
 0x33e   :  { %vm5981_vm2 = vcmp.eq.s32.totalorder %v11056_v2, %v5980_v0  ;;  %v10815_v43 = vmov 0.0|0.0   ;;  %v6169_v0 = vld [vmem:[#allocation9 + $0x88] sm:$0xff] }
 0x33f   :  { %vm5982_vm3 = vmand %vm5942_vm4, %vm5981_vm2 }
 0x340   :  { %5585 = vmatpush1.bf16.msra.mxu0 %v9987_v7  ;;  %5708 = vmatpush1.bf16.msra.mxu1 %v9989_v10  ;;  %v843_v7 = vld [vmem:[#allocation4 + $0x17b8] sm:$0xff]  ;;  %v5972_v10 = vadd.f32 %v5971_v3, %v5966_v62 }
 0x341   :  { %5586 = vmatprep.subr.bf16.mxu0 %v10004_v9  ;;  %5709 = vmatprep.subr.bf16.mxu1 %v10006_v34  ;;  %v5986_v9 = vstv %s11168_s24  ;;  %v10067_v34 = vcombine.low %v826_v58, %v834_v60  ;;  %v10086_v15 = vcombine.high %v843_v7, %v851_v8  ;;  %v6168_v60 = vld [vmem:[#allocation9 + $0x80] sm:$0xff] }
 0x342   :  { %vm5987_vm5 = vcmp.eq.s32.totalorder %v11056_v2, %v5986_v9  ;;  %v5997_v2 = vld [vmem:[#allocation7 + $0x28] sm:$0xff]  ;;  %v10121_v3 = vcombine.high %v6168_v60, %v6176_v61  ;;  %v10120_v6 = vcombine.low %v6168_v60, %v6176_v61  ;;  %v6200_v9 = vld [vmem:[#allocation9 + $0x180] sm:$0xff] }
 0x343   :  { %vm5988_vm1 = vmand %vm5942_vm4, %vm5987_vm5  ;;  %v10513_v46 = vpack.c.bf16 %v5997_v2, %v5994_v30  ;;  %vm10816_vm4 = vmmov 0   ;;  %v6240_v30 = vld [vmem:[#allocation9 + $0x2c0] sm:$0xff] }
 0x344   :  { %5587 = vmatpush1.bf16.msra.mxu0 %v10003_v18  ;;  %5710 = vmatpush1.bf16.msra.mxu1 %v10005_v21  ;;  %v5978_v18 = vadd.f32 %v5977_v11, %v5972_v10  ;;  %v5983_v21 = vsel %vm5982_vm3, 1.0, %v10814_v38  ;;  %v5989_v31 = vsel %vm5988_vm1, 1.0, %v10814_v38  ;;  %v6248_v61 = vld [vmem:[#allocation9 + $0x300] sm:$0xff] }
 0x345   :  { %5588 = vmatprep.subr.bf16.mxu0 %v10020_v22  ;;  %5711 = vmatprep.subr.bf16.mxu1 %v10022_v23  ;;  %v10085_v22 = vcombine.low %v843_v7, %v851_v8  ;;  %v10504_v23 = vpack.c.bf16 %v5996_v17, %v5993_v16  ;;  %v6193_v7 = vld [vmem:[#allocation9 + $0x148] sm:$0xff] }
 0x346   :  { %v5984_v29 = vadd.f32 %v5983_v21, %v5978_v18  ;;  %v10139_v11 = vcombine.high %v6185_v63, %v6193_v7  ;;  %v10138_v17 = vcombine.low %v6185_v63, %v6193_v7  ;;  %v6216_v18 = vld [vmem:[#allocation9 + $0x200] sm:$0xff] }
 0x347   :  { %v6272_v63 = vld [vmem:[#allocation9 + $0x3c0] sm:$0xff] }
 0x348   :  { %5589 = vmatpush1.bf16.msra.mxu0 %v10019_v59  ;;  %5712 = vmatpush1.bf16.msra.mxu1 %v10021_v36  ;;  %v10506_v59 = vpack.c.bf16 %v5995_v45, %v5992_v24  ;;  %v10508_v36 = vpack.c.bf16 %v6002_v27, %v5999_v25  ;;  %v5990_v49 = vadd.f32 %v5989_v31, %v5984_v29  ;;  %v6225_v24 = vld [vmem:[#allocation9 + $0x248] sm:$0xff]  ;;  %v6232_v29 = vld [vmem:[#allocation9 + $0x280] sm:$0xff] }
 0x349   :  { %5590 = vmatprep.subr.bf16.mxu0 %v10036_v39  ;;  %5713 = vmatprep.subr.bf16.mxu1 %v10038_v42  ;;  %v5998_v39 = vld [vmem:[#allocation7 + $0x30] sm:$0xff]  ;;  %v6001_v42 = vld [vmem:[#allocation7 + $0x48] sm:$0xff] }
 0x34a   :  { %v10510_v52 = vpack.c.bf16 %v6001_v42, %v5998_v39  ;;  %v5991_v26 = vmul.f32 0.125, %v5990_v49 }
 0x34c   :  { %5591 = vmatpush1.bf16.msra.mxu0 %v10035_v51  ;;  %5714 = vmatpush1.bf16.msra.mxu1 %v10037_v55  ;;  %v6003_v51 = vld [vmem:[#allocation7 + $0x58] sm:$0xff]  ;;  %v6153_v55 = vld [vmem:[#allocation9 + $0x8] sm:$0xff] }
 0x34d   :  { %5592 = vmatprep.subr.bf16.mxu0 %v10052_v56  ;;  %5715 = vmatprep.subr.bf16.mxu1 %v10054_v57  ;;  %v6161_v56 = vld [vmem:[#allocation9 + $0x48] sm:$0xff]  ;;  %v10105_v57 = vcombine.high %v6152_v37, %v6160_v53  ;;  %v10516_v58 = vpack.c.bf16 %v6003_v51, %v6000_v50 }
 0x34e   :  { %v10107_v62 = vcombine.high %v6153_v55, %v6161_v56 }
 0x350   :  { %5593 = vmatpush1.bf16.msra.mxu0 %v10051_v1  ;;  %5716 = vmatpush1.bf16.msra.mxu1 %v10053_v4  ;;  %v6177_v1 = vld [vmem:[#allocation9 + $0xc8] sm:$0xff]  ;;  %v10106_v4 = vcombine.low %v6153_v55, %v6161_v56  ;;  %v10185_v55 = vcombine.high %v6232_v29, %v6240_v30 }
 0x351   :  { %5594 = vmatprep.subr.bf16.mxu0 %v10068_v19  ;;  %5717 = vmatprep.subr.bf16.mxu1 %v10070_v5  ;;  %v6184_v19 = vld [vmem:[#allocation9 + $0x100] sm:$0xff]  ;;  %v10122_v10 = vcombine.low %v6169_v0, %v6177_v1 }
 0x352   :  { %v6192_v5 = vld [vmem:[#allocation9 + $0x140] sm:$0xff] }
 0x353   :  { %v10137_v8 = vcombine.high %v6184_v19, %v6192_v5 }
 0x354   :  { %5595 = vmatpush1.bf16.msra.mxu0 %v10067_v34  ;;  %5718 = vmatpush1.bf16.msra.mxu1 %v10069_v12  ;;  %v6208_v34 = vld [vmem:[#allocation9 + $0x1c0] sm:$0xff]  ;;  %v10136_v12 = vcombine.low %v6184_v19, %v6192_v5 }
 0x355   :  { %5596 = vmatprep.subr.bf16.mxu0 %v10084_v14  ;;  %5719 = vmatprep.subr.bf16.mxu1 %v10086_v15  ;;  %v6201_v14 = vld [vmem:[#allocation9 + $0x188] sm:$0xff]  ;;  %v10153_v16 = vcombine.high %v6200_v9, %v6208_v34 }
 0x356   :  { %v6209_v15 = vld [vmem:[#allocation9 + $0x1c8] sm:$0xff] }
 0x357   :  { %v10155_v21 = vcombine.high %v6201_v14, %v6209_v15  ;;  %v10154_v27 = vcombine.low %v6201_v14, %v6209_v15  ;;  %v6280_v15 = vld [vmem:[#allocation9 + $0x400] sm:$0xff] }
 0x358   :  { %5597 = vmatpush1.bf16.msra.mxu0 %v10083_v20  ;;  %5720 = vmatpush1.bf16.msra.mxu1 %v10085_v22  ;;  %v6224_v20 = vld [vmem:[#allocation9 + $0x240] sm:$0xff]  ;;  %v10152_v22 = vcombine.low %v6200_v9, %v6208_v34  ;;  %v6265_v34 = vld [vmem:[#allocation9 + $0x388] sm:$0xff] }
 0x359   :  { %10505 = vmatprep.subr.bf16.mxu0 %v10504_v23  ;;  %10512 = vmatprep.subr.bf16.mxu1 %v10815_v43  ;;  %v6217_v23 = vld [vmem:[#allocation9 + $0x208] sm:$0xff]  ;;  %v10169_v45 = vcombine.high %v6216_v18, %v6224_v20 }
 0x35a   :  { %v10170_v60 = vcombine.low %v6217_v23, %v6225_v24 }
 0x35b   :  { %5599 = vmatmul.mubr.bf16.vlgmr.msra.gmra.mrb[12].mxu0 %v10951_v32  ;;  %5722 = vmatmul.mubr.bf16.vlgmr.msra.gmra.mrb[12].mxu1 %v10951_v32  ;;  %v10104_v32 = vcombine.low %v6152_v37, %v6160_v53  ;;  %v6233_v37 = vld [vmem:[#allocation9 + $0x288] sm:$0xff] }
 0x35c   :  { %10507 = vmatpush1.bf16.msra.mxu0 %v10506_v59  ;;  %6072 = vmatprep.mubr.f32.mxu0 %v10814_v38  ;;  %v6241_v53 = vld [vmem:[#allocation9 + $0x2c8] sm:$0xff] }
 0x35d   :  { %10509 = vmatprep.subr.bf16.mxu0 %v10508_v36  ;;  %10514 = vmatpush3.bf16.msra.mxu1 %v10513_v46  ;;  %v10171_v36 = vcombine.high %v6217_v23, %v6225_v24  ;;  %v10168_v46 = vcombine.low %v6216_v18, %v6224_v20  ;;  %v6281_v20 = vld [vmem:[#allocation9 + $0x408] sm:$0xff]  ;;  %v6296_v24 = vld [vmem:[#allocation9 + $0x480] sm:$0xff] }
 0x35e   :  { %10501 = vmatprep.mubr.msk.f32.mxu1 %vm10816_vm4, %v10814_v38  ;;  %10515 = vmatprep.subr.bf16.mxu1 %v10815_v43  ;;  %v10123_v38 = vcombine.high %v6169_v0, %v6177_v1  ;;  %v10184_v1 = vcombine.low %v6232_v29, %v6240_v30  ;;  %v6297_v30 = vld [vmem:[#allocation9 + $0x488] sm:$0xff] }
 0x360   :  { %10511 = vmatpush1.bf16.msra.mxu0 %v10510_v52 }
 0x361   :  { %8540 = vmatprep.subr.bf16.mxu0 %v10105_v57  ;;  %10517 = vmatpush3.bf16.msra.mxu1 %v10516_v58 }
 0x362   :  { %8622 = vmatprep.subr.bf16.mxu1 %v10107_v62 }
 0x363   :  { %10102 = vmatmul.mubr.msk.f32.vlgmr.msra.gmra.mrb[16].mxu0 %vm6004_vm6, %v5991_v26 }
 0x364   :  { %8541 = vmatpush1.bf16.msra.mxu0 %v10104_v32  ;;  %10502 = vmatmul.mubr.msk.f32.vlgmr.msra.gmra.mrb[16].mxu1 %vm6004_vm6, %v5991_v26  ;;  %v6256_v26 = vld [vmem:[#allocation9 + $0x340] sm:$0xff]  ;;  %v10187_v32 = vcombine.high %v6233_v37, %v6241_v53 }
 0x365   :  { %8542 = vmatprep.subr.bf16.mxu0 %v10121_v3  ;;  %8623 = vmatpush1.bf16.msra.mxu1 %v10106_v4  ;;  %v6249_v3 = vld [vmem:[#allocation9 + $0x308] sm:$0xff]  ;;  %v10200_v9 = vcombine.low %v6248_v61, %v6256_v26 }
 0x366   :  { %8624 = vmatprep.subr.bf16.mxu1 %v10123_v38  ;;  %v6257_v4 = vld [vmem:[#allocation9 + $0x348] sm:$0xff]  ;;  %v10186_v38 = vcombine.low %v6233_v37, %v6241_v53 }
 0x367   :  { %v10202_v14 = vcombine.low %v6249_v3, %v6257_v4 }
 0x368   :  { %8543 = vmatpush1.bf16.msra.mxu0 %v10120_v6  ;;  %v6264_v6 = vld [vmem:[#allocation9 + $0x380] sm:$0xff] }
 0x369   :  { %8544 = vmatprep.subr.bf16.mxu0 %v10137_v8  ;;  %8625 = vmatpush1.bf16.msra.mxu1 %v10122_v10  ;;  %v10203_v8 = vcombine.high %v6249_v3, %v6257_v4  ;;  %v10216_v18 = vcombine.low %v6264_v6, %v6272_v63  ;;  %v6345_v4 = vld [vmem:[#allocation9 + $0x608] sm:$0xff] }
 0x36a   :  { %8626 = vmatprep.subr.bf16.mxu1 %v10139_v11  ;;  %v6273_v11 = vld [vmem:[#allocation9 + $0x3c8] sm:$0xff] }
 0x36b   :  { %v10218_v23 = vcombine.low %v6265_v34, %v6273_v11 }
 0x36c   :  { %8545 = vmatpush1.bf16.msra.mxu0 %v10136_v12  ;;  %v10217_v12 = vcombine.high %v6264_v6, %v6272_v63 }
 0x36d   :  { %8546 = vmatprep.subr.bf16.mxu0 %v10153_v16  ;;  %8627 = vmatpush1.bf16.msra.mxu1 %v10138_v17  ;;  %v6288_v16 = vld [vmem:[#allocation9 + $0x440] sm:$0xff]  ;;  %v10219_v17 = vcombine.high %v6265_v34, %v6273_v11  ;;  %v6369_v11 = vld [vmem:[#allocation9 + $0x6c8] sm:$0xff] }
 0x36e   :  { %v11194_v25 = vpop.f32.mrb[8].mxu0  ;;  %v11198_v59 = vpop.f32.mrb[8].mxu1  ;;  %8628 = vmatprep.subr.bf16.mxu1 %v10155_v21  ;;  %v6289_v21 = vld [vmem:[#allocation9 + $0x448] sm:$0xff]  ;;  %v10232_v29 = vcombine.low %v6280_v15, %v6288_v16 }
 0x36f   :  { %v5738_v2 = vmul.f32 %v11194_v25, %v11194_v25  ;;  %v11200_v31 = vpop.f32.mrb[9].mxu0  ;;  %v11204_v42 = vpop.f32.mrb[9].mxu1  ;;  %v5740_v50 = vmul.f32 %v11198_v59, %v11198_v59 }
 0x370   :  { %v5739_v39 = vmul.f32 %v11200_v31, %v11200_v31  ;;  %v5358_v43 = vpop.f32.mrb[10].mxu0  ;;  %8547 = vmatpush1.bf16.msra.mxu0 %v10152_v22  ;;  %v5481_v51 = vpop.f32.mrb[10].mxu1  ;;  %v5741_v62 = vmul.f32 %v11204_v42, %v11204_v42  ;;  %v10233_v22 = vcombine.high %v6280_v15, %v6288_v16  ;;  %v6376_v16 = vld [vmem:[#allocation9 + $0x700] sm:$0xff] }
 0x371   :  { %v5762_v49 = vsel %vm5746_vm0, %v5738_v2, 0.0  ;;  %v5359_v52 = vpop.f32.mrb[11].mxu0  ;;  %8548 = vmatprep.subr.bf16.mxu0 %v10169_v45  ;;  %v5482_v58 = vpop.f32.mrb[11].mxu1  ;;  %8629 = vmatpush1.bf16.msra.mxu1 %v10154_v27  ;;  %v5766_v19 = vsel %vm5746_vm0, %v5740_v50, 0.0  ;;  %v6304_v45 = vld [vmem:[#allocation9 + $0x4c0] sm:$0xff]  ;;  %v10235_v27 = vcombine.high %v6281_v20, %v6289_v21  ;;  %v6305_v2 = vld [vmem:[#allocation9 + $0x4c8] sm:$0xff] }
 0x372   :  { %v5763_v56 = vadd.f32 %v5762_v49, %v11043_v13  ;;  %v5764_v57 = vsel %vm5746_vm0, %v5739_v39, 0.0  ;;  %8630 = vmatprep.subr.bf16.mxu1 %v10171_v36  ;;  %v10201_v13 = vcombine.high %v6248_v61, %v6256_v26  ;;  %v5768_v7 = vsel %vm5746_vm0, %v5741_v62, 0.0  ;;  %v6312_v43 = vld [vmem:[#allocation9 + $0x500] sm:$0xff]  ;;  %v6313_v49 = vld [vmem:[#allocation9 + $0x508] sm:$0xff] }
 0x373   :  { %v10249_v36 = vcombine.high %v6296_v24, %v6304_v45  ;;  %v10234_v39 = vcombine.low %v6281_v20, %v6289_v21  ;;  %v10251_v37 = vcombine.high %v6297_v30, %v6305_v2  ;;  %v10248_v53 = vcombine.low %v6296_v24, %v6304_v45  ;;  %v6321_v50 = vld [vmem:[#allocation9 + $0x548] sm:$0xff]  ;;  %v6392_v45 = vld [vmem:[#allocation9 + $0x780] sm:$0xff] }
 0x374   :  { %v5765_v0 = vadd.f32 %v5764_v57, %v5763_v56  ;;  %8549 = vmatpush1.bf16.msra.mxu0 %v10168_v46  ;;  %v6320_v46 = vld [vmem:[#allocation9 + $0x540] sm:$0xff]  ;;  %v10250_v52 = vcombine.low %v6297_v30, %v6305_v2  ;;  %v10267_v57 = vcombine.high %v6313_v49, %v6321_v50  ;;  %v6337_v61 = vld [vmem:[#allocation9 + $0x5c8] sm:$0xff]  ;;  %v10266_v62 = vcombine.low %v6313_v49, %v6321_v50 }
 0x375   :  { %8550 = vmatprep.subr.bf16.mxu0 %v10185_v55  ;;  %8631 = vmatpush1.bf16.msra.mxu1 %v10170_v60  ;;  %v10265_v51 = vcombine.high %v6312_v43, %v6320_v46  ;;  %v6328_v55 = vld [vmem:[#allocation9 + $0x580] sm:$0xff]  ;;  %v10264_v58 = vcombine.low %v6312_v43, %v6320_v46  ;;  %v6329_v60 = vld [vmem:[#allocation9 + $0x588] sm:$0xff] }
 0x376   :  { %v5767_v5 = vadd.f32 %v5766_v19, %v5765_v0  ;;  %8632 = vmatprep.subr.bf16.mxu1 %v10187_v32  ;;  %v6336_v56 = vld [vmem:[#allocation9 + $0x5c0] sm:$0xff]  ;;  %v6353_v19 = vld [vmem:[#allocation9 + $0x648] sm:$0xff] }
 0x377   :  { %v10281_v26 = vcombine.high %v6328_v55, %v6336_v56  ;;  %v6344_v32 = vld [vmem:[#allocation9 + $0x600] sm:$0xff]  ;;  %v10280_v3 = vcombine.low %v6328_v55, %v6336_v56  ;;  %v10298_v63 = vcombine.low %v6345_v4, %v6353_v19  ;;  %v6385_v21 = vld [vmem:[#allocation9 + $0x748] sm:$0xff] }
 0x378   :  { %v11215_v10 = vadd.f32 %v5768_v7, %v5767_v5  ;;  %8551 = vmatpush1.bf16.msra.mxu0 %v10184_v1  ;;  %v6352_v0 = vld [vmem:[#allocation9 + $0x640] sm:$0xff]  ;;  %v10283_v1 = vcombine.high %v6329_v60, %v6337_v61  ;;  %v10282_v5 = vcombine.low %v6329_v60, %v6337_v61  ;;  %v6401_v2 = vld [vmem:[#allocation9 + $0x7c8] sm:$0xff] }
 0x379   :  { %8552 = vmatprep.subr.bf16.mxu0 %v10201_v13  ;;  %8633 = vmatpush1.bf16.msra.mxu1 %v10186_v38  ;;  %v10297_v13 = vcombine.high %v6344_v32, %v6352_v0  ;;  %v10299_v38 = vcombine.high %v6345_v4, %v6353_v19  ;;  %v10296_v6 = vcombine.low %v6344_v32, %v6352_v0  ;;  %v6360_v7 = vld [vmem:[#allocation9 + $0x680] sm:$0xff]  ;;  %v6417_v50 = vld [vmem:[#allocation9 + $0x848] sm:$0xff] }
 0x37a   :  { %8634 = vmatprep.subr.bf16.mxu1 %v10203_v8  ;;  %v6368_v8 = vld [vmem:[#allocation9 + $0x6c0] sm:$0xff] }
 0x37b   :  { %v10313_v34 = vcombine.high %v6360_v7, %v6368_v8  ;;  %v6408_v46 = vld [vmem:[#allocation9 + $0x800] sm:$0xff] }
 0x37c   :  { %8553 = vmatpush1.bf16.msra.mxu0 %v10200_v9  ;;  %v6361_v9 = vld [vmem:[#allocation9 + $0x688] sm:$0xff] }
 0x37d   :  { %8554 = vmatprep.subr.bf16.mxu0 %v10217_v12  ;;  %8635 = vmatpush1.bf16.msra.mxu1 %v10202_v14  ;;  %v10312_v12 = vcombine.low %v6360_v7, %v6368_v8  ;;  %v10314_v14 = vcombine.low %v6361_v9, %v6369_v11  ;;  %v10315_v15 = vcombine.high %v6361_v9, %v6369_v11  ;;  %v6424_v8 = vld [vmem:[#allocation9 + $0x880] sm:$0xff] }
 0x37e   :  { %8636 = vmatprep.subr.bf16.mxu1 %v10219_v17  ;;  %v6384_v17 = vld [vmem:[#allocation9 + $0x740] sm:$0xff] }
 0x37f   :  { %v10329_v20 = vcombine.high %v6376_v16, %v6384_v17  ;;  %v6432_v9 = vld [vmem:[#allocation9 + $0x8c0] sm:$0xff] }
 0x380   :  { %8555 = vmatpush1.bf16.msra.mxu0 %v10216_v18  ;;  %v6377_v18 = vld [vmem:[#allocation9 + $0x708] sm:$0xff] }
 0x381   :  { %8556 = vmatprep.subr.bf16.mxu0 %v10233_v22  ;;  %8637 = vmatpush1.bf16.msra.mxu1 %v10218_v23  ;;  %v10328_v22 = vcombine.low %v6376_v16, %v6384_v17  ;;  %v10330_v23 = vcombine.low %v6377_v18, %v6385_v21  ;;  %v10331_v24 = vcombine.high %v6377_v18, %v6385_v21 }
 0x382   :  { %8638 = vmatprep.subr.bf16.mxu1 %v10235_v27  ;;  %v6400_v27 = vld [vmem:[#allocation9 + $0x7c0] sm:$0xff]  ;;  %v10377_v18 = vcombine.high %v6424_v8, %v6432_v9 }
 0x383   :  { %v10345_v30 = vcombine.high %v6392_v45, %v6400_v27 }
 0x384   :  { %8557 = vmatpush1.bf16.msra.mxu0 %v10232_v29  ;;  %v6393_v29 = vld [vmem:[#allocation9 + $0x788] sm:$0xff] }
 0x385   :  { %8558 = vmatprep.subr.bf16.mxu0 %v10249_v36  ;;  %8639 = vmatpush1.bf16.msra.mxu1 %v10234_v39  ;;  %v10344_v36 = vcombine.low %v6392_v45, %v6400_v27  ;;  %v10346_v39 = vcombine.low %v6393_v29, %v6401_v2  ;;  %v10347_v43 = vcombine.high %v6393_v29, %v6401_v2  ;;  %v6449_v45 = vld [vmem:[#allocation9 + $0x948] sm:$0xff] }
 0x386   :  { %8640 = vmatprep.subr.bf16.mxu1 %v10251_v37  ;;  %v6416_v37 = vld [vmem:[#allocation9 + $0x840] sm:$0xff]  ;;  %v10376_v27 = vcombine.low %v6424_v8, %v6432_v9  ;;  %v6505_v9 = vld [vmem:[#allocation9 + $0xb08] sm:$0xff] }
 0x387   :  { %v10361_v49 = vcombine.high %v6408_v46, %v6416_v37  ;;  %v6512_v8 = vld [vmem:[#allocation9 + $0xb40] sm:$0xff] }
 0x388   :  { %8559 = vmatpush1.bf16.msra.mxu0 %v10248_v53  ;;  %v6409_v53 = vld [vmem:[#allocation9 + $0x808] sm:$0xff] }
 0x389   :  { %8560 = vmatprep.subr.bf16.mxu0 %v10265_v51  ;;  %8641 = vmatpush1.bf16.msra.mxu1 %v10250_v52  ;;  %v10360_v51 = vcombine.low %v6408_v46, %v6416_v37  ;;  %v10362_v52 = vcombine.low %v6409_v53, %v6417_v50  ;;  %v10363_v55 = vcombine.high %v6409_v53, %v6417_v50  ;;  %v6457_v46 = vld [vmem:[#allocation9 + $0x988] sm:$0xff] }
 0x38a   :  { %8642 = vmatprep.subr.bf16.mxu1 %v10267_v57  ;;  %v6465_v37 = vld [vmem:[#allocation9 + $0x9c8] sm:$0xff] }
 0x38c   :  { %8561 = vmatpush1.bf16.msra.mxu0 %v10264_v58 }
 0x38d   :  { %8562 = vmatprep.subr.bf16.mxu0 %v10281_v26  ;;  %8643 = vmatpush1.bf16.msra.mxu1 %v10266_v62 }
 0x38e   :  { %8644 = vmatprep.subr.bf16.mxu1 %v10283_v1 }
 0x390   :  { %8563 = vmatpush1.bf16.msra.mxu0 %v10280_v3 }
 0x391   :  { %8564 = vmatprep.subr.bf16.mxu0 %v10297_v13  ;;  %8645 = vmatpush1.bf16.msra.mxu1 %v10282_v5 }
 0x392   :  { %8646 = vmatprep.subr.bf16.mxu1 %v10299_v38 }
 0x394   :  { %8565 = vmatpush1.bf16.msra.mxu0 %v10296_v6 }
 0x395   :  { %8647 = vmatpush1.bf16.msra.mxu1 %v10298_v63  ;;  %8566 = vmatprep.subr.bf16.mxu0 %v10313_v34 }
 0x396   :  { %8648 = vmatprep.subr.bf16.mxu1 %v10315_v15 }
 0x398   :  { %8567 = vmatpush1.bf16.msra.mxu0 %v10312_v12  ;;  %v6425_v12 = vld [vmem:[#allocation9 + $0x888] sm:$0xff] }
 0x399   :  { %8649 = vmatpush1.bf16.msra.mxu1 %v10314_v14  ;;  %8568 = vmatprep.subr.bf16.mxu0 %v10329_v20  ;;  %v6433_v14 = vld [vmem:[#allocation9 + $0x8c8] sm:$0xff] }
 0x39a   :  { %8650 = vmatprep.subr.bf16.mxu1 %v10331_v24  ;;  %v10379_v21 = vcombine.high %v6425_v12, %v6433_v14  ;;  %v6441_v24 = vld [vmem:[#allocation9 + $0x908] sm:$0xff]  ;;  %v10378_v29 = vcombine.low %v6425_v12, %v6433_v14 }
 0x39b   :  { %v10395_v2 = vcombine.high %v6441_v24, %v6449_v45 }
 0x39c   :  { %8569 = vmatpush1.bf16.msra.mxu0 %v10328_v22  ;;  %v6440_v22 = vld [vmem:[#allocation9 + $0x900] sm:$0xff] }
 0x39d   :  { %8651 = vmatpush1.bf16.msra.mxu1 %v10330_v23  ;;  %8570 = vmatprep.subr.bf16.mxu0 %v10345_v30  ;;  %v6448_v23 = vld [vmem:[#allocation9 + $0x940] sm:$0xff] }
 0x39e   :  { %8652 = vmatprep.subr.bf16.mxu1 %v10347_v43  ;;  %v10393_v30 = vcombine.high %v6440_v22, %v6448_v23  ;;  %v10817_v43 = vmov 0   ;;  %v10392_v53 = vcombine.low %v6440_v22, %v6448_v23  ;;  %v6529_v22 = vld [vmem:[#allocation9 + $0xbc8] sm:$0xff] }
 0x3a0   :  { %8571 = vmatpush1.bf16.msra.mxu0 %v10344_v36  ;;  %v6456_v36 = vld [vmem:[#allocation9 + $0x980] sm:$0xff] }
 0x3a1   :  { %8653 = vmatpush1.bf16.msra.mxu1 %v10346_v39  ;;  %8581 = vmatprep.subr.bf16.mxu0 %v10361_v49  ;;  %v6464_v39 = vld [vmem:[#allocation9 + $0x9c0] sm:$0xff]  ;;  %v10394_v49 = vcombine.low %v6441_v24, %v6449_v45 }
 0x3a2   :  { %8663 = vmatprep.subr.bf16.mxu1 %v10363_v55  ;;  %v10409_v50 = vcombine.high %v6456_v36, %v6464_v39  ;;  %v6480_v55 = vld [vmem:[#allocation9 + $0xa40] sm:$0xff] }
 0x42e   :  { %v11217_v56 = vpop.f32.mrb[12].mxu0  ;;  %v11221_v58 = vpop.f32.mrb[12].mxu1 }
 0x42f   :  { %v5742_v57 = vmul.f32 %v11217_v56, %v11217_v56  ;;  %v11223_v60 = vpop.f32.mrb[13].mxu0  ;;  %v11227_v26 = vpop.f32.mrb[13].mxu1  ;;  %v5744_v0 = vmul.f32 %v11221_v58, %v11221_v58 }
 0x430   :  { %v5743_v61 = vmul.f32 %v11223_v60, %v11223_v60  ;;  %v5604_v62 = vpop.f32.mrb[14].mxu0  ;;  %v5727_v1 = vpop.f32.mrb[14].mxu1  ;;  %v5745_v5 = vmul.f32 %v11227_v26, %v11227_v26 }
 0x431   :  { %v5770_v32 = vsel %vm5746_vm0, %v5742_v57, 0.0  ;;  %v5605_v3 = vpop.f32.mrb[15].mxu0  ;;  %v5728_v13 = vpop.f32.mrb[15].mxu1  ;;  %v5774_v6 = vsel %vm5746_vm0, %v5744_v0, 0.0  ;;  %v6473_v57 = vld [vmem:[#allocation9 + $0xa08] sm:$0xff]  ;;  %v10408_v62 = vcombine.low %v6456_v36, %v6464_v39  ;;  %v6163_v36 = vld [vmem:[#allocation9 + $0x58] sm:$0xff] }
 0x432   :  { %v5771_v4 = vadd.f32 %v5770_v32, %v11215_v10  ;;  %v5772_v19 = vsel %vm5746_vm0, %v5743_v61, 0.0  ;;  %v5776_v11 = vsel %vm5746_vm0, %v5745_v5, 0.0  ;;  %v6481_v61 = vld [vmem:[#allocation9 + $0xa48] sm:$0xff]  ;;  %v10410_v32 = vcombine.low %v6457_v46, %v6465_v37  ;;  %v6488_v3 = vld [vmem:[#allocation9 + $0xa80] sm:$0xff] }
 0x433   :  { %v10427_v1 = vcombine.high %v6473_v57, %v6481_v61  ;;  %v6497_v13 = vld [vmem:[#allocation9 + $0xac8] sm:$0xff] }
 0x434   :  { %v5773_v38 = vadd.f32 %v5772_v19, %v5771_v4  ;;  %v6496_v4 = vld [vmem:[#allocation9 + $0xac0] sm:$0xff]  ;;  %v6489_v19 = vld [vmem:[#allocation9 + $0xa88] sm:$0xff] }
 0x435   :  { %v10442_v12 = vcombine.low %v6489_v19, %v6497_v13 }
 0x436   :  { %v6074_v63 = vpop.f32.mrb[16].mxu0  ;;  %v5775_v7 = vadd.f32 %v5774_v6, %v5773_v38  ;;  %v10426_v38 = vcombine.low %v6473_v57, %v6481_v61  ;;  %v10441_v6 = vcombine.high %v6488_v3, %v6496_v4  ;;  %v6179_v57 = vld [vmem:[#allocation9 + $0xd8] sm:$0xff] }
 0x437   :  { %v6076_v34 = vpop.f32.mrb[17].mxu0  ;;  %v11240_v16 = vpop.f32.mrb[16].mxu1  ;;  %v11242_v17 = vpack.c.bf16 %v6074_v63, %v6074_v63  ;;  %v10443_v63 = vcombine.high %v6489_v19, %v6497_v13 }
 0x438   :  { %v11238_v15 = vpack.c.bf16 %v6076_v34, %v6076_v34  ;;  %v5777_v10 = vadd.f32 %v5776_v11, %v5775_v7  ;;  %v10503_v20 = vpop.f32.mrb[17].mxu1  ;;  %v6504_v7 = vld [vmem:[#allocation9 + $0xb00] sm:$0xff]  ;;  %v6513_v34 = vld [vmem:[#allocation9 + $0xb48] sm:$0xff]  ;;  %v10440_v11 = vcombine.low %v6488_v3, %v6496_v4  ;;  %v6187_v3 = vld [vmem:[#allocation9 + $0x118] sm:$0xff] }
 0x439   :  { %v10457_v14 = vcombine.high %v6504_v7, %v6512_v8  ;;  %v6528_v20 = vld [vmem:[#allocation9 + $0xbc0] sm:$0xff]  ;;  %v10456_v23 = vcombine.low %v6504_v7, %v6512_v8  ;;  %v10458_v24 = vcombine.low %v6505_v9, %v6513_v34  ;;  %v6195_v4 = vld [vmem:[#allocation9 + $0x158] sm:$0xff] }
 0x43a   :  { %5778 = vadd.xlane.f32.xlu0 %v5777_v10  ;;  %8572 = vmatprep.mubr.bf16.mxu0 %v11238_v15  ;;  %v10459_v10 = vcombine.high %v6505_v9, %v6513_v34  ;;  %v6211_v7 = vld [vmem:[#allocation9 + $0x1d8] sm:$0xff]  ;;  %v10142_v9 = vcombine.low %v6187_v3, %v6195_v4 }
 0x43b   :  { %8654 = vmatprep.mubr.bf16.mxu1 %v11238_v15  ;;  %8573 = vmatmul.mubr.bf16.vlgmr.msra.gmra.mrb[20].mxu0 %v11242_v17 }
 0x43c   :  { %8582 = vmatpush1.bf16.msra.mxu0 %v10360_v51  ;;  %8655 = vmatmul.mubr.bf16.vlgmr.msra.gmra.mrb[20].mxu1 %v11242_v17  ;;  %v10411_v51 = vcombine.high %v6457_v46, %v6465_v37 }
 0x43d   :  { %8664 = vmatpush1.bf16.msra.mxu1 %v10362_v52  ;;  %8583 = vmatprep.subr.bf16.mxu0 %v10377_v18  ;;  %v6472_v52 = vld [vmem:[#allocation9 + $0xa00] sm:$0xff] }
 0x43e   :  { %8665 = vmatprep.subr.bf16.mxu1 %v10379_v21  ;;  %8613 = vmatprep.mubr.bf16.mxu0 %v10817_v43  ;;  %v10425_v0 = vcombine.high %v6472_v52, %v6480_v55  ;;  %v10424_v5 = vcombine.low %v6472_v52, %v6480_v55  ;;  %v6520_v18 = vld [vmem:[#allocation9 + $0xb80] sm:$0xff]  ;;  %v6521_v21 = vld [vmem:[#allocation9 + $0xb88] sm:$0xff]  ;;  %v6171_v55 = vld [vmem:[#allocation9 + $0x98] sm:$0xff] }
 0x43f   :  { %8695 = vmatprep.mubr.bf16.mxu1 %v10817_v43  ;;  %v10473_v45 = vcombine.high %v6520_v18, %v6528_v20  ;;  %v10472_v39 = vcombine.low %v6520_v18, %v6528_v20  ;;  %v10474_v46 = vcombine.low %v6521_v21, %v6529_v22  ;;  %v10126_v19 = vcombine.low %v6171_v55, %v6179_v57  ;;  %v6227_v18 = vld [vmem:[#allocation9 + $0x258] sm:$0xff] }
 0x440   :  { %8584 = vmatpush1.bf16.msra.mxu0 %v10376_v27  ;;  %v10475_v27 = vcombine.high %v6521_v21, %v6529_v22 }
 0x441   :  { %8666 = vmatpush1.bf16.msra.mxu1 %v10378_v29  ;;  %8585 = vmatprep.subr.bf16.mxu0 %v10393_v30  ;;  %v6154_v29 = vld [vmem:[#allocation9 + $0x10] sm:$0xff] }
 0x442   :  { %8667 = vmatprep.subr.bf16.mxu1 %v10395_v2  ;;  %v6162_v30 = vld [vmem:[#allocation9 + $0x50] sm:$0xff]  ;;  %v6155_v2 = vld [vmem:[#allocation9 + $0x18] sm:$0xff] }
 0x443   :  { %v10109_v37 = vcombine.high %v6154_v29, %v6162_v30  ;;  %v10108_v52 = vcombine.low %v6154_v29, %v6162_v30  ;;  %v10110_v61 = vcombine.low %v6155_v2, %v6163_v36  ;;  %v6243_v29 = vld [vmem:[#allocation9 + $0x2d8] sm:$0xff] }
 0x444   :  { %8586 = vmatpush1.bf16.msra.mxu0 %v10392_v53  ;;  %v10111_v53 = vcombine.high %v6155_v2, %v6163_v36 }
 0x445   :  { %8668 = vmatpush1.bf16.msra.mxu1 %v10394_v49  ;;  %8587 = vmatprep.subr.bf16.mxu0 %v10409_v50  ;;  %v11252_v49 = vpack.c.bf16 %v11240_v16, %v11240_v16  ;;  %v6170_v50 = vld [vmem:[#allocation9 + $0x90] sm:$0xff] }
 0x446   :  { %8669 = vmatprep.subr.bf16.mxu1 %v10411_v51  ;;  %v6178_v51 = vld [vmem:[#allocation9 + $0xd0] sm:$0xff] }
 0x447   :  { %v10124_v16 = vcombine.low %v6170_v50, %v6178_v51 }
 0x448   :  { %8588 = vmatpush1.bf16.msra.mxu0 %v10408_v62  ;;  %v10125_v62 = vcombine.high %v6170_v50, %v6178_v51  ;;  %v6259_v50 = vld [vmem:[#allocation9 + $0x358] sm:$0xff] }
 0x449   :  { %8670 = vmatpush1.bf16.msra.mxu1 %v10410_v32  ;;  %8589 = vmatprep.subr.bf16.mxu0 %v10425_v0  ;;  %v6186_v32 = vld [vmem:[#allocation9 + $0x110] sm:$0xff] }
 0x44a   :  { %8671 = vmatprep.subr.bf16.mxu1 %v10427_v1  ;;  %v6194_v0 = vld [vmem:[#allocation9 + $0x150] sm:$0xff]  ;;  %v10127_v1 = vcombine.high %v6171_v55, %v6179_v57 }
 0x44b   :  { %v10141_v13 = vcombine.high %v6186_v32, %v6194_v0  ;;  %v10140_v8 = vcombine.low %v6186_v32, %v6194_v0  ;;  %v6267_v32 = vld [vmem:[#allocation9 + $0x398] sm:$0xff] }
 0x44c   :  { %8590 = vmatpush1.bf16.msra.mxu0 %v10424_v5  ;;  %v10143_v5 = vcombine.high %v6187_v3, %v6195_v4  ;;  %v6275_v0 = vld [vmem:[#allocation9 + $0x3d8] sm:$0xff] }
 0x44d   :  { %8672 = vmatpush1.bf16.msra.mxu1 %v10426_v38  ;;  %8591 = vmatprep.subr.bf16.mxu0 %v10441_v6  ;;  %v6202_v38 = vld [vmem:[#allocation9 + $0x190] sm:$0xff] }
 0x44e   :  { %8673 = vmatprep.subr.bf16.mxu1 %v10443_v63  ;;  %v6210_v6 = vld [vmem:[#allocation9 + $0x1d0] sm:$0xff]  ;;  %v6203_v63 = vld [vmem:[#allocation9 + $0x198] sm:$0xff] }
 0x44f   :  { %v10157_v34 = vcombine.high %v6202_v38, %v6210_v6  ;;  %v10156_v20 = vcombine.low %v6202_v38, %v6210_v6  ;;  %v10158_v21 = vcombine.low %v6203_v63, %v6211_v7  ;;  %v6291_v38 = vld [vmem:[#allocation9 + $0x458] sm:$0xff] }
 0x450   :  { %8592 = vmatpush1.bf16.msra.mxu0 %v10440_v11  ;;  %v10159_v11 = vcombine.high %v6203_v63, %v6211_v7  ;;  %v10222_v63 = vcombine.low %v6267_v32, %v6275_v0 }
 0x451   :  { %8674 = vmatpush1.bf16.msra.mxu1 %v10442_v12  ;;  %8593 = vmatprep.subr.bf16.mxu0 %v10457_v14  ;;  %v6218_v12 = vld [vmem:[#allocation9 + $0x210] sm:$0xff] }
 0x452   :  { %8675 = vmatprep.subr.bf16.mxu1 %v10459_v10  ;;  %v6226_v14 = vld [vmem:[#allocation9 + $0x250] sm:$0xff]  ;;  %v6219_v10 = vld [vmem:[#allocation9 + $0x218] sm:$0xff] }
 0x453   :  { %v10173_v22 = vcombine.high %v6218_v12, %v6226_v14  ;;  %v10172_v30 = vcombine.low %v6218_v12, %v6226_v14  ;;  %v10174_v2 = vcombine.low %v6219_v10, %v6227_v18  ;;  %v6307_v12 = vld [vmem:[#allocation9 + $0x4d8] sm:$0xff] }
 0x454   :  { %8594 = vmatpush1.bf16.msra.mxu0 %v10456_v23  ;;  %v10175_v23 = vcombine.high %v6219_v10, %v6227_v18 }
 0x455   :  { %8676 = vmatpush1.bf16.msra.mxu1 %v10458_v24  ;;  %8595 = vmatprep.subr.bf16.mxu0 %v10473_v45  ;;  %v6234_v24 = vld [vmem:[#allocation9 + $0x290] sm:$0xff] }
 0x456   :  { %8677 = vmatprep.subr.bf16.mxu1 %v10475_v27  ;;  %v6242_v45 = vld [vmem:[#allocation9 + $0x2d0] sm:$0xff]  ;;  %v6235_v27 = vld [vmem:[#allocation9 + $0x298] sm:$0xff] }
 0x457   :  { %v10189_v36 = vcombine.high %v6234_v24, %v6242_v45  ;;  %v10188_v51 = vcombine.low %v6234_v24, %v6242_v45  ;;  %v6323_v24 = vld [vmem:[#allocation9 + $0x558] sm:$0xff] }
 0x458   :  { %8596 = vmatpush1.bf16.msra.mxu0 %v10472_v39  ;;  %v10191_v39 = vcombine.high %v6235_v27, %v6243_v29 }
 0x459   :  { %8678 = vmatpush1.bf16.msra.mxu1 %v10474_v46  ;;  %8704 = vmatprep.subr.bf16.mxu0 %v10109_v37  ;;  %v6250_v46 = vld [vmem:[#allocation9 + $0x310] sm:$0xff] }
 0x45a   :  { %8786 = vmatprep.subr.bf16.mxu1 %v10111_v53  ;;  %v6258_v37 = vld [vmem:[#allocation9 + $0x350] sm:$0xff]  ;;  %v6251_v53 = vld [vmem:[#allocation9 + $0x318] sm:$0xff] }
 0x45b   :  { %8614 = vmatmul.mubr.bf16.vlgmr.msra.gmra.mrb[20].mxu0 %v11252_v49  ;;  %v10205_v55 = vcombine.high %v6250_v46, %v6258_v37  ;;  %v10207_v57 = vcombine.high %v6251_v53, %v6259_v50  ;;  %v10206_v3 = vcombine.low %v6251_v53, %v6259_v50 }
 0x45c   :  { %8696 = vmatmul.mubr.bf16.vlgmr.msra.gmra.mrb[20].mxu1 %v11252_v49  ;;  %8705 = vmatpush1.bf16.msra.mxu0 %v10108_v52  ;;  %v10190_v52 = vcombine.low %v6235_v27, %v6243_v29 }
 0x45d   :  { %8736 = vmatprep.mubr.bf16.mxu0 %v11238_v15  ;;  %8787 = vmatpush1.bf16.msra.mxu1 %v10110_v61  ;;  %v6266_v61 = vld [vmem:[#allocation9 + $0x390] sm:$0xff] }
 0x45e   :  { %8818 = vmatprep.mubr.bf16.mxu1 %v11238_v15  ;;  %8706 = vmatprep.subr.bf16.mxu0 %v10125_v62  ;;  %v6274_v62 = vld [vmem:[#allocation9 + $0x3d0] sm:$0xff] }
 0x45f   :  { %8788 = vmatprep.subr.bf16.mxu1 %v10127_v1  ;;  %v10204_v1 = vcombine.low %v6250_v46, %v6258_v37  ;;  %v10221_v4 = vcombine.high %v6266_v61, %v6274_v62  ;;  %v10220_v6 = vcombine.low %v6266_v61, %v6274_v62  ;;  %v6339_v46 = vld [vmem:[#allocation9 + $0x5d8] sm:$0xff] }
 0x460   :  { %8707 = vmatpush1.bf16.msra.mxu0 %v10124_v16  ;;  %v10223_v16 = vcombine.high %v6267_v32, %v6275_v0  ;;  %v6355_v61 = vld [vmem:[#allocation9 + $0x658] sm:$0xff] }
 0x461   :  { %8789 = vmatpush1.bf16.msra.mxu1 %v10126_v19  ;;  %8708 = vmatprep.subr.bf16.mxu0 %v10141_v13  ;;  %v6282_v19 = vld [vmem:[#allocation9 + $0x410] sm:$0xff] }
 0x462   :  { %8790 = vmatprep.subr.bf16.mxu1 %v10143_v5  ;;  %v6290_v13 = vld [vmem:[#allocation9 + $0x450] sm:$0xff]  ;;  %v6283_v5 = vld [vmem:[#allocation9 + $0x418] sm:$0xff] }
 0x463   :  { %v10237_v7 = vcombine.high %v6282_v19, %v6290_v13  ;;  %v10236_v14 = vcombine.low %v6282_v19, %v6290_v13  ;;  %v10238_v10 = vcombine.low %v6283_v5, %v6291_v38  ;;  %v6371_v19 = vld [vmem:[#allocation9 + $0x6d8] sm:$0xff] }
 0x464   :  { %8709 = vmatpush1.bf16.msra.mxu0 %v10140_v8  ;;  %v10239_v8 = vcombine.high %v6283_v5, %v6291_v38 }
 0x465   :  { %8791 = vmatpush1.bf16.msra.mxu1 %v10142_v9  ;;  %8710 = vmatprep.subr.bf16.mxu0 %v10157_v34  ;;  %v6298_v9 = vld [vmem:[#allocation9 + $0x490] sm:$0xff] }
 0x466   :  { %8792 = vmatprep.subr.bf16.mxu1 %v10159_v11  ;;  %v6306_v34 = vld [vmem:[#allocation9 + $0x4d0] sm:$0xff]  ;;  %v6299_v11 = vld [vmem:[#allocation9 + $0x498] sm:$0xff] }
 0x467   :  { %v10253_v18 = vcombine.high %v6298_v9, %v6306_v34  ;;  %v10252_v45 = vcombine.low %v6298_v9, %v6306_v34  ;;  %v10254_v27 = vcombine.low %v6299_v11, %v6307_v12  ;;  %v6387_v9 = vld [vmem:[#allocation9 + $0x758] sm:$0xff] }
 0x468   :  { %8711 = vmatpush1.bf16.msra.mxu0 %v10156_v20  ;;  %v10255_v20 = vcombine.high %v6299_v11, %v6307_v12 }
 0x469   :  { %8793 = vmatpush1.bf16.msra.mxu1 %v10158_v21  ;;  %8712 = vmatprep.subr.bf16.mxu0 %v10173_v22  ;;  %v6314_v21 = vld [vmem:[#allocation9 + $0x510] sm:$0xff] }
 0x46a   :  { %8794 = vmatprep.subr.bf16.mxu1 %v10175_v23  ;;  %v6322_v22 = vld [vmem:[#allocation9 + $0x550] sm:$0xff]  ;;  %v6315_v23 = vld [vmem:[#allocation9 + $0x518] sm:$0xff] }
 0x46b   :  { %v10269_v29 = vcombine.high %v6314_v21, %v6322_v22  ;;  %v10268_v37 = vcombine.low %v6314_v21, %v6322_v22  ;;  %v10270_v53 = vcombine.low %v6315_v23, %v6323_v24  ;;  %v6403_v21 = vld [vmem:[#allocation9 + $0x7d8] sm:$0xff] }
 0x46c   :  { %8713 = vmatpush1.bf16.msra.mxu0 %v10172_v30  ;;  %v10271_v30 = vcombine.high %v6315_v23, %v6323_v24 }
 0x46d   :  { %8795 = vmatpush1.bf16.msra.mxu1 %v10174_v2  ;;  %8714 = vmatprep.subr.bf16.mxu0 %v10189_v36  ;;  %v6330_v2 = vld [vmem:[#allocation9 + $0x590] sm:$0xff] }
 0x46e   :  { %8796 = vmatprep.subr.bf16.mxu1 %v10191_v39  ;;  %v6338_v36 = vld [vmem:[#allocation9 + $0x5d0] sm:$0xff]  ;;  %v6331_v39 = vld [vmem:[#allocation9 + $0x598] sm:$0xff] }
 0x46f   :  { %v10285_v50 = vcombine.high %v6330_v2, %v6338_v36  ;;  %v10284_v62 = vcombine.low %v6330_v2, %v6338_v36  ;;  %v10286_v32 = vcombine.low %v6331_v39, %v6339_v46  ;;  %v6419_v2 = vld [vmem:[#allocation9 + $0x858] sm:$0xff] }
 0x470   :  { %8715 = vmatpush1.bf16.msra.mxu0 %v10188_v51  ;;  %v10287_v51 = vcombine.high %v6331_v39, %v6339_v46 }
 0x471   :  { %8797 = vmatpush1.bf16.msra.mxu1 %v10190_v52  ;;  %8716 = vmatprep.subr.bf16.mxu0 %v10205_v55  ;;  %v6346_v52 = vld [vmem:[#allocation9 + $0x610] sm:$0xff] }
 0x472   :  { %8798 = vmatprep.subr.bf16.mxu1 %v10207_v57  ;;  %v6354_v55 = vld [vmem:[#allocation9 + $0x650] sm:$0xff]  ;;  %v6347_v57 = vld [vmem:[#allocation9 + $0x618] sm:$0xff] }
 0x473   :  { %v10301_v0 = vcombine.high %v6346_v52, %v6354_v55  ;;  %v10300_v13 = vcombine.low %v6346_v52, %v6354_v55  ;;  %v10302_v5 = vcombine.low %v6347_v57, %v6355_v61  ;;  %v6435_v52 = vld [vmem:[#allocation9 + $0x8d8] sm:$0xff] }
 0x474   :  { %8717 = vmatpush1.bf16.msra.mxu0 %v10204_v1  ;;  %v10303_v1 = vcombine.high %v6347_v57, %v6355_v61 }
 0x475   :  { %8799 = vmatpush1.bf16.msra.mxu1 %v10206_v3  ;;  %8718 = vmatprep.subr.bf16.mxu0 %v10221_v4  ;;  %v6362_v3 = vld [vmem:[#allocation9 + $0x690] sm:$0xff] }
 0x476   :  { %8800 = vmatprep.subr.bf16.mxu1 %v10223_v16  ;;  %v6370_v4 = vld [vmem:[#allocation9 + $0x6d0] sm:$0xff]  ;;  %v6363_v16 = vld [vmem:[#allocation9 + $0x698] sm:$0xff] }
 0x477   :  { %v10317_v38 = vcombine.high %v6362_v3, %v6370_v4  ;;  %v10316_v34 = vcombine.low %v6362_v3, %v6370_v4  ;;  %v10318_v11 = vcombine.low %v6363_v16, %v6371_v19  ;;  %v6451_v3 = vld [vmem:[#allocation9 + $0x958] sm:$0xff] }
 0x478   :  { %8719 = vmatpush1.bf16.msra.mxu0 %v10220_v6  ;;  %v10319_v6 = vcombine.high %v6363_v16, %v6371_v19 }
 0x479   :  { %8801 = vmatpush1.bf16.msra.mxu1 %v10222_v63  ;;  %8720 = vmatprep.subr.bf16.mxu0 %v10237_v7  ;;  %v6378_v63 = vld [vmem:[#allocation9 + $0x710] sm:$0xff] }
 0x47a   :  { %8802 = vmatprep.subr.bf16.mxu1 %v10239_v8  ;;  %v6386_v7 = vld [vmem:[#allocation9 + $0x750] sm:$0xff]  ;;  %v6379_v8 = vld [vmem:[#allocation9 + $0x718] sm:$0xff] }
 0x47b   :  { %v10333_v12 = vcombine.high %v6378_v63, %v6386_v7  ;;  %v10332_v22 = vcombine.low %v6378_v63, %v6386_v7  ;;  %v10334_v23 = vcombine.low %v6379_v8, %v6387_v9  ;;  %v6467_v63 = vld [vmem:[#allocation9 + $0x9d8] sm:$0xff] }
 0x47c   :  { %8721 = vmatpush1.bf16.msra.mxu0 %v10236_v14  ;;  %v10335_v14 = vcombine.high %v6379_v8, %v6387_v9 }
 0x47d   :  { %8803 = vmatpush1.bf16.msra.mxu1 %v10238_v10  ;;  %8722 = vmatprep.subr.bf16.mxu0 %v10253_v18  ;;  %v6394_v10 = vld [vmem:[#allocation9 + $0x790] sm:$0xff] }
 0x47e   :  { %8804 = vmatprep.subr.bf16.mxu1 %v10255_v20  ;;  %v6402_v18 = vld [vmem:[#allocation9 + $0x7d0] sm:$0xff]  ;;  %v6395_v20 = vld [vmem:[#allocation9 + $0x798] sm:$0xff] }
 0x47f   :  { %v10349_v24 = vcombine.high %v6394_v10, %v6402_v18  ;;  %v10348_v36 = vcombine.low %v6394_v10, %v6402_v18  ;;  %v10350_v39 = vcombine.low %v6395_v20, %v6403_v21  ;;  %v6483_v10 = vld [vmem:[#allocation9 + $0xa58] sm:$0xff] }
 0x480   :  { %8723 = vmatpush1.bf16.msra.mxu0 %v10252_v45  ;;  %v10351_v45 = vcombine.high %v6395_v20, %v6403_v21 }
 0x481   :  { %8805 = vmatpush1.bf16.msra.mxu1 %v10254_v27  ;;  %8724 = vmatprep.subr.bf16.mxu0 %v10269_v29  ;;  %v6410_v27 = vld [vmem:[#allocation9 + $0x810] sm:$0xff] }
 0x482   :  { %8806 = vmatprep.subr.bf16.mxu1 %v10271_v30  ;;  %v6418_v29 = vld [vmem:[#allocation9 + $0x850] sm:$0xff]  ;;  %v6411_v30 = vld [vmem:[#allocation9 + $0x818] sm:$0xff] }
 0x483   :  { %v10365_v46 = vcombine.high %v6410_v27, %v6418_v29  ;;  %v10364_v55 = vcombine.low %v6410_v27, %v6418_v29  ;;  %v10366_v57 = vcombine.low %v6411_v30, %v6419_v2  ;;  %v6499_v27 = vld [vmem:[#allocation9 + $0xad8] sm:$0xff] }
 0x484   :  { %8725 = vmatpush1.bf16.msra.mxu0 %v10268_v37  ;;  %v10367_v37 = vcombine.high %v6411_v30, %v6419_v2 }
 0x485   :  { %8807 = vmatpush1.bf16.msra.mxu1 %v10270_v53  ;;  %8726 = vmatprep.subr.bf16.mxu0 %v10285_v50  ;;  %v6426_v53 = vld [vmem:[#allocation9 + $0x890] sm:$0xff] }
 0x486   :  { %8808 = vmatprep.subr.bf16.mxu1 %v10287_v51  ;;  %v6434_v50 = vld [vmem:[#allocation9 + $0x8d0] sm:$0xff]  ;;  %v6427_v51 = vld [vmem:[#allocation9 + $0x898] sm:$0xff] }
 0x487   :  { %v10381_v61 = vcombine.high %v6426_v53, %v6434_v50  ;;  %v10380_v4 = vcombine.low %v6426_v53, %v6434_v50  ;;  %v10382_v16 = vcombine.low %v6427_v51, %v6435_v52  ;;  %v6515_v53 = vld [vmem:[#allocation9 + $0xb58] sm:$0xff] }
 0x488   :  { %8727 = vmatpush1.bf16.msra.mxu0 %v10284_v62  ;;  %v10383_v62 = vcombine.high %v6427_v51, %v6435_v52 }
 0x489   :  { %8809 = vmatpush1.bf16.msra.mxu1 %v10286_v32  ;;  %8728 = vmatprep.subr.bf16.mxu0 %v10301_v0  ;;  %v6442_v32 = vld [vmem:[#allocation9 + $0x910] sm:$0xff] }
 0x48a   :  { %8810 = vmatprep.subr.bf16.mxu1 %v10303_v1  ;;  %v6450_v0 = vld [vmem:[#allocation9 + $0x950] sm:$0xff]  ;;  %v6443_v1 = vld [vmem:[#allocation9 + $0x918] sm:$0xff] }
 0x48b   :  { %v10397_v19 = vcombine.high %v6442_v32, %v6450_v0  ;;  %v10396_v7 = vcombine.low %v6442_v32, %v6450_v0  ;;  %v10398_v8 = vcombine.low %v6443_v1, %v6451_v3  ;;  %v6531_v32 = vld [vmem:[#allocation9 + $0xbd8] sm:$0xff] }
 0x48c   :  { %8729 = vmatpush1.bf16.msra.mxu0 %v10300_v13  ;;  %v10399_v13 = vcombine.high %v6443_v1, %v6451_v3 }
 0x48d   :  { %8811 = vmatpush1.bf16.msra.mxu1 %v10302_v5  ;;  %8730 = vmatprep.subr.bf16.mxu0 %v10317_v38  ;;  %v6458_v5 = vld [vmem:[#allocation9 + $0x990] sm:$0xff] }
 0x48e   :  { %8812 = vmatprep.subr.bf16.mxu1 %v10319_v6  ;;  %v6466_v38 = vld [vmem:[#allocation9 + $0x9d0] sm:$0xff]  ;;  %v6459_v6 = vld [vmem:[#allocation9 + $0x998] sm:$0xff] }
 0x48f   :  { %v10413_v9 = vcombine.high %v6458_v5, %v6466_v38  ;;  %v10412_v18 = vcombine.low %v6458_v5, %v6466_v38  ;;  %v10414_v20 = vcombine.low %v6459_v6, %v6467_v63  ;;  %v6165_v5 = vld [vmem:[#allocation9 + $0x68] sm:$0xff] }
 0x490   :  { %8731 = vmatpush1.bf16.msra.mxu0 %v10316_v34  ;;  %v10415_v34 = vcombine.high %v6459_v6, %v6467_v63 }
 0x491   :  { %8813 = vmatpush1.bf16.msra.mxu1 %v10318_v11  ;;  %8732 = vmatprep.subr.bf16.mxu0 %v10333_v12  ;;  %v6474_v11 = vld [vmem:[#allocation9 + $0xa10] sm:$0xff] }
 0x492   :  { %8814 = vmatprep.subr.bf16.mxu1 %v10335_v14  ;;  %v6482_v12 = vld [vmem:[#allocation9 + $0xa50] sm:$0xff]  ;;  %v6475_v14 = vld [vmem:[#allocation9 + $0xa18] sm:$0xff] }
 0x493   :  { %v10429_v21 = vcombine.high %v6474_v11, %v6482_v12  ;;  %v10428_v29 = vcombine.low %v6474_v11, %v6482_v12  ;;  %v10430_v30 = vcombine.low %v6475_v14, %v6483_v10  ;;  %v6173_v11 = vld [vmem:[#allocation9 + $0xa8] sm:$0xff] }
 0x494   :  { %8733 = vmatpush1.bf16.msra.mxu0 %v10332_v22  ;;  %v10431_v22 = vcombine.high %v6475_v14, %v6483_v10  ;;  %v6181_v12 = vld [vmem:[#allocation9 + $0xe8] sm:$0xff] }
 0x495   :  { %8815 = vmatpush1.bf16.msra.mxu1 %v10334_v23  ;;  %8734 = vmatprep.subr.bf16.mxu0 %v10349_v24  ;;  %v6490_v23 = vld [vmem:[#allocation9 + $0xa90] sm:$0xff] }
 0x496   :  { %8816 = vmatprep.subr.bf16.mxu1 %v10351_v45  ;;  %v6498_v24 = vld [vmem:[#allocation9 + $0xad0] sm:$0xff]  ;;  %v6491_v45 = vld [vmem:[#allocation9 + $0xa98] sm:$0xff] }
 0x497   :  { %v10445_v2 = vcombine.high %v6490_v23, %v6498_v24  ;;  %v10444_v50 = vcombine.low %v6490_v23, %v6498_v24  ;;  %v10446_v51 = vcombine.low %v6491_v45, %v6499_v27  ;;  %v6197_v23 = vld [vmem:[#allocation9 + $0x168] sm:$0xff] }
 0x498   :  { %8735 = vmatpush1.bf16.msra.mxu0 %v10348_v36  ;;  %v10447_v36 = vcombine.high %v6491_v45, %v6499_v27  ;;  %v10130_v45 = vcombine.low %v6173_v11, %v6181_v12 }
 0x499   :  { %8817 = vmatpush1.bf16.msra.mxu1 %v10350_v39  ;;  %8745 = vmatprep.subr.bf16.mxu0 %v10365_v46  ;;  %v6506_v39 = vld [vmem:[#allocation9 + $0xb10] sm:$0xff] }
 0x49a   :  { %8827 = vmatprep.subr.bf16.mxu1 %v10367_v37  ;;  %v6514_v46 = vld [vmem:[#allocation9 + $0xb50] sm:$0xff]  ;;  %v6507_v37 = vld [vmem:[#allocation9 + $0xb18] sm:$0xff] }
 0x49b   :  { %8737 = vmatmul.mubr.bf16.vlgmr.msra.gmra.mrb[24].mxu0 %v11242_v17  ;;  %v10461_v52 = vcombine.high %v6506_v39, %v6514_v46  ;;  %v10460_v0 = vcombine.low %v6506_v39, %v6514_v46  ;;  %v10462_v1 = vcombine.low %v6507_v37, %v6515_v53  ;;  %v6213_v39 = vld [vmem:[#allocation9 + $0x1e8] sm:$0xff] }
 0x49c   :  { %8819 = vmatmul.mubr.bf16.vlgmr.msra.gmra.mrb[24].mxu1 %v11242_v17  ;;  %8746 = vmatpush1.bf16.msra.mxu0 %v10364_v55  ;;  %v10463_v55 = vcombine.high %v6507_v37, %v6515_v53 }
 0x49d   :  { %8828 = vmatpush1.bf16.msra.mxu1 %v10366_v57  ;;  %8747 = vmatprep.subr.bf16.mxu0 %v10381_v61  ;;  %v6522_v57 = vld [vmem:[#allocation9 + $0xb90] sm:$0xff] }
 0x49e   :  { %8829 = vmatprep.subr.bf16.mxu1 %v10383_v62  ;;  %8777 = vmatprep.mubr.bf16.mxu0 %v10817_v43  ;;  %v6530_v61 = vld [vmem:[#allocation9 + $0xbd0] sm:$0xff]  ;;  %v6523_v62 = vld [vmem:[#allocation9 + $0xb98] sm:$0xff] }
 0x49f   :  { %8859 = vmatprep.mubr.bf16.mxu1 %v10817_v43  ;;  %v10477_v3 = vcombine.high %v6522_v57, %v6530_v61  ;;  %v10476_v38 = vcombine.low %v6522_v57, %v6530_v61  ;;  %v10478_v6 = vcombine.low %v6523_v62, %v6531_v32  ;;  %v6229_v57 = vld [vmem:[#allocation9 + $0x268] sm:$0xff] }
 0x4a0   :  { %8748 = vmatpush1.bf16.msra.mxu0 %v10380_v4  ;;  %v10479_v4 = vcombine.high %v6523_v62, %v6531_v32 }
 0x4a1   :  { %8830 = vmatpush1.bf16.msra.mxu1 %v10382_v16  ;;  %8749 = vmatprep.subr.bf16.mxu0 %v10397_v19  ;;  %v6156_v16 = vld [vmem:[#allocation9 + $0x20] sm:$0xff] }
 0x4a2   :  { %8831 = vmatprep.subr.bf16.mxu1 %v10399_v13  ;;  %v6164_v19 = vld [vmem:[#allocation9 + $0x60] sm:$0xff]  ;;  %v6157_v13 = vld [vmem:[#allocation9 + $0x28] sm:$0xff] }
 0x4a3   :  { %v10113_v63 = vcombine.high %v6156_v16, %v6164_v19  ;;  %v10114_v14 = vcombine.low %v6157_v13, %v6165_v5 }
 0x4a4   :  { %8750 = vmatpush1.bf16.msra.mxu0 %v10396_v7  ;;  %v10115_v7 = vcombine.high %v6157_v13, %v6165_v5 }
 0x4a5   :  { %8832 = vmatpush1.bf16.msra.mxu1 %v10398_v8  ;;  %8751 = vmatprep.subr.bf16.mxu0 %v10413_v9  ;;  %v6172_v8 = vld [vmem:[#allocation9 + $0xa0] sm:$0xff] }
 0x4a6   :  { %8833 = vmatprep.subr.bf16.mxu1 %v10415_v34  ;;  %v6180_v9 = vld [vmem:[#allocation9 + $0xe0] sm:$0xff]  ;;  %v10112_v34 = vcombine.low %v6156_v16, %v6164_v19  ;;  %v6237_v16 = vld [vmem:[#allocation9 + $0x2a8] sm:$0xff] }
 0x4a7   :  { %v10129_v10 = vcombine.high %v6172_v8, %v6180_v9  ;;  %v10128_v24 = vcombine.low %v6172_v8, %v6180_v9  ;;  %v6245_v19 = vld [vmem:[#allocation9 + $0x2e8] sm:$0xff]  ;;  %v10818_v8 = vmov 1983009808  }
 0x4a8   :  { %8752 = vmatpush1.bf16.msra.mxu0 %v10412_v18  ;;  %v6188_v18 = vld [vmem:[#allocation9 + $0x120] sm:$0xff]  ;;  %v5816_v9 = vunpack.c.l.s4 %v10818_v8 }
 0x4a9   :  { %8834 = vmatpush1.bf16.msra.mxu1 %v10414_v20  ;;  %8753 = vmatprep.subr.bf16.mxu0 %v10429_v21  ;;  %v6196_v20 = vld [vmem:[#allocation9 + $0x160] sm:$0xff]  ;;  %v10131_v21 = vcombine.high %v6173_v11, %v6181_v12  ;;  %v6261_v11 = vld [vmem:[#allocation9 + $0x368] sm:$0xff] }
 0x4aa   :  { %8835 = vmatprep.subr.bf16.mxu1 %v10431_v22  ;;  %v6189_v22 = vld [vmem:[#allocation9 + $0x128] sm:$0xff]  ;;  %v10145_v27 = vcombine.high %v6188_v18, %v6196_v20  ;;  %v10144_v46 = vcombine.low %v6188_v18, %v6196_v20  ;;  %v6268_v20 = vld [vmem:[#allocation9 + $0x3a0] sm:$0xff] }
 0x4ab   :  { %v10146_v37 = vcombine.low %v6189_v22, %v6197_v23 }
 0x4ac   :  { %8754 = vmatpush1.bf16.msra.mxu0 %v10428_v29  ;;  %v10147_v29 = vcombine.high %v6189_v22, %v6197_v23  ;;  %v5817_v22 = vunpack.c.0.s8 %v5816_v9  ;;  %v6269_v23 = vld [vmem:[#allocation9 + $0x3a8] sm:$0xff] }
 0x4ad   :  { %8836 = vmatpush1.bf16.msra.mxu1 %v10430_v30  ;;  %8755 = vmatprep.subr.bf16.mxu0 %v10445_v2  ;;  %v6204_v30 = vld [vmem:[#allocation9 + $0x1a0] sm:$0xff] }
 0x4ae   :  { %8837 = vmatprep.subr.bf16.mxu1 %v10447_v36  ;;  %v6212_v2 = vld [vmem:[#allocation9 + $0x1e0] sm:$0xff]  ;;  %v6205_v36 = vld [vmem:[#allocation9 + $0x1a8] sm:$0xff] }
 0x4af   :  { %v10161_v53 = vcombine.high %v6204_v30, %v6212_v2  ;;  %v10160_v61 = vcombine.low %v6204_v30, %v6212_v2  ;;  %v10162_v62 = vcombine.low %v6205_v36, %v6213_v39  ;;  %v11268_v30 = vld [vmem:[#allocation9 + $0x428] sm:$0xff] }
 0x4b0   :  { %8756 = vmatpush1.bf16.msra.mxu0 %v10444_v50  ;;  %v10163_v50 = vcombine.high %v6205_v36, %v6213_v39  ;;  %v11270_v2 = vld [vmem:[#allocation9 + $0x468] sm:$0xff] }
 0x4b1   :  { %8838 = vmatpush1.bf16.msra.mxu1 %v10446_v51  ;;  %8757 = vmatprep.subr.bf16.mxu0 %v10461_v52  ;;  %v6220_v51 = vld [vmem:[#allocation9 + $0x220] sm:$0xff] }
 0x4b2   :  { %8839 = vmatprep.subr.bf16.mxu1 %v10463_v55  ;;  %v6228_v52 = vld [vmem:[#allocation9 + $0x260] sm:$0xff]  ;;  %v6221_v55 = vld [vmem:[#allocation9 + $0x228] sm:$0xff] }
 0x4b3   :  { %v10177_v32 = vcombine.high %v6220_v51, %v6228_v52  ;;  %v10176_v13 = vcombine.low %v6220_v51, %v6228_v52  ;;  %v10178_v5 = vcombine.low %v6221_v55, %v6229_v57  ;;  %v11273_v51 = vsub.s32 %v5817_v22, %v10922_v44 }
 0x4b4   :  { %8758 = vmatpush1.bf16.msra.mxu0 %v10460_v0  ;;  %v10179_v0 = vcombine.high %v6221_v55, %v6229_v57  ;;  %v10242_v57 = vcombine.low %v11268_v30, %v11270_v2 }
 0x4b5   :  { %8840 = vmatpush1.bf16.msra.mxu1 %v10462_v1  ;;  %8759 = vmatprep.subr.bf16.mxu0 %v10477_v3  ;;  %v6236_v1 = vld [vmem:[#allocation9 + $0x2a0] sm:$0xff] }
 0x4b6   :  { %8841 = vmatprep.subr.bf16.mxu1 %v10479_v4  ;;  %v6244_v3 = vld [vmem:[#allocation9 + $0x2e0] sm:$0xff] }
 0x4b7   :  { %v10192_v12 = vcombine.low %v6236_v1, %v6244_v3 }
 0x4b8   :  { %8760 = vmatpush1.bf16.msra.mxu0 %v10476_v38  ;;  %v10193_v38 = vcombine.high %v6236_v1, %v6244_v3  ;;  %v11286_v1 = vld [vmem:[#allocation9 + $0x4e8] sm:$0xff] }
 0x4b9   :  { %8842 = vmatpush1.bf16.msra.mxu1 %v10478_v6  ;;  %8868 = vmatprep.subr.bf16.mxu0 %v10113_v63  ;;  %v10195_v6 = vcombine.high %v6237_v16, %v6245_v19  ;;  %v6252_v63 = vld [vmem:[#allocation9 + $0x320] sm:$0xff] }
 0x4ba   :  { %8950 = vmatprep.subr.bf16.mxu1 %v10115_v7  ;;  %v6260_v7 = vld [vmem:[#allocation9 + $0x360] sm:$0xff] }
 0x4bb   :  { %8778 = vmatmul.mubr.bf16.vlgmr.msra.gmra.mrb[24].mxu0 %v11252_v49 }
 0x4bc   :  { %8860 = vmatmul.mubr.bf16.vlgmr.msra.gmra.mrb[24].mxu1 %v11252_v49  ;;  %8869 = vmatpush1.bf16.msra.mxu0 %v10112_v34  ;;  %v6253_v34 = vld [vmem:[#allocation9 + $0x328] sm:$0xff] }
 0x4bd   :  { %8900 = vmatprep.mubr.bf16.mxu0 %v11238_v15  ;;  %8951 = vmatpush1.bf16.msra.mxu1 %v10114_v14  ;;  %v10194_v14 = vcombine.low %v6237_v16, %v6245_v19  ;;  %v10211_v18 = vcombine.high %v6253_v34, %v6261_v11  ;;  %v10210_v36 = vcombine.low %v6253_v34, %v6261_v11 }
 0x4be   :  { %8982 = vmatprep.mubr.bf16.mxu1 %v11238_v15  ;;  %8870 = vmatprep.subr.bf16.mxu0 %v10129_v10  ;;  %v10209_v10 = vcombine.high %v6252_v63, %v6260_v7 }
 0x4bf   :  { %8952 = vmatprep.subr.bf16.mxu1 %v10131_v21  ;;  %v6276_v21 = vld [vmem:[#allocation9 + $0x3e0] sm:$0xff] }
 0x4c0   :  { %8871 = vmatpush1.bf16.msra.mxu0 %v10128_v24  ;;  %v6277_v24 = vld [vmem:[#allocation9 + $0x3e8] sm:$0xff]  ;;  %v10225_v39 = vcombine.high %v6268_v20, %v6276_v21 }
 0x4c1   :  { %8953 = vmatpush1.bf16.msra.mxu1 %v10130_v45  ;;  %8872 = vmatprep.subr.bf16.mxu0 %v10145_v27  ;;  %v11266_v45 = vld [vmem:[#allocation9 + $0x420] sm:$0xff]  ;;  %v10208_v27 = vcombine.low %v6252_v63, %v6260_v7 }
 0x4c2   :  { %8954 = vmatprep.subr.bf16.mxu1 %v10147_v29  ;;  %v6292_v29 = vld [vmem:[#allocation9 + $0x460] sm:$0xff] }
 0x4c3   :  { %v10240_v52 = vcombine.low %v11266_v45, %v6292_v29  ;;  %v10241_v55 = vcombine.high %v11266_v45, %v6292_v29  ;;  %v6324_v7 = vld [vmem:[#allocation9 + $0x560] sm:$0xff] }
 0x4c4   :  { %8873 = vmatpush1.bf16.msra.mxu0 %v10144_v46  ;;  %v6332_v29 = vld [vmem:[#allocation9 + $0x5a0] sm:$0xff] }
 0x4c5   :  { %8955 = vmatpush1.bf16.msra.mxu1 %v10146_v37  ;;  %8874 = vmatprep.subr.bf16.mxu0 %v10161_v53  ;;  %v10224_v37 = vcombine.low %v6268_v20, %v6276_v21  ;;  %v10226_v53 = vcombine.low %v6269_v23, %v6277_v24 }
 0x4c6   :  { %8956 = vmatprep.subr.bf16.mxu1 %v10163_v50  ;;  %v10227_v50 = vcombine.high %v6269_v23, %v6277_v24 }
 0x4c7   :  { %v5779_v4 = vpop.xlane.xlu0 %5778 }
 0x4c8   :  { %10648 = vrsqrt.f32 %v5779_v4  ;;  %8875 = vmatpush1.bf16.msra.mxu0 %v10160_v61  ;;  %v11279_v61 = vld [vmem:[#allocation9 + $0x4a0] sm:$0xff] }
 0x4c9   :  { %8957 = vmatpush1.bf16.msra.mxu1 %v10162_v62  ;;  %8876 = vmatprep.subr.bf16.mxu0 %v10177_v32  ;;  %v11282_v32 = vld [vmem:[#allocation9 + $0x4e0] sm:$0xff] }
 0x4ca   :  { %8958 = vmatprep.subr.bf16.mxu1 %v10179_v0  ;;  %v11284_v0 = vld [vmem:[#allocation9 + $0x4a8] sm:$0xff] }
 0x4cc   :  { %8877 = vmatpush1.bf16.msra.mxu0 %v10176_v13 }
 0x4cd   :  { %8959 = vmatpush1.bf16.msra.mxu1 %v10178_v5  ;;  %8878 = vmatprep.subr.bf16.mxu0 %v10193_v38  ;;  %v10243_v38 = vcombine.high %v11268_v30, %v11270_v2  ;;  %v6340_v30 = vld [vmem:[#allocation9 + $0x5e0] sm:$0xff] }
 0x4ce   :  { %8960 = vmatprep.subr.bf16.mxu1 %v10195_v6 }
 0x4d0   :  { %8879 = vmatpush1.bf16.msra.mxu0 %v10192_v12 }
 0x4d1   :  { %8961 = vmatpush1.bf16.msra.mxu1 %v10194_v14  ;;  %8880 = vmatprep.subr.bf16.mxu0 %v10209_v10  ;;  %v6325_v14 = vld [vmem:[#allocation9 + $0x568] sm:$0xff] }
 0x4d2   :  { %v10649_v46 = vpop.eup %10648  ;;  %8962 = vmatprep.subr.bf16.mxu1 %v10211_v18  ;;  %v10258_v18 = vcombine.low %v11284_v0, %v11286_v1 }
 0x4d3   :  { %v5781_v62 = vmul.f32 %v10649_v46, %v10988_v41  ;;  %v5782_v3 = vmul.f32 %v10649_v46, %v10994_v48  ;;  %v5783_v4 = vmul.f32 %v10649_v46, %v10992_v47  ;;  %v5784_v16 = vmul.f32 %v10649_v46, %v11000_v54 }
 0x4d4   :  { %8881 = vmatpush1.bf16.msra.mxu0 %v10208_v27  ;;  %v5785_v19 = vmul.f32 %v10649_v46, %v11022_v28  ;;  %v5786_v13 = vmul.f32 %v10649_v46, %v11028_v35  ;;  %v5787_v41 = vmul.f32 %v10649_v46, %v11026_v33  ;;  %v5788_v5 = vmul.f32 %v10649_v46, %v11032_v40 }
 0x4d5   :  { %8963 = vmatpush1.bf16.msra.mxu1 %v10210_v36  ;;  %8882 = vmatprep.subr.bf16.mxu0 %v10225_v39  ;;  %v5789_v48 = vmul.f32 %v10649_v46, %v11194_v25  ;;  %v5790_v47 = vmul.f32 %v10649_v46, %v11200_v31  ;;  %v5791_v54 = vmul.f32 %v10649_v46, %v11198_v59  ;;  %v6316_v59 = vld [vmem:[#allocation9 + $0x520] sm:$0xff]  ;;  %v6333_v39 = vld [vmem:[#allocation9 + $0x5a8] sm:$0xff] }
 0x4d6   :  { %8964 = vmatprep.subr.bf16.mxu1 %v10227_v50  ;;  %v10257_v28 = vcombine.high %v11279_v61, %v11282_v32  ;;  %v10259_v35 = vcombine.high %v11284_v0, %v11286_v1  ;;  %v5792_v33 = vmul.f32 %v10649_v46, %v11204_v42  ;;  %v5793_v40 = vmul.f32 %v10649_v46, %v11217_v56  ;;  %v6349_v0 = vld [vmem:[#allocation9 + $0x628] sm:$0xff] }
 0x4d7   :  { %v5794_v6 = vmul.f32 %v10649_v46, %v11223_v60  ;;  %v5795_v63 = vmul.f32 %v10649_v46, %v11221_v58  ;;  %v5796_v25 = vmul.f32 %v10649_v46, %v11227_v26  ;;  %v5813_v31 = vcombine.low %v5781_v62, %v5782_v3  ;;  %v6317_v58 = vld [vmem:[#allocation9 + $0x528] sm:$0xff]  ;;  %v6348_v62 = vld [vmem:[#allocation9 + $0x620] sm:$0xff] }
 0x4d8   :  { %8883 = vmatpush1.bf16.msra.mxu0 %v10224_v37  ;;  %v5814_v8 = vcombine.low %v5783_v4, %v5784_v16  ;;  %v5830_v9 = vcombine.low %v5785_v19, %v5786_v13  ;;  %v5831_v34 = vcombine.low %v5787_v41, %v5788_v5  ;;  %v5847_v11 = vcombine.low %v5789_v48, %v5790_v47  ;;  %v6341_v46 = vld [vmem:[#allocation9 + $0x5e8] sm:$0xff]  ;;  %v6364_v13 = vld [vmem:[#allocation9 + $0x6a0] sm:$0xff] }
 0x4d9   :  { %8965 = vmatpush1.bf16.msra.mxu1 %v10226_v53  ;;  %8884 = vmatprep.subr.bf16.mxu0 %v10241_v55  ;;  %v5821_v42 = vrot.slane %v5813_v31, %v11273_v51  ;;  %v5848_v56 = vcombine.low %v5791_v54, %v5792_v33  ;;  %v5864_v12 = vcombine.low %v5793_v40, %v5794_v6  ;;  %v6357_v1 = vld [vmem:[#allocation9 + $0x668] sm:$0xff]  ;;  %v6372_v41 = vld [vmem:[#allocation9 + $0x6e0] sm:$0xff] }
 0x4da   :  { %8966 = vmatprep.subr.bf16.mxu1 %v10243_v38  ;;  %v10256_v60 = vcombine.low %v11279_v61, %v11282_v32  ;;  %v5828_v26 = vrot.slane %v5814_v8, %v11273_v51  ;;  %v5838_v10 = vrot.slane %v5830_v9, %v11273_v51  ;;  %v10273_v20 = vcombine.high %v6316_v59, %v6324_v7  ;;  %v6356_v32 = vld [vmem:[#allocation9 + $0x660] sm:$0xff]  ;;  %v6365_v5 = vld [vmem:[#allocation9 + $0x6a8] sm:$0xff] }
 0x4db   :  { %v5845_v21 = vrot.slane %v5831_v34, %v11273_v51  ;;  %v5855_v22 = vrot.slane %v5847_v11, %v11273_v51  ;;  %v5862_v24 = vrot.slane %v5848_v56, %v11273_v51  ;;  %v5865_v45 = vcombine.low %v5795_v63, %v5796_v25  ;;  %v6373_v38 = vld [vmem:[#allocation9 + $0x6e8] sm:$0xff]  ;;  %v6388_v33 = vld [vmem:[#allocation9 + $0x760] sm:$0xff] }
 0x4dc   :  { %8885 = vmatpush1.bf16.msra.mxu0 %v10240_v52  ;;  %v5829_v23 = vcombine.low %v5821_v42, %v5828_v26  ;;  %v10275_v27 = vcombine.high %v6317_v58, %v6325_v14  ;;  %v5872_v36 = vrot.slane %v5864_v12, %v11273_v51  ;;  %v10272_v50 = vcombine.low %v6316_v59, %v6324_v7  ;;  %v6381_v40 = vld [vmem:[#allocation9 + $0x728] sm:$0xff]  ;;  %v6396_v7 = vld [vmem:[#allocation9 + $0x7a0] sm:$0xff] }
 0x4dd   :  { %8967 = vmatpush1.bf16.msra.mxu1 %v10242_v57  ;;  %8886 = vmatprep.subr.bf16.mxu0 %v10257_v28  ;;  %v5846_v2 = vcombine.low %v5838_v10, %v5845_v21  ;;  %v5863_v37 = vcombine.low %v5855_v22, %v5862_v24  ;;  %v5879_v53 = vrot.slane %v5865_v45, %v11273_v51  ;;  %v6389_v6 = vld [vmem:[#allocation9 + $0x768] sm:$0xff]  ;;  %v6404_v8 = vld [vmem:[#allocation9 + $0x7e0] sm:$0xff] }
 0x4de   :  { %8968 = vmatprep.subr.bf16.mxu1 %v10259_v35  ;;  %5885 = vst [vmem:[#allocation12] sm:$0xff] %v5829_v23  ;;  %v10274_v52 = vcombine.low %v6317_v58, %v6325_v14  ;;  %v10289_v55 = vcombine.high %v6332_v29, %v6340_v30  ;;  %v10291_v61 = vcombine.high %v6333_v39, %v6341_v46  ;;  %v6380_v35 = vld [vmem:[#allocation9 + $0x720] sm:$0xff]  ;;  %v6397_v9 = vld [vmem:[#allocation9 + $0x7a8] sm:$0xff] }
 0x4df   :  { %5886 = vst [vmem:[#allocation12 + $0x8] sm:$0xff] %v5846_v2  ;;  %v5880_v57 = vcombine.low %v5872_v36, %v5879_v53  ;;  %5887 = vst [vmem:[#allocation12 + $0x10] sm:$0xff] %v5863_v37  ;;  %v10288_v3 = vcombine.low %v6332_v29, %v6340_v30  ;;  %v10290_v4 = vcombine.low %v6333_v39, %v6341_v46  ;;  %v6405_v34 = vld [vmem:[#allocation9 + $0x7e8] sm:$0xff]  ;;  %v6420_v58 = vld [vmem:[#allocation9 + $0x860] sm:$0xff] }
 0x4e0   :  { %8887 = vmatpush1.bf16.msra.mxu0 %v10256_v60  ;;  %v10305_v16 = vcombine.high %v6348_v62, %v6356_v32  ;;  %v10307_v19 = vcombine.high %v6349_v0, %v6357_v1  ;;  %v10304_v48 = vcombine.low %v6348_v62, %v6356_v32  ;;  %v10306_v47 = vcombine.low %v6349_v0, %v6357_v1  ;;  %v6412_v60 = vld [vmem:[#allocation9 + $0x820] sm:$0xff]  ;;  %v6413_v14 = vld [vmem:[#allocation9 + $0x828] sm:$0xff] }
 0x4e1   :  { %8969 = vmatpush1.bf16.msra.mxu1 %v10258_v18  ;;  %8888 = vmatprep.subr.bf16.mxu0 %v10273_v20  ;;  %5888 = vst [vmem:[#allocation12 + $0x18] sm:$0xff] %v5880_v57  ;;  %v10321_v54 = vcombine.high %v6364_v13, %v6372_v41  ;;  %v10323_v28 = vcombine.high %v6365_v5, %v6373_v38  ;;  %v6421_v26 = vld [vmem:[#allocation9 + $0x868] sm:$0xff]  ;;  %v6428_v22 = vld [vmem:[#allocation9 + $0x8a0] sm:$0xff] }
 0x4e2   :  { %8970 = vmatprep.subr.bf16.mxu1 %v10275_v27  ;;  %v10320_v63 = vcombine.low %v6364_v13, %v6372_v41  ;;  %v10322_v25 = vcombine.low %v6365_v5, %v6373_v38  ;;  %v10337_v31 = vcombine.high %v6380_v35, %v6388_v33  ;;  %v10339_v59 = vcombine.high %v6381_v40, %v6389_v6  ;;  %v6436_v23 = vld [vmem:[#allocation9 + $0x8e0] sm:$0xff]  ;;  %v6429_v24 = vld [vmem:[#allocation9 + $0x8a8] sm:$0xff] }
 0x4e3   :  { %v10336_v42 = vcombine.low %v6380_v35, %v6388_v33  ;;  %v10338_v11 = vcombine.low %v6381_v40, %v6389_v6  ;;  %v10353_v56 = vcombine.high %v6396_v7, %v6404_v8  ;;  %v10355_v12 = vcombine.high %v6397_v9, %v6405_v34  ;;  %v6437_v45 = vld [vmem:[#allocation9 + $0x8e8] sm:$0xff]  ;;  %v6444_v36 = vld [vmem:[#allocation9 + $0x920] sm:$0xff] }
 0x4e4   :  { %8889 = vmatpush1.bf16.msra.mxu0 %v10272_v50  ;;  %v10352_v10 = vcombine.low %v6396_v7, %v6404_v8  ;;  %v10354_v18 = vcombine.low %v6397_v9, %v6405_v34  ;;  %v10369_v20 = vcombine.high %v6412_v60, %v6420_v58  ;;  %v10371_v21 = vcombine.high %v6413_v14, %v6421_v26  ;;  %v6452_v39 = vld [vmem:[#allocation9 + $0x960] sm:$0xff]  ;;  %v6445_v46 = vld [vmem:[#allocation9 + $0x928] sm:$0xff] }
 0x4e5   :  { %8971 = vmatpush1.bf16.msra.mxu1 %v10274_v52  ;;  %8890 = vmatprep.subr.bf16.mxu0 %v10289_v55  ;;  %v10368_v27 = vcombine.low %v6412_v60, %v6420_v58  ;;  %v10370_v29 = vcombine.low %v6413_v14, %v6421_v26  ;;  %v10385_v30 = vcombine.high %v6428_v22, %v6436_v23  ;;  %v6453_v37 = vld [vmem:[#allocation9 + $0x968] sm:$0xff]  ;;  %v6460_v57 = vld [vmem:[#allocation9 + $0x9a0] sm:$0xff] }
 0x4e6   :  { %8972 = vmatprep.subr.bf16.mxu1 %v10291_v61  ;;  %v10387_v2 = vcombine.high %v6429_v24, %v6437_v45  ;;  %v10384_v53 = vcombine.low %v6428_v22, %v6436_v23  ;;  %v10386_v50 = vcombine.low %v6429_v24, %v6437_v45  ;;  %v10401_v52 = vcombine.high %v6444_v36, %v6452_v39  ;;  %v6468_v61 = vld [vmem:[#allocation9 + $0x9e0] sm:$0xff]  ;;  %v6461_v62 = vld [vmem:[#allocation9 + $0x9a8] sm:$0xff]  ;;  %v6159_v22 = vld [vmem:[#allocation9 + $0x38] sm:$0xff] }
 0x4e7   :  { %v10403_v55 = vcombine.high %v6445_v46, %v6453_v37  ;;  %v6469_v32 = vld [vmem:[#allocation9 + $0x9e8] sm:$0xff]  ;;  %v10400_v0 = vcombine.low %v6444_v36, %v6452_v39  ;;  %v10402_v1 = vcombine.low %v6445_v46, %v6453_v37  ;;  %v10416_v5 = vcombine.low %v6460_v57, %v6468_v61  ;;  %v6167_v23 = vld [vmem:[#allocation9 + $0x78] sm:$0xff] }
 0x4e8   :  { %8891 = vmatpush1.bf16.msra.mxu0 %v10288_v3  ;;  %v10417_v3 = vcombine.high %v6460_v57, %v6468_v61  ;;  %v6477_v13 = vld [vmem:[#allocation9 + $0xa28] sm:$0xff]  ;;  %v10418_v38 = vcombine.low %v6461_v62, %v6469_v32  ;;  %v6175_v39 = vld [vmem:[#allocation9 + $0xb8] sm:$0xff]  ;;  %v10118_v37 = vcombine.low %v6159_v22, %v6167_v23 }
 0x4e9   :  { %8973 = vmatpush1.bf16.msra.mxu1 %v10290_v4  ;;  %8892 = vmatprep.subr.bf16.mxu0 %v10305_v16  ;;  %v10419_v4 = vcombine.high %v6461_v62, %v6469_v32  ;;  %v6476_v16 = vld [vmem:[#allocation9 + $0xa20] sm:$0xff]  ;;  %v6485_v41 = vld [vmem:[#allocation9 + $0xa68] sm:$0xff]  ;;  %v6183_v46 = vld [vmem:[#allocation9 + $0xf8] sm:$0xff] }
 0x4ea   :  { %8974 = vmatprep.subr.bf16.mxu1 %v10307_v19  ;;  %v6484_v19 = vld [vmem:[#allocation9 + $0xa60] sm:$0xff]  ;;  %v6493_v35 = vld [vmem:[#allocation9 + $0xaa8] sm:$0xff]  ;;  %v10434_v6 = vcombine.low %v6477_v13, %v6485_v41  ;;  %v6191_v57 = vld [vmem:[#allocation9 + $0x138] sm:$0xff]  ;;  %v10134_v32 = vcombine.low %v6175_v39, %v6183_v46 }
 0x4eb   :  { %v6501_v33 = vld [vmem:[#allocation9 + $0xae8] sm:$0xff]  ;;  %v10432_v40 = vcombine.low %v6476_v16, %v6484_v19  ;;  %v6199_v61 = vld [vmem:[#allocation9 + $0x178] sm:$0xff] }
 0x4ec   :  { %8893 = vmatpush1.bf16.msra.mxu0 %v10304_v48  ;;  %v10433_v48 = vcombine.high %v6476_v16, %v6484_v19  ;;  %v6509_v7 = vld [vmem:[#allocation9 + $0xb28] sm:$0xff]  ;;  %v10450_v34 = vcombine.low %v6493_v35, %v6501_v33  ;;  %v6207_v16 = vld [vmem:[#allocation9 + $0x1b8] sm:$0xff] }
 0x4ed   :  { %8975 = vmatpush1.bf16.msra.mxu1 %v10306_v47  ;;  %8894 = vmatprep.subr.bf16.mxu0 %v10321_v54  ;;  %v10435_v47 = vcombine.high %v6477_v13, %v6485_v41  ;;  %v6492_v54 = vld [vmem:[#allocation9 + $0xaa0] sm:$0xff]  ;;  %v6517_v8 = vld [vmem:[#allocation9 + $0xb68] sm:$0xff]  ;;  %v6215_v19 = vld [vmem:[#allocation9 + $0x1f8] sm:$0xff]  ;;  %v10150_v41 = vcombine.low %v6191_v57, %v6199_v61 }
 0x4ee   :  { %8976 = vmatprep.subr.bf16.mxu1 %v10323_v28  ;;  %v6500_v28 = vld [vmem:[#allocation9 + $0xae0] sm:$0xff]  ;;  %v6525_v60 = vld [vmem:[#allocation9 + $0xba8] sm:$0xff]  ;;  %v10466_v26 = vcombine.low %v6509_v7, %v6517_v8 }
 0x4ef   :  { %v10448_v9 = vcombine.low %v6492_v54, %v6500_v28  ;;  %v6533_v58 = vld [vmem:[#allocation9 + $0xbe8] sm:$0xff] }
 0x4f0   :  { %8895 = vmatpush1.bf16.msra.mxu0 %v10320_v63  ;;  %v10449_v63 = vcombine.high %v6492_v54, %v6500_v28  ;;  %v10482_v45 = vcombine.low %v6525_v60, %v6533_v58  ;;  %v6223_v54 = vld [vmem:[#allocation9 + $0x238] sm:$0xff] }
 0x4f1   :  { %8977 = vmatpush1.bf16.msra.mxu1 %v10322_v25  ;;  %8896 = vmatprep.subr.bf16.mxu0 %v10337_v31  ;;  %v10451_v25 = vcombine.high %v6493_v35, %v6501_v33  ;;  %v6508_v31 = vld [vmem:[#allocation9 + $0xb20] sm:$0xff]  ;;  %v6231_v28 = vld [vmem:[#allocation9 + $0x278] sm:$0xff]  ;;  %v10166_v35 = vcombine.low %v6207_v16, %v6215_v19 }
 0x4f2   :  { %8978 = vmatprep.subr.bf16.mxu1 %v10339_v59  ;;  %v6516_v59 = vld [vmem:[#allocation9 + $0xb60] sm:$0xff] }
 0x4f3   :  { %v10464_v14 = vcombine.low %v6508_v31, %v6516_v59 }
 0x4f4   :  { %8897 = vmatpush1.bf16.msra.mxu0 %v10336_v42  ;;  %v10465_v42 = vcombine.high %v6508_v31, %v6516_v59  ;;  %v6239_v31 = vld [vmem:[#allocation9 + $0x2b8] sm:$0xff] }
 0x4f5   :  { %8979 = vmatpush1.bf16.msra.mxu1 %v10338_v11  ;;  %8898 = vmatprep.subr.bf16.mxu0 %v10353_v56  ;;  %v10467_v11 = vcombine.high %v6509_v7, %v6517_v8  ;;  %v6524_v56 = vld [vmem:[#allocation9 + $0xba0] sm:$0xff]  ;;  %v6247_v59 = vld [vmem:[#allocation9 + $0x2f8] sm:$0xff] }
 0x4f6   :  { %8980 = vmatprep.subr.bf16.mxu1 %v10355_v12  ;;  %v6532_v12 = vld [vmem:[#allocation9 + $0xbe0] sm:$0xff] }
 0x4f7   :  { %v10480_v24 = vcombine.low %v6524_v56, %v6532_v12  ;;  %v11330_v8 = vld [vmem:[#allocation10] sm:$0xff] }
 0x4f8   :  { %8899 = vmatpush1.bf16.msra.mxu0 %v10352_v10  ;;  %v10481_v10 = vcombine.high %v6524_v56, %v6532_v12  ;;  %v10199_v12 = vcombine.high %v6239_v31, %v6247_v59 }
 0x4f9   :  { %8981 = vmatpush1.bf16.msra.mxu1 %v10354_v18  ;;  %8909 = vmatprep.subr.bf16.mxu0 %v10369_v20  ;;  %v10483_v18 = vcombine.high %v6525_v60, %v6533_v58  ;;  %v6158_v20 = vld [vmem:[#allocation9 + $0x30] sm:$0xff] }
 0x4fa   :  { %8991 = vmatprep.subr.bf16.mxu1 %v10371_v21  ;;  %v6166_v21 = vld [vmem:[#allocation9 + $0x70] sm:$0xff] }
 0x4fb   :  { %8901 = vmatmul.mubr.bf16.vlgmr.msra.gmra.mrb[28].mxu0 %v11242_v17  ;;  %v10116_v36 = vcombine.low %v6158_v20, %v6166_v21  ;;  %v6254_v60 = vld [vmem:[#allocation9 + $0x330] sm:$0xff] }
 0x4fc   :  { %8983 = vmatmul.mubr.bf16.vlgmr.msra.gmra.mrb[28].mxu1 %v11242_v17  ;;  %8910 = vmatpush1.bf16.msra.mxu0 %v10368_v27  ;;  %v10117_v27 = vcombine.high %v6158_v20, %v6166_v21  ;;  %v6262_v58 = vld [vmem:[#allocation9 + $0x370] sm:$0xff] }
 0x4fd   :  { %8992 = vmatpush1.bf16.msra.mxu1 %v10370_v29  ;;  %8911 = vmatprep.subr.bf16.mxu0 %v10385_v30  ;;  %v10119_v29 = vcombine.high %v6159_v22, %v6167_v23  ;;  %v6174_v30 = vld [vmem:[#allocation9 + $0xb0] sm:$0xff]  ;;  %v10198_v23 = vcombine.low %v6239_v31, %v6247_v59  ;;  %v6311_v31 = vld [vmem:[#allocation9 + $0x4f8] sm:$0xff] }
 0x4fe   :  { %8993 = vmatprep.subr.bf16.mxu1 %v10387_v2  ;;  %8941 = vmatprep.mubr.bf16.mxu0 %v10817_v43  ;;  %v6182_v2 = vld [vmem:[#allocation9 + $0xf0] sm:$0xff] }
 0x4ff   :  { %9023 = vmatprep.mubr.bf16.mxu1 %v10817_v43  ;;  %v10132_v62 = vcombine.low %v6174_v30, %v6182_v2 }
 0x500   :  { %8912 = vmatpush1.bf16.msra.mxu0 %v10384_v53  ;;  %v10133_v53 = vcombine.high %v6174_v30, %v6182_v2  ;;  %v6278_v30 = vld [vmem:[#allocation9 + $0x3f0] sm:$0xff] }
 0x501   :  { %8994 = vmatpush1.bf16.msra.mxu1 %v10386_v50  ;;  %8913 = vmatprep.subr.bf16.mxu0 %v10401_v52  ;;  %v6190_v50 = vld [vmem:[#allocation9 + $0x130] sm:$0xff] }
 0x502   :  { %8995 = vmatprep.subr.bf16.mxu1 %v10403_v55  ;;  %v6198_v52 = vld [vmem:[#allocation9 + $0x170] sm:$0xff]  ;;  %v10135_v55 = vcombine.high %v6175_v39, %v6183_v46  ;;  %v6271_v46 = vld [vmem:[#allocation9 + $0x3b8] sm:$0xff] }
 0x503   :  { %v10148_v13 = vcombine.low %v6190_v50, %v6198_v52 }
 0x504   :  { %8914 = vmatpush1.bf16.msra.mxu0 %v10400_v0  ;;  %v10149_v0 = vcombine.high %v6190_v50, %v6198_v52 }
 0x505   :  { %8996 = vmatpush1.bf16.msra.mxu1 %v10402_v1  ;;  %8915 = vmatprep.subr.bf16.mxu0 %v10417_v3  ;;  %v10151_v1 = vcombine.high %v6191_v57, %v6199_v61  ;;  %v6206_v3 = vld [vmem:[#allocation9 + $0x1b0] sm:$0xff]  ;;  %v10212_v57 = vcombine.low %v6254_v60, %v6262_v58 }
 0x506   :  { %8997 = vmatprep.subr.bf16.mxu1 %v10419_v4  ;;  %v6214_v4 = vld [vmem:[#allocation9 + $0x1f0] sm:$0xff] }
 0x508   :  { %8916 = vmatpush1.bf16.msra.mxu0 %v10416_v5  ;;  %v10165_v5 = vcombine.high %v6206_v3, %v6214_v4 }
 0x509   :  { %8998 = vmatpush1.bf16.msra.mxu1 %v10418_v38  ;;  %8917 = vmatprep.subr.bf16.mxu0 %v10433_v48  ;;  %v10167_v38 = vcombine.high %v6207_v16, %v6215_v19  ;;  %v6222_v48 = vld [vmem:[#allocation9 + $0x230] sm:$0xff] }
 0x50a   :  { %8999 = vmatprep.subr.bf16.mxu1 %v10435_v47  ;;  %v6230_v47 = vld [vmem:[#allocation9 + $0x270] sm:$0xff] }
 0x50b   :  { %v10181_v33 = vcombine.high %v6222_v48, %v6230_v47  ;;  %v10180_v7 = vcombine.low %v6222_v48, %v6230_v47  ;;  %v6286_v19 = vld [vmem:[#allocation9 + $0x430] sm:$0xff] }
 0x50c   :  { %8918 = vmatpush1.bf16.msra.mxu0 %v10432_v40  ;;  %v10183_v40 = vcombine.high %v6223_v54, %v6231_v28 }
 0x50d   :  { %9000 = vmatpush1.bf16.msra.mxu1 %v10434_v6  ;;  %8919 = vmatprep.subr.bf16.mxu0 %v10449_v63  ;;  %v6238_v6 = vld [vmem:[#allocation9 + $0x2b0] sm:$0xff] }
 0x50e   :  { %9001 = vmatprep.subr.bf16.mxu1 %v10451_v25  ;;  %v6246_v63 = vld [vmem:[#allocation9 + $0x2f0] sm:$0xff]  ;;  %v6542_v25 = vsub.s32 0, %v10922_v44 }
 0x50f   :  { %v10197_v56 = vcombine.high %v6238_v6, %v6246_v63  ;;  %v10196_v21 = vcombine.low %v6238_v6, %v6246_v63  ;;  %v6303_v63 = vld [vmem:[#allocation9 + $0x4b8] sm:$0xff] }
 0x510   :  { %8920 = vmatpush1.bf16.msra.mxu0 %v10448_v9  ;;  %v6550_v9 = vsub.s32 2, %v10922_v44 }
 0x511   :  { %9002 = vmatpush1.bf16.msra.mxu1 %v10450_v34  ;;  %8921 = vmatprep.subr.bf16.mxu0 %v10465_v42  ;;  %v6546_v34 = vsub.s32 1, %v10922_v44  ;;  %v10182_v42 = vcombine.low %v6223_v54, %v6231_v28 }
 0x512   :  { %9003 = vmatprep.subr.bf16.mxu1 %v10467_v11  ;;  %v6554_v11 = vsub.s32 3, %v10922_v44 }
 0x513   :  { %v6547_v20 = vrot.slane %v11330_v8, %v6546_v34 }
 0x514   :  { %8922 = vmatpush1.bf16.msra.mxu0 %v10464_v14  ;;  %v6543_v14 = vrot.slane %v11330_v8, %v6542_v25  ;;  %v6555_v22 = vrot.slane %v11330_v8, %v6554_v11 }
 0x515   :  { %9004 = vmatpush1.bf16.msra.mxu1 %v10466_v26  ;;  %8923 = vmatprep.subr.bf16.mxu0 %v10481_v10  ;;  %v6255_v26 = vld [vmem:[#allocation9 + $0x338] sm:$0xff] }
 0x516   :  { %9005 = vmatprep.subr.bf16.mxu1 %v10483_v18  ;;  %v6263_v10 = vld [vmem:[#allocation9 + $0x378] sm:$0xff]  ;;  %v6551_v18 = vrot.slane %v11330_v8, %v6550_v9 }
 0x518   :  { %8924 = vmatpush1.bf16.msra.mxu0 %v10480_v24  ;;  %v10213_v24 = vcombine.high %v6254_v60, %v6262_v58  ;;  %v6326_v60 = vld [vmem:[#allocation9 + $0x570] sm:$0xff]  ;;  %v6319_v58 = vld [vmem:[#allocation9 + $0x538] sm:$0xff] }
 0x519   :  { %9006 = vmatpush1.bf16.msra.mxu1 %v10482_v45  ;;  %9032 = vmatprep.subr.bf16.mxu0 %v10117_v27  ;;  %v10215_v27 = vcombine.high %v6255_v26, %v6263_v10 }
 0x51a   :  { %9114 = vmatprep.subr.bf16.mxu1 %v10119_v29  ;;  %v6270_v29 = vld [vmem:[#allocation9 + $0x3b0] sm:$0xff] }
 0x51b   :  { %8942 = vmatmul.mubr.bf16.vlgmr.msra.gmra.mrb[28].mxu0 %v11252_v49  ;;  %v10228_v47 = vcombine.low %v6270_v29, %v6278_v30 }
 0x51c   :  { %9024 = vmatmul.mubr.bf16.vlgmr.msra.gmra.mrb[28].mxu1 %v11252_v49  ;;  %9033 = vmatpush1.bf16.msra.mxu0 %v10116_v36 }
 0x51d   :  { %9064 = vmatprep.mubr.bf16.mxu0 %v11238_v15  ;;  %9115 = vmatpush1.bf16.msra.mxu1 %v10118_v37  ;;  %v6279_v37 = vld [vmem:[#allocation9 + $0x3f8] sm:$0xff] }
 0x51e   :  { %9146 = vmatprep.mubr.bf16.mxu1 %v11238_v15  ;;  %9034 = vmatprep.subr.bf16.mxu0 %v10133_v53  ;;  %v10164_v15 = vcombine.low %v6206_v3, %v6214_v4  ;;  %v10231_v16 = vcombine.high %v6271_v46, %v6279_v37  ;;  %v10230_v28 = vcombine.low %v6271_v46, %v6279_v37  ;;  %v6359_v46 = vld [vmem:[#allocation9 + $0x678] sm:$0xff] }
 0x51f   :  { %9116 = vmatprep.subr.bf16.mxu1 %v10135_v55 }
 0x520   :  { %9035 = vmatpush1.bf16.msra.mxu0 %v10132_v62 }
 0x521   :  { %9117 = vmatpush1.bf16.msra.mxu1 %v10134_v32  ;;  %9036 = vmatprep.subr.bf16.mxu0 %v10149_v0  ;;  %v10214_v0 = vcombine.low %v6255_v26, %v6263_v10  ;;  %v10262_v10 = vcombine.low %v6303_v63, %v6311_v31 }
 0x522   :  { %9118 = vmatprep.subr.bf16.mxu1 %v10151_v1  ;;  %v10229_v1 = vcombine.high %v6270_v29, %v6278_v30 }
 0x524   :  { %9037 = vmatpush1.bf16.msra.mxu0 %v10148_v13  ;;  %v6294_v13 = vld [vmem:[#allocation9 + $0x470] sm:$0xff] }
 0x525   :  { %9119 = vmatpush1.bf16.msra.mxu1 %v10150_v41  ;;  %9038 = vmatprep.subr.bf16.mxu0 %v10165_v5  ;;  %v6287_v5 = vld [vmem:[#allocation9 + $0x438] sm:$0xff]  ;;  %v10244_v59 = vcombine.low %v6286_v19, %v6294_v13 }
 0x526   :  { %9120 = vmatprep.subr.bf16.mxu1 %v10167_v38  ;;  %v6295_v38 = vld [vmem:[#allocation9 + $0x478] sm:$0xff] }
 0x528   :  { %9039 = vmatpush1.bf16.msra.mxu0 %v10164_v15  ;;  %v10245_v15 = vcombine.high %v6286_v19, %v6294_v13  ;;  %v6383_v19 = vld [vmem:[#allocation9 + $0x738] sm:$0xff] }
 0x529   :  { %9121 = vmatpush1.bf16.msra.mxu1 %v10166_v35  ;;  %9040 = vmatprep.subr.bf16.mxu0 %v10181_v33  ;;  %v10247_v35 = vcombine.high %v6287_v5, %v6295_v38  ;;  %v6302_v33 = vld [vmem:[#allocation9 + $0x4b0] sm:$0xff]  ;;  %v6391_v13 = vld [vmem:[#allocation9 + $0x778] sm:$0xff] }
 0x52a   :  { %9122 = vmatprep.subr.bf16.mxu1 %v10183_v40  ;;  %v6310_v40 = vld [vmem:[#allocation9 + $0x4f0] sm:$0xff] }
 0x52b   :  { %v10260_v26 = vcombine.low %v6302_v33, %v6310_v40 }
 0x52c   :  { %9041 = vmatpush1.bf16.msra.mxu0 %v10180_v7  ;;  %v10246_v7 = vcombine.low %v6287_v5, %v6295_v38 }
 0x52d   :  { %9123 = vmatpush1.bf16.msra.mxu1 %v10182_v42  ;;  %9042 = vmatprep.subr.bf16.mxu0 %v10197_v56  ;;  %v10261_v42 = vcombine.high %v6302_v33, %v6310_v40  ;;  %v10263_v56 = vcombine.high %v6303_v63, %v6311_v31  ;;  %v10342_v33 = vcombine.low %v6383_v19, %v6391_v13  ;;  %v6414_v63 = vld [vmem:[#allocation9 + $0x830] sm:$0xff] }
 0x52e   :  { %v8615_v45 = vpop.f32.mrb[20].mxu0  ;;  %9124 = vmatprep.subr.bf16.mxu1 %v10199_v12  ;;  %v6318_v12 = vld [vmem:[#allocation9 + $0x530] sm:$0xff] }
 0x52f   :  { %v10518_v2 = vadd.f32 %v8615_v45, %v6543_v14  ;;  %v8697_v36 = vpop.f32.mrb[20].mxu1  ;;  %v8617_v39 = vpop.f32.mrb[21].mxu0  ;;  %v6327_v14 = vld [vmem:[#allocation9 + $0x578] sm:$0xff]  ;;  %v10276_v45 = vcombine.low %v6318_v12, %v6326_v60  ;;  %v6422_v31 = vld [vmem:[#allocation9 + $0x870] sm:$0xff] }
 0x530   :  { %v10520_v53 = vadd.f32 %v8697_v36, %v6551_v18  ;;  %v10519_v50 = vadd.f32 %v8617_v39, %v6547_v20  ;;  %v8699_v52 = vpop.f32.mrb[21].mxu1  ;;  %v8619_v55 = vpop.f32.mrb[22].mxu0  ;;  %9043 = vmatpush1.bf16.msra.mxu0 %v10196_v21  ;;  %v10277_v18 = vcombine.high %v6318_v12, %v6326_v60  ;;  %v10279_v20 = vcombine.high %v6319_v58, %v6327_v14  ;;  %v6334_v21 = vld [vmem:[#allocation9 + $0x5b0] sm:$0xff]  ;;  %v6351_v39 = vld [vmem:[#allocation9 + $0x638] sm:$0xff] }
 0x531   :  { %v10521_v61 = vadd.f32 %v8699_v52, %v6555_v22  ;;  %v8701_v62 = vpop.f32.mrb[22].mxu1  ;;  %9125 = vmatpush1.bf16.msra.mxu1 %v10198_v23  ;;  %v8620_v32 = vpop.f32.mrb[23].mxu0  ;;  %9044 = vmatprep.subr.bf16.mxu0 %v10213_v24  ;;  %v6342_v22 = vld [vmem:[#allocation9 + $0x5f0] sm:$0xff]  ;;  %v6335_v23 = vld [vmem:[#allocation9 + $0x5b8] sm:$0xff]  ;;  %v10311_v52 = vcombine.high %v6351_v39, %v6359_v46  ;;  %v10373_v12 = vcombine.high %v6414_v63, %v6422_v31 }
 0x532   :  { %v9212_v3 = vcombine.low %v10518_v2, %v10519_v50  ;;  %v8702_v4 = vpop.f32.mrb[23].mxu1  ;;  %9126 = vmatprep.subr.bf16.mxu1 %v10215_v27  ;;  %v6343_v24 = vld [vmem:[#allocation9 + $0x5f8] sm:$0xff]  ;;  %v10278_v27 = vcombine.low %v6319_v58, %v6327_v14  ;;  %v10293_v29 = vcombine.high %v6334_v21, %v6342_v22  ;;  %v6350_v2 = vld [vmem:[#allocation9 + $0x630] sm:$0xff]  ;;  %v10292_v37 = vcombine.low %v6334_v21, %v6342_v22 }
 0x533   :  { %v9213_v41 = vcombine.low %v10520_v53, %v10521_v61  ;;  %v10295_v30 = vcombine.high %v6335_v23, %v6343_v24  ;;  %v6358_v36 = vld [vmem:[#allocation9 + $0x670] sm:$0xff]  ;;  %v10294_v53 = vcombine.low %v6335_v23, %v6343_v24  ;;  %v6367_v61 = vld [vmem:[#allocation9 + $0x6b8] sm:$0xff] }
 0x534   :  { %v9220_v48 = vrot.slane %v9212_v3, %v11273_v51  ;;  %9045 = vmatpush1.bf16.msra.mxu0 %v10212_v57  ;;  %v10309_v50 = vcombine.high %v6350_v2, %v6358_v36  ;;  %v6366_v55 = vld [vmem:[#allocation9 + $0x6b0] sm:$0xff]  ;;  %v6375_v62 = vld [vmem:[#allocation9 + $0x6f8] sm:$0xff]  ;;  %v10308_v32 = vcombine.low %v6350_v2, %v6358_v36 }
 0x535   :  { %v9227_v54 = vrot.slane %v9213_v41, %v11273_v51  ;;  %9127 = vmatpush1.bf16.msra.mxu1 %v10214_v0  ;;  %9046 = vmatprep.subr.bf16.mxu0 %v10229_v1  ;;  %v6374_v57 = vld [vmem:[#allocation9 + $0x6f0] sm:$0xff]  ;;  %v10310_v0 = vcombine.low %v6351_v39, %v6359_v46  ;;  %v10327_v3 = vcombine.high %v6367_v61, %v6375_v62 }
 0x536   :  { %9128 = vmatprep.subr.bf16.mxu1 %v10231_v16  ;;  %v10325_v1 = vcombine.high %v6366_v55, %v6374_v57  ;;  %v6382_v4 = vld [vmem:[#allocation9 + $0x730] sm:$0xff]  ;;  %v10324_v41 = vcombine.low %v6366_v55, %v6374_v57  ;;  %v10326_v5 = vcombine.low %v6367_v61, %v6375_v62  ;;  %v6479_v62 = vld [vmem:[#allocation9 + $0xa38] sm:$0xff] }
 0x537   :  { %v9228_v6 = vcombine.low %v9220_v48, %v9227_v54  ;;  %v6390_v16 = vld [vmem:[#allocation9 + $0x770] sm:$0xff]  ;;  %v10343_v48 = vcombine.high %v6383_v19, %v6391_v13  ;;  %v6495_v19 = vld [vmem:[#allocation9 + $0xab8] sm:$0xff] }
 0x538   :  { %9047 = vmatpush1.bf16.msra.mxu0 %v10228_v47  ;;  %v10341_v38 = vcombine.high %v6382_v4, %v6390_v16  ;;  %v6398_v47 = vld [vmem:[#allocation9 + $0x7b0] sm:$0xff]  ;;  %v6503_v13 = vld [vmem:[#allocation9 + $0xaf8] sm:$0xff] }
 0x539   :  { %9284 = vst [vmem:[#allocation13] sm:$0xff] %v9228_v6  ;;  %9129 = vmatpush1.bf16.msra.mxu1 %v10230_v28  ;;  %9048 = vmatprep.subr.bf16.mxu0 %v10245_v15  ;;  %v6406_v54 = vld [vmem:[#allocation9 + $0x7f0] sm:$0xff]  ;;  %v6399_v28 = vld [vmem:[#allocation9 + $0x7b8] sm:$0xff] }
 0x53a   :  { %9130 = vmatprep.subr.bf16.mxu1 %v10247_v35  ;;  %v6407_v15 = vld [vmem:[#allocation9 + $0x7f8] sm:$0xff]  ;;  %v10340_v35 = vcombine.low %v6382_v4, %v6390_v16  ;;  %v10357_v40 = vcombine.high %v6398_v47, %v6406_v54  ;;  %v6430_v58 = vld [vmem:[#allocation9 + $0x8b0] sm:$0xff] }
 0x53b   :  { %v10359_v6 = vcombine.high %v6399_v28, %v6407_v15  ;;  %v6438_v14 = vld [vmem:[#allocation9 + $0x8f0] sm:$0xff] }
 0x53c   :  { %9049 = vmatpush1.bf16.msra.mxu0 %v10244_v59  ;;  %v6415_v59 = vld [vmem:[#allocation9 + $0x838] sm:$0xff]  ;;  %v10389_v21 = vcombine.high %v6430_v58, %v6438_v14  ;;  %v6446_v23 = vld [vmem:[#allocation9 + $0x930] sm:$0xff] }
 0x53d   :  { %9131 = vmatpush1.bf16.msra.mxu1 %v10246_v7  ;;  %9050 = vmatprep.subr.bf16.mxu0 %v10261_v42  ;;  %v6423_v7 = vld [vmem:[#allocation9 + $0x878] sm:$0xff]  ;;  %v10356_v42 = vcombine.low %v6398_v47, %v6406_v54  ;;  %v6454_v24 = vld [vmem:[#allocation9 + $0x970] sm:$0xff] }
 0x53e   :  { %9132 = vmatprep.subr.bf16.mxu1 %v10263_v56  ;;  %v10358_v56 = vcombine.low %v6399_v28, %v6407_v15  ;;  %v10375_v60 = vcombine.high %v6415_v59, %v6423_v7  ;;  %v10405_v2 = vcombine.high %v6446_v23, %v6454_v24  ;;  %v6462_v39 = vld [vmem:[#allocation9 + $0x9b0] sm:$0xff]  ;;  %v6511_v28 = vld [vmem:[#allocation9 + $0xb38] sm:$0xff] }
 0x53f   :  { %v6470_v46 = vld [vmem:[#allocation9 + $0x9f0] sm:$0xff]  ;;  %v6519_v15 = vld [vmem:[#allocation9 + $0xb78] sm:$0xff] }
 0x540   :  { %9051 = vmatpush1.bf16.msra.mxu0 %v10260_v26  ;;  %v6431_v26 = vld [vmem:[#allocation9 + $0x8b8] sm:$0xff]  ;;  %v6478_v57 = vld [vmem:[#allocation9 + $0xa30] sm:$0xff] }
 0x541   :  { %9133 = vmatpush1.bf16.msra.mxu1 %v10262_v10  ;;  %9052 = vmatprep.subr.bf16.mxu0 %v10277_v18  ;;  %v6439_v10 = vld [vmem:[#allocation9 + $0x8f8] sm:$0xff]  ;;  %v10372_v18 = vcombine.low %v6414_v63, %v6422_v31  ;;  %v6486_v61 = vld [vmem:[#allocation9 + $0xa70] sm:$0xff] }
 0x542   :  { %9134 = vmatprep.subr.bf16.mxu1 %v10279_v20  ;;  %v10374_v20 = vcombine.low %v6415_v59, %v6423_v7  ;;  %v10391_v22 = vcombine.high %v6431_v26, %v6439_v10  ;;  %v6494_v4 = vld [vmem:[#allocation9 + $0xab0] sm:$0xff]  ;;  %v6527_v59 = vld [vmem:[#allocation9 + $0xbb8] sm:$0xff] }
 0x543   :  { %v6502_v16 = vld [vmem:[#allocation9 + $0xaf0] sm:$0xff]  ;;  %v6535_v7 = vld [vmem:[#allocation9 + $0xbf8] sm:$0xff] }
 0x544   :  { %9053 = vmatpush1.bf16.msra.mxu0 %v10276_v45  ;;  %v6447_v45 = vld [vmem:[#allocation9 + $0x938] sm:$0xff]  ;;  %v6510_v47 = vld [vmem:[#allocation9 + $0xb30] sm:$0xff] }
 0x545   :  { %9135 = vmatpush1.bf16.msra.mxu1 %v10278_v27  ;;  %9054 = vmatprep.subr.bf16.mxu0 %v10293_v29  ;;  %v6455_v27 = vld [vmem:[#allocation9 + $0x978] sm:$0xff]  ;;  %v10388_v29 = vcombine.low %v6430_v58, %v6438_v14  ;;  %v6518_v54 = vld [vmem:[#allocation9 + $0xb70] sm:$0xff]  ;;  %v10486_v14 = vcombine.low %v6527_v59, %v6535_v7 }
 0x546   :  { %9136 = vmatprep.subr.bf16.mxu1 %v10295_v30  ;;  %v10390_v30 = vcombine.low %v6431_v26, %v6439_v10  ;;  %v10407_v36 = vcombine.high %v6447_v45, %v6455_v27  ;;  %v6526_v63 = vld [vmem:[#allocation9 + $0xbb0] sm:$0xff]  ;;  %v6558_v26 = vsub.s32 4, %v10922_v44  ;;  %v6566_v10 = vsub.s32 6, %v10922_v44 }
 0x547   :  { %v6534_v31 = vld [vmem:[#allocation9 + $0xbf0] sm:$0xff] }
 0x548   :  { %9055 = vmatpush1.bf16.msra.mxu0 %v10292_v37  ;;  %v6463_v37 = vld [vmem:[#allocation9 + $0x9b8] sm:$0xff]  ;;  %v10484_v58 = vcombine.low %v6526_v63, %v6534_v31 }
 0x549   :  { %9137 = vmatpush1.bf16.msra.mxu1 %v10294_v53  ;;  %9056 = vmatprep.subr.bf16.mxu0 %v10309_v50  ;;  %v6471_v53 = vld [vmem:[#allocation9 + $0x9f8] sm:$0xff]  ;;  %v10404_v50 = vcombine.low %v6446_v23, %v6454_v24 }
 0x54a   :  { %9138 = vmatprep.subr.bf16.mxu1 %v10311_v52  ;;  %v10421_v52 = vcombine.high %v6462_v39, %v6470_v46  ;;  %v10423_v55 = vcombine.high %v6463_v37, %v6471_v53 }
 0x54c   :  { %9057 = vmatpush1.bf16.msra.mxu0 %v10308_v32  ;;  %v6487_v32 = vld [vmem:[#allocation9 + $0xa78] sm:$0xff] }
 0x54d   :  { %9139 = vmatpush1.bf16.msra.mxu1 %v10310_v0  ;;  %9058 = vmatprep.subr.bf16.mxu0 %v10325_v1  ;;  %v10420_v0 = vcombine.low %v6462_v39, %v6470_v46  ;;  %v10422_v1 = vcombine.low %v6463_v37, %v6471_v53 }
 0x54e   :  { %9140 = vmatprep.subr.bf16.mxu1 %v10327_v3  ;;  %v10437_v3 = vcombine.high %v6478_v57, %v6486_v61 }
 0x550   :  { %9059 = vmatpush1.bf16.msra.mxu0 %v10324_v41  ;;  %v10436_v41 = vcombine.low %v6478_v57, %v6486_v61 }
 0x551   :  { %9141 = vmatpush1.bf16.msra.mxu1 %v10326_v5  ;;  %9060 = vmatprep.subr.bf16.mxu0 %v10341_v38  ;;  %v10438_v5 = vcombine.low %v6479_v62, %v6487_v32  ;;  %v10453_v38 = vcombine.high %v6494_v4, %v6502_v16 }
 0x552   :  { %9142 = vmatprep.subr.bf16.mxu1 %v10343_v48  ;;  %v10455_v48 = vcombine.high %v6495_v19, %v6503_v13 }
 0x554   :  { %9061 = vmatpush1.bf16.msra.mxu0 %v10340_v35  ;;  %v10452_v35 = vcombine.low %v6494_v4, %v6502_v16 }
 0x555   :  { %9143 = vmatpush1.bf16.msra.mxu1 %v10342_v33  ;;  %9062 = vmatprep.subr.bf16.mxu0 %v10357_v40  ;;  %v10454_v33 = vcombine.low %v6495_v19, %v6503_v13  ;;  %v10469_v40 = vcombine.high %v6510_v47, %v6518_v54 }
 0x556   :  { %9144 = vmatprep.subr.bf16.mxu1 %v10359_v6  ;;  %v10471_v6 = vcombine.high %v6511_v28, %v6519_v15 }
 0x558   :  { %9063 = vmatpush1.bf16.msra.mxu0 %v10356_v42  ;;  %v10468_v42 = vcombine.low %v6510_v47, %v6518_v54 }
 0x559   :  { %9145 = vmatpush1.bf16.msra.mxu1 %v10358_v56  ;;  %9073 = vmatprep.subr.bf16.mxu0 %v10373_v12  ;;  %v10470_v56 = vcombine.low %v6511_v28, %v6519_v15  ;;  %v10485_v12 = vcombine.high %v6526_v63, %v6534_v31 }
 0x55a   :  { %9155 = vmatprep.subr.bf16.mxu1 %v10375_v60  ;;  %v10487_v60 = vcombine.high %v6527_v59, %v6535_v7 }
 0x55b   :  { %9065 = vmatmul.mubr.bf16.vlgmr.msra.gmra.mrb[32].mxu0 %v11242_v17 }
 0x55c   :  { %9147 = vmatmul.mubr.bf16.vlgmr.msra.gmra.mrb[32].mxu1 %v11242_v17  ;;  %9074 = vmatpush1.bf16.msra.mxu0 %v10372_v18  ;;  %v10406_v17 = vcombine.low %v6447_v45, %v6455_v27  ;;  %v6562_v18 = vsub.s32 5, %v10922_v44 }
 0x55d   :  { %9156 = vmatpush1.bf16.msra.mxu1 %v10374_v20  ;;  %9075 = vmatprep.subr.bf16.mxu0 %v10389_v21  ;;  %v6570_v20 = vsub.s32 7, %v10922_v44  ;;  %v6559_v21 = vrot.slane %v11330_v8, %v6558_v26 }
 0x55e   :  { %9157 = vmatprep.subr.bf16.mxu1 %v10391_v22  ;;  %9105 = vmatprep.mubr.bf16.mxu0 %v10817_v43  ;;  %v6567_v22 = vrot.slane %v11330_v8, %v6566_v10 }
 0x55f   :  { %9187 = vmatprep.mubr.bf16.mxu1 %v10817_v43  ;;  %v10439_v43 = vcombine.high %v6479_v62, %v6487_v32  ;;  %v6571_v23 = vrot.slane %v11330_v8, %v6570_v20 }
 0x560   :  { %9076 = vmatpush1.bf16.msra.mxu0 %v10388_v29 }
 0x561   :  { %9158 = vmatpush1.bf16.msra.mxu1 %v10390_v30  ;;  %9077 = vmatprep.subr.bf16.mxu0 %v10405_v2 }
 0x562   :  { %9159 = vmatprep.subr.bf16.mxu1 %v10407_v36 }
 0x564   :  { %9078 = vmatpush1.bf16.msra.mxu0 %v10404_v50 }
 0x565   :  { %9160 = vmatpush1.bf16.msra.mxu1 %v10406_v17  ;;  %9079 = vmatprep.subr.bf16.mxu0 %v10421_v52 }
 0x566   :  { %9161 = vmatprep.subr.bf16.mxu1 %v10423_v55 }
 0x568   :  { %9080 = vmatpush1.bf16.msra.mxu0 %v10420_v0 }
 0x569   :  { %9162 = vmatpush1.bf16.msra.mxu1 %v10422_v1  ;;  %9081 = vmatprep.subr.bf16.mxu0 %v10437_v3 }
 0x56a   :  { %9163 = vmatprep.subr.bf16.mxu1 %v10439_v43 }
 0x56c   :  { %9082 = vmatpush1.bf16.msra.mxu0 %v10436_v41 }
 0x56d   :  { %9164 = vmatpush1.bf16.msra.mxu1 %v10438_v5  ;;  %9083 = vmatprep.subr.bf16.mxu0 %v10453_v38 }
 0x56e   :  { %9165 = vmatprep.subr.bf16.mxu1 %v10455_v48 }
 0x570   :  { %9084 = vmatpush1.bf16.msra.mxu0 %v10452_v35 }
 0x571   :  { %9166 = vmatpush1.bf16.msra.mxu1 %v10454_v33  ;;  %9085 = vmatprep.subr.bf16.mxu0 %v10469_v40 }
 0x572   :  { %9167 = vmatprep.subr.bf16.mxu1 %v10471_v6 }
 0x574   :  { %9086 = vmatpush1.bf16.msra.mxu0 %v10468_v42 }
 0x575   :  { %9168 = vmatpush1.bf16.msra.mxu1 %v10470_v56  ;;  %9087 = vmatprep.subr.bf16.mxu0 %v10485_v12 }
 0x576   :  { %9169 = vmatprep.subr.bf16.mxu1 %v10487_v60 }
 0x578   :  { %9088 = vmatpush1.bf16.msra.mxu0 %v10484_v58 }
 0x579   :  { %9170 = vmatpush1.bf16.msra.mxu1 %v10486_v14 }
 0x57b   :  { %9106 = vmatmul.mubr.bf16.vlgmr.msra.gmra.mrb[32].mxu0 %v11252_v49 }
 0x57c   :  { %9188 = vmatmul.mubr.bf16.vlgmr.msra.gmra.mrb[32].mxu1 %v11252_v49  ;;  %v6563_v49 = vrot.slane %v11330_v8, %v6562_v18 }
 0x58e   :  { %v8779_v24 = vpop.f32.mrb[24].mxu0 }
 0x58f   :  { %v10522_v45 = vadd.f32 %v8779_v24, %v6559_v21  ;;  %v8861_v27 = vpop.f32.mrb[24].mxu1  ;;  %v8781_v29 = vpop.f32.mrb[25].mxu0 }
 0x590   :  { %v10524_v30 = vadd.f32 %v8861_v27, %v6567_v22  ;;  %v10523_v2 = vadd.f32 %v8781_v29, %v6563_v49  ;;  %v8863_v36 = vpop.f32.mrb[25].mxu1  ;;  %v8783_v39 = vpop.f32.mrb[26].mxu0 }
 0x591   :  { %v10525_v46 = vadd.f32 %v8863_v36, %v6571_v23  ;;  %v8865_v37 = vpop.f32.mrb[26].mxu1  ;;  %v8784_v53 = vpop.f32.mrb[27].mxu0 }
 0x592   :  { %v9229_v50 = vcombine.low %v10522_v45, %v10523_v2  ;;  %v8866_v17 = vpop.f32.mrb[27].mxu1 }
 0x593   :  { %v9230_v52 = vcombine.low %v10524_v30, %v10525_v46 }
 0x594   :  { %v9237_v55 = vrot.slane %v9229_v50, %v11273_v51 }
 0x595   :  { %v9244_v57 = vrot.slane %v9230_v52, %v11273_v51 }
 0x597   :  { %v9245_v61 = vcombine.low %v9237_v55, %v9244_v57 }
 0x599   :  { %9285 = vst [vmem:[#allocation13 + $0x8] sm:$0xff] %v9245_v61 }
 0x59a   :  { %10759 = shalt.err (!%p10756_p11)
}
 0x59b   :  { %s10760_s30 = scalar_lea.hbm %s11423_s6, 512 }
 0x59c   :  { %p10761_p12 = scmp.ne.s32.totalorder %s11423_s6, %s10760_s30  ;;  %p10764_p13 = scmp.lt.u32.totalorder %s10760_s30, %s11423_s6 }
 0x59e   :  { %p10766_p0 = pnand %p10764_p13, %p10761_p12 }
 0x5a0   :  { %10769 = shalt.err (!%p10766_p0)
}
 0x5a1   :  { %9297 = dma.vmem_to_hbm [thread:$0]  %s9295_s26, 512, %s11423_s6, [#allocation6]   ;;  %v6537_v8 = vld [vmem:[#allocation10 + $0x8] sm:$0xff] }
 0x5a2   :  { %v6575_v62 = vrot.slane %v6537_v8, %v6542_v25  ;;  %v6583_v32 = vrot.slane %v6537_v8, %v6550_v9  ;;  %v6579_v0 = vrot.slane %v6537_v8, %v6546_v34  ;;  %v6587_v1 = vrot.slane %v6537_v8, %v6554_v11  ;;  %s10820_s6 = smov [#allocation13]  }
 0x5a3   :  { %v6591_v11 = vrot.slane %v6537_v8, %v6558_v26  ;;  %v6599_v35 = vrot.slane %v6537_v8, %v6566_v10  ;;  %v6595_v33 = vrot.slane %v6537_v8, %v6562_v18  ;;  %v6603_v40 = vrot.slane %v6537_v8, %v6570_v20  ;;  %s9304_s11 = sshll.u32 %s10820_s6, 4  ;;  %s9305_s11 = int_to_ptr.vmem [resolvable:$true] %s9304_s11 }
 0x5a4   :  { %s10770_s1 = scalar_lea.vmem %s9305_s11, 512  ;;  %p10775_p2 = scmp.lt.s32.totalorder %s9305_s11, %s9305_s11 }
 0x5a5   :  { %p10771_p1 = scmp.ne.s32.totalorder %s9305_s11, %s10770_s1  ;;  %p10776_p3 = scmp.lt.s32.totalorder %s10770_s1, %s10770_s1 }
 0x5a7   :  { %p10777_p4 = por %p10776_p3, %p10775_p2 }
 0x5a9   :  { %p10778_p5 = pnand %p10777_p4, %p10771_p1 }
 0x5ee   :  { %v8943_v3 = vpop.f32.mrb[28].mxu0 }
 0x5ef   :  { %v10526_v43 = vadd.f32 %v8943_v3, %v6575_v62  ;;  %v9025_v4 = vpop.f32.mrb[28].mxu1  ;;  %v8945_v16 = vpop.f32.mrb[29].mxu0 }
 0x5f0   :  { %v10528_v19 = vadd.f32 %v9025_v4, %v6583_v32  ;;  %v10527_v13 = vadd.f32 %v8945_v16, %v6579_v0  ;;  %v9027_v41 = vpop.f32.mrb[29].mxu1  ;;  %v8947_v5 = vpop.f32.mrb[30].mxu0 }
 0x5f1   :  { %v10529_v38 = vadd.f32 %v9027_v41, %v6587_v1  ;;  %v9029_v48 = vpop.f32.mrb[30].mxu1  ;;  %v8948_v25 = vpop.f32.mrb[31].mxu0 }
 0x5f2   :  { %v9246_v47 = vcombine.low %v10526_v43, %v10527_v13  ;;  %v9030_v54 = vpop.f32.mrb[31].mxu1 }
 0x5f3   :  { %v9247_v9 = vcombine.low %v10528_v19, %v10529_v38 }
 0x5f4   :  { %v9254_v28 = vrot.slane %v9246_v47, %v11273_v51 }
 0x5f5   :  { %v9261_v34 = vrot.slane %v9247_v9, %v11273_v51 }
 0x5f7   :  { %v9262_v15 = vcombine.low %v9254_v28, %v9261_v34 }
 0x5f9   :  { %9286 = vst [vmem:[#allocation13 + $0x10] sm:$0xff] %v9262_v15 }
 0x64e   :  { %v9107_v6 = vpop.f32.mrb[32].mxu0 }
 0x64f   :  { %v10530_v63 = vadd.f32 %v9107_v6, %v6591_v11  ;;  %v9189_v31 = vpop.f32.mrb[32].mxu1  ;;  %v9109_v59 = vpop.f32.mrb[33].mxu0 }
 0x650   :  { %v10532_v7 = vadd.f32 %v9189_v31, %v6599_v35  ;;  %v10531_v42 = vadd.f32 %v9109_v59, %v6595_v33  ;;  %v9191_v56 = vpop.f32.mrb[33].mxu1  ;;  %v9111_v12 = vpop.f32.mrb[34].mxu0 }
 0x651   :  { %v10533_v60 = vadd.f32 %v9191_v56, %v6603_v40  ;;  %v9193_v58 = vpop.f32.mrb[34].mxu1  ;;  %v9112_v14 = vpop.f32.mrb[35].mxu0 }
 0x652   :  { %v9263_v26 = vcombine.low %v10530_v63, %v10531_v42  ;;  %v9194_v21 = vpop.f32.mrb[35].mxu1 }
 0x653   :  { %v9264_v10 = vcombine.low %v10532_v7, %v10533_v60 }
 0x654   :  { %v9271_v22 = vrot.slane %v9263_v26, %v11273_v51 }
 0x655   :  { %v9278_v44 = vrot.slane %v9264_v10, %v11273_v51 }
 0x657   :  { %v9279_v18 = vcombine.low %v9271_v22, %v9278_v44 }
 0x659   :  { %9287 = vst [vmem:[#allocation13 + $0x18] sm:$0xff] %v9279_v18 }
 0x65a   :  { %10781 = shalt.err (!%p10778_p5)
}
 0x65b   :  { %s10782_s14 = scalar_lea.hbm %s11424_s7, 512 }
 0x65c   :  { %p10783_p6 = scmp.ne.s32.totalorder %s11424_s7, %s10782_s14  ;;  %p10786_p7 = scmp.lt.u32.totalorder %s10782_s14, %s11424_s7 }
 0x65e   :  { %p10788_p8 = pnand %p10786_p7, %p10783_p6 }
 0x660   :  { %10791 = shalt.err (!%p10788_p8)
}
 0x661   :  { %9307 = dma.vmem_to_hbm [thread:$0]  %s9305_s11, 512, %s11424_s7, [#allocation14]  }
 0x662   :  { %10800 = dma.done.wait [#allocation6], 512  }
 0x663   :  { %10801 = vsyncadd [#allocation6], 4294966784 }
 0x664   :  { %10802 = dma.done.wait [#allocation14], 512  }
 0x665   :  { %10803 = vsyncadd [#allocation14], 4294966784 }
 0x666   :  { %9314 = vsyncpa [#allocation5], 1 }
 0x667   :  { %9315 = vsyncpa [#allocation8], 1 }
 0x668   :  { %9316 = vsyncpa [#allocation11], 1 }
 0x669   :  { %9317 = vsyncpa [#allocation6], 1 }
 0x66a   :  { %9318 = vsyncpa [#allocation14], 1 }

</bundles_post_ra>
